<compile_context>
chip_gen: v5e
topology: v5e:2x2
jax: 0.10.0
libtpu: 0.0.40
codegen_flags: <defaults>
</compile_context>

<pallas_src>
import functools

import jax
import jax.numpy as jnp
from jax.experimental import pallas as pl
from jax.experimental.pallas import tpu as pltpu


# ----------------------------------------------------------------------------
# Pallas kernels
# ----------------------------------------------------------------------------
def _conv_mm_kernel(w_ref, p_ref, b_ref, o_ref):
    """o = relu(W @ P + b) ; W:[O,K] bf16  P:[K,TM] bf16  b:[O,1] f32  o:[O,TM] bf16."""
    acc = jnp.dot(w_ref[...], p_ref[...], preferred_element_type=jnp.float32)
    acc = acc + b_ref[...]
    o_ref[...] = jnp.maximum(acc, 0.0).astype(o_ref.dtype)


def _head_kernel(h_ref, w1_ref, b1_ref, wva_ref, bva_ref,
                 woa_ref, boa_ref, wov_ref, bov_ref, o_ref, acc_ref,
                 *, n_hidden, batch, block_b):
    """Fused dense head, gridded over batch rows; weights + output stay resident.

       per block:  h1 = relu(h @ W1 + b1)                 [tb, 512]
                   va = relu(h1 @ Wva + bva)              [tb, 2*n_hidden] (value|adv)
                   v  = va[:, :n_hidden] @ Wov + bov      [tb, 1]
                   a  = va[:, n_hidden:] @ Woa + boa      [tb, n_out]
                   out rows <- v + a ;  acc += sum(a)
       last block: out <- out - acc / (B * n_out)         (global mean, as torch a.mean())
    """
    i = pl.program_id(0)

    @pl.when(i == 0)
    def _():
        acc_ref[...] = jnp.zeros_like(acc_ref)

    h1 = jnp.dot(h_ref[...], w1_ref[...], preferred_element_type=jnp.float32)
    h1 = jnp.maximum(h1 + b1_ref[...], 0.0).astype(jnp.bfloat16)

    va = jnp.dot(h1, wva_ref[...], preferred_element_type=jnp.float32)
    va = jnp.maximum(va + bva_ref[...], 0.0).astype(jnp.bfloat16)

    v_h = va[:, :n_hidden]          # 256 is a clean multiple of 128 -> cheap lane slice
    a_h = va[:, n_hidden:]

    v = jnp.dot(v_h, wov_ref[...], preferred_element_type=jnp.float32) + bov_ref[...]
    a = jnp.dot(a_h, woa_ref[...], preferred_element_type=jnp.float32) + boa_ref[...]

    acc_ref[...] += jnp.sum(a).reshape(1, 1)
    o_ref[pl.ds(i * block_b, block_b), :] = (v + a).astype(o_ref.dtype)

    @pl.when(i == pl.num_programs(0) - 1)
    def _():
        n_elems = float(batch * o_ref.shape[1])
        mean_a = acc_ref[...] * (1.0 / n_elems)          # (1,1), broadcasts
        o_ref[...] = o_ref[...] - mean_a


# ----------------------------------------------------------------------------
# Conv2d(+ReLU) = one patches op (XLA glue) + gridded Pallas matmul
# ----------------------------------------------------------------------------
def _round_up(v, m):
    return ((v + m - 1) // m) * m


def conv2d_relu_pallas(x, w_mat, b_col, kh, kw, stride, lhs_layout):
    """PyTorch-semantics Conv2d (VALID, stride) + ReLU.

    `x` is in `lhs_layout` ('NCHW' for the network input, 'CNHW' for internal
    activations).  Returns the activation in CNHW layout: [O, B, Ho, Wo], bf16.
    """
    # Single XLA op extracts every patch; feature order is channel-major (c, kh, kw),
    # exactly matching PyTorch's weight.view(O, C*kh*kw) columns.  bf16 in / bf16 out,
    # so the HBM-materialized patches tensor is half-width.
    patches = jax.lax.conv_general_dilated_patches(
        x, (kh, kw), (stride, stride), "VALID",
        dimension_numbers=(lhs_layout, "HWIO", "CNHW"))
    K, B, Ho, Wo = patches.shape
    M = B * Ho * Wo
    p2 = patches.reshape(K, M)                      # contiguous reshape, no copy
    O = w_mat.shape[0]

    # >=2 grid steps whenever possible (v7x: both TensorCores engage), cap at 2048
    # lanes for big training batches (85%+ of HBM roofline, amortizes step overhead).
    tm = min(2048, max(128, _round_up(pl.cdiv(M, 2), 128)))
    grid = (pl.cdiv(M, tm),)

    flops = 2 * O * K * M
    bytes_accessed = O * K * 2 + K * M * 2 + O * 4 + O * M * 2

    out = pl.pallas_call(
        _conv_mm_kernel,
        out_shape=jax.ShapeDtypeStruct((O, M), jnp.bfloat16),
        grid=grid,
        in_specs=[
            pl.BlockSpec((O, K), lambda i: (0, 0)),   # weights resident across grid
            pl.BlockSpec((K, tm), lambda i: (0, i)),  # stream patch columns over M
            pl.BlockSpec((O, 1), lambda i: (0, 0)),   # bias resident (f32)
        ],
        out_specs=pl.BlockSpec((O, tm), lambda i: (0, i)),
        compiler_params=pltpu.CompilerParams(
            dimension_semantics=("parallel",),        # v7x: shard M over both TCs
            vmem_limit_bytes=32 << 20),               # covers [K,2048] double buffers
        cost_estimate=pl.CostEstimate(flops=flops, transcendentals=0,
                                      bytes_accessed=bytes_accessed),
    )(w_mat, p2, b_col)
    return out.reshape(O, B, Ho, Wo)


# ----------------------------------------------------------------------------
# Fused dense head (batch-gridded)
# ----------------------------------------------------------------------------
def _pick_tb(batch):
    """Exact-division row tile so no partial blocks ever touch the resident output."""
    if batch <= 256:
        return batch
    for tb in (256, 128, 64, 32, 16):
        if batch % tb == 0:
            return tb
    return batch


def head_pallas(h, packed):
    """linear1 + value/adv + output heads + dueling combine in ONE pallas_call."""
    B, D = h.shape
    n_hidden = packed["wov"].shape[0]
    n_output = packed["woa"].shape[1]
    tb = _pick_tb(B)
    grid = (pl.cdiv(B, tb),)

    kernel = functools.partial(_head_kernel, n_hidden=n_hidden, batch=B, block_b=tb)

    w_args = (packed["w1"], packed["b1"], packed["wva"], packed["bva"],
              packed["woa"], packed["boa"], packed["wov"], packed["bov"])

    in_specs = [pl.BlockSpec((tb, D), lambda i: (i, 0))]              # stream h rows
    in_specs += [pl.BlockSpec(a.shape, lambda i: (0, 0)) for a in w_args]  # resident

    flops = 2 * B * (D * 512 + 512 * 512 + n_hidden * (n_output + 1))
    bytes_accessed = (h.size * h.dtype.itemsize
                      + sum(int(a.size) * a.dtype.itemsize for a in w_args)
                      + B * n_output * 4)

    return pl.pallas_call(
        kernel,
        out_shape=jax.ShapeDtypeStruct((B, n_output), jnp.float32),
        grid=grid,
        in_specs=in_specs,
        out_specs=pl.BlockSpec((B, n_output), lambda i: (0, 0)),      # resident output
        scratch_shapes=[pltpu.VMEM((1, 1), jnp.float32)],             # sum(a) accumulator
        compiler_params=pltpu.CompilerParams(
            dimension_semantics=("arbitrary",),       # output revisited across grid
            vmem_limit_bytes=32 << 20),
        cost_estimate=pl.CostEstimate(flops=flops, transcendentals=0,
                                      bytes_accessed=bytes_accessed),
    )(h, *w_args)


# ----------------------------------------------------------------------------
# Parameter init (PyTorch layouts, deterministic) + one-time packing
# ----------------------------------------------------------------------------
def init_params(key, n_input, n_output, n_filters=32, n_hidden=256):
    ks = jax.random.split(key, 16)

    def kaiming_uniform(k, shape, fan_in, a=2.0):
        gain = (2.0 / (1.0 + a * a)) ** 0.5
        bound = gain * (3.0 / fan_in) ** 0.5
        return jax.random.uniform(k, shape, jnp.float32, -bound, bound)

    def uniform_fan(k, shape, fan_in):
        bound = 1.0 / (fan_in ** 0.5)
        return jax.random.uniform(k, shape, jnp.float32, -bound, bound)

    p = {}
    # convs (PyTorch [O, C, kh, kw])
    p["conv1_w"] = kaiming_uniform(ks[0], (n_filters, n_input, 8, 8), n_input * 8 * 8)
    p["conv1_b"] = uniform_fan(ks[1], (n_filters,), n_input * 8 * 8)
    p["conv2_w"] = kaiming_uniform(ks[2], (n_filters, n_filters, 4, 4), n_filters * 4 * 4)
    p["conv2_b"] = uniform_fan(ks[3], (n_filters,), n_filters * 4 * 4)
    p["conv3_w"] = kaiming_uniform(ks[4], (n_filters, n_filters, 3, 3), n_filters * 3 * 3)
    p["conv3_b"] = uniform_fan(ks[5], (n_filters,), n_filters * 3 * 3)
    # linears (PyTorch layout [out, in])
    p["linear1_w"] = uniform_fan(ks[6], (512, 7 * 7 * 32), 7 * 7 * 32)
    p["linear1_b"] = uniform_fan(ks[7], (512,), 7 * 7 * 32)
    p["value_w"] = uniform_fan(ks[8], (n_hidden, 512), 512)
    p["value_b"] = uniform_fan(ks[9], (n_hidden,), 512)
    p["adv_w"] = uniform_fan(ks[10], (n_hidden, 512), 512)
    p["adv_b"] = uniform_fan(ks[11], (n_hidden,), 512)
    p["out_adv_w"] = uniform_fan(ks[12], (n_output, n_hidden), n_hidden)
    p["out_adv_b"] = uniform_fan(ks[13], (n_output,), n_hidden)
    p["out_val_w"] = uniform_fan(ks[14], (1, n_hidden), n_hidden)
    p["out_val_b"] = uniform_fan(ks[15], (1,), n_hidden)
    return p


def pack_params(p):
    """One-time repack into kernel-consumable layouts: every transpose / reshape and
    the f32->bf16 weight cast is hoisted out of the forward pass; biases stay f32
    because they're added to the f32 MXU accumulator in-kernel."""
    bf16, f32 = jnp.bfloat16, jnp.float32
    pk = {}
    # conv weights: [O, C*kh*kw] bf16 (channel-major columns = PyTorch .view order)
    pk["conv1_w"] = p["conv1_w"].reshape(p["conv1_w"].shape[0], -1).astype(bf16)
    pk["conv1_b"] = p["conv1_b"].reshape(-1, 1).astype(f32)
    pk["conv2_w"] = p["conv2_w"].reshape(p["conv2_w"].shape[0], -1).astype(bf16)
    pk["conv2_b"] = p["conv2_b"].reshape(-1, 1).astype(f32)
    pk["conv3_w"] = p["conv3_w"].reshape(p["conv3_w"].shape[0], -1).astype(bf16)
    pk["conv3_b"] = p["conv3_b"].reshape(-1, 1).astype(f32)
    # dense head (store transposed once; value|adv concatenated into one matmul)
    pk["w1"] = p["linear1_w"].T.astype(bf16)                                          # [1568, 512]
    pk["b1"] = p["linear1_b"].reshape(1, -1).astype(f32)
    pk["wva"] = jnp.concatenate([p["value_w"].T, p["adv_w"].T], axis=1).astype(bf16)  # [512, 512]
    pk["bva"] = jnp.concatenate([p["value_b"], p["adv_b"]]).reshape(1, -1).astype(f32)
    pk["woa"] = p["out_adv_w"].T.astype(bf16)                                         # [n_hidden, n_out]
    pk["boa"] = p["out_adv_b"].reshape(1, -1).astype(f32)
    pk["wov"] = p["out_val_w"].T.astype(bf16)                                         # [n_hidden, 1]
    pk["bov"] = p["out_val_b"].reshape(1, -1).astype(f32)
    return pk


# ----------------------------------------------------------------------------
# Forward pass (mirrors ConvolutionalNeuralNetwork.forward)
# ----------------------------------------------------------------------------
def forward(packed, x):
    # x: [B, n_input, 84, 84] NCHW (84x84 required by the 7*7*32 flatten)
    x = x.astype(jnp.bfloat16)                                    # bf16 activation stream
    h = conv2d_relu_pallas(x, packed["conv1_w"], packed["conv1_b"], 8, 8, 4, "NCHW")  # [32,B,20,20]
    h = conv2d_relu_pallas(h, packed["conv2_w"], packed["conv2_b"], 4, 4, 2, "CNHW")  # [32,B,9,9]
    h = conv2d_relu_pallas(h, packed["conv3_w"], packed["conv3_b"], 3, 3, 1, "CNHW")  # [32,B,7,7]
    B = x.shape[0]
    nf = h.shape[0]
    # PyTorch's h.view(-1, 7*7*32) on NCHW => per-sample features ordered (c, h, w).
    # TODO(synk): fold this (tiny, bf16) transpose into the head kernel to save a dispatch.
    h = jnp.transpose(h.reshape(nf, B, -1), (1, 0, 2)).reshape(B, -1)                 # [B, 1568] bf16
    return head_pallas(h, packed)                                                     # [B, n_output] f32


if __name__ == "__main__":
    B, n_input, n_output = 2, 4, 6
    key = jax.random.PRNGKey(0)
    k_param, k_x = jax.random.split(key)

    params = init_params(k_param, n_input, n_output)
    packed = pack_params(params)
    x = jax.random.uniform(k_x, (B, n_input, 84, 84), jnp.float32)

    fwd = jax.jit(forward)
    out = jax.block_until_ready(fwd(packed, x))

    assert out.shape == (B, n_output), out.shape
    assert out.dtype == jnp.float32
    print("KERNEL_OK")
</pallas_src>

<mosaic_0001>
module attributes {stable_mosaic.version = 11 : i64} {
  func.func @_conv_mm_kernel(%arg0: i32, %arg1: memref<32x256xbf16, #tpu.memory_space<vmem>>, %arg2: memref<256x512xbf16, #tpu.memory_space<vmem>>, %arg3: memref<32x1xf32, #tpu.memory_space<vmem>>, %arg4: memref<32x512xbf16, #tpu.memory_space<vmem>>) attributes {dimension_semantics = [#tpu.dimension_semantics<parallel>], iteration_bounds = array<i64: 2>, scalar_prefetch = 0 : i64, scratch_operands = 0 : i64, tpu.core_type = #tpu.core_type<tc>, window_params = [{pipeline_mode = #tpu.pipeline_mode<synchronous>, transform_indices = @transform_0, window_bounds = array<i64: 32, 256>}, {transform_indices = @transform_1, window_bounds = array<i64: 256, 512>}, {pipeline_mode = #tpu.pipeline_mode<synchronous>, transform_indices = @transform_2, window_bounds = array<i64: 32, 1>}, {transform_indices = @transform_3, window_bounds = array<i64: 32, 512>}]} {
    %c0 = arith.constant 0 : index
    %c0_0 = arith.constant 0 : index
    %0 = vector.load %arg1[%c0, %c0_0] : memref<32x256xbf16, #tpu.memory_space<vmem>>, vector<32x256xbf16>
    %c0_1 = arith.constant 0 : index
    %c0_2 = arith.constant 0 : index
    %1 = vector.load %arg2[%c0_1, %c0_2] : memref<256x512xbf16, #tpu.memory_space<vmem>>, vector<256x512xbf16>
    %cst = arith.constant dense<0.000000e+00> : vector<32x512xf32>
    %2 = tpu.matmul %0, %1, %cst {dimension_numbers = #tpu.dot_dimension_numbers<[1], [0], [0], [1], [0, 0, 1, 1], [], []>} : vector<32x256xbf16>, vector<256x512xbf16>, vector<32x512xf32> -> vector<32x512xf32>
    %c0_3 = arith.constant 0 : index
    %c0_4 = arith.constant 0 : index
    %3 = vector.load %arg3[%c0_3, %c0_4] : memref<32x1xf32, #tpu.memory_space<vmem>>, vector<32x1xf32>
    %4 = vector.broadcast %3 : vector<32x1xf32> to vector<32x512xf32>
    %5 = arith.addf %2, %4 : vector<32x512xf32>
    %cst_5 = arith.constant 0.000000e+00 : f32
    %6 = vector.broadcast %cst_5 : f32 to vector<32x512xf32>
    %7 = arith.maximumf %5, %6 : vector<32x512xf32>
    %8 = arith.truncf %7 : vector<32x512xf32> to vector<32x512xbf16>
    %c0_6 = arith.constant 0 : index
    %c0_7 = arith.constant 0 : index
    %9 = vector.load %arg4[%c0_6, %c0_7] : memref<32x512xbf16, #tpu.memory_space<vmem>>, vector<32x512xbf16>
    tpu.vector_store %arg4[%c0_6, %c0_7], %8 {strides = array<i32>} : memref<32x512xbf16, #tpu.memory_space<vmem>>, vector<32x512xbf16>,
    return
  }
  func.func @transform_0(%arg0: i32) -> (i32, i32) {
    %c0_i32 = arith.constant 0 : i32
    %c0_i32_0 = arith.constant 0 : i32
    %c0_i32_1 = arith.constant 0 : i32
    return %c0_i32, %c0_i32_0 : i32, i32
  }
  func.func @transform_1(%arg0: i32) -> (i32, i32) {
    %c0_i32 = arith.constant 0 : i32
    %c0_i32_0 = arith.constant 0 : i32
    return %c0_i32, %arg0 : i32, i32
  }
  func.func @transform_2(%arg0: i32) -> (i32, i32) {
    %c0_i32 = arith.constant 0 : i32
    %c0_i32_0 = arith.constant 0 : i32
    %c0_i32_1 = arith.constant 0 : i32
    return %c0_i32, %c0_i32_0 : i32, i32
  }
  func.func @transform_3(%arg0: i32) -> (i32, i32) {
    %c0_i32 = arith.constant 0 : i32
    %c0_i32_0 = arith.constant 0 : i32
    return %c0_i32, %arg0 : i32, i32
  }
}

module attributes {stable_mosaic.version = 11 : i64} {
  func.func @_conv_mm_kernel(%arg0: i32, %arg1: memref<32x512xbf16, #tpu.memory_space<vmem>>, %arg2: memref<512x128xbf16, #tpu.memory_space<vmem>>, %arg3: memref<32x1xf32, #tpu.memory_space<vmem>>, %arg4: memref<32x128xbf16, #tpu.memory_space<vmem>>) attributes {dimension_semantics = [#tpu.dimension_semantics<parallel>], iteration_bounds = array<i64: 2>, scalar_prefetch = 0 : i64, scratch_operands = 0 : i64, tpu.core_type = #tpu.core_type<tc>, window_params = [{pipeline_mode = #tpu.pipeline_mode<synchronous>, transform_indices = @transform_0, window_bounds = array<i64: 32, 512>}, {transform_indices = @transform_1, window_bounds = array<i64: 512, 128>}, {pipeline_mode = #tpu.pipeline_mode<synchronous>, transform_indices = @transform_2, window_bounds = array<i64: 32, 1>}, {transform_indices = @transform_3, window_bounds = array<i64: 32, 128>}]} {
    %c0 = arith.constant 0 : index
    %c0_0 = arith.constant 0 : index
    %0 = vector.load %arg1[%c0, %c0_0] : memref<32x512xbf16, #tpu.memory_space<vmem>>, vector<32x512xbf16>
    %c0_1 = arith.constant 0 : index
    %c0_2 = arith.constant 0 : index
    %1 = vector.load %arg2[%c0_1, %c0_2] : memref<512x128xbf16, #tpu.memory_space<vmem>>, vector<512x128xbf16>
    %cst = arith.constant dense<0.000000e+00> : vector<32x128xf32>
    %2 = tpu.matmul %0, %1, %cst {dimension_numbers = #tpu.dot_dimension_numbers<[1], [0], [0], [1], [0, 0, 1, 1], [], []>} : vector<32x512xbf16>, vector<512x128xbf16>, vector<32x128xf32> -> vector<32x128xf32>
    %c0_3 = arith.constant 0 : index
    %c0_4 = arith.constant 0 : index
    %3 = vector.load %arg3[%c0_3, %c0_4] : memref<32x1xf32, #tpu.memory_space<vmem>>, vector<32x1xf32>
    %4 = vector.broadcast %3 : vector<32x1xf32> to vector<32x128xf32>
    %5 = arith.addf %2, %4 : vector<32x128xf32>
    %cst_5 = arith.constant 0.000000e+00 : f32
    %6 = vector.broadcast %cst_5 : f32 to vector<32x128xf32>
    %7 = arith.maximumf %5, %6 : vector<32x128xf32>
    %8 = arith.truncf %7 : vector<32x128xf32> to vector<32x128xbf16>
    %c0_6 = arith.constant 0 : index
    %c0_7 = arith.constant 0 : index
    %9 = vector.load %arg4[%c0_6, %c0_7] : memref<32x128xbf16, #tpu.memory_space<vmem>>, vector<32x128xbf16>
    tpu.vector_store %arg4[%c0_6, %c0_7], %8 {strides = array<i32>} : memref<32x128xbf16, #tpu.memory_space<vmem>>, vector<32x128xbf16>,
    return
  }
  func.func @transform_0(%arg0: i32) -> (i32, i32) {
    %c0_i32 = arith.constant 0 : i32
    %c0_i32_0 = arith.constant 0 : i32
    %c0_i32_1 = arith.constant 0 : i32
    return %c0_i32, %c0_i32_0 : i32, i32
  }
  func.func @transform_1(%arg0: i32) -> (i32, i32) {
    %c0_i32 = arith.constant 0 : i32
    %c0_i32_0 = arith.constant 0 : i32
    return %c0_i32, %arg0 : i32, i32
  }
  func.func @transform_2(%arg0: i32) -> (i32, i32) {
    %c0_i32 = arith.constant 0 : i32
    %c0_i32_0 = arith.constant 0 : i32
    %c0_i32_1 = arith.constant 0 : i32
    return %c0_i32, %c0_i32_0 : i32, i32
  }
  func.func @transform_3(%arg0: i32) -> (i32, i32) {
    %c0_i32 = arith.constant 0 : i32
    %c0_i32_0 = arith.constant 0 : i32
    return %c0_i32, %arg0 : i32, i32
  }
}

module attributes {stable_mosaic.version = 11 : i64} {
  func.func @_conv_mm_kernel(%arg0: i32, %arg1: memref<32x288xbf16, #tpu.memory_space<vmem>>, %arg2: memref<288x128xbf16, #tpu.memory_space<vmem>>, %arg3: memref<32x1xf32, #tpu.memory_space<vmem>>, %arg4: memref<32x128xbf16, #tpu.memory_space<vmem>>) attributes {dimension_semantics = [#tpu.dimension_semantics<parallel>], iteration_bounds = array<i64: 1>, scalar_prefetch = 0 : i64, scratch_operands = 0 : i64, tpu.core_type = #tpu.core_type<tc>, window_params = [{pipeline_mode = #tpu.pipeline_mode<synchronous>, transform_indices = @transform_0, window_bounds = array<i64: 32, 288>}, {transform_indices = @transform_1, window_bounds = array<i64: 288, 128>}, {pipeline_mode = #tpu.pipeline_mode<synchronous>, transform_indices = @transform_2, window_bounds = array<i64: 32, 1>}, {transform_indices = @transform_3, window_bounds = array<i64: 32, 128>}]} {
    %c0 = arith.constant 0 : index
    %c0_0 = arith.constant 0 : index
    %0 = vector.load %arg1[%c0, %c0_0] : memref<32x288xbf16, #tpu.memory_space<vmem>>, vector<32x288xbf16>
    %c0_1 = arith.constant 0 : index
    %c0_2 = arith.constant 0 : index
    %1 = vector.load %arg2[%c0_1, %c0_2] : memref<288x128xbf16, #tpu.memory_space<vmem>>, vector<288x128xbf16>
    %cst = arith.constant dense<0.000000e+00> : vector<32x128xf32>
    %2 = tpu.matmul %0, %1, %cst {dimension_numbers = #tpu.dot_dimension_numbers<[1], [0], [0], [1], [0, 0, 1, 1], [], []>} : vector<32x288xbf16>, vector<288x128xbf16>, vector<32x128xf32> -> vector<32x128xf32>
    %c0_3 = arith.constant 0 : index
    %c0_4 = arith.constant 0 : index
    %3 = vector.load %arg3[%c0_3, %c0_4] : memref<32x1xf32, #tpu.memory_space<vmem>>, vector<32x1xf32>
    %4 = vector.broadcast %3 : vector<32x1xf32> to vector<32x128xf32>
    %5 = arith.addf %2, %4 : vector<32x128xf32>
    %cst_5 = arith.constant 0.000000e+00 : f32
    %6 = vector.broadcast %cst_5 : f32 to vector<32x128xf32>
    %7 = arith.maximumf %5, %6 : vector<32x128xf32>
    %8 = arith.truncf %7 : vector<32x128xf32> to vector<32x128xbf16>
    %c0_6 = arith.constant 0 : index
    %c0_7 = arith.constant 0 : index
    %9 = vector.load %arg4[%c0_6, %c0_7] : memref<32x128xbf16, #tpu.memory_space<vmem>>, vector<32x128xbf16>
    tpu.vector_store %arg4[%c0_6, %c0_7], %8 {strides = array<i32>} : memref<32x128xbf16, #tpu.memory_space<vmem>>, vector<32x128xbf16>,
    return
  }
  func.func @transform_0(%arg0: i32) -> (i32, i32) {
    %c0_i32 = arith.constant 0 : i32
    %c0_i32_0 = arith.constant 0 : i32
    %c0_i32_1 = arith.constant 0 : i32
    return %c0_i32, %c0_i32_0 : i32, i32
  }
  func.func @transform_1(%arg0: i32) -> (i32, i32) {
    %c0_i32 = arith.constant 0 : i32
    %c0_i32_0 = arith.constant 0 : i32
    return %c0_i32, %arg0 : i32, i32
  }
  func.func @transform_2(%arg0: i32) -> (i32, i32) {
    %c0_i32 = arith.constant 0 : i32
    %c0_i32_0 = arith.constant 0 : i32
    %c0_i32_1 = arith.constant 0 : i32
    return %c0_i32, %c0_i32_0 : i32, i32
  }
  func.func @transform_3(%arg0: i32) -> (i32, i32) {
    %c0_i32 = arith.constant 0 : i32
    %c0_i32_0 = arith.constant 0 : i32
    return %c0_i32, %arg0 : i32, i32
  }
}

module attributes {stable_mosaic.version = 11 : i64} {
  func.func @_head_kernel(%arg0: i32, %arg1: memref<2x1568xbf16, #tpu.memory_space<vmem>>, %arg2: memref<1568x512xbf16, #tpu.memory_space<vmem>>, %arg3: memref<1x512xf32, #tpu.memory_space<vmem>>, %arg4: memref<512x512xbf16, #tpu.memory_space<vmem>>, %arg5: memref<1x512xf32, #tpu.memory_space<vmem>>, %arg6: memref<256x6xbf16, #tpu.memory_space<vmem>>, %arg7: memref<1x6xf32, #tpu.memory_space<vmem>>, %arg8: memref<256x1xbf16, #tpu.memory_space<vmem>>, %arg9: memref<1x1xf32, #tpu.memory_space<vmem>>, %arg10: memref<2x6xf32, #tpu.memory_space<vmem>>, %arg11: memref<1x1xf32, #tpu.memory_space<vmem>>) attributes {dimension_semantics = [#tpu.dimension_semantics<arbitrary>], iteration_bounds = array<i64: 1>, scalar_prefetch = 0 : i64, scratch_operands = 1 : i64, tpu.core_type = #tpu.core_type<tc>, window_params = [{transform_indices = @transform_0, window_bounds = array<i64: 2, 1568>}, {pipeline_mode = #tpu.pipeline_mode<synchronous>, transform_indices = @transform_1, window_bounds = array<i64: 1568, 512>}, {pipeline_mode = #tpu.pipeline_mode<synchronous>, transform_indices = @transform_2, window_bounds = array<i64: 1, 512>}, {pipeline_mode = #tpu.pipeline_mode<synchronous>, transform_indices = @transform_3, window_bounds = array<i64: 512, 512>}, {pipeline_mode = #tpu.pipeline_mode<synchronous>, transform_indices = @transform_4, window_bounds = array<i64: 1, 512>}, {pipeline_mode = #tpu.pipeline_mode<synchronous>, transform_indices = @transform_5, window_bounds = array<i64: 256, 6>}, {pipeline_mode = #tpu.pipeline_mode<synchronous>, transform_indices = @transform_6, window_bounds = array<i64: 1, 6>}, {pipeline_mode = #tpu.pipeline_mode<synchronous>, transform_indices = @transform_7, window_bounds = array<i64: 256, 1>}, {pipeline_mode = #tpu.pipeline_mode<synchronous>, transform_indices = @transform_8, window_bounds = array<i64: 1, 1>}, {pipeline_mode = #tpu.pipeline_mode<synchronous>, transform_indices = @transform_9, window_bounds = array<i64: 2, 6>}]} {
    %c0_i32 = arith.constant 0 : i32
    %0 = arith.cmpi eq, %arg0, %c0_i32 : i32
    %1 = arith.extui %0 : i1 to i32
    %c0_i32_0 = arith.constant 0 : i32
    %2 = arith.cmpi ne, %1, %c0_i32_0 : i32
    scf.if %2 {
      %cst_31 = arith.constant 0.000000e+00 : f32
      %48 = vector.broadcast %cst_31 : f32 to vector<1x1xf32>
      %c0_32 = arith.constant 0 : index
      %c0_33 = arith.constant 0 : index
      %49 = vector.load %arg11[%c0_32, %c0_33] : memref<1x1xf32, #tpu.memory_space<vmem>>, vector<1x1xf32>
      tpu.vector_store %arg11[%c0_32, %c0_33], %48 {strides = array<i32>} : memref<1x1xf32, #tpu.memory_space<vmem>>, vector<1x1xf32>,
    } else {
    }
    %c0 = arith.constant 0 : index
    %c0_1 = arith.constant 0 : index
    %3 = vector.load %arg1[%c0, %c0_1] : memref<2x1568xbf16, #tpu.memory_space<vmem>>, vector<2x1568xbf16>
    %c0_2 = arith.constant 0 : index
    %c0_3 = arith.constant 0 : index
    %4 = vector.load %arg2[%c0_2, %c0_3] : memref<1568x512xbf16, #tpu.memory_space<vmem>>, vector<1568x512xbf16>
    %cst = arith.constant dense<0.000000e+00> : vector<2x512xf32>
    %5 = tpu.matmul %3, %4, %cst {dimension_numbers = #tpu.dot_dimension_numbers<[1], [0], [0], [1], [0, 0, 1, 1], [], []>} : vector<2x1568xbf16>, vector<1568x512xbf16>, vector<2x512xf32> -> vector<2x512xf32>
    %c0_4 = arith.constant 0 : index
    %c0_5 = arith.constant 0 : index
    %6 = vector.load %arg3[%c0_4, %c0_5] : memref<1x512xf32, #tpu.memory_space<vmem>>, vector<1x512xf32>
    %7 = vector.broadcast %6 : vector<1x512xf32> to vector<2x512xf32>
    %8 = arith.addf %5, %7 : vector<2x512xf32>
    %cst_6 = arith.constant 0.000000e+00 : f32
    %9 = vector.broadcast %cst_6 : f32 to vector<2x512xf32>
    %10 = arith.maximumf %8, %9 : vector<2x512xf32>
    %11 = arith.truncf %10 : vector<2x512xf32> to vector<2x512xbf16>
    %c0_7 = arith.constant 0 : index
    %c0_8 = arith.constant 0 : index
    %12 = vector.load %arg4[%c0_7, %c0_8] : memref<512x512xbf16, #tpu.memory_space<vmem>>, vector<512x512xbf16>
    %cst_9 = arith.constant dense<0.000000e+00> : vector<2x512xf32>
    %13 = tpu.matmul %11, %12, %cst_9 {dimension_numbers = #tpu.dot_dimension_numbers<[1], [0], [0], [1], [0, 0, 1, 1], [], []>} : vector<2x512xbf16>, vector<512x512xbf16>, vector<2x512xf32> -> vector<2x512xf32>
    %c0_10 = arith.constant 0 : index
    %c0_11 = arith.constant 0 : index
    %14 = vector.load %arg5[%c0_10, %c0_11] : memref<1x512xf32, #tpu.memory_space<vmem>>, vector<1x512xf32>
    %15 = vector.broadcast %14 : vector<1x512xf32> to vector<2x512xf32>
    %16 = arith.addf %13, %15 : vector<2x512xf32>
    %cst_12 = arith.constant 0.000000e+00 : f32
    %17 = vector.broadcast %cst_12 : f32 to vector<2x512xf32>
    %18 = arith.maximumf %16, %17 : vector<2x512xf32>
    %19 = arith.truncf %18 : vector<2x512xf32> to vector<2x512xbf16>
    %20 = vector.extract_strided_slice %19 {offsets = [0, 0], sizes = [2, 256], strides = [1, 1]} : vector<2x512xbf16> to vector<2x256xbf16>
    %21 = vector.extract_strided_slice %19 {offsets = [0, 256], sizes = [2, 256], strides = [1, 1]} : vector<2x512xbf16> to vector<2x256xbf16>
    %c0_13 = arith.constant 0 : index
    %c0_14 = arith.constant 0 : index
    %22 = vector.load %arg8[%c0_13, %c0_14] : memref<256x1xbf16, #tpu.memory_space<vmem>>, vector<256x1xbf16>
    %cst_15 = arith.constant dense<0.000000e+00> : vector<2x1xf32>
    %23 = tpu.matmul %20, %22, %cst_15 {dimension_numbers = #tpu.dot_dimension_numbers<[1], [0], [0], [1], [0, 0, 1, 1], [], []>} : vector<2x256xbf16>, vector<256x1xbf16>, vector<2x1xf32> -> vector<2x1xf32>
    %c0_16 = arith.constant 0 : index
    %c0_17 = arith.constant 0 : index
    %24 = vector.load %arg9[%c0_16, %c0_17] : memref<1x1xf32, #tpu.memory_space<vmem>>, vector<1x1xf32>
    %25 = vector.broadcast %24 : vector<1x1xf32> to vector<2x1xf32>
    %26 = arith.addf %23, %25 : vector<2x1xf32>
    %c0_18 = arith.constant 0 : index
    %c0_19 = arith.constant 0 : index
    %27 = vector.load %arg6[%c0_18, %c0_19] : memref<256x6xbf16, #tpu.memory_space<vmem>>, vector<256x6xbf16>
    %cst_20 = arith.constant dense<0.000000e+00> : vector<2x6xf32>
    %28 = tpu.matmul %21, %27, %cst_20 {dimension_numbers = #tpu.dot_dimension_numbers<[1], [0], [0], [1], [0, 0, 1, 1], [], []>} : vector<2x256xbf16>, vector<256x6xbf16>, vector<2x6xf32> -> vector<2x6xf32>
    %c0_21 = arith.constant 0 : index
    %c0_22 = arith.constant 0 : index
    %29 = vector.load %arg7[%c0_21, %c0_22] : memref<1x6xf32, #tpu.memory_space<vmem>>, vector<1x6xf32>
    %30 = vector.broadcast %29 : vector<1x6xf32> to vector<2x6xf32>
    %31 = arith.addf %28, %30 : vector<2x6xf32>
    %c0_23 = arith.constant 0 : index
    %c0_24 = arith.constant 0 : index
    %32 = vector.load %arg11[%c0_23, %c0_24] : memref<1x1xf32, #tpu.memory_space<vmem>>, vector<1x1xf32>
    %33 = vector.shape_cast %31 : vector<2x6xf32> to vector<1x2x6xf32>
    %cst_25 = arith.constant dense<0.000000e+00> : vector<1xf32>
    %34 = vector.multi_reduction <add>, %33, %cst_25 [1, 2] : vector<1x2x6xf32> to vector<1xf32>
    %35 = vector.shape_cast %34 : vector<1xf32> to vector<1x1x1xf32>
    %36 = vector.extract %35[0, 0, 0] : f32 from vector<1x1x1xf32>
    %37 = vector.broadcast %36 : f32 to vector<1x1xf32>
    %38 = arith.addf %32, %37 : vector<1x1xf32>
    %c0_26 = arith.constant 0 : index
    %c0_27 = arith.constant 0 : index
    %39 = vector.load %arg11[%c0_26, %c0_27] : memref<1x1xf32, #tpu.memory_space<vmem>>, vector<1x1xf32>
    tpu.vector_store %arg11[%c0_26, %c0_27], %38 {strides = array<i32>} : memref<1x1xf32, #tpu.memory_space<vmem>>, vector<1x1xf32>,
    %40 = vector.broadcast %26 : vector<2x1xf32> to vector<2x6xf32>
    %41 = arith.addf %40, %31 : vector<2x6xf32>
    %c2_i32 = arith.constant 2 : i32
    %42 = arith.muli %arg0, %c2_i32 : i32
    %43 = arith.index_cast %42 : i32 to index
    %c0_28 = arith.constant 0 : index
    %44 = vector.load %arg10[%43, %c0_28] : memref<2x6xf32, #tpu.memory_space<vmem>>, vector<2x6xf32>
    tpu.vector_store %arg10[%43, %c0_28], %41 {strides = array<i32>} : memref<2x6xf32, #tpu.memory_space<vmem>>, vector<2x6xf32>,
    %c0_i32_29 = arith.constant 0 : i32
    %45 = arith.cmpi eq, %arg0, %c0_i32_29 : i32
    %46 = arith.extui %45 : i1 to i32
    %c0_i32_30 = arith.constant 0 : i32
    %47 = arith.cmpi ne, %46, %c0_i32_30 : i32
    scf.if %47 {
      %c0_31 = arith.constant 0 : index
      %c0_32 = arith.constant 0 : index
      %48 = vector.load %arg11[%c0_31, %c0_32] : memref<1x1xf32, #tpu.memory_space<vmem>>, vector<1x1xf32>
      %cst_33 = arith.constant 0.0833333358 : f32
      %49 = vector.broadcast %cst_33 : f32 to vector<1x1xf32>
      %50 = arith.mulf %48, %49 : vector<1x1xf32>
      %c0_34 = arith.constant 0 : index
      %c0_35 = arith.constant 0 : index
      %51 = vector.load %arg10[%c0_34, %c0_35] : memref<2x6xf32, #tpu.memory_space<vmem>>, vector<2x6xf32>
      %52 = vector.broadcast %50 : vector<1x1xf32> to vector<2x6xf32>
      %53 = arith.subf %51, %52 : vector<2x6xf32>
      %c0_36 = arith.constant 0 : index
      %c0_37 = arith.constant 0 : index
      %54 = vector.load %arg10[%c0_36, %c0_37] : memref<2x6xf32, #tpu.memory_space<vmem>>, vector<2x6xf32>
      tpu.vector_store %arg10[%c0_36, %c0_37], %53 {strides = array<i32>} : memref<2x6xf32, #tpu.memory_space<vmem>>, vector<2x6xf32>,
    } else {
    }
    return
  }
  func.func @transform_0(%arg0: i32) -> (i32, i32) {
    %c0_i32 = arith.constant 0 : i32
    %c0_i32_0 = arith.constant 0 : i32
    return %arg0, %c0_i32 : i32, i32
  }
  func.func @transform_1(%arg0: i32) -> (i32, i32) {
    %c0_i32 = arith.constant 0 : i32
    %c0_i32_0 = arith.constant 0 : i32
    %c0_i32_1 = arith.constant 0 : i32
    return %c0_i32, %c0_i32_0 : i32, i32
  }
  func.func @transform_2(%arg0: i32) -> (i32, i32) {
    %c0_i32 = arith.constant 0 : i32
    %c0_i32_0 = arith.constant 0 : i32
    %c0_i32_1 = arith.constant 0 : i32
    return %c0_i32, %c0_i32_0 : i32, i32
  }
  func.func @transform_3(%arg0: i32) -> (i32, i32) {
    %c0_i32 = arith.constant 0 : i32
    %c0_i32_0 = arith.constant 0 : i32
    %c0_i32_1 = arith.constant 0 : i32
    return %c0_i32, %c0_i32_0 : i32, i32
  }
  func.func @transform_4(%arg0: i32) -> (i32, i32) {
    %c0_i32 = arith.constant 0 : i32
    %c0_i32_0 = arith.constant 0 : i32
    %c0_i32_1 = arith.constant 0 : i32
    return %c0_i32, %c0_i32_0 : i32, i32
  }
  func.func @transform_5(%arg0: i32) -> (i32, i32) {
    %c0_i32 = arith.constant 0 : i32
    %c0_i32_0 = arith.constant 0 : i32
    %c0_i32_1 = arith.constant 0 : i32
    return %c0_i32, %c0_i32_0 : i32, i32
  }
  func.func @transform_6(%arg0: i32) -> (i32, i32) {
    %c0_i32 = arith.constant 0 : i32
    %c0_i32_0 = arith.constant 0 : i32
    %c0_i32_1 = arith.constant 0 : i32
    return %c0_i32, %c0_i32_0 : i32, i32
  }
  func.func @transform_7(%arg0: i32) -> (i32, i32) {
    %c0_i32 = arith.constant 0 : i32
    %c0_i32_0 = arith.constant 0 : i32
    %c0_i32_1 = arith.constant 0 : i32
    return %c0_i32, %c0_i32_0 : i32, i32
  }
  func.func @transform_8(%arg0: i32) -> (i32, i32) {
    %c0_i32 = arith.constant 0 : i32
    %c0_i32_0 = arith.constant 0 : i32
    %c0_i32_1 = arith.constant 0 : i32
    return %c0_i32, %c0_i32_0 : i32, i32
  }
  func.func @transform_9(%arg0: i32) -> (i32, i32) {
    %c0_i32 = arith.constant 0 : i32
    %c0_i32_0 = arith.constant 0 : i32
    %c0_i32_1 = arith.constant 0 : i32
    return %c0_i32, %c0_i32_0 : i32, i32
  }
}

</mosaic_0001>

<bundles_post_ra>
// kernel: forward.4
= control target key start
LH: loop header
LB: loop body
LE: loop exit
PB: predicated region body
PF: predicated region fallthrough
CT: control target
= control target key end

     0   :  { %s2485_s12 = smov 0   ;;  %s2487_s13 = smov 0   ;;  %s3560_s0 = inlined_call_operand.vmem [shape: bf16[32,256], index: 0, kind: input, shape index: {}]   ;;  %s3561_s1 = inlined_call_operand.vmem [shape: bf16[256,800], index: 1, kind: input, shape index: {}]   ;;  %s3562_s2 = inlined_call_operand.vmem [shape: f32[32,1], index: 2, kind: input, shape index: {}]   ;;  %s3563_s3 = inlined_call_operand.vmem [shape: bf16[32,800], index: 3, kind: output, shape index: {}]  }
   0x1   :  { %s2489_s14 = smov 0  }
   0x2 LB: > { %s2501_s15 = sadd.s32 4294967295, %s2362_s14   ;;  %s2504_s16 = sadd.s32 1, %s2362_s14   ;;  %s2362_s14 = sphi %s2489_s14, %s3592_s14   ;;  %s2358_s13 = sphi %s2487_s13, %s3591_s13   ;;  %s2354_s12 = sphi %s2485_s12, %s3590_s12  }
   0x3   : > { %s38_s17 = ssub.s32 %s2362_s14, %s2504_s16  ;;  %s41_s18 = sadd.s32 1, %s2358_s13 }
   0x4   : > { %p39_p0 = scmp.eq.s32.totalorder %s38_s17, 0  ;;  %p48_p1 = scmp.ne.s32.totalorder %s2358_s13, %s2354_s12 }
   0x5   : > { %p49_p2 = scmp.eq.s32.totalorder %s2362_s14, 0  ;;  %p99_p3 = scmp.eq.s32.totalorder %s2501_s15, 1 }
   0x6   : > { %s2514_s19 = scalar_select %p39_p0, %s2358_s13, %s41_s18  }
   0x7   : > { %p50_p4 = por %p49_p2, %p48_p1  ;;  %p2516_p5 = por %p99_p3, %p48_p1 }
   0x8   : > { %p1623_p6 = scmp.ge.s32.totalorder %s2362_s14, 2 }
   0xa   : > { %127 = sbr.rel (%p1623_p6) target bundleno = 196 (0xc4), region = 24 }
   0xf   : > { %130 = sbr.rel (!%p50_p4) target bundleno = 196 (0xc4), region = 28  ;;  %s132_s21 = sand.u32 (%p50_p4), 1, %s2358_s13  }
  0x10   : > { %s1625_s22 = sshll.u32 (%p50_p4), %s2362_s14, 2  ;;  %s1624_s23 = sshll.u32 (%p50_p4), %s132_s21, 9 }
  0x11   : > { %s136_s24 = ssub.s32 (%p50_p4), 7, %s1625_s22  ;;  %s1947_s25 = sshll.u32 (%p50_p4), %s2362_s14, 4 }
  0x12   : > { %p137_p7 = scmp.lt.s32.totalorder (%p50_p4), %s136_s24, 4  ;;  %s2527_s28 = scalar_lea.vmem (%p50_p4), %s3561_s1, %s1947_s25  }
  0x13   : > { %s2531_s4 = scalar_lea.vmem (%p50_p4), [#allocation2], %s1624_s23  }
  0x14   : > { %s3594_s24 = smov (!%p137_p7, %s136_s24), 4 }
  0x15   : > { %s1626_s29 = sshll.u32 %s3594_s24, 7  ;;  %s2529_s30 = sshll.u32 %s3594_s24, 2 }
  0x16   : > { %p1630_p8 = scmp.eq.s32.totalorder %s1626_s29, 0 }
  0x17   : > { %p147_p9 = scmp.lt.u32.totalorder (!%p1630_p8), %s2529_s30, 8 }
  0x18   : > { %146 = sbr.rel (%p1630_p8) target bundleno = 196 (0xc4), region = 32 }
  0x1d   : > { %150 = sbr.rel (%p147_p9) target bundleno = 156 (0x9c), region = 36  ;;  %s2535_s5 = sand.u32 (!%p147_p9), 7, %s2529_s30  }
  0x1e   : > { %p229_p10 = scmp.eq.s32.totalorder (!%p147_p9), %s2535_s5, 0  ;;  %p1631_p11 = scmp.ne.s32.totalorder (!%p147_p9), %s2535_s5, 0 }
  0x22   : > { %232 = sbr.rel (%p1631_p11) target bundleno = 77 (0x4d), region = 51  ;;  %s2540_s6 = sshrl.u32 (!%p1631_p11), %s2529_s30, 3 }
  0x23   : > { %p1632_p12 = scmp.le.s32.totalorder (!%p1631_p11), %s2540_s6, 0 }
  0x27   : > { %1521 = sbr.rel (%p1632_p12) target bundleno = 77 (0x4d), region = 207  ;;  %s3565_s7 = smov (!%p1632_p12), %s2531_s4 }
  0x28   : > { %s3566_s8 = smov (!%p1632_p12), %s2527_s28  ;;  %s2549_s9 = smov (!%p1632_p12), 0  }
  0x29   : > { %s2551_s10 = smov (!%p1632_p12), 0  }
  0x2c LB: >> { %v243_v0 = vld [vmem:[%s2370_s8] sm:$0xff]  ;;  %v247_v2 = vld [vmem:[%s2370_s8 + $0x38] sm:$0xff]  ;;  %s307_s11 = sadd.s32 1, %s2374_s9  ;;  %v251_v4 = vld [vmem:[%s2370_s8 + $0x70] sm:$0xff]  ;;  %s237_s10 = sadd.s32 1, %s2378_s10   ;;  %s2378_s10 = sphi %s2551_s10, %s237_s10   ;;  %s2374_s9 = sphi %s2549_s9, %s3569_s9   ;;  %s2370_s8 = sphi %s3566_s8, %s3568_s8   ;;  %s2366_s7 = sphi %s3565_s7, %s3567_s7  }
  0x2d   : >> { %v245_v1 = vld [vmem:[%s2370_s8 + $0x1c] sm:$0xff]  ;;  %244 = vst [vmem:[%s2366_s7] sm:$0xff] %v243_v0  ;;  %v249_v3 = vld [vmem:[%s2370_s8 + $0x54] sm:$0xff]  ;;  %p308_p13 = scmp.ge.s32.totalorder %s307_s11, %s2540_s6  ;;  %v253_v5 = vld [vmem:[%s2370_s8 + $0x8c] sm:$0xff]  ;;  %p236_p0 = scmp.ge.s32.totalorder %s237_s10, %s2540_s6 }
  0x2e   : >> { %246 = vst [vmem:[%s2366_s7 + $0x10] sm:$0xff] %v245_v1  ;;  %v255_v6 = vld [vmem:[%s2370_s8 + $0xa8] sm:$0xff]  ;;  %v259_v8 = vld [vmem:[%s2370_s8 + $0xe0] sm:$0xff]  ;;  %v263_v10 = vld [vmem:[%s2370_s8 + $0x118] sm:$0xff] }
  0x2f   : >> { %248 = vst [vmem:[%s2366_s7 + $0x20] sm:$0xff] %v247_v2  ;;  %s3596_s11 = smov (%p308_p13, %s307_s11), 0  ;;  %v257_v7 = vld [vmem:[%s2370_s8 + $0xc4] sm:$0xff]  ;;  %v261_v9 = vld [vmem:[%s2370_s8 + $0xfc] sm:$0xff]  ;;  %v265_v11 = vld [vmem:[%s2370_s8 + $0x134] sm:$0xff] }
  0x30   : >> { %250 = vst [vmem:[%s2366_s7 + $0x30] sm:$0xff] %v249_v3  ;;  %s1633_s17 = sshll.u32 %s3596_s11, 3  ;;  %v267_v12 = vld [vmem:[%s2370_s8 + $0x150] sm:$0xff]  ;;  %v271_v14 = vld [vmem:[%s2370_s8 + $0x188] sm:$0xff]  ;;  %v275_v16 = vld [vmem:[%s2370_s8 + $0x1c0] sm:$0xff]  ;;  %s3569_s9 = smov %s3596_s11 }
  0x31   : >> { %252 = vst [vmem:[%s2366_s7 + $0x40] sm:$0xff] %v251_v4  ;;  %s2583_s18 = scalar_lea.vmem %s2527_s28, %s1633_s17   ;;  %s2586_s21 = scalar_lea.vmem %s2531_s4, %s1633_s17 [#allocation2]   ;;  %v269_v13 = vld [vmem:[%s2370_s8 + $0x16c] sm:$0xff]  ;;  %v273_v15 = vld [vmem:[%s2370_s8 + $0x1a4] sm:$0xff]  ;;  %v277_v17 = vld [vmem:[%s2370_s8 + $0x1dc] sm:$0xff] }
  0x32   : >> { %254 = vst [vmem:[%s2366_s7 + $0x50] sm:$0xff] %v253_v5  ;;  %v279_v18 = vld [vmem:[%s2370_s8 + $0x1f8] sm:$0xff]  ;;  %v283_v20 = vld [vmem:[%s2370_s8 + $0x230] sm:$0xff]  ;;  %v287_v22 = vld [vmem:[%s2370_s8 + $0x268] sm:$0xff] }
  0x33   : >> { %256 = vst [vmem:[%s2366_s7 + $0x60] sm:$0xff] %v255_v6  ;;  %v281_v19 = vld [vmem:[%s2370_s8 + $0x214] sm:$0xff]  ;;  %v285_v21 = vld [vmem:[%s2370_s8 + $0x24c] sm:$0xff]  ;;  %v289_v23 = vld [vmem:[%s2370_s8 + $0x284] sm:$0xff] }
  0x34   : >> { %258 = vst [vmem:[%s2366_s7 + $0x70] sm:$0xff] %v257_v7  ;;  %v291_v24 = vld [vmem:[%s2370_s8 + $0x2a0] sm:$0xff]  ;;  %v295_v26 = vld [vmem:[%s2370_s8 + $0x2d8] sm:$0xff]  ;;  %v299_v28 = vld [vmem:[%s2370_s8 + $0x310] sm:$0xff] }
  0x35   : >> { %260 = vst [vmem:[%s2366_s7 + $0x80] sm:$0xff] %v259_v8  ;;  %v293_v25 = vld [vmem:[%s2370_s8 + $0x2bc] sm:$0xff]  ;;  %v297_v27 = vld [vmem:[%s2370_s8 + $0x2f4] sm:$0xff]  ;;  %v301_v29 = vld [vmem:[%s2370_s8 + $0x32c] sm:$0xff] }
  0x36   : >> { %262 = vst [vmem:[%s2366_s7 + $0x90] sm:$0xff] %v261_v9  ;;  %v303_v30 = vld [vmem:[%s2370_s8 + $0x348] sm:$0xff] }
  0x37   : >> { %264 = vst [vmem:[%s2366_s7 + $0xa0] sm:$0xff] %v263_v10  ;;  %v305_v31 = vld [vmem:[%s2370_s8 + $0x364] sm:$0xff]  ;;  %s3568_s8 = smov %s2583_s18 }
  0x38   : >> { %266 = vst [vmem:[%s2366_s7 + $0xb0] sm:$0xff] %v265_v11 }
  0x39   : >> { %268 = vst [vmem:[%s2366_s7 + $0xc0] sm:$0xff] %v267_v12 }
  0x3a   : >> { %270 = vst [vmem:[%s2366_s7 + $0xd0] sm:$0xff] %v269_v13 }
  0x3b   : >> { %272 = vst [vmem:[%s2366_s7 + $0xe0] sm:$0xff] %v271_v14 }
  0x3c   : >> { %274 = vst [vmem:[%s2366_s7 + $0xf0] sm:$0xff] %v273_v15 }
  0x3d   : >> { %276 = vst [vmem:[%s2366_s7 + $0x100] sm:$0xff] %v275_v16 }
  0x3e   : >> { %278 = vst [vmem:[%s2366_s7 + $0x110] sm:$0xff] %v277_v17 }
  0x3f   : >> { %280 = vst [vmem:[%s2366_s7 + $0x120] sm:$0xff] %v279_v18 }
  0x40   : >> { %282 = vst [vmem:[%s2366_s7 + $0x130] sm:$0xff] %v281_v19 }
  0x41   : >> { %284 = vst [vmem:[%s2366_s7 + $0x140] sm:$0xff] %v283_v20 }
  0x42   : >> { %286 = vst [vmem:[%s2366_s7 + $0x150] sm:$0xff] %v285_v21 }
  0x43   : >> { %288 = vst [vmem:[%s2366_s7 + $0x160] sm:$0xff] %v287_v22 }
  0x44   : >> { %290 = vst [vmem:[%s2366_s7 + $0x170] sm:$0xff] %v289_v23 }
  0x45   : >> { %292 = vst [vmem:[%s2366_s7 + $0x180] sm:$0xff] %v291_v24 }
  0x46   : >> { %294 = vst [vmem:[%s2366_s7 + $0x190] sm:$0xff] %v293_v25 }
  0x47   : >> { %296 = vst [vmem:[%s2366_s7 + $0x1a0] sm:$0xff] %v295_v26 }
  0x48   : >> { %298 = vst [vmem:[%s2366_s7 + $0x1b0] sm:$0xff] %v297_v27  ;;  %239 = sbr.rel (!%p236_p0) target bundleno = 44 (0x2c), region = 213 }
  0x49   : >> { %300 = vst [vmem:[%s2366_s7 + $0x1c0] sm:$0xff] %v299_v28 }
  0x4a   : >> { %302 = vst [vmem:[%s2366_s7 + $0x1d0] sm:$0xff] %v301_v29 }
  0x4b   : >> { %304 = vst [vmem:[%s2366_s7 + $0x1e0] sm:$0xff] %v303_v30 }
  0x4c   : >> { %306 = vst [vmem:[%s2366_s7 + $0x1f0] sm:$0xff] %v305_v31  ;;  %s3567_s7 = smov %s2586_s21 }
  0x4d PF: > { %316 = sbr.rel (%p229_p10) target bundleno = 156 (0x9c), region = 62  ;;  %s318_s22 = ssub.s32 (!%p229_p10), %s2529_s30, %s2535_s5 }
  0x4e   : > { %s2655_s23 = sshrl.u32 (!%p229_p10), %s2529_s30, 3  ;;  %s2658_s24 = scalar_lea.vmem (!%p229_p10), %s2527_s28, %s318_s22 }
  0x4f   : > { %s2661_s25 = scalar_lea.vmem (!%p229_p10), %s2531_s4, %s318_s22 [#allocation2]  ;;  %p1635_p1 = scmp.le.s32.totalorder (!%p229_p10), %s2655_s23, 0 }
  0x52   : > { %1535 = sbr.rel (%p1635_p1) target bundleno = 120 (0x78), region = 218  ;;  %s3570_s26 = smov (!%p1635_p1), %s2531_s4 }
  0x53   : > { %s3571_s27 = smov (!%p1635_p1), %s2527_s28  ;;  %s2670_s29 = smov (!%p1635_p1), 0  }
  0x54   : > { %s2672_s6 = smov (!%p1635_p1), 0  }
  0x57 LB: >> { %v332_v32 = vld [vmem:[%s2386_s27] sm:$0xff]  ;;  %v336_v34 = vld [vmem:[%s2386_s27 + $0x38] sm:$0xff]  ;;  %s396_s7 = sadd.s32 1, %s2390_s29  ;;  %v340_v36 = vld [vmem:[%s2386_s27 + $0x70] sm:$0xff]  ;;  %s326_s6 = sadd.s32 1, %s2394_s6   ;;  %s2394_s6 = sphi %s2672_s6, %s326_s6   ;;  %s2390_s29 = sphi %s2670_s29, %s3574_s29   ;;  %s2386_s27 = sphi %s3571_s27, %s3573_s27   ;;  %s2382_s26 = sphi %s3570_s26, %s3572_s26  }
  0x58   : >> { %v334_v33 = vld [vmem:[%s2386_s27 + $0x1c] sm:$0xff]  ;;  %333 = vst [vmem:[%s2382_s26] sm:$0xff] %v332_v32  ;;  %v338_v35 = vld [vmem:[%s2386_s27 + $0x54] sm:$0xff]  ;;  %p397_p2 = scmp.ge.s32.totalorder %s396_s7, %s2655_s23  ;;  %v342_v37 = vld [vmem:[%s2386_s27 + $0x8c] sm:$0xff]  ;;  %p325_p3 = scmp.ge.s32.totalorder %s326_s6, %s2655_s23 }
  0x59   : >> { %335 = vst [vmem:[%s2382_s26 + $0x10] sm:$0xff] %v334_v33  ;;  %v344_v38 = vld [vmem:[%s2386_s27 + $0xa8] sm:$0xff]  ;;  %v348_v40 = vld [vmem:[%s2386_s27 + $0xe0] sm:$0xff]  ;;  %v352_v42 = vld [vmem:[%s2386_s27 + $0x118] sm:$0xff] }
  0x5a   : >> { %337 = vst [vmem:[%s2382_s26 + $0x20] sm:$0xff] %v336_v34  ;;  %s3598_s7 = smov (%p397_p2, %s396_s7), 0  ;;  %v346_v39 = vld [vmem:[%s2386_s27 + $0xc4] sm:$0xff]  ;;  %v350_v41 = vld [vmem:[%s2386_s27 + $0xfc] sm:$0xff]  ;;  %v354_v43 = vld [vmem:[%s2386_s27 + $0x134] sm:$0xff] }
  0x5b   : >> { %339 = vst [vmem:[%s2382_s26 + $0x30] sm:$0xff] %v338_v35  ;;  %s1636_s8 = sshll.u32 %s3598_s7, 3  ;;  %v356_v44 = vld [vmem:[%s2386_s27 + $0x150] sm:$0xff]  ;;  %v360_v46 = vld [vmem:[%s2386_s27 + $0x188] sm:$0xff]  ;;  %v364_v48 = vld [vmem:[%s2386_s27 + $0x1c0] sm:$0xff]  ;;  %s3574_s29 = smov %s3598_s7 }
  0x5c   : >> { %341 = vst [vmem:[%s2382_s26 + $0x40] sm:$0xff] %v340_v36  ;;  %s2704_s9 = scalar_lea.vmem %s2527_s28, %s1636_s8   ;;  %s2707_s10 = scalar_lea.vmem %s2531_s4, %s1636_s8 [#allocation2]   ;;  %v358_v45 = vld [vmem:[%s2386_s27 + $0x16c] sm:$0xff]  ;;  %v362_v47 = vld [vmem:[%s2386_s27 + $0x1a4] sm:$0xff]  ;;  %v366_v49 = vld [vmem:[%s2386_s27 + $0x1dc] sm:$0xff] }
  0x5d   : >> { %343 = vst [vmem:[%s2382_s26 + $0x50] sm:$0xff] %v342_v37  ;;  %v368_v50 = vld [vmem:[%s2386_s27 + $0x1f8] sm:$0xff]  ;;  %v372_v52 = vld [vmem:[%s2386_s27 + $0x230] sm:$0xff]  ;;  %v376_v54 = vld [vmem:[%s2386_s27 + $0x268] sm:$0xff] }
  0x5e   : >> { %345 = vst [vmem:[%s2382_s26 + $0x60] sm:$0xff] %v344_v38  ;;  %v370_v51 = vld [vmem:[%s2386_s27 + $0x214] sm:$0xff]  ;;  %v374_v53 = vld [vmem:[%s2386_s27 + $0x24c] sm:$0xff]  ;;  %v378_v55 = vld [vmem:[%s2386_s27 + $0x284] sm:$0xff] }
  0x5f   : >> { %347 = vst [vmem:[%s2382_s26 + $0x70] sm:$0xff] %v346_v39  ;;  %v380_v56 = vld [vmem:[%s2386_s27 + $0x2a0] sm:$0xff]  ;;  %v384_v58 = vld [vmem:[%s2386_s27 + $0x2d8] sm:$0xff]  ;;  %v388_v60 = vld [vmem:[%s2386_s27 + $0x310] sm:$0xff] }
  0x60   : >> { %349 = vst [vmem:[%s2382_s26 + $0x80] sm:$0xff] %v348_v40  ;;  %v382_v57 = vld [vmem:[%s2386_s27 + $0x2bc] sm:$0xff]  ;;  %v386_v59 = vld [vmem:[%s2386_s27 + $0x2f4] sm:$0xff]  ;;  %v390_v61 = vld [vmem:[%s2386_s27 + $0x32c] sm:$0xff] }
  0x61   : >> { %351 = vst [vmem:[%s2382_s26 + $0x90] sm:$0xff] %v350_v41  ;;  %v392_v62 = vld [vmem:[%s2386_s27 + $0x348] sm:$0xff] }
  0x62   : >> { %353 = vst [vmem:[%s2382_s26 + $0xa0] sm:$0xff] %v352_v42  ;;  %v394_v63 = vld [vmem:[%s2386_s27 + $0x364] sm:$0xff]  ;;  %s3573_s27 = smov %s2704_s9 }
  0x63   : >> { %355 = vst [vmem:[%s2382_s26 + $0xb0] sm:$0xff] %v354_v43 }
  0x64   : >> { %357 = vst [vmem:[%s2382_s26 + $0xc0] sm:$0xff] %v356_v44 }
  0x65   : >> { %359 = vst [vmem:[%s2382_s26 + $0xd0] sm:$0xff] %v358_v45 }
  0x66   : >> { %361 = vst [vmem:[%s2382_s26 + $0xe0] sm:$0xff] %v360_v46 }
  0x67   : >> { %363 = vst [vmem:[%s2382_s26 + $0xf0] sm:$0xff] %v362_v47 }
  0x68   : >> { %365 = vst [vmem:[%s2382_s26 + $0x100] sm:$0xff] %v364_v48 }
  0x69   : >> { %367 = vst [vmem:[%s2382_s26 + $0x110] sm:$0xff] %v366_v49 }
  0x6a   : >> { %369 = vst [vmem:[%s2382_s26 + $0x120] sm:$0xff] %v368_v50 }
  0x6b   : >> { %371 = vst [vmem:[%s2382_s26 + $0x130] sm:$0xff] %v370_v51 }
  0x6c   : >> { %373 = vst [vmem:[%s2382_s26 + $0x140] sm:$0xff] %v372_v52 }
  0x6d   : >> { %375 = vst [vmem:[%s2382_s26 + $0x150] sm:$0xff] %v374_v53 }
  0x6e   : >> { %377 = vst [vmem:[%s2382_s26 + $0x160] sm:$0xff] %v376_v54 }
  0x6f   : >> { %379 = vst [vmem:[%s2382_s26 + $0x170] sm:$0xff] %v378_v55 }
  0x70   : >> { %381 = vst [vmem:[%s2382_s26 + $0x180] sm:$0xff] %v380_v56 }
  0x71   : >> { %383 = vst [vmem:[%s2382_s26 + $0x190] sm:$0xff] %v382_v57 }
  0x72   : >> { %385 = vst [vmem:[%s2382_s26 + $0x1a0] sm:$0xff] %v384_v58 }
  0x73   : >> { %387 = vst [vmem:[%s2382_s26 + $0x1b0] sm:$0xff] %v386_v59  ;;  %328 = sbr.rel (!%p325_p3) target bundleno = 87 (0x57), region = 224 }
  0x74   : >> { %389 = vst [vmem:[%s2382_s26 + $0x1c0] sm:$0xff] %v388_v60 }
  0x75   : >> { %391 = vst [vmem:[%s2382_s26 + $0x1d0] sm:$0xff] %v390_v61 }
  0x76   : >> { %393 = vst [vmem:[%s2382_s26 + $0x1e0] sm:$0xff] %v392_v62 }
  0x77   : >> { %395 = vst [vmem:[%s2382_s26 + $0x1f0] sm:$0xff] %v394_v63  ;;  %s3572_s26 = smov %s2707_s10 }
  0x78 PF: > { %s2460_s11 = smov 1  }
  0x79   : > { %s403_s17 = sshll.u32 %s2460_s11, %s2535_s5 }
  0x7a   : > { %s2772_s18 = sadd.s32 4294967295, %s403_s17 }
  0x7b   : > { %v413_v0 = vld [vmem:[%s2658_s24] sm:%s2772_s18]  ;;  %v417_v2 = vld [vmem:[%s2658_s24 + $0x38] sm:%s2772_s18] }
  0x7c   : > { %v415_v1 = vld [vmem:[%s2658_s24 + $0x1c] sm:%s2772_s18]  ;;  %414 = vst [vmem:[%s2661_s25] sm:%s2772_s18] %v413_v0 }
  0x7d   : > { %416 = vst [vmem:[%s2661_s25 + $0x10] sm:%s2772_s18] %v415_v1  ;;  %v419_v3 = vld [vmem:[%s2658_s24 + $0x54] sm:%s2772_s18] }
  0x7e   : > { %418 = vst [vmem:[%s2661_s25 + $0x20] sm:%s2772_s18] %v417_v2  ;;  %v421_v4 = vld [vmem:[%s2658_s24 + $0x70] sm:%s2772_s18] }
  0x7f   : > { %420 = vst [vmem:[%s2661_s25 + $0x30] sm:%s2772_s18] %v419_v3  ;;  %v423_v5 = vld [vmem:[%s2658_s24 + $0x8c] sm:%s2772_s18] }
  0x80   : > { %422 = vst [vmem:[%s2661_s25 + $0x40] sm:%s2772_s18] %v421_v4  ;;  %v425_v6 = vld [vmem:[%s2658_s24 + $0xa8] sm:%s2772_s18] }
  0x81   : > { %424 = vst [vmem:[%s2661_s25 + $0x50] sm:%s2772_s18] %v423_v5  ;;  %v427_v7 = vld [vmem:[%s2658_s24 + $0xc4] sm:%s2772_s18] }
  0x82   : > { %426 = vst [vmem:[%s2661_s25 + $0x60] sm:%s2772_s18] %v425_v6  ;;  %v429_v8 = vld [vmem:[%s2658_s24 + $0xe0] sm:%s2772_s18] }
  0x83   : > { %428 = vst [vmem:[%s2661_s25 + $0x70] sm:%s2772_s18] %v427_v7  ;;  %v431_v9 = vld [vmem:[%s2658_s24 + $0xfc] sm:%s2772_s18] }
  0x84   : > { %430 = vst [vmem:[%s2661_s25 + $0x80] sm:%s2772_s18] %v429_v8  ;;  %v433_v10 = vld [vmem:[%s2658_s24 + $0x118] sm:%s2772_s18] }
  0x85   : > { %432 = vst [vmem:[%s2661_s25 + $0x90] sm:%s2772_s18] %v431_v9  ;;  %v435_v11 = vld [vmem:[%s2658_s24 + $0x134] sm:%s2772_s18] }
  0x86   : > { %434 = vst [vmem:[%s2661_s25 + $0xa0] sm:%s2772_s18] %v433_v10  ;;  %v437_v12 = vld [vmem:[%s2658_s24 + $0x150] sm:%s2772_s18] }
  0x87   : > { %436 = vst [vmem:[%s2661_s25 + $0xb0] sm:%s2772_s18] %v435_v11  ;;  %v439_v13 = vld [vmem:[%s2658_s24 + $0x16c] sm:%s2772_s18] }
  0x88   : > { %438 = vst [vmem:[%s2661_s25 + $0xc0] sm:%s2772_s18] %v437_v12  ;;  %v441_v14 = vld [vmem:[%s2658_s24 + $0x188] sm:%s2772_s18] }
  0x89   : > { %440 = vst [vmem:[%s2661_s25 + $0xd0] sm:%s2772_s18] %v439_v13  ;;  %v443_v15 = vld [vmem:[%s2658_s24 + $0x1a4] sm:%s2772_s18] }
  0x8a   : > { %442 = vst [vmem:[%s2661_s25 + $0xe0] sm:%s2772_s18] %v441_v14  ;;  %v445_v16 = vld [vmem:[%s2658_s24 + $0x1c0] sm:%s2772_s18] }
  0x8b   : > { %444 = vst [vmem:[%s2661_s25 + $0xf0] sm:%s2772_s18] %v443_v15  ;;  %v447_v17 = vld [vmem:[%s2658_s24 + $0x1dc] sm:%s2772_s18] }
  0x8c   : > { %446 = vst [vmem:[%s2661_s25 + $0x100] sm:%s2772_s18] %v445_v16  ;;  %v449_v18 = vld [vmem:[%s2658_s24 + $0x1f8] sm:%s2772_s18] }
  0x8d   : > { %448 = vst [vmem:[%s2661_s25 + $0x110] sm:%s2772_s18] %v447_v17  ;;  %v451_v19 = vld [vmem:[%s2658_s24 + $0x214] sm:%s2772_s18] }
  0x8e   : > { %450 = vst [vmem:[%s2661_s25 + $0x120] sm:%s2772_s18] %v449_v18  ;;  %v453_v20 = vld [vmem:[%s2658_s24 + $0x230] sm:%s2772_s18] }
  0x8f   : > { %452 = vst [vmem:[%s2661_s25 + $0x130] sm:%s2772_s18] %v451_v19  ;;  %v455_v21 = vld [vmem:[%s2658_s24 + $0x24c] sm:%s2772_s18] }
  0x90   : > { %454 = vst [vmem:[%s2661_s25 + $0x140] sm:%s2772_s18] %v453_v20  ;;  %v457_v22 = vld [vmem:[%s2658_s24 + $0x268] sm:%s2772_s18] }
  0x91   : > { %456 = vst [vmem:[%s2661_s25 + $0x150] sm:%s2772_s18] %v455_v21  ;;  %v459_v23 = vld [vmem:[%s2658_s24 + $0x284] sm:%s2772_s18] }
  0x92   : > { %458 = vst [vmem:[%s2661_s25 + $0x160] sm:%s2772_s18] %v457_v22  ;;  %v461_v24 = vld [vmem:[%s2658_s24 + $0x2a0] sm:%s2772_s18] }
  0x93   : > { %460 = vst [vmem:[%s2661_s25 + $0x170] sm:%s2772_s18] %v459_v23  ;;  %v463_v25 = vld [vmem:[%s2658_s24 + $0x2bc] sm:%s2772_s18] }
  0x94   : > { %462 = vst [vmem:[%s2661_s25 + $0x180] sm:%s2772_s18] %v461_v24  ;;  %v465_v26 = vld [vmem:[%s2658_s24 + $0x2d8] sm:%s2772_s18] }
  0x95   : > { %464 = vst [vmem:[%s2661_s25 + $0x190] sm:%s2772_s18] %v463_v25  ;;  %v467_v27 = vld [vmem:[%s2658_s24 + $0x2f4] sm:%s2772_s18] }
  0x96   : > { %466 = vst [vmem:[%s2661_s25 + $0x1a0] sm:%s2772_s18] %v465_v26  ;;  %v469_v28 = vld [vmem:[%s2658_s24 + $0x310] sm:%s2772_s18] }
  0x97   : > { %468 = vst [vmem:[%s2661_s25 + $0x1b0] sm:%s2772_s18] %v467_v27  ;;  %v471_v29 = vld [vmem:[%s2658_s24 + $0x32c] sm:%s2772_s18] }
  0x98   : > { %470 = vst [vmem:[%s2661_s25 + $0x1c0] sm:%s2772_s18] %v469_v28  ;;  %v473_v30 = vld [vmem:[%s2658_s24 + $0x348] sm:%s2772_s18] }
  0x99   : > { %472 = vst [vmem:[%s2661_s25 + $0x1d0] sm:%s2772_s18] %v471_v29  ;;  %v475_v31 = vld [vmem:[%s2658_s24 + $0x364] sm:%s2772_s18] }
  0x9a   : > { %474 = vst [vmem:[%s2661_s25 + $0x1e0] sm:%s2772_s18] %v473_v30 }
  0x9b   : > { %476 = vst [vmem:[%s2661_s25 + $0x1f0] sm:%s2772_s18] %v475_v31 }
  0x9c PF: > { %p1639_p4 = scmp.ge.u32.totalorder %s2529_s30, 8 }
  0x9d   : > { %s2461_s5 = smov (!%p1639_p4), 1  }
  0x9e   : > { %153 = sbr.rel (%p1639_p4) target bundleno = 196 (0xc4), region = 40  ;;  %s154_s21 = sshll.u32 (!%p1639_p4), %s2461_s5, %s2529_s30 }
  0x9f   : > { %s2904_s22 = sadd.s32 (!%p1639_p4), 4294967295, %s154_s21 }
  0xa3   : > { %v164_v32 = vld [vmem:[%s2527_s28] sm:%s2904_s22]  ;;  %v168_v34 = vld [vmem:[%s2527_s28 + $0x38] sm:%s2904_s22] }
  0xa4   : > { %v166_v33 = vld [vmem:[%s2527_s28 + $0x1c] sm:%s2904_s22]  ;;  %165 = vst [vmem:[%s2531_s4] sm:%s2904_s22] %v164_v32 }
  0xa5   : > { %167 = vst [vmem:[%s2531_s4 + $0x10] sm:%s2904_s22] %v166_v33  ;;  %v170_v35 = vld [vmem:[%s2527_s28 + $0x54] sm:%s2904_s22] }
  0xa6   : > { %169 = vst [vmem:[%s2531_s4 + $0x20] sm:%s2904_s22] %v168_v34  ;;  %v172_v36 = vld [vmem:[%s2527_s28 + $0x70] sm:%s2904_s22] }
  0xa7   : > { %171 = vst [vmem:[%s2531_s4 + $0x30] sm:%s2904_s22] %v170_v35  ;;  %v174_v37 = vld [vmem:[%s2527_s28 + $0x8c] sm:%s2904_s22] }
  0xa8   : > { %173 = vst [vmem:[%s2531_s4 + $0x40] sm:%s2904_s22] %v172_v36  ;;  %v176_v38 = vld [vmem:[%s2527_s28 + $0xa8] sm:%s2904_s22] }
  0xa9   : > { %175 = vst [vmem:[%s2531_s4 + $0x50] sm:%s2904_s22] %v174_v37  ;;  %v178_v39 = vld [vmem:[%s2527_s28 + $0xc4] sm:%s2904_s22] }
  0xaa   : > { %177 = vst [vmem:[%s2531_s4 + $0x60] sm:%s2904_s22] %v176_v38  ;;  %v180_v40 = vld [vmem:[%s2527_s28 + $0xe0] sm:%s2904_s22] }
  0xab   : > { %179 = vst [vmem:[%s2531_s4 + $0x70] sm:%s2904_s22] %v178_v39  ;;  %v182_v41 = vld [vmem:[%s2527_s28 + $0xfc] sm:%s2904_s22] }
  0xac   : > { %181 = vst [vmem:[%s2531_s4 + $0x80] sm:%s2904_s22] %v180_v40  ;;  %v184_v42 = vld [vmem:[%s2527_s28 + $0x118] sm:%s2904_s22] }
  0xad   : > { %183 = vst [vmem:[%s2531_s4 + $0x90] sm:%s2904_s22] %v182_v41  ;;  %v186_v43 = vld [vmem:[%s2527_s28 + $0x134] sm:%s2904_s22] }
  0xae   : > { %185 = vst [vmem:[%s2531_s4 + $0xa0] sm:%s2904_s22] %v184_v42  ;;  %v188_v44 = vld [vmem:[%s2527_s28 + $0x150] sm:%s2904_s22] }
  0xaf   : > { %187 = vst [vmem:[%s2531_s4 + $0xb0] sm:%s2904_s22] %v186_v43  ;;  %v190_v45 = vld [vmem:[%s2527_s28 + $0x16c] sm:%s2904_s22] }
  0xb0   : > { %189 = vst [vmem:[%s2531_s4 + $0xc0] sm:%s2904_s22] %v188_v44  ;;  %v192_v46 = vld [vmem:[%s2527_s28 + $0x188] sm:%s2904_s22] }
  0xb1   : > { %191 = vst [vmem:[%s2531_s4 + $0xd0] sm:%s2904_s22] %v190_v45  ;;  %v194_v47 = vld [vmem:[%s2527_s28 + $0x1a4] sm:%s2904_s22] }
  0xb2   : > { %193 = vst [vmem:[%s2531_s4 + $0xe0] sm:%s2904_s22] %v192_v46  ;;  %v196_v48 = vld [vmem:[%s2527_s28 + $0x1c0] sm:%s2904_s22] }
  0xb3   : > { %195 = vst [vmem:[%s2531_s4 + $0xf0] sm:%s2904_s22] %v194_v47  ;;  %v198_v49 = vld [vmem:[%s2527_s28 + $0x1dc] sm:%s2904_s22] }
  0xb4   : > { %197 = vst [vmem:[%s2531_s4 + $0x100] sm:%s2904_s22] %v196_v48  ;;  %v200_v50 = vld [vmem:[%s2527_s28 + $0x1f8] sm:%s2904_s22] }
  0xb5   : > { %199 = vst [vmem:[%s2531_s4 + $0x110] sm:%s2904_s22] %v198_v49  ;;  %v202_v51 = vld [vmem:[%s2527_s28 + $0x214] sm:%s2904_s22] }
  0xb6   : > { %201 = vst [vmem:[%s2531_s4 + $0x120] sm:%s2904_s22] %v200_v50  ;;  %v204_v52 = vld [vmem:[%s2527_s28 + $0x230] sm:%s2904_s22] }
  0xb7   : > { %203 = vst [vmem:[%s2531_s4 + $0x130] sm:%s2904_s22] %v202_v51  ;;  %v206_v53 = vld [vmem:[%s2527_s28 + $0x24c] sm:%s2904_s22] }
  0xb8   : > { %205 = vst [vmem:[%s2531_s4 + $0x140] sm:%s2904_s22] %v204_v52  ;;  %v208_v54 = vld [vmem:[%s2527_s28 + $0x268] sm:%s2904_s22] }
  0xb9   : > { %207 = vst [vmem:[%s2531_s4 + $0x150] sm:%s2904_s22] %v206_v53  ;;  %v210_v55 = vld [vmem:[%s2527_s28 + $0x284] sm:%s2904_s22] }
  0xba   : > { %209 = vst [vmem:[%s2531_s4 + $0x160] sm:%s2904_s22] %v208_v54  ;;  %v212_v56 = vld [vmem:[%s2527_s28 + $0x2a0] sm:%s2904_s22] }
  0xbb   : > { %211 = vst [vmem:[%s2531_s4 + $0x170] sm:%s2904_s22] %v210_v55  ;;  %v214_v57 = vld [vmem:[%s2527_s28 + $0x2bc] sm:%s2904_s22] }
  0xbc   : > { %213 = vst [vmem:[%s2531_s4 + $0x180] sm:%s2904_s22] %v212_v56  ;;  %v216_v58 = vld [vmem:[%s2527_s28 + $0x2d8] sm:%s2904_s22] }
  0xbd   : > { %215 = vst [vmem:[%s2531_s4 + $0x190] sm:%s2904_s22] %v214_v57  ;;  %v218_v59 = vld [vmem:[%s2527_s28 + $0x2f4] sm:%s2904_s22] }
  0xbe   : > { %217 = vst [vmem:[%s2531_s4 + $0x1a0] sm:%s2904_s22] %v216_v58  ;;  %v220_v60 = vld [vmem:[%s2527_s28 + $0x310] sm:%s2904_s22] }
  0xbf   : > { %219 = vst [vmem:[%s2531_s4 + $0x1b0] sm:%s2904_s22] %v218_v59  ;;  %v222_v61 = vld [vmem:[%s2527_s28 + $0x32c] sm:%s2904_s22] }
  0xc0   : > { %221 = vst [vmem:[%s2531_s4 + $0x1c0] sm:%s2904_s22] %v220_v60  ;;  %v224_v62 = vld [vmem:[%s2527_s28 + $0x348] sm:%s2904_s22] }
  0xc1   : > { %223 = vst [vmem:[%s2531_s4 + $0x1d0] sm:%s2904_s22] %v222_v61  ;;  %v226_v63 = vld [vmem:[%s2527_s28 + $0x364] sm:%s2904_s22] }
  0xc2   : > { %225 = vst [vmem:[%s2531_s4 + $0x1e0] sm:%s2904_s22] %v224_v62 }
  0xc3   : > { %227 = vst [vmem:[%s2531_s4 + $0x1f0] sm:%s2904_s22] %v226_v63 }
  0xc4 PF: > { %p1641_p6 = scmp.ge.s32.totalorder %s2362_s14, 1  ;;  %p479_p7 = scmp.lt.s32.totalorder %s2362_s14, 3 }
  0xc6   : > { %p480_p8 = pnand %p1641_p6, %p479_p7 }
  0xc7   : > { %s486_s30 = sand.u32 (!%p480_p8), 1, %s2354_s12  }
  0xc8   : > { %483 = sbr.rel (%p480_p8) target bundleno = 591 (0x24f), region = 80  ;;  %s1642_s23 = sshll.u32 (!%p480_p8), %s486_s30, 9 }
  0xc9   : > { %s3039_s24 = scalar_lea.vmem (!%p480_p8), [#allocation2], %s1642_s23 }
  0xcd   : > { %v1774_v0 = vld [vmem:[%s3039_s24 + $0xe0] sm:$0xf]  ;;  %v1982_v1 = vld [vmem:[%s3039_s24 + $0xec] sm:$0xf0]  ;;  %v1980_v5 = vld [vmem:[%s3039_s24 + $0xe4] sm:$0xf] }
  0xce   : > { %v1902_v2 = vld [vmem:[%s3039_s24 + $0x1e0] sm:$0xf]  ;;  %v1775_v3 = vor.u32 %v1982_v1, %v1774_v0  ;;  %v2014_v4 = vld [vmem:[%s3039_s24 + $0x1ec] sm:$0xf0]  ;;  %v1776_v6 = vld [vmem:[%s3039_s24 + $0xf0] sm:$0xf0] }
  0xcf   : > { %v1903_v7 = vor.u32 %v2014_v4, %v1902_v2  ;;  %v1779_v8 = vor.u32 %v1980_v5, %v1776_v6  ;;  %v2012_v9 = vld [vmem:[%s3039_s24 + $0x1e4] sm:$0xf]  ;;  %v1904_v10 = vld [vmem:[%s3039_s24 + $0x1f0] sm:$0xf0]  ;;  %v1758_v11 = vld [vmem:[%s3039_s24 + $0xc0] sm:$0xf] }
  0xd0   : > { %950 = vmatpush.bf16.msra.mxu0 %v1775_v3  ;;  %v1907_v12 = vor.u32 %v2012_v9, %v1904_v10  ;;  %v1978_v13 = vld [vmem:[%s3039_s24 + $0xcc] sm:$0xf0]  ;;  %v1886_v14 = vld [vmem:[%s3039_s24 + $0x1c0] sm:$0xf]  ;;  %v1976_v18 = vld [vmem:[%s3039_s24 + $0xc4] sm:$0xf] }
  0xd1   : > { %v2010_v15 = vld [vmem:[%s3039_s24 + $0x1cc] sm:$0xf0]  ;;  %969 = vmatpush.bf16.msra.mxu1 %v1903_v7  ;;  %988 = vmatpush.bf16.msra.mxu2 %v1779_v8  ;;  %v1759_v16 = vor.u32 %v1978_v13, %v1758_v11  ;;  %v1760_v19 = vld [vmem:[%s3039_s24 + $0xd0] sm:$0xf0]  ;;  %v2008_v20 = vld [vmem:[%s3039_s24 + $0x1c4] sm:$0xf] }
  0xd2   : > { %v1887_v17 = vor.u32 %v2010_v15, %v1886_v14  ;;  %1007 = vmatpush.bf16.msra.mxu3 %v1907_v12  ;;  %v1763_v21 = vor.u32 %v1976_v18, %v1760_v19  ;;  %v1888_v22 = vld [vmem:[%s3039_s24 + $0x1d0] sm:$0xf0]  ;;  %v1742_v23 = vld [vmem:[%s3039_s24 + $0xa0] sm:$0xf]  ;;  %v1974_v24 = vld [vmem:[%s3039_s24 + $0xac] sm:$0xf0] }
  0xd3   : > { %v1891_v25 = vor.u32 %v2008_v20, %v1888_v22  ;;  %v1870_v26 = vld [vmem:[%s3039_s24 + $0x1a0] sm:$0xf]  ;;  %v2006_v27 = vld [vmem:[%s3039_s24 + $0x1ac] sm:$0xf0]  ;;  %v1972_v28 = vld [vmem:[%s3039_s24 + $0xa4] sm:$0xf]  ;;  %v1743_v29 = vor.u32 %v1974_v24, %v1742_v23 }
  0xd4   : > { %951 = vmatpush.bf16.msra.mxu0 %v1759_v16  ;;  %v1744_v30 = vld [vmem:[%s3039_s24 + $0xb0] sm:$0xf0]  ;;  %v2004_v31 = vld [vmem:[%s3039_s24 + $0x1a4] sm:$0xf]  ;;  %v1871_v33 = vor.u32 %v2006_v27, %v1870_v26  ;;  %v1726_v35 = vld [vmem:[%s3039_s24 + $0x80] sm:$0xf] }
  0xd5   : > { %v1872_v32 = vld [vmem:[%s3039_s24 + $0x1b0] sm:$0xf0]  ;;  %970 = vmatpush.bf16.msra.mxu1 %v1887_v17  ;;  %989 = vmatpush.bf16.msra.mxu2 %v1763_v21  ;;  %v1747_v34 = vor.u32 %v1972_v28, %v1744_v30  ;;  %v1970_v36 = vld [vmem:[%s3039_s24 + $0x8c] sm:$0xf0]  ;;  %v1854_v37 = vld [vmem:[%s3039_s24 + $0x180] sm:$0xf] }
  0xd6   : > { %1008 = vmatpush.bf16.msra.mxu3 %v1891_v25  ;;  %v1875_v38 = vor.u32 %v2004_v31, %v1872_v32  ;;  %v2002_v39 = vld [vmem:[%s3039_s24 + $0x18c] sm:$0xf0]  ;;  %v1968_v40 = vld [vmem:[%s3039_s24 + $0x84] sm:$0xf]  ;;  %v1728_v41 = vld [vmem:[%s3039_s24 + $0x90] sm:$0xf0]  ;;  %v1727_v44 = vor.u32 %v1970_v36, %v1726_v35 }
  0xd7   : > { %v2000_v42 = vld [vmem:[%s3039_s24 + $0x184] sm:$0xf]  ;;  %v1856_v43 = vld [vmem:[%s3039_s24 + $0x190] sm:$0xf0]  ;;  %v1855_v45 = vor.u32 %v2002_v39, %v1854_v37  ;;  %v1731_v46 = vor.u32 %v1968_v40, %v1728_v41  ;;  %v1710_v47 = vld [vmem:[%s3039_s24 + $0x60] sm:$0xf] }
  0xd8   : > { %952 = vmatpush.bf16.msra.mxu0 %v1743_v29  ;;  %v1966_v48 = vld [vmem:[%s3039_s24 + $0x6c] sm:$0xf0]  ;;  %v1838_v49 = vld [vmem:[%s3039_s24 + $0x160] sm:$0xf]  ;;  %v1859_v50 = vor.u32 %v2000_v42, %v1856_v43  ;;  %v1964_v52 = vld [vmem:[%s3039_s24 + $0x64] sm:$0xf] }
  0xd9   : > { %971 = vmatpush.bf16.msra.mxu1 %v1871_v33  ;;  %990 = vmatpush.bf16.msra.mxu2 %v1747_v34  ;;  %v1998_v51 = vld [vmem:[%s3039_s24 + $0x16c] sm:$0xf0]  ;;  %v1712_v53 = vld [vmem:[%s3039_s24 + $0x70] sm:$0xf0]  ;;  %v1996_v54 = vld [vmem:[%s3039_s24 + $0x164] sm:$0xf]  ;;  %v1711_v56 = vor.u32 %v1966_v48, %v1710_v47 }
  0xda   : > { %1009 = vmatpush.bf16.msra.mxu3 %v1875_v38  ;;  %v1840_v55 = vld [vmem:[%s3039_s24 + $0x170] sm:$0xf0]  ;;  %v1839_v57 = vor.u32 %v1998_v51, %v1838_v49  ;;  %v1715_v58 = vor.u32 %v1964_v52, %v1712_v53  ;;  %v1694_v59 = vld [vmem:[%s3039_s24 + $0x40] sm:$0xf]  ;;  %v1962_v60 = vld [vmem:[%s3039_s24 + $0x4c] sm:$0xf0] }
  0xdb   : > { %v1822_v61 = vld [vmem:[%s3039_s24 + $0x140] sm:$0xf]  ;;  %v1843_v62 = vor.u32 %v1996_v54, %v1840_v55  ;;  %v1994_v63 = vld [vmem:[%s3039_s24 + $0x14c] sm:$0xf0]  ;;  %v1960_v0 = vld [vmem:[%s3039_s24 + $0x44] sm:$0xf]  ;;  %v1695_v4 = vor.u32 %v1962_v60, %v1694_v59 }
  0xdc   : > { %953 = vmatpush.bf16.msra.mxu0 %v1727_v44  ;;  %v1696_v1 = vld [vmem:[%s3039_s24 + $0x50] sm:$0xf0]  ;;  %v1992_v2 = vld [vmem:[%s3039_s24 + $0x144] sm:$0xf]  ;;  %v1823_v5 = vor.u32 %v1994_v63, %v1822_v61  ;;  %v1678_v7 = vld [vmem:[%s3039_s24 + $0x20] sm:$0xf] }
  0xdd   : > { %972 = vmatpush.bf16.msra.mxu1 %v1855_v45  ;;  %991 = vmatpush.bf16.msra.mxu2 %v1731_v46  ;;  %v1824_v3 = vld [vmem:[%s3039_s24 + $0x150] sm:$0xf0]  ;;  %v1699_v6 = vor.u32 %v1960_v0, %v1696_v1  ;;  %v1958_v8 = vld [vmem:[%s3039_s24 + $0x2c] sm:$0xf0]  ;;  %v1806_v9 = vld [vmem:[%s3039_s24 + $0x120] sm:$0xf] }
  0xde   : > { %1010 = vmatpush.bf16.msra.mxu3 %v1859_v50  ;;  %v1827_v10 = vor.u32 %v1992_v2, %v1824_v3  ;;  %v1990_v11 = vld [vmem:[%s3039_s24 + $0x12c] sm:$0xf0]  ;;  %v1956_v12 = vld [vmem:[%s3039_s24 + $0x24] sm:$0xf]  ;;  %v1680_v13 = vld [vmem:[%s3039_s24 + $0x30] sm:$0xf0]  ;;  %v1679_v16 = vor.u32 %v1958_v8, %v1678_v7 }
  0xdf   : > { %v1988_v14 = vld [vmem:[%s3039_s24 + $0x124] sm:$0xf]  ;;  %v1808_v15 = vld [vmem:[%s3039_s24 + $0x130] sm:$0xf0]  ;;  %v1662_v17 = vld [vmem:[%s3039_s24] sm:$0xf]  ;;  %v1807_v19 = vor.u32 %v1990_v11, %v1806_v9  ;;  %v1683_v20 = vor.u32 %v1956_v12, %v1680_v13 }
  0xe0   : > { %954 = vmatpush.bf16.msra.mxu0 %v1711_v56  ;;  %v1954_v18 = vld [vmem:[%s3039_s24 + $0xc] sm:$0xf0]  ;;  %v1790_v21 = vld [vmem:[%s3039_s24 + $0x100] sm:$0xf]  ;;  %v1952_v23 = vld [vmem:[%s3039_s24 + $0x4] sm:$0xf]  ;;  %v1811_v24 = vor.u32 %v1988_v14, %v1808_v15 }
  0xe1   : > { %973 = vmatpush.bf16.msra.mxu1 %v1839_v57  ;;  %992 = vmatpush.bf16.msra.mxu2 %v1715_v58  ;;  %v1986_v22 = vld [vmem:[%s3039_s24 + $0x10c] sm:$0xf0]  ;;  %v1664_v25 = vld [vmem:[%s3039_s24 + $0x10] sm:$0xf0]  ;;  %v1984_v26 = vld [vmem:[%s3039_s24 + $0x104] sm:$0xf]  ;;  %v1663_v31 = vor.u32 %v1954_v18, %v1662_v17 }
  0xe2   : > { %1011 = vmatpush.bf16.msra.mxu3 %v1843_v62  ;;  %v1792_v27 = vld [vmem:[%s3039_s24 + $0x110] sm:$0xf0]  ;;  %v1646_v28 = vld [vmem:[%s3560_s0] sm:$0xf]  ;;  %v1981_v29 = vld [vmem:[%s3039_s24 + $0xec] sm:$0xf]  ;;  %v1791_v35 = vor.u32 %v1986_v22, %v1790_v21  ;;  %v1667_v36 = vor.u32 %v1952_v23, %v1664_v25 }
  0xe3   : > { %v1784_v30 = vld [vmem:[%s3039_s24 + $0xf8] sm:$0xf0]  ;;  %v1949_v32 = vld [vmem:[%s3560_s0 + $0x4] sm:$0xf0]  ;;  %v2015_v34 = vld [vmem:[%s3039_s24 + $0x1f4] sm:$0xf0]  ;;  %v1795_v40 = vor.u32 %v1984_v26, %v1792_v27 }
  0xe4   : > { %955 = vmatpush.bf16.msra.mxu0 %v1695_v4  ;;  %v1910_v33 = vld [vmem:[%s3039_s24 + $0x1e8] sm:$0xf]  ;;  %v1948_v37 = vld [vmem:[%s3560_s0 + $0x4] sm:$0xf]  ;;  %v1648_v38 = vld [vmem:[%s3560_s0 + $0x8] sm:$0xf0]  ;;  %v1787_v41 = vor.u32 %v1981_v29, %v1784_v30  ;;  %v3125_v45 = vor.u32 %v1949_v32, %v1646_v28 }
  0xe5   : > { %974 = vmatpush.bf16.msra.mxu1 %v1823_v5  ;;  %993 = vmatpush.bf16.msra.mxu2 %v1699_v6  ;;  %v1782_v39 = vld [vmem:[%s3039_s24 + $0xe8] sm:$0xf]  ;;  %v1983_v42 = vld [vmem:[%s3039_s24 + $0xf4] sm:$0xf0]  ;;  %v2013_v43 = vld [vmem:[%s3039_s24 + $0x1ec] sm:$0xf]  ;;  %v1911_v46 = vor.u32 %v2015_v34, %v1910_v33  ;;  %v3129_v49 = vor.u32 %v1948_v37, %v1648_v38 }
  0xe6   : > { %1012 = vmatpush.bf16.msra.mxu3 %v1827_v10  ;;  %v1912_v44 = vld [vmem:[%s3039_s24 + $0x1f8] sm:$0xf0]  ;;  %v1977_v47 = vld [vmem:[%s3039_s24 + $0xcc] sm:$0xf]  ;;  %v1894_v50 = vld [vmem:[%s3039_s24 + $0x1c8] sm:$0xf]  ;;  %v1783_v53 = vor.u32 %v1983_v42, %v1782_v39 }
  0xe7   : > { %v1768_v48 = vld [vmem:[%s3039_s24 + $0xd8] sm:$0xf0]  ;;  %v2011_v51 = vld [vmem:[%s3039_s24 + $0x1d4] sm:$0xf0]  ;;  %v2462_v52 = vmov 0   ;;  %v1915_v54 = vor.u32 %v2013_v43, %v1912_v44  ;;  %v586_v1 = vld [vmem:[%s3562_s2] sm:$0xff] }
  0xe8   : > { %956 = vmatpush.bf16.msra.mxu0 %v1679_v16  ;;  %2242 = vset.pattern.permute.xlu0 %v2462_v52  ;;  %v1771_v55 = vor.u32 %v1977_v47, %v1768_v48  ;;  %v1766_v56 = vld [vmem:[%s3039_s24 + $0xc8] sm:$0xf]  ;;  %v1979_v57 = vld [vmem:[%s3039_s24 + $0xd4] sm:$0xf0]  ;;  %v2009_v58 = vld [vmem:[%s3039_s24 + $0x1cc] sm:$0xf]  ;;  %v1895_v59 = vor.u32 %v2011_v51, %v1894_v50 }
  0xe9   : > { %975 = vmatpush.bf16.msra.mxu1 %v1807_v19  ;;  %994 = vmatpush.bf16.msra.mxu2 %v1683_v20  ;;  %v1896_v60 = vld [vmem:[%s3039_s24 + $0x1d8] sm:$0xf0]  ;;  %v1973_v61 = vld [vmem:[%s3039_s24 + $0xac] sm:$0xf]  ;;  %v1878_v63 = vld [vmem:[%s3039_s24 + $0x1a8] sm:$0xf]  ;;  %v1767_v2 = vor.u32 %v1979_v57, %v1766_v56 }
  0xea   : > { %1013 = vmatpush.bf16.msra.mxu3 %v1811_v24  ;;  %v1752_v62 = vld [vmem:[%s3039_s24 + $0xb8] sm:$0xf0]  ;;  %v2007_v0 = vld [vmem:[%s3039_s24 + $0x1b4] sm:$0xf0]  ;;  %v1899_v3 = vor.u32 %v2009_v58, %v1896_v60  ;;  %v1750_v5 = vld [vmem:[%s3039_s24 + $0xa8] sm:$0xf]  ;;  %592 = vperm.xlu0 %2242, %v586_v1  }
  0xeb   : > { %v1755_v4 = vor.u32 %v1973_v61, %v1752_v62  ;;  %v1975_v6 = vld [vmem:[%s3039_s24 + $0xb4] sm:$0xf0]  ;;  %v2005_v7 = vld [vmem:[%s3039_s24 + $0x1ac] sm:$0xf]  ;;  %v1879_v8 = vor.u32 %v2007_v0, %v1878_v63  ;;  %v1880_v9 = vld [vmem:[%s3039_s24 + $0x1b8] sm:$0xf0]  ;;  %2243 = vset.pattern.permute.xlu1 %v2462_v52 }
  0xec   : > { %957 = vmatpush.bf16.msra.mxu0 %v1663_v31  ;;  %v1969_v10 = vld [vmem:[%s3039_s24 + $0x8c] sm:$0xf]  ;;  %v1736_v11 = vld [vmem:[%s3039_s24 + $0x98] sm:$0xf0]  ;;  %v1862_v12 = vld [vmem:[%s3039_s24 + $0x188] sm:$0xf]  ;;  %v1751_v14 = vor.u32 %v1975_v6, %v1750_v5  ;;  %v1883_v18 = vor.u32 %v2005_v7, %v1880_v9 }
  0xed   : > { %976 = vmatpush.bf16.msra.mxu1 %v1791_v35  ;;  %995 = vmatpush.bf16.msra.mxu2 %v1667_v36  ;;  %v2003_v13 = vld [vmem:[%s3039_s24 + $0x194] sm:$0xf0]  ;;  %v1734_v15 = vld [vmem:[%s3039_s24 + $0x88] sm:$0xf]  ;;  %v2001_v17 = vld [vmem:[%s3039_s24 + $0x18c] sm:$0xf]  ;;  %v1739_v19 = vor.u32 %v1969_v10, %v1736_v11 }
  0xee   : > { %1014 = vmatpush.bf16.msra.mxu3 %v1795_v40  ;;  %v1971_v16 = vld [vmem:[%s3039_s24 + $0x94] sm:$0xf0]  ;;  %v1864_v20 = vld [vmem:[%s3039_s24 + $0x198] sm:$0xf0]  ;;  %v1654_v21 = vld [vmem:[%s3560_s0 + $0x10] sm:$0xf]  ;;  %v1863_v23 = vor.u32 %v2003_v13, %v1862_v12 }
  0xef   : > { %958 = vmatmul.bf16.vlgmr.msra.gmra.mxu0 %v3125_v45  ;;  %v1951_v22 = vld [vmem:[%s3560_s0 + $0x14] sm:$0xf0]  ;;  %v1965_v24 = vld [vmem:[%s3039_s24 + $0x6c] sm:$0xf]  ;;  %v1720_v25 = vld [vmem:[%s3039_s24 + $0x78] sm:$0xf0]  ;;  %v1735_v30 = vor.u32 %v1971_v16, %v1734_v15  ;;  %v1867_v33 = vor.u32 %v2001_v17, %v1864_v20 }
  0xf0   : > { %977 = vmatmul.bf16.vlgmr.msra.gmra.mxu1 %v3129_v49  ;;  %996 = vmatmul.bf16.vlgmr.msra.gmra.mxu2 %v3125_v45  ;;  %v1846_v26 = vld [vmem:[%s3039_s24 + $0x168] sm:$0xf]  ;;  %v1999_v27 = vld [vmem:[%s3039_s24 + $0x174] sm:$0xf0]  ;;  %v588_v29 = vld [vmem:[%s3562_s2 + $0x10] sm:$0xff]  ;;  %v1723_v34 = vor.u32 %v1965_v24, %v1720_v25  ;;  %v3185_v38 = vor.u32 %v1951_v22, %v1654_v21  ;;  %s1917_s12 = sshll.u32 (%p2516_p5), %s2501_s15, 2 }
  0xf1   : > { %1064 = vmatpush.bf16.msrb.mxu2 %v1787_v41  ;;  %1045 = vmatpush.bf16.msrb.mxu1 %v1911_v46  ;;  %v587_v28 = vld [vmem:[%s3562_s2 + $0x8] sm:$0xff]  ;;  %v1950_v31 = vld [vmem:[%s3560_s0 + $0x14] sm:$0xf]  ;;  %v1656_v32 = vld [vmem:[%s3560_s0 + $0x18] sm:$0xf0]  ;;  %v1847_v39 = vor.u32 %v1999_v27, %v1846_v26  ;;  %s1142_s29 = ssub.s32 (%p2516_p5), 7, %s1917_s12 }
  0xf2   : > { %1015 = vmatmul.bf16.vlgmr.msra.gmra.mxu3 %v3129_v49  ;;  %1026 = vmatpush.bf16.msrb.mxu0 %v1783_v53  ;;  %v1718_v35 = vld [vmem:[%s3039_s24 + $0x68] sm:$0xf]  ;;  %v1967_v36 = vld [vmem:[%s3039_s24 + $0x74] sm:$0xf0]  ;;  %v1997_v37 = vld [vmem:[%s3039_s24 + $0x16c] sm:$0xf]  ;;  %v3190_v43 = vor.u32 %v1950_v31, %v1656_v32 }
  0xf3   : > { %1083 = vmatpush.bf16.msrb.mxu3 %v1915_v54  ;;  %602 = vperm.xlu1 %2243, %v588_v29   ;;  %v1848_v40 = vld [vmem:[%s3039_s24 + $0x178] sm:$0xf0]  ;;  %v1961_v41 = vld [vmem:[%s3039_s24 + $0x4c] sm:$0xf]  ;;  %v1830_v44 = vld [vmem:[%s3039_s24 + $0x148] sm:$0xf]  ;;  %v1719_v47 = vor.u32 %v1967_v36, %v1718_v35 }
  0xf4   : > { %597 = vperm.xlu0 %2242, %v587_v28   ;;  %v1704_v42 = vld [vmem:[%s3039_s24 + $0x58] sm:$0xf0]  ;;  %v1995_v46 = vld [vmem:[%s3039_s24 + $0x154] sm:$0xf0]  ;;  %v1851_v48 = vor.u32 %v1997_v37, %v1848_v40  ;;  %v1702_v51 = vld [vmem:[%s3039_s24 + $0x48] sm:$0xf] }
  0xf5   : > { %1065 = vmatpush.bf16.msrb.mxu2 %v1771_v55  ;;  %1046 = vmatpush.bf16.msrb.mxu1 %v1895_v59  ;;  %v1707_v50 = vor.u32 %v1961_v41, %v1704_v42  ;;  %v1963_v52 = vld [vmem:[%s3039_s24 + $0x54] sm:$0xf0]  ;;  %v1993_v53 = vld [vmem:[%s3039_s24 + $0x14c] sm:$0xf]  ;;  %v1831_v54 = vor.u32 %v1995_v46, %v1830_v44  ;;  %v1832_v55 = vld [vmem:[%s3039_s24 + $0x158] sm:$0xf0] }
  0xf6   : > { %1027 = vmatpush.bf16.msrb.mxu0 %v1767_v2  ;;  %v1957_v56 = vld [vmem:[%s3039_s24 + $0x2c] sm:$0xf]  ;;  %v1688_v57 = vld [vmem:[%s3039_s24 + $0x38] sm:$0xf0]  ;;  %v1814_v58 = vld [vmem:[%s3039_s24 + $0x128] sm:$0xf]  ;;  %v1703_v61 = vor.u32 %v1963_v52, %v1702_v51  ;;  %v1835_v62 = vor.u32 %v1993_v53, %v1832_v55 }
  0xf7   : > { %1084 = vmatpush.bf16.msrb.mxu3 %v1899_v3  ;;  %v1991_v59 = vld [vmem:[%s3039_s24 + $0x134] sm:$0xf0]  ;;  %v1691_v63 = vor.u32 %v1957_v56, %v1688_v57  ;;  %v1686_v0 = vld [vmem:[%s3039_s24 + $0x28] sm:$0xf]  ;;  %v1989_v2 = vld [vmem:[%s3039_s24 + $0x12c] sm:$0xf] }
  0xf8   : > { %v589_v60 = vld [vmem:[%s3562_s2 + $0x18] sm:$0xff]  ;;  %v1815_v3 = vor.u32 %v1991_v59, %v1814_v58  ;;  %v1953_v5 = vld [vmem:[%s3039_s24 + $0xc] sm:$0xf]  ;;  %v1798_v7 = vld [vmem:[%s3039_s24 + $0x108] sm:$0xf]  ;;  %p1143_p9 = scmp.lt.s32.totalorder (%p2516_p5), %s1142_s29, 4 }
  0xf9   : > { %1066 = vmatpush.bf16.msrb.mxu2 %v1755_v4  ;;  %1047 = vmatpush.bf16.msrb.mxu1 %v1879_v8  ;;  %v1959_v1 = vld [vmem:[%s3039_s24 + $0x34] sm:$0xf0]  ;;  %v1816_v4 = vld [vmem:[%s3039_s24 + $0x138] sm:$0xf0]  ;;  %v1670_v12 = vld [vmem:[%s3039_s24 + $0x8] sm:$0xf] }
  0xfa   : > { %1028 = vmatpush.bf16.msrb.mxu0 %v1751_v14  ;;  %v1672_v6 = vld [vmem:[%s3039_s24 + $0x18] sm:$0xf0]  ;;  %v1987_v8 = vld [vmem:[%s3039_s24 + $0x114] sm:$0xf0]  ;;  %v1687_v9 = vor.u32 %v1959_v1, %v1686_v0  ;;  %v1819_v10 = vor.u32 %v1989_v2, %v1816_v4  ;;  %v1985_v15 = vld [vmem:[%s3039_s24 + $0x10c] sm:$0xf] }
  0xfb   : > { %1085 = vmatpush.bf16.msrb.mxu3 %v1883_v18  ;;  %607 = vperm.xlu1 %2243, %v589_v60   ;;  %v1675_v11 = vor.u32 %v1953_v5, %v1672_v6  ;;  %v1955_v13 = vld [vmem:[%s3039_s24 + $0x14] sm:$0xf0]  ;;  %v1799_v14 = vor.u32 %v1987_v8, %v1798_v7  ;;  %v1800_v16 = vld [vmem:[%s3039_s24 + $0x118] sm:$0xf0]  ;;  %s1643_s24 = sshll.u32 %s486_s30, 6  ;;  %s2016_s30 = sshll.u32 (%p2516_p5), %s2501_s15, 4 }
  0xfc   : > { %v1671_v17 = vor.u32 %v1955_v13, %v1670_v12  ;;  %v1803_v18 = vor.u32 %v1985_v15, %v1800_v16  ;;  %s3236_s27 = scalar_lea.vmem [#allocation3], %s1643_s24   ;;  %s3260_s8 = scalar_lea.vmem (%p2516_p5), %s3563_s3, %s2016_s30  }
  0xfd   : > { %1067 = vmatpush.bf16.msrb.mxu2 %v1739_v19  ;;  %1048 = vmatpush.bf16.msrb.mxu1 %v1863_v23 }
  0xfe   : > { %1029 = vmatpush.bf16.msrb.mxu0 %v1735_v30 }
  0xff   : > { %1086 = vmatpush.bf16.msrb.mxu3 %v1867_v33  ;;  %963 = vmatmul.bf16.gmra.mxu0 %v3185_v38 }
 0x100   : > { %982 = vmatmul.bf16.gmra.mxu1 %v3190_v43  ;;  %1001 = vmatmul.bf16.gmra.mxu2 %v3185_v38 }
 0x101   : > { %1068 = vmatpush.bf16.msrb.mxu2 %v1723_v34  ;;  %1049 = vmatpush.bf16.msrb.mxu1 %v1847_v39 }
 0x102   : > { %1020 = vmatmul.bf16.gmra.mxu3 %v3190_v43  ;;  %1030 = vmatpush.bf16.msrb.mxu0 %v1719_v47 }
 0x103   : > { %1087 = vmatpush.bf16.msrb.mxu3 %v1851_v48 }
 0x105   : > { %1069 = vmatpush.bf16.msrb.mxu2 %v1707_v50  ;;  %1050 = vmatpush.bf16.msrb.mxu1 %v1831_v54 }
 0x106   : > { %1031 = vmatpush.bf16.msrb.mxu0 %v1703_v61 }
 0x107   : > { %1088 = vmatpush.bf16.msrb.mxu3 %v1835_v62 }
 0x109   : > { %1070 = vmatpush.bf16.msrb.mxu2 %v1691_v63  ;;  %1051 = vmatpush.bf16.msrb.mxu1 %v1815_v3 }
 0x10a   : > { %1032 = vmatpush.bf16.msrb.mxu0 %v1687_v9 }
 0x10b   : > { %1089 = vmatpush.bf16.msrb.mxu3 %v1819_v10 }
 0x10d   : > { %1071 = vmatpush.bf16.msrb.mxu2 %v1675_v11  ;;  %1052 = vmatpush.bf16.msrb.mxu1 %v1799_v14 }
 0x10e   : > { %1033 = vmatpush.bf16.msrb.mxu0 %v1671_v17 }
 0x10f   : > { %1090 = vmatpush.bf16.msrb.mxu3 %v1803_v18 }
 0x110   : > { %1053 = vmatmul.bf16.vlgmr.msrb.gmra.mxu1 %v3129_v49  ;;  %1072 = vmatmul.bf16.vlgmr.msrb.gmra.mxu2 %v3125_v45 }
 0x111   : > { %1034 = vmatmul.bf16.vlgmr.msrb.gmra.mxu0 %v3125_v45 }
 0x112   : > { %1091 = vmatmul.bf16.vlgmr.msrb.gmra.mxu3 %v3129_v49 }
 0x120   : > { %1058 = vmatmul.bf16.gmra.mxu1 %v3190_v43  ;;  %1077 = vmatmul.bf16.gmra.mxu2 %v3185_v38 }
 0x121   : > { %1039 = vmatmul.bf16.gmra.mxu0 %v3185_v38 }
 0x122   : > { %1096 = vmatmul.bf16.gmra.mxu3 %v3190_v43 }
 0x15c   : > { %v593_v19 = vpop.permute.xlu0 %592 }
 0x165   : > { %v3234_v34 = vpop.permute.xlu1 %602 }
 0x166   : > { %v3229_v27 = vpop.permute.xlu0 %597 }
 0x16c   : > { %v959_v20 = vpop.f32.mrf.mxu0 }
 0x16d   : > { %v978_v21 = vpop.f32.mrf.mxu1  ;;  %v960_v22 = vadd.f32 %v959_v20, %v593_v19  ;;  %v608_v52 = vpop.permute.xlu1 %607 }
 0x16f   : > { %v979_v23 = vadd.f32 %v978_v21, %v960_v22 }
 0x171   : > { %v1102_v28 = vmax.f32 %v979_v23, 0.0 }
 0x173   : > { %v997_v24 = vpop.f32.mrf.mxu2 }
 0x174   : > { %v998_v25 = vadd.f32 %v997_v24, %v593_v19  ;;  %v961_v45 = vpop.f32.mrf.mxu0 }
 0x175   : > { %v1016_v26 = vpop.f32.mrf.mxu3  ;;  %v980_v49 = vpop.f32.mrf.mxu1  ;;  %v962_v31 = vadd.f32 %v961_v45, %v3229_v27 }
 0x176   : > { %v1017_v29 = vadd.f32 %v1016_v26, %v998_v25 }
 0x177   : > { %v981_v35 = vadd.f32 %v980_v49, %v962_v31 }
 0x178   : > { %v1103_v30 = vmax.f32 %v1017_v29, 0.0 }
 0x179   : > { %v1106_v42 = vmax.f32 %v981_v35, 0.0 }
 0x17a   : > { %v1118_v32 = vpack.c.bf16 %v1103_v30, %v1102_v28 }
 0x17b   : > { %v999_v33 = vpop.f32.mrf.mxu2 }
 0x17c   : > { %1126 = vst [vmem:[%s3236_s27] sm:$0xff] %v1118_v32  ;;  %v1000_v36 = vadd.f32 %v999_v33, %v3229_v27  ;;  %v964_v38 = vpop.f32.mrf.mxu0 }
 0x17d   : > { %v1018_v37 = vpop.f32.mrf.mxu3  ;;  %v983_v39 = vpop.f32.mrf.mxu1  ;;  %v965_v41 = vadd.f32 %v964_v38, %v3234_v34 }
 0x17e   : > { %v1019_v40 = vadd.f32 %v1018_v37, %v1000_v36 }
 0x17f   : > { %v984_v46 = vadd.f32 %v983_v39, %v965_v41 }
 0x180   : > { %v1107_v43 = vmax.f32 %v1019_v40, 0.0 }
 0x181   : > { %v1110_v54 = vmax.f32 %v984_v46, 0.0 }
 0x182   : > { %v1120_v44 = vpack.c.bf16 %v1107_v43, %v1106_v42 }
 0x183   : > { %v1002_v47 = vpop.f32.mrf.mxu2 }
 0x184   : > { %1128 = vst [vmem:[%s3236_s27 + $0x10] sm:$0xff] %v1120_v44  ;;  %v1003_v48 = vadd.f32 %v1002_v47, %v3234_v34  ;;  %v966_v51 = vpop.f32.mrf.mxu0 }
 0x185   : > { %v1021_v50 = vpop.f32.mrf.mxu3  ;;  %v985_v53 = vpop.f32.mrf.mxu1  ;;  %v967_v57 = vadd.f32 %v966_v51, %v608_v52 }
 0x186   : > { %v1022_v55 = vadd.f32 %v1021_v50, %v1003_v48 }
 0x187   : > { %v986_v60 = vadd.f32 %v985_v53, %v967_v57 }
 0x188   : > { %v1111_v56 = vmax.f32 %v1022_v55, 0.0 }
 0x189   : > { %v1114_v3 = vmax.f32 %v986_v60, 0.0 }
 0x18a   : > { %v1122_v58 = vpack.c.bf16 %v1111_v56, %v1110_v54 }
 0x18b   : > { %v1004_v59 = vpop.f32.mrf.mxu2 }
 0x18c   : > { %1130 = vst [vmem:[%s3236_s27 + $0x20] sm:$0xff] %v1122_v58  ;;  %v1005_v61 = vadd.f32 %v1004_v59, %v608_v52 }
 0x18d   : > { %v1023_v62 = vpop.f32.mrf.mxu3  ;;  %v1054_v1 = vpop.f32.mrf.mxu1 }
 0x18e   : > { %v1035_v63 = vpop.f32.mrf.mxu0  ;;  %v1024_v0 = vadd.f32 %v1023_v62, %v1005_v61 }
 0x18f   : > { %v1036_v2 = vadd.f32 %v1035_v63, %v593_v19 }
 0x190   : > { %v1115_v4 = vmax.f32 %v1024_v0, 0.0 }
 0x191   : > { %v1055_v6 = vadd.f32 %v1054_v1, %v1036_v2 }
 0x192   : > { %v1124_v5 = vpack.c.bf16 %v1115_v4, %v1114_v3 }
 0x193   : > { %v1073_v7 = vpop.f32.mrf.mxu2  ;;  %v1104_v11 = vmax.f32 %v1055_v6, 0.0 }
 0x194   : > { %1132 = vst [vmem:[%s3236_s27 + $0x30] sm:$0xff] %v1124_v5  ;;  %v1074_v9 = vadd.f32 %v1073_v7, %v593_v19 }
 0x195   : > { %v1092_v8 = vpop.f32.mrf.mxu3  ;;  %v1056_v13 = vpop.f32.mrf.mxu1 }
 0x196   : > { %v1037_v10 = vpop.f32.mrf.mxu0  ;;  %v1093_v12 = vadd.f32 %v1092_v8, %v1074_v9 }
 0x197   : > { %v1038_v15 = vadd.f32 %v1037_v10, %v3229_v27 }
 0x198   : > { %v1105_v14 = vmax.f32 %v1093_v12, 0.0 }
 0x199   : > { %v1057_v20 = vadd.f32 %v1056_v13, %v1038_v15 }
 0x19a   : > { %v1119_v16 = vpack.c.bf16 %v1105_v14, %v1104_v11 }
 0x19b   : > { %v1075_v17 = vpop.f32.mrf.mxu2  ;;  %v1108_v19 = vmax.f32 %v1057_v20, 0.0 }
 0x19c   : > { %1127 = vst [vmem:[%s3236_s27 + $0x8] sm:$0xff] %v1119_v16  ;;  %v1076_v21 = vadd.f32 %v1075_v17, %v3229_v27 }
 0x19d   : > { %v1094_v18 = vpop.f32.mrf.mxu3  ;;  %v1059_v26 = vpop.f32.mrf.mxu1 }
 0x19e   : > { %v1040_v22 = vpop.f32.mrf.mxu0  ;;  %v1095_v23 = vadd.f32 %v1094_v18, %v1076_v21 }
 0x19f   : > { %v1041_v24 = vadd.f32 %v1040_v22, %v3234_v34 }
 0x1a0   : > { %v1109_v25 = vmax.f32 %v1095_v23, 0.0 }
 0x1a1   : > { %v1060_v49 = vadd.f32 %v1059_v26, %v1041_v24 }
 0x1a2   : > { %v1121_v45 = vpack.c.bf16 %v1109_v25, %v1108_v19 }
 0x1a3   : > { %v1078_v28 = vpop.f32.mrf.mxu2  ;;  %v1112_v32 = vmax.f32 %v1060_v49, 0.0 }
 0x1a4   : > { %1129 = vst [vmem:[%s3236_s27 + $0x18] sm:$0xff] %v1121_v45  ;;  %v1079_v30 = vadd.f32 %v1078_v28, %v3234_v34 }
 0x1a5   : > { %v1097_v29 = vpop.f32.mrf.mxu3  ;;  %v1061_v37 = vpop.f32.mrf.mxu1 }
 0x1a6   : > { %v1042_v31 = vpop.f32.mrf.mxu0  ;;  %v1098_v33 = vadd.f32 %v1097_v29, %v1079_v30 }
 0x1a7   : > { %v1043_v35 = vadd.f32 %v1042_v31, %v608_v52 }
 0x1a8   : > { %v1113_v27 = vmax.f32 %v1098_v33, 0.0 }
 0x1a9   : > { %v1062_v39 = vadd.f32 %v1061_v37, %v1043_v35 }
 0x1aa   : > { %v1123_v36 = vpack.c.bf16 %v1113_v27, %v1112_v32 }
 0x1ab   : > { %v1080_v38 = vpop.f32.mrf.mxu2  ;;  %v1116_v43 = vmax.f32 %v1062_v39, 0.0 }
 0x1ac   : > { %1131 = vst [vmem:[%s3236_s27 + $0x28] sm:$0xff] %v1123_v36  ;;  %v1081_v40 = vadd.f32 %v1080_v38, %v608_v52 }
 0x1ad   : > { %v1099_v41 = vpop.f32.mrf.mxu3 }
 0x1ae   : > { %v1100_v42 = vadd.f32 %v1099_v41, %v1081_v40 }
 0x1b0   : > { %v1117_v44 = vmax.f32 %v1100_v42, 0.0  ;;  %1140 = sbr.rel (!%p2516_p5) target bundleno = 591 (0x24f), region = 88 }
 0x1b2   : > { %v1125_v46 = vpack.c.bf16 %v1117_v44, %v1116_v43 }
 0x1b4   : > { %1133 = vst [vmem:[%s3236_s27 + $0x38] sm:$0xff] %v1125_v46 }
 0x1b5   : > { %s3600_s29 = smov (!%p1143_p9, %s1142_s29), 4 }
 0x1b6   : > { %s1918_s9 = sshll.u32 %s3600_s29, 4  ;;  %s3262_s10 = sshll.u32 %s3600_s29, 2 }
 0x1b7   : > { %p1922_p10 = scmp.eq.s32.totalorder %s1918_s9, 0 }
 0x1b8   : > { %p1153_p11 = scmp.lt.u32.totalorder (!%p1922_p10), %s3262_s10, 8 }
 0x1b9   : > { %1152 = sbr.rel (%p1922_p10) target bundleno = 591 (0x24f), region = 92 }
 0x1be   : > { %1156 = sbr.rel (%p1153_p11) target bundleno = 579 (0x243), region = 96  ;;  %s3266_s20 = sand.u32 (!%p1153_p11), 7, %s3262_s10  }
 0x1bf   : > { %p1179_p5 = scmp.eq.s32.totalorder (!%p1153_p11), %s3266_s20, 0  ;;  %p1923_p12 = scmp.ne.s32.totalorder (!%p1153_p11), %s3266_s20, 0 }
 0x1c3   : > { %1182 = sbr.rel (%p1923_p12) target bundleno = 511 (0x1ff), region = 111  ;;  %s1183_s15 = sshrl.u32 (!%p1923_p12), %s3262_s10, 3 }
 0x1c4   : > { %s3273_s11 = sshrl.u32 (!%p1923_p12), %s1183_s15, 3 }
 0x1c5   : > { %p1924_p13 = scmp.le.s32.totalorder (!%p1923_p12), %s3273_s11, 0 }
 0x1c8   : > { %1549 = sbr.rel (%p1924_p13) target bundleno = 494 (0x1ee), region = 229  ;;  %s3575_s17 = smov (!%p1924_p13), %s3260_s8 }
 0x1c9   : > { %s3576_s18 = smov (!%p1924_p13), %s3236_s27  ;;  %s3282_s5 = smov (!%p1924_p13), 0  }
 0x1ca   : > { %s3284_s21 = smov (!%p1924_p13), 0  }
 0x1cd LB: >> { %v1206_v34 = vld [vmem:[%s2402_s18 + $0x30] sm:$0xff]  ;;  %v1208_v47 = vld [vmem:[%s2402_s18 + $0x38] sm:$0xff]  ;;  %v1222_v48 = vld [vmem:[%s2402_s18 + $0x40] sm:$0xff]  ;;  %s1258_s22 = sadd.s32 1, %s2406_s5  ;;  %s1188_s21 = sadd.s32 1, %s2410_s21   ;;  %s2410_s21 = sphi %s3284_s21, %s1188_s21   ;;  %s2406_s5 = sphi %s3282_s5, %s3579_s5   ;;  %s2402_s18 = sphi %s3576_s18, %s3578_s18   ;;  %s2398_s17 = sphi %s3575_s17, %s3577_s17  }
 0x1ce   : >> { %1207 = vst [vmem:[%s2398_s17 + $0x30] sm:$0xff] %v1206_v34  ;;  %v1224_v50 = vld [vmem:[%s2402_s18 + $0x48] sm:$0xff]  ;;  %v1200_v51 = vld [vmem:[%s2402_s18 + $0x18] sm:$0xff]  ;;  %v1202_v52 = vld [vmem:[%s2402_s18 + $0x20] sm:$0xff]  ;;  %p1259_p0 = scmp.ge.s32.totalorder %s1258_s22, %s3273_s11  ;;  %p1187_p1 = scmp.ge.s32.totalorder %s1188_s21, %s3273_s11 }
 0x1cf   : >> { %1209 = vst [vmem:[%s2398_s17 + $0x38] sm:$0xff] %v1208_v47  ;;  %v1204_v53 = vld [vmem:[%s2402_s18 + $0x28] sm:$0xff]  ;;  %v1238_v54 = vld [vmem:[%s2402_s18 + $0x50] sm:$0xff]  ;;  %v1240_v55 = vld [vmem:[%s2402_s18 + $0x58] sm:$0xff] }
 0x1d0   : >> { %1223 = vst [vmem:[%s2398_s17 + $0x4c] sm:$0xff] %v1222_v48  ;;  %s3602_s22 = smov (%p1259_p0, %s1258_s22), 0  ;;  %v1194_v56 = vld [vmem:[%s2402_s18] sm:$0xff]  ;;  %v1196_v57 = vld [vmem:[%s2402_s18 + $0x8] sm:$0xff]  ;;  %v1198_v58 = vld [vmem:[%s2402_s18 + $0x10] sm:$0xff] }
 0x1d1   : >> { %1225 = vst [vmem:[%s2398_s17 + $0x54] sm:$0xff] %v1224_v50  ;;  %s1925_s23 = sshll.u32 %s3602_s22, 6  ;;  %v1254_v59 = vld [vmem:[%s2402_s18 + $0x60] sm:$0xff]  ;;  %v1256_v60 = vld [vmem:[%s2402_s18 + $0x68] sm:$0xff]  ;;  %s3579_s5 = smov %s3602_s22 }
 0x1d2   : >> { %1201 = vst [vmem:[%s2398_s17 + $0x18] sm:$0xff] %v1200_v51  ;;  %s3316_s14 = scalar_lea.vmem %s3236_s27, %s1925_s23 [#allocation3]   ;;  %s3319_s28 = scalar_lea.vmem %s3260_s8, %s1925_s23  }
 0x1d3   : >> { %1203 = vst [vmem:[%s2398_s17 + $0x20] sm:$0xff] %v1202_v52  ;;  %s3578_s18 = smov %s3316_s14 }
 0x1d4   : >> { %1205 = vst [vmem:[%s2398_s17 + $0x28] sm:$0xff] %v1204_v53 }
 0x1d5   : >> { %1217 = vst [vmem:[%s2398_s17 + $0x34] sm:$0xff] %v1204_v53 }
 0x1d6   : >> { %1219 = vst [vmem:[%s2398_s17 + $0x3c] sm:$0xff] %v1206_v34 }
 0x1d7   : >> { %1221 = vst [vmem:[%s2398_s17 + $0x44] sm:$0xff] %v1208_v47 }
 0x1d8   : >> { %1233 = vst [vmem:[%s2398_s17 + $0x50] sm:$0xff] %v1208_v47 }
 0x1d9   : >> { %1235 = vst [vmem:[%s2398_s17 + $0x58] sm:$0xff] %v1222_v48 }
 0x1da   : >> { %1237 = vst [vmem:[%s2398_s17 + $0x60] sm:$0xff] %v1224_v50 }
 0x1db   : >> { %1239 = vst [vmem:[%s2398_s17 + $0x68] sm:$0xff] %v1238_v54 }
 0x1dc   : >> { %1241 = vst [vmem:[%s2398_s17 + $0x70] sm:$0xff] %v1240_v55 }
 0x1dd   : >> { %1195 = vst [vmem:[%s2398_s17] sm:$0xff] %v1194_v56 }
 0x1de   : >> { %1197 = vst [vmem:[%s2398_s17 + $0x8] sm:$0xff] %v1196_v57 }
 0x1df   : >> { %1199 = vst [vmem:[%s2398_s17 + $0x10] sm:$0xff] %v1198_v58 }
 0x1e0   : >> { %1211 = vst [vmem:[%s2398_s17 + $0x1c] sm:$0xff] %v1198_v58 }
 0x1e1   : >> { %1213 = vst [vmem:[%s2398_s17 + $0x24] sm:$0xff] %v1200_v51 }
 0x1e2   : >> { %1215 = vst [vmem:[%s2398_s17 + $0x2c] sm:$0xff] %v1202_v52 }
 0x1e3   : >> { %1227 = vst [vmem:[%s2398_s17 + $0x38] sm:$0xff] %v1202_v52 }
 0x1e4   : >> { %1229 = vst [vmem:[%s2398_s17 + $0x40] sm:$0xff] %v1204_v53 }
 0x1e5   : >> { %1231 = vst [vmem:[%s2398_s17 + $0x48] sm:$0xff] %v1206_v34 }
 0x1e6   : >> { %1243 = vst [vmem:[%s2398_s17 + $0x54] sm:$0xff] %v1206_v34 }
 0x1e7   : >> { %1245 = vst [vmem:[%s2398_s17 + $0x5c] sm:$0xff] %v1208_v47 }
 0x1e8   : >> { %1247 = vst [vmem:[%s2398_s17 + $0x64] sm:$0xff] %v1222_v48 }
 0x1e9   : >> { %1249 = vst [vmem:[%s2398_s17 + $0x6c] sm:$0xff] %v1224_v50  ;;  %1190 = sbr.rel (!%p1187_p1) target bundleno = 461 (0x1cd), region = 235 }
 0x1ea   : >> { %1251 = vst [vmem:[%s2398_s17 + $0x74] sm:$0xff] %v1238_v54 }
 0x1eb   : >> { %1253 = vst [vmem:[%s2398_s17 + $0x7c] sm:$0xff] %v1240_v55 }
 0x1ec   : >> { %1255 = vst [vmem:[%s2398_s17 + $0x84] sm:$0xff] %v1254_v59 }
 0x1ed   : >> { %1257 = vst [vmem:[%s2398_s17 + $0x8c] sm:$0xff] %v1256_v60  ;;  %s3577_s17 = smov %s3319_s28 }
 0x1ee PF: > { %s3367_s4 = sand.u32 7, %s1183_s15   ;;  %s2017_s25 = sshll.u32 %s3273_s11, 6 }
 0x1ef   : > { %s3371_s26 = scalar_lea.vmem %s3236_s27, %s2017_s25 [#allocation3]   ;;  %s3374_s24 = scalar_lea.vmem %s3260_s8, %s2017_s25  }
 0x1f0   : > { %p1930_p2 = scmp.le.s32.totalorder %s3367_s4, 0 }
 0x1f1   : > { %s3580_s12 = smov (!%p1930_p2), %s3374_s24  ;;  %s3581_s30 = smov (!%p1930_p2), %s3371_s26 }
 0x1f2   : > { %1563 = sbr.rel (%p1930_p2) target bundleno = 511 (0x1ff), region = 240  ;;  %s3383_s29 = smov (!%p1930_p2), 0  }
 0x1f3   : > { %s2424_s6 = smov (!%p1930_p2), 0  }
 0x1f7 LB: >> { %v1281_v61 = vld [vmem:[%s2418_s30] sm:$0xff]  ;;  %v1283_v62 = vld [vmem:[%s2418_s30 + $0x10] sm:$0xff]  ;;  %s1289_s7 = sadd.s32 1, %s2422_s29  ;;  %s1275_s6 = sadd.s32 1, %s2426_s6   ;;  %s2426_s6 = sphi %s2424_s6, %s1275_s6   ;;  %s2422_s29 = sphi %s3383_s29, %s3582_s29   ;;  %s2418_s30 = sphi %s3581_s30, %s1294_s30   ;;  %s2414_s12 = sphi %s3580_s12, %s1295_s12  }
 0x1f8   : >> { %v1285_v63 = vld [vmem:[%s2418_s30 + $0x20] sm:$0xff]  ;;  %1282 = vst [vmem:[%s2414_s12] sm:$0xff] %v1281_v61  ;;  %v1287_v0 = vld [vmem:[%s2418_s30 + $0x30] sm:$0xff]  ;;  %p1290_p3 = scmp.ge.s32.totalorder %s1289_s7, %s3367_s4  ;;  %p1274_p4 = scmp.ge.s32.totalorder %s1275_s6, %s3367_s4 }
 0x1f9   : >> { %1284 = vst [vmem:[%s2414_s12 + $0x1c] sm:$0xff] %v1283_v62 }
 0x1fa   : >> { %1286 = vst [vmem:[%s2414_s12 + $0x38] sm:$0xff] %v1285_v63  ;;  %s3604_s7 = smov (%p1290_p3, %s1289_s7), 0  ;;  %1277 = sbr.rel (!%p1274_p4) target bundleno = 503 (0x1f7), region = 246 }
 0x1fb   : >> { %1288 = vst [vmem:[%s2414_s12 + $0x54] sm:$0xff] %v1287_v0  ;;  %s1931_s9 = sshll.u32 %s3604_s7, 3  ;;  %s3582_s29 = smov %s3604_s7 }
 0x1fc   : >> { %s1294_s30 = scalar_lea.vmem %s3371_s26, %s1931_s9 [#allocation3]   ;;  %s1295_s12 = scalar_lea.vmem %s3374_s24, %s1931_s9  }
 0x1ff PF: > { %1298 = sbr.rel (%p1179_p5) target bundleno = 579 (0x243), region = 129  ;;  %s1300_s15 = ssub.s32 (!%p1179_p5), %s3262_s10, %s3266_s20 }
 0x200   : > { %s1304_s11 = sshrl.u32 (!%p1179_p5), %s3262_s10, 3  ;;  %s3404_s17 = scalar_lea.vmem (!%p1179_p5), %s3236_s27, %s1300_s15 [#allocation3] }
 0x201   : > { %s3407_s18 = scalar_lea.vmem (!%p1179_p5), %s3260_s8, %s1300_s15  ;;  %s3411_s5 = sshrl.u32 (!%p1179_p5), %s1304_s11, 3 }
 0x202   : > { %p1933_p6 = scmp.le.s32.totalorder (!%p1179_p5), %s3411_s5, 0 }
 0x204   : > { %1577 = sbr.rel (%p1933_p6) target bundleno = 554 (0x22a), region = 251  ;;  %s3583_s21 = smov (!%p1933_p6), %s3260_s8 }
 0x205   : > { %s3584_s22 = smov (!%p1933_p6), %s3236_s27  ;;  %s3420_s23 = smov (!%p1933_p6), 0  }
 0x206   : > { %s3422_s14 = smov (!%p1933_p6), 0  }
 0x209 LB: >> { %v1327_v1 = vld [vmem:[%s2434_s22 + $0x30] sm:$0xff]  ;;  %v1329_v2 = vld [vmem:[%s2434_s22 + $0x38] sm:$0xff]  ;;  %v1343_v3 = vld [vmem:[%s2434_s22 + $0x40] sm:$0xff]  ;;  %s1379_s28 = sadd.s32 1, %s2438_s23  ;;  %s1309_s14 = sadd.s32 1, %s2442_s14   ;;  %s2442_s14 = sphi %s3422_s14, %s1309_s14   ;;  %s2438_s23 = sphi %s3420_s23, %s3587_s23   ;;  %s2434_s22 = sphi %s3584_s22, %s3586_s22   ;;  %s2430_s21 = sphi %s3583_s21, %s3585_s21  }
 0x20a   : >> { %1328 = vst [vmem:[%s2430_s21 + $0x30] sm:$0xff] %v1327_v1  ;;  %v1345_v4 = vld [vmem:[%s2434_s22 + $0x48] sm:$0xff]  ;;  %v1321_v5 = vld [vmem:[%s2434_s22 + $0x18] sm:$0xff]  ;;  %v1323_v6 = vld [vmem:[%s2434_s22 + $0x20] sm:$0xff]  ;;  %p1380_p7 = scmp.ge.s32.totalorder %s1379_s28, %s3411_s5  ;;  %p1308_p8 = scmp.ge.s32.totalorder %s1309_s14, %s3411_s5 }
 0x20b   : >> { %1330 = vst [vmem:[%s2430_s21 + $0x38] sm:$0xff] %v1329_v2  ;;  %v1325_v7 = vld [vmem:[%s2434_s22 + $0x28] sm:$0xff]  ;;  %v1359_v8 = vld [vmem:[%s2434_s22 + $0x50] sm:$0xff]  ;;  %v1361_v9 = vld [vmem:[%s2434_s22 + $0x58] sm:$0xff] }
 0x20c   : >> { %1344 = vst [vmem:[%s2430_s21 + $0x4c] sm:$0xff] %v1343_v3  ;;  %s3606_s28 = smov (%p1380_p7, %s1379_s28), 0  ;;  %v1315_v10 = vld [vmem:[%s2434_s22] sm:$0xff]  ;;  %v1317_v11 = vld [vmem:[%s2434_s22 + $0x8] sm:$0xff]  ;;  %v1319_v12 = vld [vmem:[%s2434_s22 + $0x10] sm:$0xff] }
 0x20d   : >> { %1346 = vst [vmem:[%s2430_s21 + $0x54] sm:$0xff] %v1345_v4  ;;  %s1934_s4 = sshll.u32 %s3606_s28, 6  ;;  %v1375_v13 = vld [vmem:[%s2434_s22 + $0x60] sm:$0xff]  ;;  %v1377_v14 = vld [vmem:[%s2434_s22 + $0x68] sm:$0xff]  ;;  %s3587_s23 = smov %s3606_s28 }
 0x20e   : >> { %1322 = vst [vmem:[%s2430_s21 + $0x18] sm:$0xff] %v1321_v5  ;;  %s3454_s25 = scalar_lea.vmem %s3236_s27, %s1934_s4 [#allocation3]   ;;  %s3457_s26 = scalar_lea.vmem %s3260_s8, %s1934_s4  }
 0x20f   : >> { %1324 = vst [vmem:[%s2430_s21 + $0x20] sm:$0xff] %v1323_v6  ;;  %s3586_s22 = smov %s3454_s25 }
 0x210   : >> { %1326 = vst [vmem:[%s2430_s21 + $0x28] sm:$0xff] %v1325_v7 }
 0x211   : >> { %1338 = vst [vmem:[%s2430_s21 + $0x34] sm:$0xff] %v1325_v7 }
 0x212   : >> { %1340 = vst [vmem:[%s2430_s21 + $0x3c] sm:$0xff] %v1327_v1 }
 0x213   : >> { %1342 = vst [vmem:[%s2430_s21 + $0x44] sm:$0xff] %v1329_v2 }
 0x214   : >> { %1354 = vst [vmem:[%s2430_s21 + $0x50] sm:$0xff] %v1329_v2 }
 0x215   : >> { %1356 = vst [vmem:[%s2430_s21 + $0x58] sm:$0xff] %v1343_v3 }
 0x216   : >> { %1358 = vst [vmem:[%s2430_s21 + $0x60] sm:$0xff] %v1345_v4 }
 0x217   : >> { %1360 = vst [vmem:[%s2430_s21 + $0x68] sm:$0xff] %v1359_v8 }
 0x218   : >> { %1362 = vst [vmem:[%s2430_s21 + $0x70] sm:$0xff] %v1361_v9 }
 0x219   : >> { %1316 = vst [vmem:[%s2430_s21] sm:$0xff] %v1315_v10 }
 0x21a   : >> { %1318 = vst [vmem:[%s2430_s21 + $0x8] sm:$0xff] %v1317_v11 }
 0x21b   : >> { %1320 = vst [vmem:[%s2430_s21 + $0x10] sm:$0xff] %v1319_v12 }
 0x21c   : >> { %1332 = vst [vmem:[%s2430_s21 + $0x1c] sm:$0xff] %v1319_v12 }
 0x21d   : >> { %1334 = vst [vmem:[%s2430_s21 + $0x24] sm:$0xff] %v1321_v5 }
 0x21e   : >> { %1336 = vst [vmem:[%s2430_s21 + $0x2c] sm:$0xff] %v1323_v6 }
 0x21f   : >> { %1348 = vst [vmem:[%s2430_s21 + $0x38] sm:$0xff] %v1323_v6 }
 0x220   : >> { %1350 = vst [vmem:[%s2430_s21 + $0x40] sm:$0xff] %v1325_v7 }
 0x221   : >> { %1352 = vst [vmem:[%s2430_s21 + $0x48] sm:$0xff] %v1327_v1 }
 0x222   : >> { %1364 = vst [vmem:[%s2430_s21 + $0x54] sm:$0xff] %v1327_v1 }
 0x223   : >> { %1366 = vst [vmem:[%s2430_s21 + $0x5c] sm:$0xff] %v1329_v2 }
 0x224   : >> { %1368 = vst [vmem:[%s2430_s21 + $0x64] sm:$0xff] %v1343_v3 }
 0x225   : >> { %1370 = vst [vmem:[%s2430_s21 + $0x6c] sm:$0xff] %v1345_v4  ;;  %1311 = sbr.rel (!%p1308_p8) target bundleno = 521 (0x209), region = 257 }
 0x226   : >> { %1372 = vst [vmem:[%s2430_s21 + $0x74] sm:$0xff] %v1359_v8 }
 0x227   : >> { %1374 = vst [vmem:[%s2430_s21 + $0x7c] sm:$0xff] %v1361_v9 }
 0x228   : >> { %1376 = vst [vmem:[%s2430_s21 + $0x84] sm:$0xff] %v1375_v13 }
 0x229   : >> { %1378 = vst [vmem:[%s2430_s21 + $0x8c] sm:$0xff] %v1377_v14  ;;  %s3585_s21 = smov %s3457_s26 }
 0x22a PF: > { %s3505_s24 = sand.u32 7, %s1304_s11   ;;  %s2019_s12 = sshll.u32 %s3411_s5, 6 }
 0x22b   : > { %s3509_s30 = scalar_lea.vmem %s3236_s27, %s2019_s12 [#allocation3]   ;;  %s3512_s29 = scalar_lea.vmem %s3260_s8, %s2019_s12  }
 0x22c   : > { %p1939_p9 = scmp.le.s32.totalorder %s3505_s24, 0 }
 0x22d   : > { %s3588_s6 = smov (!%p1939_p9), %s3512_s29  ;;  %s3589_s7 = smov (!%p1939_p9), %s3509_s30 }
 0x22e   : > { %1591 = sbr.rel (%p1939_p9) target bundleno = 571 (0x23b), region = 262  ;;  %s2452_s9 = smov (!%p1939_p9), 0  }
 0x22f   : > { %s2456_s15 = smov (!%p1939_p9), 0  }
 0x233 LB: >> { %v1402_v15 = vld [vmem:[%s2450_s7] sm:$0xff]  ;;  %v1404_v16 = vld [vmem:[%s2450_s7 + $0x10] sm:$0xff]  ;;  %s1410_s11 = sadd.s32 1, %s2454_s9  ;;  %s1396_s15 = sadd.s32 1, %s2458_s15   ;;  %s2458_s15 = sphi %s2456_s15, %s1396_s15   ;;  %s2454_s9 = sphi %s2452_s9, %s2453_s9   ;;  %s2450_s7 = sphi %s3589_s7, %s1415_s7   ;;  %s2446_s6 = sphi %s3588_s6, %s1416_s6  }
 0x234   : >> { %v1406_v17 = vld [vmem:[%s2450_s7 + $0x20] sm:$0xff]  ;;  %1403 = vst [vmem:[%s2446_s6] sm:$0xff] %v1402_v15  ;;  %v1408_v18 = vld [vmem:[%s2450_s7 + $0x30] sm:$0xff]  ;;  %p1411_p10 = scmp.ge.s32.totalorder %s1410_s11, %s3505_s24  ;;  %p1395_p11 = scmp.ge.s32.totalorder %s1396_s15, %s3505_s24 }
 0x235   : >> { %1405 = vst [vmem:[%s2446_s6 + $0x1c] sm:$0xff] %v1404_v16 }
 0x236   : >> { %1407 = vst [vmem:[%s2446_s6 + $0x38] sm:$0xff] %v1406_v17  ;;  %s3608_s11 = smov (%p1411_p10, %s1410_s11), 0  ;;  %1398 = sbr.rel (!%p1395_p11) target bundleno = 563 (0x233), region = 268 }
 0x237   : >> { %1409 = vst [vmem:[%s2446_s6 + $0x54] sm:$0xff] %v1408_v18  ;;  %s1940_s5 = sshll.u32 %s3608_s11, 3  ;;  %s2453_s9 = smov %s3608_s11  }
 0x238   : >> { %s1415_s7 = scalar_lea.vmem %s3509_s30, %s1940_s5 [#allocation3]   ;;  %s1416_s6 = scalar_lea.vmem %s3512_s29, %s1940_s5  }
 0x23b PF: > { %s2463_s21 = smov 1  }
 0x23c   : > { %s1417_s22 = sshll.u32 %s2463_s21, %s3266_s20 }
 0x23d   : > { %s1942_s23 = sadd.s32 4294967295, %s1417_s22 }
 0x23e   : > { %v1427_v20 = vld [vmem:[%s3404_s17] sm:%s1942_s23]  ;;  %v1429_v21 = vld [vmem:[%s3404_s17 + $0x10] sm:%s1942_s23] }
 0x23f   : > { %1428 = vst [vmem:[%s3407_s18] sm:%s1942_s23] %v1427_v20  ;;  %v1431_v22 = vld [vmem:[%s3404_s17 + $0x20] sm:%s1942_s23] }
 0x240   : > { %1430 = vst [vmem:[%s3407_s18 + $0x1c] sm:%s1942_s23] %v1429_v21  ;;  %v1433_v23 = vld [vmem:[%s3404_s17 + $0x30] sm:%s1942_s23] }
 0x241   : > { %1432 = vst [vmem:[%s3407_s18 + $0x38] sm:%s1942_s23] %v1431_v22 }
 0x242   : > { %1434 = vst [vmem:[%s3407_s18 + $0x54] sm:%s1942_s23] %v1433_v23 }
 0x243 PF: > { %p1943_p5 = scmp.ge.u32.totalorder %s3262_s10, 8 }
 0x244   : > { %s2464_s14 = smov (!%p1943_p5), 1  }
 0x245   : > { %1159 = sbr.rel (%p1943_p5) target bundleno = 591 (0x24f), region = 100  ;;  %s1160_s20 = sshll.u32 (!%p1943_p5), %s2464_s14, %s3262_s10 }
 0x246   : > { %s1944_s28 = sadd.s32 (!%p1943_p5), 4294967295, %s1160_s20 }
 0x24a   : > { %v1170_v24 = vld [vmem:[%s3236_s27] sm:%s1944_s28]  ;;  %v1172_v19 = vld [vmem:[%s3236_s27 + $0x10] sm:%s1944_s28] }
 0x24b   : > { %1171 = vst [vmem:[%s3260_s8] sm:%s1944_s28] %v1170_v24  ;;  %v1174_v25 = vld [vmem:[%s3236_s27 + $0x20] sm:%s1944_s28] }
 0x24c   : > { %1173 = vst [vmem:[%s3260_s8 + $0x1c] sm:%s1944_s28] %v1172_v19  ;;  %v1176_v26 = vld [vmem:[%s3236_s27 + $0x30] sm:%s1944_s28] }
 0x24d   : > { %1175 = vst [vmem:[%s3260_s8 + $0x38] sm:%s1944_s28] %v1174_v25 }
 0x24e   : > { %1177 = vst [vmem:[%s3260_s8 + $0x54] sm:%s1944_s28] %v1176_v26 }
 0x24f PF: > { %p10_p12 = scmp.ge.s32.totalorder %s2504_s16, 4   ;;  %s3590_s12 = smov %s2358_s13 }
 0x250   : > { %s3591_s13 = smov %s2514_s19  ;;  %s3592_s14 = smov %s2504_s16 }
 0x251   :  { %12 = sbr.rel (!%p10_p12) target bundleno = 2 (0x2), region = 279 }

// kernel: forward.5
= control target key start
LH: loop header
LB: loop body
LE: loop exit
PB: predicated region body
PF: predicated region fallthrough
CT: control target
= control target key end

     0   :  { %s1290_s12 = smov 0   ;;  %s1292_s13 = smov 0   ;;  %s1580_s0 = inlined_call_operand.vmem [shape: bf16[32,512], index: 0, kind: input, shape index: {}]   ;;  %s1581_s1 = inlined_call_operand.vmem [shape: bf16[512,162], index: 1, kind: input, shape index: {}]   ;;  %s1582_s2 = inlined_call_operand.vmem [shape: f32[32,1], index: 2, kind: input, shape index: {}]   ;;  %s1583_s3 = inlined_call_operand.vmem [shape: bf16[32,162], index: 3, kind: output, shape index: {}]  }
   0x1   :  { %s1294_s14 = smov 0  }
   0x2 LB: > { %s994_s15 = sadd.s32 4294967295, %s1267_s14   ;;  %s1307_s16 = sadd.s32 1, %s1267_s14   ;;  %s1267_s14 = sphi %s1294_s14, %s1587_s14   ;;  %s1263_s13 = sphi %s1292_s13, %s1586_s13   ;;  %s1259_s12 = sphi %s1290_s12, %s1585_s12  }
   0x3   : > { %s38_s17 = ssub.s32 %s1267_s14, %s1307_s16  ;;  %s41_s18 = sadd.s32 1, %s1263_s13 }
   0x4   : > { %p39_p0 = scmp.eq.s32.totalorder %s38_s17, 0  ;;  %p48_p1 = scmp.ne.s32.totalorder %s1263_s13, %s1259_s12 }
   0x5   : > { %p49_p2 = scmp.eq.s32.totalorder %s1267_s14, 0  ;;  %p99_p3 = scmp.eq.s32.totalorder %s994_s15, 1 }
   0x6   : > { %s1318_s19 = scalar_select %p39_p0, %s1263_s13, %s41_s18  }
   0x7   : > { %p50_p4 = por %p49_p2, %p48_p1  ;;  %p1320_p5 = por %p99_p3, %p48_p1 }
   0x8   : > { %p997_p6 = scmp.ge.s32.totalorder %s1267_s14, 2 }
   0xa   : > { %127 = sbr.rel (%p997_p6) target bundleno = 83 (0x53), region = 24 }
   0xf   : > { %130 = sbr.rel (!%p50_p4) target bundleno = 83 (0x53), region = 28  ;;  %s132_s21 = sand.u32 (%p50_p4), 1, %s1263_s13  }
  0x10   : > { %s999_s22 = sshll.u32 (%p50_p4), %s1267_s14, 2  ;;  %s998_s23 = sshll.u32 (%p50_p4), %s132_s21, 8 }
  0x11   : > { %s1330_s26 = scalar_lea.vmem (%p50_p4), %s1581_s1, %s999_s22  ;;  %s1334_s27 = scalar_lea.vmem (%p50_p4), [#allocation2], %s998_s23 }
  0x12   : > { %v153_v0 = vld [vmem:[%s1330_s26] sm:$0xf] (%p50_p4)  ;;  %v155_v1 = vld [vmem:[%s1330_s26 + $0x8] sm:$0xf] (%p50_p4)  ;;  %v157_v2 = vld [vmem:[%s1330_s26 + $0x10] sm:$0xf] (%p50_p4) }
  0x13   : > { %154 = vst [vmem:[%s1334_s27] sm:$0xf] (%p50_p4), %v153_v0  ;;  %v159_v3 = vld [vmem:[%s1330_s26 + $0x18] sm:$0xf] (%p50_p4)  ;;  %v161_v4 = vld [vmem:[%s1330_s26 + $0x20] sm:$0xf] (%p50_p4) }
  0x14   : > { %156 = vst [vmem:[%s1334_s27 + $0x4] sm:$0xf] %v155_v1  ;;  %v163_v5 = vld [vmem:[%s1330_s26 + $0x28] sm:$0xf]  ;;  %v165_v6 = vld [vmem:[%s1330_s26 + $0x30] sm:$0xf] }
  0x15   : > { %158 = vst [vmem:[%s1334_s27 + $0x8] sm:$0xf] %v157_v2  ;;  %v167_v7 = vld [vmem:[%s1330_s26 + $0x38] sm:$0xf]  ;;  %v169_v8 = vld [vmem:[%s1330_s26 + $0x40] sm:$0xf] }
  0x16   : > { %160 = vst [vmem:[%s1334_s27 + $0xc] sm:$0xf] %v159_v3  ;;  %v171_v9 = vld [vmem:[%s1330_s26 + $0x48] sm:$0xf]  ;;  %v173_v10 = vld [vmem:[%s1330_s26 + $0x50] sm:$0xf] }
  0x17   : > { %162 = vst [vmem:[%s1334_s27 + $0x10] sm:$0xf] %v161_v4  ;;  %v175_v11 = vld [vmem:[%s1330_s26 + $0x58] sm:$0xf]  ;;  %v177_v12 = vld [vmem:[%s1330_s26 + $0x60] sm:$0xf] }
  0x18   : > { %164 = vst [vmem:[%s1334_s27 + $0x14] sm:$0xf] %v163_v5  ;;  %v179_v13 = vld [vmem:[%s1330_s26 + $0x68] sm:$0xf]  ;;  %v181_v14 = vld [vmem:[%s1330_s26 + $0x70] sm:$0xf] }
  0x19   : > { %166 = vst [vmem:[%s1334_s27 + $0x18] sm:$0xf] %v165_v6  ;;  %v183_v15 = vld [vmem:[%s1330_s26 + $0x78] sm:$0xf]  ;;  %v185_v16 = vld [vmem:[%s1330_s26 + $0x80] sm:$0xf] }
  0x1a   : > { %168 = vst [vmem:[%s1334_s27 + $0x1c] sm:$0xf] %v167_v7  ;;  %v187_v17 = vld [vmem:[%s1330_s26 + $0x88] sm:$0xf]  ;;  %v189_v18 = vld [vmem:[%s1330_s26 + $0x90] sm:$0xf] }
  0x1b   : > { %170 = vst [vmem:[%s1334_s27 + $0x20] sm:$0xf] %v169_v8  ;;  %v191_v19 = vld [vmem:[%s1330_s26 + $0x98] sm:$0xf]  ;;  %v193_v20 = vld [vmem:[%s1330_s26 + $0xa0] sm:$0xf] }
  0x1c   : > { %172 = vst [vmem:[%s1334_s27 + $0x24] sm:$0xf] %v171_v9  ;;  %v195_v21 = vld [vmem:[%s1330_s26 + $0xa8] sm:$0xf]  ;;  %v197_v22 = vld [vmem:[%s1330_s26 + $0xb0] sm:$0xf] }
  0x1d   : > { %174 = vst [vmem:[%s1334_s27 + $0x28] sm:$0xf] %v173_v10  ;;  %v199_v23 = vld [vmem:[%s1330_s26 + $0xb8] sm:$0xf]  ;;  %v201_v24 = vld [vmem:[%s1330_s26 + $0xc0] sm:$0xf] }
  0x1e   : > { %176 = vst [vmem:[%s1334_s27 + $0x2c] sm:$0xf] %v175_v11  ;;  %v203_v25 = vld [vmem:[%s1330_s26 + $0xc8] sm:$0xf]  ;;  %v205_v26 = vld [vmem:[%s1330_s26 + $0xd0] sm:$0xf] }
  0x1f   : > { %178 = vst [vmem:[%s1334_s27 + $0x30] sm:$0xf] %v177_v12  ;;  %v207_v27 = vld [vmem:[%s1330_s26 + $0xd8] sm:$0xf]  ;;  %v209_v28 = vld [vmem:[%s1330_s26 + $0xe0] sm:$0xf] }
  0x20   : > { %180 = vst [vmem:[%s1334_s27 + $0x34] sm:$0xf] %v179_v13  ;;  %v211_v29 = vld [vmem:[%s1330_s26 + $0xe8] sm:$0xf]  ;;  %v213_v30 = vld [vmem:[%s1330_s26 + $0xf0] sm:$0xf] }
  0x21   : > { %182 = vst [vmem:[%s1334_s27 + $0x38] sm:$0xf] %v181_v14  ;;  %v215_v31 = vld [vmem:[%s1330_s26 + $0xf8] sm:$0xf]  ;;  %v217_v32 = vld [vmem:[%s1330_s26 + $0x100] sm:$0xf] }
  0x22   : > { %184 = vst [vmem:[%s1334_s27 + $0x3c] sm:$0xf] %v183_v15  ;;  %v219_v33 = vld [vmem:[%s1330_s26 + $0x108] sm:$0xf]  ;;  %v221_v34 = vld [vmem:[%s1330_s26 + $0x110] sm:$0xf] }
  0x23   : > { %186 = vst [vmem:[%s1334_s27 + $0x40] sm:$0xf] %v185_v16  ;;  %v223_v35 = vld [vmem:[%s1330_s26 + $0x118] sm:$0xf]  ;;  %v225_v36 = vld [vmem:[%s1330_s26 + $0x120] sm:$0xf] }
  0x24   : > { %188 = vst [vmem:[%s1334_s27 + $0x44] sm:$0xf] %v187_v17  ;;  %v227_v37 = vld [vmem:[%s1330_s26 + $0x128] sm:$0xf]  ;;  %v229_v38 = vld [vmem:[%s1330_s26 + $0x130] sm:$0xf] }
  0x25   : > { %190 = vst [vmem:[%s1334_s27 + $0x48] sm:$0xf] %v189_v18  ;;  %v231_v39 = vld [vmem:[%s1330_s26 + $0x138] sm:$0xf]  ;;  %v233_v40 = vld [vmem:[%s1330_s26 + $0x140] sm:$0xf] }
  0x26   : > { %192 = vst [vmem:[%s1334_s27 + $0x4c] sm:$0xf] %v191_v19  ;;  %v235_v41 = vld [vmem:[%s1330_s26 + $0x148] sm:$0xf]  ;;  %v237_v42 = vld [vmem:[%s1330_s26 + $0x150] sm:$0xf] }
  0x27   : > { %194 = vst [vmem:[%s1334_s27 + $0x50] sm:$0xf] %v193_v20  ;;  %v239_v43 = vld [vmem:[%s1330_s26 + $0x158] sm:$0xf]  ;;  %v241_v44 = vld [vmem:[%s1330_s26 + $0x160] sm:$0xf] }
  0x28   : > { %196 = vst [vmem:[%s1334_s27 + $0x54] sm:$0xf] %v195_v21  ;;  %v243_v45 = vld [vmem:[%s1330_s26 + $0x168] sm:$0xf]  ;;  %v245_v46 = vld [vmem:[%s1330_s26 + $0x170] sm:$0xf] }
  0x29   : > { %198 = vst [vmem:[%s1334_s27 + $0x58] sm:$0xf] %v197_v22  ;;  %v247_v47 = vld [vmem:[%s1330_s26 + $0x178] sm:$0xf]  ;;  %v249_v48 = vld [vmem:[%s1330_s26 + $0x180] sm:$0xf] }
  0x2a   : > { %200 = vst [vmem:[%s1334_s27 + $0x5c] sm:$0xf] %v199_v23  ;;  %v251_v49 = vld [vmem:[%s1330_s26 + $0x188] sm:$0xf]  ;;  %v253_v50 = vld [vmem:[%s1330_s26 + $0x190] sm:$0xf] }
  0x2b   : > { %202 = vst [vmem:[%s1334_s27 + $0x60] sm:$0xf] %v201_v24  ;;  %v255_v51 = vld [vmem:[%s1330_s26 + $0x198] sm:$0xf]  ;;  %v257_v52 = vld [vmem:[%s1330_s26 + $0x1a0] sm:$0xf] }
  0x2c   : > { %204 = vst [vmem:[%s1334_s27 + $0x64] sm:$0xf] %v203_v25  ;;  %v259_v53 = vld [vmem:[%s1330_s26 + $0x1a8] sm:$0xf]  ;;  %v261_v54 = vld [vmem:[%s1330_s26 + $0x1b0] sm:$0xf] }
  0x2d   : > { %206 = vst [vmem:[%s1334_s27 + $0x68] sm:$0xf] %v205_v26  ;;  %v263_v55 = vld [vmem:[%s1330_s26 + $0x1b8] sm:$0xf]  ;;  %v265_v56 = vld [vmem:[%s1330_s26 + $0x1c0] sm:$0xf] }
  0x2e   : > { %208 = vst [vmem:[%s1334_s27 + $0x6c] sm:$0xf] %v207_v27  ;;  %v267_v57 = vld [vmem:[%s1330_s26 + $0x1c8] sm:$0xf]  ;;  %v269_v58 = vld [vmem:[%s1330_s26 + $0x1d0] sm:$0xf] }
  0x2f   : > { %210 = vst [vmem:[%s1334_s27 + $0x70] sm:$0xf] %v209_v28  ;;  %v271_v59 = vld [vmem:[%s1330_s26 + $0x1d8] sm:$0xf]  ;;  %v273_v60 = vld [vmem:[%s1330_s26 + $0x1e0] sm:$0xf] }
  0x30   : > { %212 = vst [vmem:[%s1334_s27 + $0x74] sm:$0xf] %v211_v29  ;;  %v275_v61 = vld [vmem:[%s1330_s26 + $0x1e8] sm:$0xf]  ;;  %v277_v62 = vld [vmem:[%s1330_s26 + $0x1f0] sm:$0xf] }
  0x31   : > { %214 = vst [vmem:[%s1334_s27 + $0x78] sm:$0xf] %v213_v30  ;;  %v279_v63 = vld [vmem:[%s1330_s26 + $0x1f8] sm:$0xf] }
  0x32   : > { %216 = vst [vmem:[%s1334_s27 + $0x7c] sm:$0xf] %v215_v31 }
  0x33   : > { %218 = vst [vmem:[%s1334_s27 + $0x80] sm:$0xf] %v217_v32 }
  0x34   : > { %220 = vst [vmem:[%s1334_s27 + $0x84] sm:$0xf] %v219_v33 }
  0x35   : > { %222 = vst [vmem:[%s1334_s27 + $0x88] sm:$0xf] %v221_v34 }
  0x36   : > { %224 = vst [vmem:[%s1334_s27 + $0x8c] sm:$0xf] %v223_v35 }
  0x37   : > { %226 = vst [vmem:[%s1334_s27 + $0x90] sm:$0xf] %v225_v36 }
  0x38   : > { %228 = vst [vmem:[%s1334_s27 + $0x94] sm:$0xf] %v227_v37 }
  0x39   : > { %230 = vst [vmem:[%s1334_s27 + $0x98] sm:$0xf] %v229_v38 }
  0x3a   : > { %232 = vst [vmem:[%s1334_s27 + $0x9c] sm:$0xf] %v231_v39 }
  0x3b   : > { %234 = vst [vmem:[%s1334_s27 + $0xa0] sm:$0xf] %v233_v40 }
  0x3c   : > { %236 = vst [vmem:[%s1334_s27 + $0xa4] sm:$0xf] %v235_v41 }
  0x3d   : > { %238 = vst [vmem:[%s1334_s27 + $0xa8] sm:$0xf] %v237_v42 }
  0x3e   : > { %240 = vst [vmem:[%s1334_s27 + $0xac] sm:$0xf] %v239_v43 }
  0x3f   : > { %242 = vst [vmem:[%s1334_s27 + $0xb0] sm:$0xf] %v241_v44 }
  0x40   : > { %244 = vst [vmem:[%s1334_s27 + $0xb4] sm:$0xf] %v243_v45 }
  0x41   : > { %246 = vst [vmem:[%s1334_s27 + $0xb8] sm:$0xf] %v245_v46 }
  0x42   : > { %248 = vst [vmem:[%s1334_s27 + $0xbc] sm:$0xf] %v247_v47 }
  0x43   : > { %250 = vst [vmem:[%s1334_s27 + $0xc0] sm:$0xf] %v249_v48 }
  0x44   : > { %252 = vst [vmem:[%s1334_s27 + $0xc4] sm:$0xf] %v251_v49 }
  0x45   : > { %254 = vst [vmem:[%s1334_s27 + $0xc8] sm:$0xf] %v253_v50 }
  0x46   : > { %256 = vst [vmem:[%s1334_s27 + $0xcc] sm:$0xf] %v255_v51 }
  0x47   : > { %258 = vst [vmem:[%s1334_s27 + $0xd0] sm:$0xf] %v257_v52 }
  0x48   : > { %260 = vst [vmem:[%s1334_s27 + $0xd4] sm:$0xf] %v259_v53 }
  0x49   : > { %262 = vst [vmem:[%s1334_s27 + $0xd8] sm:$0xf] %v261_v54 }
  0x4a   : > { %264 = vst [vmem:[%s1334_s27 + $0xdc] sm:$0xf] %v263_v55 }
  0x4b   : > { %266 = vst [vmem:[%s1334_s27 + $0xe0] sm:$0xf] %v265_v56 }
  0x4c   : > { %268 = vst [vmem:[%s1334_s27 + $0xe4] sm:$0xf] %v267_v57 }
  0x4d   : > { %270 = vst [vmem:[%s1334_s27 + $0xe8] sm:$0xf] %v269_v58 }
  0x4e   : > { %272 = vst [vmem:[%s1334_s27 + $0xec] sm:$0xf] %v271_v59 }
  0x4f   : > { %274 = vst [vmem:[%s1334_s27 + $0xf0] sm:$0xf] %v273_v60 }
  0x50   : > { %276 = vst [vmem:[%s1334_s27 + $0xf4] sm:$0xf] %v275_v61 }
  0x51   : > { %278 = vst [vmem:[%s1334_s27 + $0xf8] sm:$0xf] %v277_v62 }
  0x52   : > { %280 = vst [vmem:[%s1334_s27 + $0xfc] sm:$0xf] %v279_v63 }
  0x53 PF: > { %p1000_p7 = scmp.ge.s32.totalorder %s1267_s14, 1  ;;  %p431_p8 = scmp.lt.s32.totalorder %s1267_s14, 3 }
  0x55   : > { %p432_p9 = pnand %p1000_p7, %p431_p8 }
  0x56   : > { %s438_s28 = sand.u32 (!%p432_p9), 1, %s1259_s12  }
  0x57   : > { %435 = sbr.rel (%p432_p9) target bundleno = 300 (0x12c), region = 69  ;;  %s1001_s29 = sshll.u32 (!%p432_p9), %s438_s28, 8 }
  0x58   : > { %s1467_s30 = scalar_lea.vmem (!%p432_p9), [#allocation2], %s1001_s29  ;;  %s1002_s6 = sshll.u32 (!%p432_p9), %s438_s28, 4 }
  0x59   : > { %s459_s7 = scalar_lea.vmem (!%p432_p9), [#allocation3], %s1002_s6 }
  0x5c   : > { %v1182_v0 = vld [vmem:[%s1467_s30 + $0x38] sm:$0xff]  ;;  %v1181_v4 = vld [vmem:[%s1467_s30 + $0x30] sm:$0xff]  ;;  %v1269_v8 = vmov 0   ;;  %v1180_v9 = vld [vmem:[%s1467_s30 + $0x28] sm:$0xff]  ;;  %s1164_s12 = sshll.u32 (%p1320_p5), %s994_s15, 2 }
  0x5d   : > { %v1190_v1 = vld [vmem:[%s1467_s30 + $0x78] sm:$0xff]  ;;  %788 = vmatpush.bf16.msra.mxu0 %v1182_v0  ;;  %v1189_v5 = vld [vmem:[%s1467_s30 + $0x70] sm:$0xff]  ;;  %1243 = vset.pattern.permute.xlu0 %v1269_v8  ;;  %v1188_v10 = vld [vmem:[%s1467_s30 + $0x68] sm:$0xff]  ;;  %s884_s9 = scalar_lea.vmem (%p1320_p5), %s1583_s3, %s1164_s12 }
  0x5e   : > { %v1198_v2 = vld [vmem:[%s1467_s30 + $0xb8] sm:$0xff]  ;;  %807 = vmatpush.bf16.msra.mxu1 %v1190_v1  ;;  %v1197_v6 = vld [vmem:[%s1467_s30 + $0xb0] sm:$0xff]  ;;  %1244 = vset.pattern.permute.xlu1 %v1269_v8  ;;  %v1196_v11 = vld [vmem:[%s1467_s30 + $0xa8] sm:$0xff] }
  0x5f   : > { %v1206_v3 = vld [vmem:[%s1467_s30 + $0xf8] sm:$0xff]  ;;  %826 = vmatpush.bf16.msra.mxu2 %v1198_v2  ;;  %v1205_v7 = vld [vmem:[%s1467_s30 + $0xf0] sm:$0xff]  ;;  %v1204_v12 = vld [vmem:[%s1467_s30 + $0xe8] sm:$0xff] }
  0x60   : > { %845 = vmatpush.bf16.msra.mxu3 %v1206_v3  ;;  %v1179_v13 = vld [vmem:[%s1467_s30 + $0x20] sm:$0xff]  ;;  %v1178_v18 = vld [vmem:[%s1467_s30 + $0x18] sm:$0xff]  ;;  %v1177_v22 = vld [vmem:[%s1467_s30 + $0x10] sm:$0xff] }
  0x61   : > { %789 = vmatpush.bf16.msra.mxu0 %v1181_v4  ;;  %v1187_v14 = vld [vmem:[%s1467_s30 + $0x60] sm:$0xff]  ;;  %v1186_v19 = vld [vmem:[%s1467_s30 + $0x58] sm:$0xff]  ;;  %v1185_v23 = vld [vmem:[%s1467_s30 + $0x50] sm:$0xff] }
  0x62   : > { %808 = vmatpush.bf16.msra.mxu1 %v1189_v5  ;;  %v1195_v15 = vld [vmem:[%s1467_s30 + $0xa0] sm:$0xff]  ;;  %v1194_v20 = vld [vmem:[%s1467_s30 + $0x98] sm:$0xff]  ;;  %v533_v24 = vld [vmem:[%s1582_s2 + $0x8] sm:$0xff] }
  0x63   : > { %827 = vmatpush.bf16.msra.mxu2 %v1197_v6  ;;  %v1203_v16 = vld [vmem:[%s1467_s30 + $0xe0] sm:$0xff]  ;;  %v1202_v21 = vld [vmem:[%s1467_s30 + $0xd8] sm:$0xff]  ;;  %v534_v25 = vld [vmem:[%s1582_s2 + $0x10] sm:$0xff] }
  0x64   : > { %846 = vmatpush.bf16.msra.mxu3 %v1205_v7  ;;  %v532_v17 = vld [vmem:[%s1582_s2] sm:$0xff]  ;;  %v1193_v26 = vld [vmem:[%s1467_s30 + $0x90] sm:$0xff]  ;;  %548 = vperm.xlu1 %1244, %v534_v25   ;;  %v1176_v28 = vld [vmem:[%s1467_s30 + $0x8] sm:$0xff] }
  0x65   : > { %790 = vmatpush.bf16.msra.mxu0 %v1180_v9  ;;  %538 = vperm.xlu0 %1243, %v532_v17   ;;  %v1201_v27 = vld [vmem:[%s1467_s30 + $0xd0] sm:$0xff]  ;;  %v1184_v29 = vld [vmem:[%s1467_s30 + $0x48] sm:$0xff]  ;;  %v1175_v32 = vld [vmem:[%s1467_s30] sm:$0xff] }
  0x66   : > { %809 = vmatpush.bf16.msra.mxu1 %v1188_v10  ;;  %v1192_v30 = vld [vmem:[%s1467_s30 + $0x88] sm:$0xff]  ;;  %v1183_v33 = vld [vmem:[%s1467_s30 + $0x40] sm:$0xff]  ;;  %v1169_v35 = vld [vmem:[%s1580_s0 + $0xc] sm:$0xf0] }
  0x67   : > { %828 = vmatpush.bf16.msra.mxu2 %v1196_v11  ;;  %v1200_v31 = vld [vmem:[%s1467_s30 + $0xc8] sm:$0xff]  ;;  %v1005_v34 = vld [vmem:[%s1580_s0] sm:$0xf]  ;;  %v535_v38 = vld [vmem:[%s1582_s2 + $0x18] sm:$0xff] }
  0x68   : > { %847 = vmatpush.bf16.msra.mxu3 %v1204_v12  ;;  %v1191_v36 = vld [vmem:[%s1467_s30 + $0x80] sm:$0xff]  ;;  %v1007_v40 = vld [vmem:[%s1580_s0 + $0x10] sm:$0xf0]  ;;  %v1013_v41 = vld [vmem:[%s1580_s0 + $0x8] sm:$0xf]  ;;  %v1006_v45 = vor.u32 %v1169_v35, %v1005_v34 }
  0x69   : > { %791 = vmatpush.bf16.msra.mxu0 %v1179_v13  ;;  %v1199_v37 = vld [vmem:[%s1467_s30 + $0xc0] sm:$0xff]  ;;  %v1170_v42 = vld [vmem:[%s1580_s0 + $0x14] sm:$0xf0]  ;;  %v1168_v43 = vld [vmem:[%s1580_s0 + $0xc] sm:$0xf] }
  0x6a   : > { %810 = vmatpush.bf16.msra.mxu1 %v1187_v14  ;;  %v1167_v39 = vld [vmem:[%s1580_s0 + $0x4] sm:$0xf]  ;;  %v1015_v44 = vld [vmem:[%s1580_s0 + $0x18] sm:$0xf0]  ;;  %v1014_v47 = vor.u32 %v1170_v42, %v1013_v41  ;;  %v1021_v49 = vld [vmem:[%s1580_s0 + $0x20] sm:$0xf] }
  0x6b   : > { %829 = vmatpush.bf16.msra.mxu2 %v1195_v15  ;;  %v1010_v46 = vor.u32 %v1167_v39, %v1007_v40  ;;  %v1018_v48 = vor.u32 %v1168_v43, %v1015_v44  ;;  %v1173_v50 = vld [vmem:[%s1580_s0 + $0x2c] sm:$0xf0]  ;;  %v1171_v51 = vld [vmem:[%s1580_s0 + $0x24] sm:$0xf]  ;;  %v1023_v52 = vld [vmem:[%s1580_s0 + $0x30] sm:$0xf0] }
  0x6c   : > { %848 = vmatpush.bf16.msra.mxu3 %v1203_v16  ;;  %553 = vperm.xlu1 %1244, %v535_v38   ;;  %v1029_v53 = vld [vmem:[%s1580_s0 + $0x28] sm:$0xf]  ;;  %v1174_v54 = vld [vmem:[%s1580_s0 + $0x34] sm:$0xf0]  ;;  %v1172_v55 = vld [vmem:[%s1580_s0 + $0x2c] sm:$0xf]  ;;  %v1022_v57 = vor.u32 %v1173_v50, %v1021_v49  ;;  %v1026_v58 = vor.u32 %v1171_v51, %v1023_v52 }
  0x6d   : > { %792 = vmatpush.bf16.msra.mxu0 %v1178_v18  ;;  %543 = vperm.xlu0 %1243, %v533_v24   ;;  %v1031_v56 = vld [vmem:[%s1580_s0 + $0x38] sm:$0xf0]  ;;  %v1030_v59 = vor.u32 %v1174_v54, %v1029_v53 }
  0x6e   : > { %811 = vmatpush.bf16.msra.mxu1 %v1186_v19  ;;  %v1034_v60 = vor.u32 %v1172_v55, %v1031_v56 }
  0x6f   : > { %830 = vmatpush.bf16.msra.mxu2 %v1194_v20 }
  0x70   : > { %849 = vmatpush.bf16.msra.mxu3 %v1202_v21 }
  0x71   : > { %793 = vmatpush.bf16.msra.mxu0 %v1177_v22 }
  0x72   : > { %812 = vmatpush.bf16.msra.mxu1 %v1185_v23 }
  0x73   : > { %831 = vmatpush.bf16.msra.mxu2 %v1193_v26 }
  0x74   : > { %850 = vmatpush.bf16.msra.mxu3 %v1201_v27 }
  0x75   : > { %794 = vmatpush.bf16.msra.mxu0 %v1176_v28 }
  0x76   : > { %813 = vmatpush.bf16.msra.mxu1 %v1184_v29 }
  0x77   : > { %832 = vmatpush.bf16.msra.mxu2 %v1192_v30 }
  0x78   : > { %851 = vmatpush.bf16.msra.mxu3 %v1200_v31 }
  0x79   : > { %795 = vmatpush.bf16.msra.mxu0 %v1175_v32 }
  0x7a   : > { %814 = vmatpush.bf16.msra.mxu1 %v1183_v33 }
  0x7b   : > { %833 = vmatpush.bf16.msra.mxu2 %v1191_v36 }
  0x7c   : > { %852 = vmatpush.bf16.msra.mxu3 %v1199_v37  ;;  %796 = vmatmul.bf16.vlgmr.msra.gmra.mxu0 %v1006_v45 }
  0x7d   : > { %815 = vmatmul.bf16.vlgmr.msra.gmra.mxu1 %v1010_v46 }
  0x7e   : > { %834 = vmatmul.bf16.vlgmr.msra.gmra.mxu2 %v1014_v47 }
  0x7f   : > { %853 = vmatmul.bf16.vlgmr.msra.gmra.mxu3 %v1018_v48 }
  0x8c   : > { %801 = vmatmul.bf16.gmra.mxu0 %v1022_v57 }
  0x8d   : > { %820 = vmatmul.bf16.gmra.mxu1 %v1026_v58 }
  0x8e   : > { %839 = vmatmul.bf16.gmra.mxu2 %v1030_v59 }
  0x8f   : > { %858 = vmatmul.bf16.gmra.mxu3 %v1034_v60 }
  0xd6   : > { %v549_v10 = vpop.permute.xlu1 %548 }
  0xd7   : > { %v539_v61 = vpop.permute.xlu0 %538 }
  0xde   : > { %v554_v26 = vpop.permute.xlu1 %553 }
  0xdf   : > { %v544_v1 = vpop.permute.xlu0 %543 }
  0xf9   : > { %v797_v62 = vpop.f32.mrf.mxu0 }
  0xfa   : > { %v816_v63 = vpop.f32.mrf.mxu1  ;;  %v798_v0 = vadd.f32 %v797_v62, %v539_v61 }
  0xfc   : > { %v817_v4 = vadd.f32 %v816_v63, %v798_v0 }
 0x101   : > { %v835_v2 = vpop.f32.mrf.mxu2  ;;  %v799_v5 = vpop.f32.mrf.mxu0 }
 0x102   : > { %v854_v3 = vpop.f32.mrf.mxu3  ;;  %v818_v6 = vpop.f32.mrf.mxu1  ;;  %v800_v7 = vadd.f32 %v799_v5, %v544_v1  ;;  %v836_v8 = vadd.f32 %v835_v2, %v817_v4 }
 0x104   : > { %v819_v9 = vadd.f32 %v818_v6, %v800_v7  ;;  %v855_v13 = vadd.f32 %v854_v3, %v836_v8 }
 0x106   : > { %v864_v18 = vmax.f32 %v855_v13, 0.0 }
 0x109   : > { %v837_v11 = vpop.f32.mrf.mxu2  ;;  %v802_v15 = vpop.f32.mrf.mxu0 }
 0x10a   : > { %v856_v12 = vpop.f32.mrf.mxu3  ;;  %v838_v14 = vadd.f32 %v837_v11, %v819_v9  ;;  %v821_v17 = vpop.f32.mrf.mxu1  ;;  %v803_v20 = vadd.f32 %v802_v15, %v549_v10 }
 0x10c   : > { %v857_v16 = vadd.f32 %v856_v12, %v838_v14  ;;  %v822_v24 = vadd.f32 %v821_v17, %v803_v20 }
 0x10e   : > { %v865_v19 = vmax.f32 %v857_v16, 0.0 }
 0x110   : > { %v1210_v21 = vpack.c.bf16 %v865_v19, %v864_v18 }
 0x111   : > { %v840_v22 = vpop.f32.mrf.mxu2  ;;  %v804_v25 = vpop.f32.mrf.mxu0 }
 0x112   : > { %v859_v23 = vpop.f32.mrf.mxu3  ;;  %1211 = vst [vmem:[%s459_s7] sm:$0xff] %v1210_v21   ;;  %v805_v27 = vadd.f32 %v804_v25, %v554_v26  ;;  %v841_v28 = vadd.f32 %v840_v22, %v822_v24  ;;  %v823_v29 = vpop.f32.mrf.mxu1 }
 0x114   : > { %v824_v30 = vadd.f32 %v823_v29, %v805_v27  ;;  %v860_v32 = vadd.f32 %v859_v23, %v841_v28 }
 0x116   : > { %v866_v36 = vmax.f32 %v860_v32, 0.0 }
 0x119   : > { %v842_v31 = vpop.f32.mrf.mxu2  ;;  %v901_v39 = vld [vmem:[%s459_s7] sm:$0xf] (%p1320_p5)  ;;  %v903_v40 = vld [vmem:[%s459_s7 + $0x4] sm:$0xf] (%p1320_p5) }
 0x11a   : > { %v843_v33 = vadd.f32 %v842_v31, %v824_v30  ;;  %v861_v34 = vpop.f32.mrf.mxu3  ;;  %902 = vst [vmem:[%s884_s9] sm:$0xf] (%p1320_p5), %v901_v39 }
 0x11b   : > { %904 = vst [vmem:[%s884_s9 + $0x8] sm:$0xf] (%p1320_p5), %v903_v40 }
 0x11c   : > { %v862_v35 = vadd.f32 %v861_v34, %v843_v33 }
 0x11e   : > { %v867_v37 = vmax.f32 %v862_v35, 0.0  ;;  %882 = sbr.rel (!%p1320_p5) target bundleno = 300 (0x12c), region = 77 }
 0x120   : > { %v1215_v38 = vpack.c.bf16 %v867_v37, %v866_v36 }
 0x122   : > { %1217 = vst [vmem:[%s459_s7 + $0x8] sm:$0xff] %v1215_v38  }
 0x129   : > { %v905_v41 = vld [vmem:[%s459_s7 + $0x8] sm:$0xf]  ;;  %v907_v42 = vld [vmem:[%s459_s7 + $0xc] sm:$0xf] }
 0x12a   : > { %906 = vst [vmem:[%s884_s9 + $0x10] sm:$0xf] %v905_v41 }
 0x12b   : > { %908 = vst [vmem:[%s884_s9 + $0x18] sm:$0xf] %v907_v42 }
 0x12c PF: > { %p10_p10 = scmp.ge.s32.totalorder %s1307_s16, 4   ;;  %s1585_s12 = smov %s1263_s13 }
 0x12d   : > { %s1586_s13 = smov %s1318_s19  ;;  %s1587_s14 = smov %s1307_s16 }
 0x12e   :  { %12 = sbr.rel (!%p10_p10) target bundleno = 2 (0x2), region = 149 }

// kernel: forward.6
= control target key start
LH: loop header
LB: loop body
LE: loop exit
PB: predicated region body
PF: predicated region fallthrough
CT: control target
= control target key end

     0   :  { %v445_v5 = vmov 0   ;;  %vm221_vm0 = vcmask 261120   ;;  %s576_s1 = inlined_call_operand.vmem [shape: bf16[288,98], index: 1, kind: input, shape index: {}]   ;;  %s577_s0 = inlined_call_operand.vmem [shape: bf16[32,288], index: 0, kind: input, shape index: {}]   ;;  %s578_s2 = inlined_call_operand.vmem [shape: f32[32,1], index: 2, kind: input, shape index: {}]   ;;  %s579_s3 = inlined_call_operand.vmem [shape: bf16[32,98], index: 3, kind: output, shape index: {}]  }
   0x1   :  { %v412_v0 = vld [vmem:[%s576_s1 + $0x38] sm:$0xff]  ;;  %v411_v2 = vld [vmem:[%s576_s1 + $0x30] sm:$0xff]  ;;  %v422_v3 = vld [vmem:[%s576_s1 + $0x88] sm:$0xff]  ;;  %443 = vset.pattern.permute.xlu0 %v445_v5  ;;  %444 = vset.pattern.permute.xlu1 %v445_v5 }
   0x2   :  { %v420_v1 = vld [vmem:[%s576_s1 + $0x78] sm:$0xff]  ;;  %228 = vmatpush.bf16.msra.mxu0 %v412_v0  ;;  %434 = vmatpush.bf16.msra.mxu3 %v412_v0  ;;  %v419_v4 = vld [vmem:[%s576_s1 + $0x70] sm:$0xff]  ;;  %v421_v6 = vld [vmem:[%s576_s1 + $0x80] sm:$0xff] }
   0x3   :  { %247 = vmatpush.bf16.msra.mxu1 %v420_v1  ;;  %272 = vmatpush.bf16.msra.mxu2 %v422_v3  ;;  %v311_v7 = vld [vmem:[%s577_s0 + $0x8] sm:$0xf]  ;;  %v401_v8 = vld [vmem:[%s577_s0 + $0x10] sm:$0xf0]  ;;  %v59_v12 = vld [vmem:[%s578_s2] sm:$0xff] }
   0x4   :  { %v410_v9 = vld [vmem:[%s576_s1 + $0x28] sm:$0xff]  ;;  %v312_v11 = vor.u32 %v401_v8, %v311_v7  ;;  %v409_v13 = vld [vmem:[%s576_s1 + $0x20] sm:$0xff]  ;;  %65 = vperm.xlu0 %443, %v59_v12   ;;  %v408_v15 = vld [vmem:[%s576_s1 + $0x18] sm:$0xff] }
   0x5   :  { %v418_v10 = vld [vmem:[%s576_s1 + $0x68] sm:$0xff]  ;;  %v417_v14 = vld [vmem:[%s576_s1 + $0x60] sm:$0xff]  ;;  %v416_v16 = vld [vmem:[%s576_s1 + $0x58] sm:$0xff] }
   0x6   :  { %229 = vmatpush.bf16.msra.mxu0 %v411_v2  ;;  %435 = vmatpush.bf16.msra.mxu3 %v411_v2  ;;  %v407_v17 = vld [vmem:[%s576_s1 + $0x10] sm:$0xff]  ;;  %v60_v19 = vld [vmem:[%s578_s2 + $0x8] sm:$0xff]  ;;  %v323_v21 = vld [vmem:[%s577_s0 + $0x20] sm:$0xf] }
   0x7   :  { %248 = vmatpush.bf16.msra.mxu1 %v419_v4  ;;  %273 = vmatpush.bf16.msra.mxu2 %v421_v6  ;;  %v61_v18 = vld [vmem:[%s578_s2 + $0x10] sm:$0xff]  ;;  %v404_v22 = vld [vmem:[%s577_s0 + $0x28] sm:$0xf0]  ;;  %v405_v26 = vld [vmem:[%s576_s1] sm:$0xff] }
   0x8   :  { %v415_v20 = vld [vmem:[%s576_s1 + $0x50] sm:$0xff]  ;;  %75 = vperm.xlu1 %444, %v61_v18   ;;  %v406_v23 = vld [vmem:[%s576_s1 + $0x8] sm:$0xff]  ;;  %v324_v25 = vor.u32 %v404_v22, %v323_v21  ;;  %v303_v27 = vld [vmem:[%s577_s0] sm:$0xf] }
   0x9   :  { %v414_v24 = vld [vmem:[%s576_s1 + $0x48] sm:$0xff]  ;;  %v62_v28 = vld [vmem:[%s578_s2 + $0x18] sm:$0xff]  ;;  %v403_v31 = vld [vmem:[%s577_s0 + $0x20] sm:$0xf0] }
   0xa   :  { %230 = vmatpush.bf16.msra.mxu0 %v410_v9  ;;  %436 = vmatpush.bf16.msra.mxu3 %v410_v9  ;;  %v400_v29 = vld [vmem:[%s577_s0 + $0x8] sm:$0xf0]  ;;  %v315_v30 = vld [vmem:[%s577_s0 + $0x18] sm:$0xf]  ;;  %v413_v32 = vld [vmem:[%s576_s1 + $0x40] sm:$0xff] }
   0xb   :  { %249 = vmatpush.bf16.msra.mxu1 %v418_v10  ;;  %397 = vmatmul.msk.bf16.vlgmr.msra.gmra.mxu2 %vm221_vm0, %v312_v11  ;;  %v399_v33 = vld [vmem:[%s577_s0 + $0x4] sm:$0xf]  ;;  %v305_v34 = vld [vmem:[%s577_s0 + $0xc] sm:$0xf0]  ;;  %v304_v35 = vor.u32 %v400_v29, %v303_v27  ;;  %v316_v36 = vor.u32 %v403_v31, %v315_v30  ;;  %v402_v38 = vld [vmem:[%s577_s0 + $0x1c] sm:$0xf] }
   0xc   :  { %70 = vperm.xlu0 %443, %v60_v19   ;;  %v308_v37 = vor.u32 %v399_v33, %v305_v34  ;;  %v317_v39 = vld [vmem:[%s577_s0 + $0x24] sm:$0xf0] }
   0xd   :  { %v320_v40 = vor.u32 %v402_v38, %v317_v39 }
   0xe   :  { %231 = vmatpush.bf16.msra.mxu0 %v409_v13  ;;  %437 = vmatpush.bf16.msra.mxu3 %v409_v13 }
   0xf   :  { %250 = vmatpush.bf16.msra.mxu1 %v417_v14 }
  0x10   :  { %80 = vperm.xlu1 %444, %v62_v28  }
  0x12   :  { %232 = vmatpush.bf16.msra.mxu0 %v408_v15  ;;  %438 = vmatpush.bf16.msra.mxu3 %v408_v15 }
  0x13   :  { %251 = vmatpush.bf16.msra.mxu1 %v416_v16 }
  0x16   :  { %233 = vmatpush.bf16.msra.mxu0 %v407_v17  ;;  %439 = vmatpush.bf16.msra.mxu3 %v407_v17 }
  0x17   :  { %252 = vmatpush.bf16.msra.mxu1 %v415_v20 }
  0x1a   :  { %234 = vmatpush.bf16.msra.mxu0 %v406_v23  ;;  %440 = vmatpush.bf16.msra.mxu3 %v406_v23 }
  0x1b   :  { %253 = vmatpush.bf16.msra.mxu1 %v414_v24  ;;  %398 = vmatmul.msk.bf16.gmra.mxu2 %vm221_vm0, %v324_v25 }
  0x1e   :  { %235 = vmatpush.bf16.msra.mxu0 %v405_v26  ;;  %441 = vmatpush.bf16.msra.mxu3 %v405_v26 }
  0x1f   :  { %254 = vmatpush.bf16.msra.mxu1 %v413_v32 }
  0x21   :  { %236 = vmatmul.bf16.vlgmr.msra.gmra.mxu0 %v304_v35  ;;  %241 = vmatmul.bf16.vlgmr.msra.gmra.mxu3 %v316_v36 }
  0x22   :  { %255 = vmatmul.bf16.vlgmr.msra.gmra.mxu1 %v308_v37 }
  0x32   :  { %260 = vmatmul.bf16.gmra.mxu1 %v320_v40 }
  0x76   :  { %v66_v41 = vpop.permute.xlu0 %65 }
  0x7a   :  { %v76_v53 = vpop.permute.xlu1 %75 }
  0x7e   :  { %v71_v46 = vpop.permute.xlu0 %70 }
  0x82   :  { %v81_v63 = vpop.permute.xlu1 %80 }
  0x8e   :  { %v275_v42 = vpop.f32.mrf.mxu2 }
  0x96   :  { %v277_v48 = vpop.f32.mrf.mxu2 }
  0x9e   :  { %v237_v43 = vpop.f32.mrf.mxu0  ;;  %v280_v60 = vpop.f32.mrf.mxu2 }
  0x9f   :  { %v256_v44 = vpop.f32.mrf.mxu1  ;;  %v238_v45 = vadd.f32 %v237_v43, %v66_v41 }
  0xa1   :  { %v257_v47 = vadd.f32 %v256_v44, %v238_v45 }
  0xa3   :  { %v276_v52 = vadd.f32 %v275_v42, %v257_v47 }
  0xa4   :  { %v242_v54 = vpop.f32.mrf.mxu3 }
  0xa5   :  { %v285_v57 = vmax.f32 %v276_v52, 0.0  ;;  %v243_v62 = vadd.f32 %v242_v54, %v76_v53 }
  0xa6   :  { %v239_v49 = vpop.f32.mrf.mxu0  ;;  %v282_v6 = vpop.f32.mrf.mxu2 }
  0xa7   :  { %v240_v50 = vadd.f32 %v239_v49, %v71_v46  ;;  %v258_v51 = vpop.f32.mrf.mxu1 }
  0xa9   :  { %v259_v55 = vadd.f32 %v258_v51, %v240_v50 }
  0xab   :  { %v278_v56 = vadd.f32 %v277_v48, %v259_v55 }
  0xac   :  { %v244_v0 = vpop.f32.mrf.mxu3 }
  0xad   :  { %v286_v58 = vmax.f32 %v278_v56, 0.0  ;;  %v245_v2 = vadd.f32 %v244_v0, %v81_v63 }
  0xaf   :  { %v426_v59 = vpack.c.bf16 %v286_v58, %v285_v57  ;;  %v261_v61 = vpop.f32.mrf.mxu1 }
  0xb0   :  { %v262_v1 = vadd.f32 %v261_v61, %v243_v62 }
  0xb1   :  { %427 = vst [vmem:[%s579_s3] sm:$0xff] %v426_v59  }
  0xb2   :  { %v281_v4 = vadd.f32 %v280_v60, %v262_v1 }
  0xb4   :  { %v287_v8 = vmax.f32 %v281_v4, 0.0 }
  0xb7   :  { %v263_v3 = vpop.f32.mrf.mxu1 }
  0xb8   :  { %v264_v5 = vadd.f32 %v263_v3, %v245_v2 }
  0xba   :  { %v283_v7 = vadd.f32 %v282_v6, %v264_v5 }
  0xbc   :  { %v288_v9 = vmax.f32 %v283_v7, 0.0 }
  0xbe   :  { %v431_v10 = vpack.c.bf16 %v288_v9, %v287_v8 }
  0xc0   :  { %433 = vst [vmem:[%s579_s3 + $0x8] sm:$0xff] %v431_v10  }

// kernel: forward.7
= control target key start
LH: loop header
LB: loop body
LE: loop exit
PB: predicated region body
PF: predicated region fallthrough
CT: control target
= control target key end

     0   :  { %s10813_s0 = inlined_call_operand.vmem [shape: bf16[2,1568], index: 0, kind: input, shape index: {}]   ;;  %s10814_s1 = inlined_call_operand.vmem [shape: bf16[1568,512], index: 1, kind: input, shape index: {}]   ;;  %s10815_s2 = inlined_call_operand.vmem [shape: f32[1,512], index: 2, kind: input, shape index: {}]   ;;  %s10816_s3 = inlined_call_operand.vmem [shape: bf16[512,512], index: 3, kind: input, shape index: {}]   ;;  %s10817_s4 = inlined_call_operand.vmem [shape: f32[1,512], index: 4, kind: input, shape index: {}]   ;;  %s10818_s5 = inlined_call_operand.vmem [shape: bf16[256,6], index: 5, kind: input, shape index: {}]   ;;  %s10819_s6 = inlined_call_operand.vmem [shape: f32[1,6], index: 6, kind: input, shape index: {}]   ;;  %s10820_s7 = inlined_call_operand.vmem [shape: bf16[256,1], index: 7, kind: input, shape index: {}]   ;;  %s10821_s8 = inlined_call_operand.<no memory space> [shape: f32[1,1], index: 8, kind: input, shape index: {}]   ;;  %s10822_s9 = inlined_call_operand.hbm [shape: f32[2,6], index: 9, kind: output, shape index: {}]  }
   0x1   :  { %v14_v0 = vstv %s10821_s8 }
   0x2   :  { %15 = vst [vmem:[#allocation3] sm:$0x1] %v14_v0 }
   0x3   :  { %v4613_v1 = vld [vmem:[%s10814_s1 + $0xe0] sm:$0xf]  ;;  %v6741_v2 = vld [vmem:[%s10814_s1 + $0xec] sm:$0xf0] }
   0x4   :  { %v4741_v3 = vld [vmem:[%s10814_s1 + $0x1e0] sm:$0xf]  ;;  %v4614_v4 = vor.u32 %v6741_v2, %v4613_v1  ;;  %v6773_v5 = vld [vmem:[%s10814_s1 + $0x1ec] sm:$0xf0] }
   0x5   :  { %v4869_v6 = vld [vmem:[%s10814_s1 + $0x2e0] sm:$0xf]  ;;  %v6805_v7 = vld [vmem:[%s10814_s1 + $0x2ec] sm:$0xf0]  ;;  %v4742_v8 = vor.u32 %v6773_v5, %v4741_v3 }
   0x6   :  { %v4870_v9 = vor.u32 %v6805_v7, %v4869_v6  ;;  %v4997_v10 = vld [vmem:[%s10814_s1 + $0x3e0] sm:$0xf]  ;;  %v6837_v11 = vld [vmem:[%s10814_s1 + $0x3ec] sm:$0xf0]  ;;  %2438 = vmatpush.bf16.msra.mxu0 %v4614_v4 }
   0x7   :  { %v4597_v12 = vld [vmem:[%s10814_s1 + $0xc0] sm:$0xf]  ;;  %v4998_v13 = vor.u32 %v6837_v11, %v4997_v10  ;;  %v6737_v14 = vld [vmem:[%s10814_s1 + $0xcc] sm:$0xf0]  ;;  %2451 = vmatpush.bf16.msra.mxu1 %v4742_v8 }
   0x8   :  { %v4725_v15 = vld [vmem:[%s10814_s1 + $0x1c0] sm:$0xf]  ;;  %v6769_v16 = vld [vmem:[%s10814_s1 + $0x1cc] sm:$0xf0]  ;;  %2464 = vmatpush.bf16.msra.mxu2 %v4870_v9  ;;  %v4598_v17 = vor.u32 %v6737_v14, %v4597_v12 }
   0x9   :  { %v4726_v18 = vor.u32 %v6769_v16, %v4725_v15  ;;  %v4853_v19 = vld [vmem:[%s10814_s1 + $0x2c0] sm:$0xf]  ;;  %v6801_v20 = vld [vmem:[%s10814_s1 + $0x2cc] sm:$0xf0]  ;;  %2477 = vmatpush.bf16.msra.mxu3 %v4998_v13 }
   0xa   :  { %v4981_v21 = vld [vmem:[%s10814_s1 + $0x3c0] sm:$0xf]  ;;  %v4854_v22 = vor.u32 %v6801_v20, %v4853_v19  ;;  %v6833_v23 = vld [vmem:[%s10814_s1 + $0x3cc] sm:$0xf0]  ;;  %2439 = vmatpush.bf16.msra.mxu0 %v4598_v17 }
   0xb   :  { %v4581_v24 = vld [vmem:[%s10814_s1 + $0xa0] sm:$0xf]  ;;  %v6733_v25 = vld [vmem:[%s10814_s1 + $0xac] sm:$0xf0]  ;;  %v4982_v26 = vor.u32 %v6833_v23, %v4981_v21  ;;  %2452 = vmatpush.bf16.msra.mxu1 %v4726_v18 }
   0xc   :  { %v4709_v27 = vld [vmem:[%s10814_s1 + $0x1a0] sm:$0xf]  ;;  %v6765_v28 = vld [vmem:[%s10814_s1 + $0x1ac] sm:$0xf0]  ;;  %v4582_v30 = vor.u32 %v6733_v25, %v4581_v24  ;;  %2465 = vmatpush.bf16.msra.mxu2 %v4854_v22 }
   0xd   :  { %v4837_v29 = vld [vmem:[%s10814_s1 + $0x2a0] sm:$0xf]  ;;  %v6797_v31 = vld [vmem:[%s10814_s1 + $0x2ac] sm:$0xf0]  ;;  %v4710_v34 = vor.u32 %v6765_v28, %v4709_v27  ;;  %2478 = vmatpush.bf16.msra.mxu3 %v4982_v26 }
   0xe   :  { %v4965_v32 = vld [vmem:[%s10814_s1 + $0x3a0] sm:$0xf]  ;;  %v6829_v33 = vld [vmem:[%s10814_s1 + $0x3ac] sm:$0xf0]  ;;  %v4838_v35 = vor.u32 %v6797_v31, %v4837_v29  ;;  %2440 = vmatpush.bf16.msra.mxu0 %v4582_v30 }
   0xf   :  { %v4565_v36 = vld [vmem:[%s10814_s1 + $0x80] sm:$0xf]  ;;  %v6729_v37 = vld [vmem:[%s10814_s1 + $0x8c] sm:$0xf0]  ;;  %v4966_v39 = vor.u32 %v6829_v33, %v4965_v32  ;;  %2453 = vmatpush.bf16.msra.mxu1 %v4710_v34 }
  0x10   :  { %v4693_v38 = vld [vmem:[%s10814_s1 + $0x180] sm:$0xf]  ;;  %v6761_v40 = vld [vmem:[%s10814_s1 + $0x18c] sm:$0xf0]  ;;  %v4566_v45 = vor.u32 %v6729_v37, %v4565_v36  ;;  %2466 = vmatpush.bf16.msra.mxu2 %v4838_v35 }
  0x11   :  { %v4821_v41 = vld [vmem:[%s10814_s1 + $0x280] sm:$0xf]  ;;  %v6793_v42 = vld [vmem:[%s10814_s1 + $0x28c] sm:$0xf0]  ;;  %v4694_v46 = vor.u32 %v6761_v40, %v4693_v38  ;;  %2479 = vmatpush.bf16.msra.mxu3 %v4966_v39 }
  0x12   :  { %v4949_v43 = vld [vmem:[%s10814_s1 + $0x380] sm:$0xf]  ;;  %v6825_v44 = vld [vmem:[%s10814_s1 + $0x38c] sm:$0xf0]  ;;  %v4822_v47 = vor.u32 %v6793_v42, %v4821_v41  ;;  %2441 = vmatpush.bf16.msra.mxu0 %v4566_v45 }
  0x13   :  { %v4549_v48 = vld [vmem:[%s10814_s1 + $0x60] sm:$0xf]  ;;  %v6725_v49 = vld [vmem:[%s10814_s1 + $0x6c] sm:$0xf0]  ;;  %v4950_v51 = vor.u32 %v6825_v44, %v4949_v43  ;;  %2454 = vmatpush.bf16.msra.mxu1 %v4694_v46 }
  0x14   :  { %v4677_v50 = vld [vmem:[%s10814_s1 + $0x160] sm:$0xf]  ;;  %v6757_v52 = vld [vmem:[%s10814_s1 + $0x16c] sm:$0xf0]  ;;  %v4550_v57 = vor.u32 %v6725_v49, %v4549_v48  ;;  %2467 = vmatpush.bf16.msra.mxu2 %v4822_v47 }
  0x15   :  { %v4805_v53 = vld [vmem:[%s10814_s1 + $0x260] sm:$0xf]  ;;  %v6789_v54 = vld [vmem:[%s10814_s1 + $0x26c] sm:$0xf0]  ;;  %v4678_v58 = vor.u32 %v6757_v52, %v4677_v50  ;;  %2480 = vmatpush.bf16.msra.mxu3 %v4950_v51 }
  0x16   :  { %v4933_v55 = vld [vmem:[%s10814_s1 + $0x360] sm:$0xf]  ;;  %v6821_v56 = vld [vmem:[%s10814_s1 + $0x36c] sm:$0xf0]  ;;  %v4806_v59 = vor.u32 %v6789_v54, %v4805_v53  ;;  %2442 = vmatpush.bf16.msra.mxu0 %v4550_v57 }
  0x17   :  { %v4533_v60 = vld [vmem:[%s10814_s1 + $0x40] sm:$0xf]  ;;  %v6721_v61 = vld [vmem:[%s10814_s1 + $0x4c] sm:$0xf0]  ;;  %v4934_v63 = vor.u32 %v6821_v56, %v4933_v55  ;;  %2455 = vmatpush.bf16.msra.mxu1 %v4678_v58 }
  0x18   :  { %v4661_v62 = vld [vmem:[%s10814_s1 + $0x140] sm:$0xf]  ;;  %v6753_v0 = vld [vmem:[%s10814_s1 + $0x14c] sm:$0xf0]  ;;  %v4534_v5 = vor.u32 %v6721_v61, %v4533_v60  ;;  %2468 = vmatpush.bf16.msra.mxu2 %v4806_v59 }
  0x19   :  { %v4789_v1 = vld [vmem:[%s10814_s1 + $0x240] sm:$0xf]  ;;  %v6785_v2 = vld [vmem:[%s10814_s1 + $0x24c] sm:$0xf0]  ;;  %v4662_v6 = vor.u32 %v6753_v0, %v4661_v62  ;;  %2481 = vmatpush.bf16.msra.mxu3 %v4934_v63 }
  0x1a   :  { %v4917_v3 = vld [vmem:[%s10814_s1 + $0x340] sm:$0xf]  ;;  %v6817_v4 = vld [vmem:[%s10814_s1 + $0x34c] sm:$0xf0]  ;;  %v4790_v7 = vor.u32 %v6785_v2, %v4789_v1  ;;  %2443 = vmatpush.bf16.msra.mxu0 %v4534_v5 }
  0x1b   :  { %v4517_v8 = vld [vmem:[%s10814_s1 + $0x20] sm:$0xf]  ;;  %v6717_v9 = vld [vmem:[%s10814_s1 + $0x2c] sm:$0xf0]  ;;  %v4918_v11 = vor.u32 %v6817_v4, %v4917_v3  ;;  %2456 = vmatpush.bf16.msra.mxu1 %v4662_v6 }
  0x1c   :  { %v4645_v10 = vld [vmem:[%s10814_s1 + $0x120] sm:$0xf]  ;;  %v6749_v12 = vld [vmem:[%s10814_s1 + $0x12c] sm:$0xf0]  ;;  %v4518_v17 = vor.u32 %v6717_v9, %v4517_v8  ;;  %2469 = vmatpush.bf16.msra.mxu2 %v4790_v7 }
  0x1d   :  { %v4773_v13 = vld [vmem:[%s10814_s1 + $0x220] sm:$0xf]  ;;  %v6781_v14 = vld [vmem:[%s10814_s1 + $0x22c] sm:$0xf0]  ;;  %v4646_v20 = vor.u32 %v6749_v12, %v4645_v10  ;;  %2482 = vmatpush.bf16.msra.mxu3 %v4918_v11 }
  0x1e   :  { %v4901_v15 = vld [vmem:[%s10814_s1 + $0x320] sm:$0xf]  ;;  %v6813_v16 = vld [vmem:[%s10814_s1 + $0x32c] sm:$0xf0]  ;;  %v4774_v21 = vor.u32 %v6781_v14, %v4773_v13  ;;  %2444 = vmatpush.bf16.msra.mxu0 %v4518_v17 }
  0x1f   :  { %v4501_v18 = vld [vmem:[%s10814_s1] sm:$0xf]  ;;  %v6713_v19 = vld [vmem:[%s10814_s1 + $0xc] sm:$0xf0]  ;;  %v4902_v25 = vor.u32 %v6813_v16, %v4901_v15  ;;  %2457 = vmatpush.bf16.msra.mxu1 %v4646_v20 }
  0x20   :  { %v4629_v22 = vld [vmem:[%s10814_s1 + $0x100] sm:$0xf]  ;;  %v6745_v23 = vld [vmem:[%s10814_s1 + $0x10c] sm:$0xf0]  ;;  %v4502_v32 = vor.u32 %v6713_v19, %v4501_v18  ;;  %2470 = vmatpush.bf16.msra.mxu2 %v4774_v21 }
  0x21   :  { %v4757_v24 = vld [vmem:[%s10814_s1 + $0x200] sm:$0xf]  ;;  %v6777_v26 = vld [vmem:[%s10814_s1 + $0x20c] sm:$0xf0]  ;;  %v4630_v36 = vor.u32 %v6745_v23, %v4629_v22  ;;  %2483 = vmatpush.bf16.msra.mxu3 %v4902_v25 }
  0x22   :  { %v4885_v27 = vld [vmem:[%s10814_s1 + $0x300] sm:$0xf]  ;;  %v6809_v28 = vld [vmem:[%s10814_s1 + $0x30c] sm:$0xf0]  ;;  %v4758_v37 = vor.u32 %v6777_v26, %v4757_v24  ;;  %2445 = vmatpush.bf16.msra.mxu0 %v4502_v32 }
  0x23   :  { %v5125_v29 = vld [vmem:[%s10814_s1 + $0x4e0] sm:$0xf]  ;;  %v6869_v30 = vld [vmem:[%s10814_s1 + $0x4ec] sm:$0xf0]  ;;  %v4886_v40 = vor.u32 %v6809_v28, %v4885_v27  ;;  %2458 = vmatpush.bf16.msra.mxu1 %v4630_v36 }
  0x24   :  { %v5253_v31 = vld [vmem:[%s10814_s1 + $0x5e0] sm:$0xf]  ;;  %v6901_v33 = vld [vmem:[%s10814_s1 + $0x5ec] sm:$0xf0]  ;;  %v5126_v41 = vor.u32 %v6869_v30, %v5125_v29  ;;  %2471 = vmatpush.bf16.msra.mxu2 %v4758_v37 }
  0x25   :  { %v5381_v34 = vld [vmem:[%s10814_s1 + $0x6e0] sm:$0xf]  ;;  %v6933_v35 = vld [vmem:[%s10814_s1 + $0x6ec] sm:$0xf0]  ;;  %v5254_v42 = vor.u32 %v6901_v33, %v5253_v31  ;;  %2484 = vmatpush.bf16.msra.mxu3 %v4886_v40 }
  0x26   :  { %v5509_v38 = vld [vmem:[%s10814_s1 + $0x7e0] sm:$0xf]  ;;  %v6965_v39 = vld [vmem:[%s10814_s1 + $0x7ec] sm:$0xf0]  ;;  %v5382_v43 = vor.u32 %v6933_v35, %v5381_v34  ;;  %2490 = vmatpush.bf16.msrb.mxu0 %v5126_v41 }
  0x27   :  { %v5109_v44 = vld [vmem:[%s10814_s1 + $0x4c0] sm:$0xf]  ;;  %v6865_v45 = vld [vmem:[%s10814_s1 + $0x4cc] sm:$0xf0]  ;;  %v5510_v47 = vor.u32 %v6965_v39, %v5509_v38  ;;  %2503 = vmatpush.bf16.msrb.mxu1 %v5254_v42 }
  0x28   :  { %v5237_v46 = vld [vmem:[%s10814_s1 + $0x5c0] sm:$0xf]  ;;  %v6897_v48 = vld [vmem:[%s10814_s1 + $0x5cc] sm:$0xf0]  ;;  %v5110_v53 = vor.u32 %v6865_v45, %v5109_v44  ;;  %2516 = vmatpush.bf16.msrb.mxu2 %v5382_v43 }
  0x29   :  { %v5365_v49 = vld [vmem:[%s10814_s1 + $0x6c0] sm:$0xf]  ;;  %v6929_v50 = vld [vmem:[%s10814_s1 + $0x6cc] sm:$0xf0]  ;;  %v5238_v56 = vor.u32 %v6897_v48, %v5237_v46  ;;  %2529 = vmatpush.bf16.msrb.mxu3 %v5510_v47 }
  0x2a   :  { %v5493_v51 = vld [vmem:[%s10814_s1 + $0x7c0] sm:$0xf]  ;;  %v6961_v52 = vld [vmem:[%s10814_s1 + $0x7cc] sm:$0xf0]  ;;  %v5366_v57 = vor.u32 %v6929_v50, %v5365_v49  ;;  %2491 = vmatpush.bf16.msrb.mxu0 %v5110_v53 }
  0x2b   :  { %v5093_v54 = vld [vmem:[%s10814_s1 + $0x4a0] sm:$0xf]  ;;  %v6861_v55 = vld [vmem:[%s10814_s1 + $0x4ac] sm:$0xf0]  ;;  %v5494_v61 = vor.u32 %v6961_v52, %v5493_v51  ;;  %2504 = vmatpush.bf16.msrb.mxu1 %v5238_v56 }
  0x2c   :  { %v5221_v58 = vld [vmem:[%s10814_s1 + $0x5a0] sm:$0xf]  ;;  %v6893_v59 = vld [vmem:[%s10814_s1 + $0x5ac] sm:$0xf0]  ;;  %v5094_v2 = vor.u32 %v6861_v55, %v5093_v54  ;;  %2517 = vmatpush.bf16.msrb.mxu2 %v5366_v57 }
  0x2d   :  { %v42_v60 = vld [vmem:[%s10813_s0] sm:$0xff]  ;;  %v6925_v63 = vld [vmem:[%s10814_s1 + $0x6ac] sm:$0xf0]  ;;  %v5222_v3 = vor.u32 %v6893_v59, %v5221_v58  ;;  %2530 = vmatpush.bf16.msrb.mxu3 %v5494_v61 }
  0x2e   :  { %v5349_v62 = vld [vmem:[%s10814_s1 + $0x6a0] sm:$0xf]  ;;  %447 = vst [vmem:[#allocation1] ss:$9 sm:$0xff] %v42_v60  ;;  %v6957_v1 = vld [vmem:[%s10814_s1 + $0x7ac] sm:$0xf0]  ;;  %2492 = vmatpush.bf16.msrb.mxu0 %v5094_v2 }
  0x2f   :  { %v5477_v0 = vld [vmem:[%s10814_s1 + $0x7a0] sm:$0xf]  ;;  %v5350_v4 = vor.u32 %v6925_v63, %v5349_v62  ;;  %v6857_v6 = vld [vmem:[%s10814_s1 + $0x48c] sm:$0xf0]  ;;  %2505 = vmatpush.bf16.msrb.mxu1 %v5222_v3  ;;  %v43_v62 = vld [vmem:[%s10813_s0 + $0x8] sm:$0x1f] }
  0x30   :  { %v5077_v5 = vld [vmem:[%s10814_s1 + $0x480] sm:$0xf]  ;;  %v5478_v8 = vor.u32 %v6957_v1, %v5477_v0  ;;  %v6889_v9 = vld [vmem:[%s10814_s1 + $0x58c] sm:$0xf0] }
  0x31   :  { %v5205_v7 = vld [vmem:[%s10814_s1 + $0x580] sm:$0xf]  ;;  %v6921_v11 = vld [vmem:[%s10814_s1 + $0x68c] sm:$0xf0]  ;;  %v5078_v15 = vor.u32 %v6857_v6, %v5077_v5  ;;  %2518 = vmatpush.bf16.msrb.mxu2 %v5350_v4 }
  0x32   :  { %v5333_v10 = vld [vmem:[%s10814_s1 + $0x680] sm:$0xf]  ;;  %v6953_v13 = vld [vmem:[%s10814_s1 + $0x78c] sm:$0xf0]  ;;  %v5206_v19 = vor.u32 %v6889_v9, %v5205_v7  ;;  %2531 = vmatpush.bf16.msrb.mxu3 %v5478_v8 }
  0x33   :  { %v5461_v12 = vld [vmem:[%s10814_s1 + $0x780] sm:$0xf]  ;;  %v6853_v16 = vld [vmem:[%s10814_s1 + $0x46c] sm:$0xf0]  ;;  %v5334_v20 = vor.u32 %v6921_v11, %v5333_v10  ;;  %2493 = vmatpush.bf16.msrb.mxu0 %v5078_v15 }
  0x34   :  { %v5061_v14 = vld [vmem:[%s10814_s1 + $0x460] sm:$0xf]  ;;  %v6885_v18 = vld [vmem:[%s10814_s1 + $0x56c] sm:$0xf0]  ;;  %v5462_v24 = vor.u32 %v6953_v13, %v5461_v12  ;;  %2506 = vmatpush.bf16.msrb.mxu1 %v5206_v19 }
  0x35   :  { %v5189_v17 = vld [vmem:[%s10814_s1 + $0x560] sm:$0xf]  ;;  %v7663_v21 = vld [vmem:[#allocation1 + $0x12] sm:$0xff]  ;;  %v7676_v27 = vld [vmem:[#allocation1 + $0x9] sm:$0xff]  ;;  %v5062_v30 = vor.u32 %v6853_v16, %v5061_v14  ;;  %2519 = vmatpush.bf16.msrb.mxu2 %v5334_v20 }
  0x36   :  { %v7665_v22 = vld [vmem:[#allocation1] sm:$0xff]  ;;  %v6917_v26 = vld [vmem:[%s10814_s1 + $0x66c] sm:$0xf0]  ;;  %2472 = vmatmul.bf16.vlgmr.msra.gmra.mxu2 %v7663_v21  ;;  %2459 = vmatmul.bf16.vlgmr.msra.gmra.mxu1 %v7676_v27  ;;  %v5190_v31 = vor.u32 %v6885_v18, %v5189_v17  ;;  %v7753_v61 = vld [vmem:[#allocation1 + $0x36] sm:$0xff] }
  0x37   :  { %v7667_v23 = vld [vmem:[#allocation1 + $0x1b] sm:$0xff]  ;;  %v6949_v29 = vld [vmem:[%s10814_s1 + $0x76c] sm:$0xf0]  ;;  %2446 = vmatmul.bf16.vlgmr.msra.gmra.mxu0 %v7665_v22  ;;  %2532 = vmatpush.bf16.msrb.mxu3 %v5462_v24  ;;  %v7758_v1 = vld [vmem:[#allocation1 + $0x24] sm:$0xff] }
  0x38   :  { %v5317_v25 = vld [vmem:[%s10814_s1 + $0x660] sm:$0xf]  ;;  %2485 = vmatmul.bf16.vlgmr.msra.gmra.mxu3 %v7667_v23  ;;  %v6849_v34 = vld [vmem:[%s10814_s1 + $0x44c] sm:$0xf0]  ;;  %2494 = vmatpush.bf16.msrb.mxu0 %v5062_v30 }
  0x39   :  { %v5445_v28 = vld [vmem:[%s10814_s1 + $0x760] sm:$0xf]  ;;  %v5318_v32 = vor.u32 %v6917_v26, %v5317_v25  ;;  %v6881_v37 = vld [vmem:[%s10814_s1 + $0x54c] sm:$0xf0]  ;;  %2507 = vmatpush.bf16.msrb.mxu1 %v5190_v31 }
  0x3a   :  { %v5045_v33 = vld [vmem:[%s10814_s1 + $0x440] sm:$0xf]  ;;  %v5446_v36 = vor.u32 %v6949_v29, %v5445_v28  ;;  %v6913_v39 = vld [vmem:[%s10814_s1 + $0x64c] sm:$0xf0] }
  0x3b   :  { %v5173_v35 = vld [vmem:[%s10814_s1 + $0x540] sm:$0xf]  ;;  %v6945_v41 = vld [vmem:[%s10814_s1 + $0x74c] sm:$0xf0]  ;;  %v5046_v42 = vor.u32 %v6849_v34, %v5045_v33  ;;  %2520 = vmatpush.bf16.msrb.mxu2 %v5318_v32 }
  0x3c   :  { %v5301_v38 = vld [vmem:[%s10814_s1 + $0x640] sm:$0xf]  ;;  %v5174_v44 = vor.u32 %v6881_v37, %v5173_v35  ;;  %v6845_v46 = vld [vmem:[%s10814_s1 + $0x42c] sm:$0xf0]  ;;  %2533 = vmatpush.bf16.msrb.mxu3 %v5446_v36 }
  0x3d   :  { %v5429_v40 = vld [vmem:[%s10814_s1 + $0x740] sm:$0xf]  ;;  %v5302_v45 = vor.u32 %v6913_v39, %v5301_v38  ;;  %v6877_v48 = vld [vmem:[%s10814_s1 + $0x52c] sm:$0xf0]  ;;  %2495 = vmatpush.bf16.msrb.mxu0 %v5046_v42 }
  0x3e   :  { %v5029_v43 = vld [vmem:[%s10814_s1 + $0x420] sm:$0xf]  ;;  %v5430_v49 = vor.u32 %v6945_v41, %v5429_v40  ;;  %v6909_v51 = vld [vmem:[%s10814_s1 + $0x62c] sm:$0xf0]  ;;  %2508 = vmatpush.bf16.msrb.mxu1 %v5174_v44 }
  0x3f   :  { %v5157_v47 = vld [vmem:[%s10814_s1 + $0x520] sm:$0xf]  ;;  %v6941_v53 = vld [vmem:[%s10814_s1 + $0x72c] sm:$0xf0]  ;;  %v5030_v56 = vor.u32 %v6845_v46, %v5029_v43  ;;  %2521 = vmatpush.bf16.msrb.mxu2 %v5302_v45 }
  0x40   :  { %v5285_v50 = vld [vmem:[%s10814_s1 + $0x620] sm:$0xf]  ;;  %v6841_v55 = vld [vmem:[%s10814_s1 + $0x40c] sm:$0xf0]  ;;  %v5158_v63 = vor.u32 %v6877_v48, %v5157_v47  ;;  %2534 = vmatpush.bf16.msrb.mxu3 %v5430_v49 }
  0x41   :  { %v5413_v52 = vld [vmem:[%s10814_s1 + $0x720] sm:$0xf]  ;;  %v6873_v58 = vld [vmem:[%s10814_s1 + $0x50c] sm:$0xf0]  ;;  %v5286_v0 = vor.u32 %v6909_v51, %v5285_v50  ;;  %2496 = vmatpush.bf16.msrb.mxu0 %v5030_v56 }
  0x42   :  { %v5013_v54 = vld [vmem:[%s10814_s1 + $0x400] sm:$0xf]  ;;  %v6905_v60 = vld [vmem:[%s10814_s1 + $0x60c] sm:$0xf0]  ;;  %v5414_v4 = vor.u32 %v6941_v53, %v5413_v52  ;;  %2509 = vmatpush.bf16.msrb.mxu1 %v5158_v63 }
  0x43   :  { %v5141_v57 = vld [vmem:[%s10814_s1 + $0x500] sm:$0xf]  ;;  %v7762_v3 = vld [vmem:[#allocation1 + $0x2d] sm:$0xff]  ;;  %v5014_v10 = vor.u32 %v6841_v55, %v5013_v54  ;;  %2522 = vmatpush.bf16.msrb.mxu2 %v5286_v0 }
  0x44   :  { %v5269_v59 = vld [vmem:[%s10814_s1 + $0x600] sm:$0xf]  ;;  %v6937_v6 = vld [vmem:[%s10814_s1 + $0x70c] sm:$0xf0]  ;;  %v5142_v14 = vor.u32 %v6873_v58, %v5141_v57  ;;  %2535 = vmatpush.bf16.msrb.mxu3 %v5414_v4 }
  0x45   :  { %v7760_v2 = vld [vmem:[#allocation1 + $0x3f] sm:$0xff]  ;;  %v6997_v8 = vld [vmem:[%s10814_s1 + $0x8ec] sm:$0xf0]  ;;  %v5270_v15 = vor.u32 %v6905_v60, %v5269_v59  ;;  %2497 = vmatpush.bf16.msrb.mxu0 %v5014_v10 }
  0x46   :  { %v5397_v5 = vld [vmem:[%s10814_s1 + $0x700] sm:$0xf]  ;;  %457 = vst [vmem:[#allocation1] ss:$9 sm:$0xff] %v43_v62  ;;  %v7029_v11 = vld [vmem:[%s10814_s1 + $0x9ec] sm:$0xf0]  ;;  %2510 = vmatpush.bf16.msrb.mxu1 %v5142_v14 }
  0x47   :  { %v5637_v7 = vld [vmem:[%s10814_s1 + $0x8e0] sm:$0xf]  ;;  %v7061_v13 = vld [vmem:[%s10814_s1 + $0xaec] sm:$0xf0]  ;;  %v5398_v18 = vor.u32 %v6937_v6, %v5397_v5  ;;  %2523 = vmatpush.bf16.msrb.mxu2 %v5270_v15 }
  0x48   :  { %v5765_v9 = vld [vmem:[%s10814_s1 + $0x9e0] sm:$0xf]  ;;  %v7093_v17 = vld [vmem:[%s10814_s1 + $0xbec] sm:$0xf0]  ;;  %v5638_v19 = vor.u32 %v6997_v8, %v5637_v7  ;;  %2498 = vmatmul.bf16.vlgmr.msrb.gmra.mxu0 %v7758_v1 }
  0x49   :  { %v5893_v12 = vld [vmem:[%s10814_s1 + $0xae0] sm:$0xf]  ;;  %v5766_v20 = vor.u32 %v7029_v11, %v5765_v9  ;;  %v6993_v26 = vld [vmem:[%s10814_s1 + $0x8cc] sm:$0xf0]  ;;  %2536 = vmatpush.bf16.msrb.mxu3 %v5398_v18  ;;  %2511 = vmatmul.bf16.vlgmr.msrb.gmra.mxu1 %v7762_v3 }
  0x4a   :  { %v6021_v16 = vld [vmem:[%s10814_s1 + $0xbe0] sm:$0xf]  ;;  %v5894_v24 = vor.u32 %v7061_v13, %v5893_v12  ;;  %v7025_v30 = vld [vmem:[%s10814_s1 + $0x9cc] sm:$0xf0]  ;;  %2542 = vmatpush.bf16.msra.mxu0 %v5638_v19  ;;  %2524 = vmatmul.bf16.vlgmr.msrb.gmra.mxu2 %v7753_v61 }
  0x4b   :  { %v5621_v25 = vld [vmem:[%s10814_s1 + $0x8c0] sm:$0xf]  ;;  %v6022_v29 = vor.u32 %v7093_v17, %v6021_v16  ;;  %v7057_v32 = vld [vmem:[%s10814_s1 + $0xacc] sm:$0xf0]  ;;  %2555 = vmatpush.bf16.msra.mxu1 %v5766_v20 }
  0x4c   :  { %v5749_v28 = vld [vmem:[%s10814_s1 + $0x9c0] sm:$0xf]  ;;  %v7089_v34 = vld [vmem:[%s10814_s1 + $0xbcc] sm:$0xf0]  ;;  %v5622_v35 = vor.u32 %v6993_v26, %v5621_v25  ;;  %2568 = vmatpush.bf16.msra.mxu2 %v5894_v24  ;;  %2537 = vmatmul.bf16.vlgmr.msrb.gmra.mxu3 %v7760_v2 }
  0x4d   :  { %v5877_v31 = vld [vmem:[%s10814_s1 + $0xac0] sm:$0xf]  ;;  %v5750_v36 = vor.u32 %v7025_v30, %v5749_v28  ;;  %v6989_v39 = vld [vmem:[%s10814_s1 + $0x8ac] sm:$0xf0]  ;;  %2581 = vmatpush.bf16.msra.mxu3 %v6022_v29 }
  0x4e   :  { %v6005_v33 = vld [vmem:[%s10814_s1 + $0xbc0] sm:$0xf]  ;;  %v5878_v37 = vor.u32 %v7057_v32, %v5877_v31  ;;  %v7021_v42 = vld [vmem:[%s10814_s1 + $0x9ac] sm:$0xf0]  ;;  %2543 = vmatpush.bf16.msra.mxu0 %v5622_v35 }
  0x4f   :  { %v5605_v38 = vld [vmem:[%s10814_s1 + $0x8a0] sm:$0xf]  ;;  %v6006_v41 = vor.u32 %v7089_v34, %v6005_v33  ;;  %v7053_v44 = vld [vmem:[%s10814_s1 + $0xaac] sm:$0xf0]  ;;  %2556 = vmatpush.bf16.msra.mxu1 %v5750_v36 }
  0x50   :  { %v5733_v40 = vld [vmem:[%s10814_s1 + $0x9a0] sm:$0xf]  ;;  %v7085_v46 = vld [vmem:[%s10814_s1 + $0xbac] sm:$0xf0]  ;;  %v5606_v47 = vor.u32 %v6989_v39, %v5605_v38  ;;  %2569 = vmatpush.bf16.msra.mxu2 %v5878_v37 }
  0x51   :  { %v5861_v43 = vld [vmem:[%s10814_s1 + $0xaa0] sm:$0xf]  ;;  %v5734_v48 = vor.u32 %v7021_v42, %v5733_v40  ;;  %v6985_v51 = vld [vmem:[%s10814_s1 + $0x88c] sm:$0xf0]  ;;  %2582 = vmatpush.bf16.msra.mxu3 %v6006_v41 }
  0x52   :  { %v5989_v45 = vld [vmem:[%s10814_s1 + $0xba0] sm:$0xf]  ;;  %v5862_v49 = vor.u32 %v7053_v44, %v5861_v43  ;;  %v7017_v54 = vld [vmem:[%s10814_s1 + $0x98c] sm:$0xf0]  ;;  %2544 = vmatpush.bf16.msra.mxu0 %v5606_v47 }
  0x53   :  { %v5589_v50 = vld [vmem:[%s10814_s1 + $0x880] sm:$0xf]  ;;  %v5990_v53 = vor.u32 %v7085_v46, %v5989_v45  ;;  %v7049_v56 = vld [vmem:[%s10814_s1 + $0xa8c] sm:$0xf0]  ;;  %2557 = vmatpush.bf16.msra.mxu1 %v5734_v48 }
  0x54   :  { %v5717_v52 = vld [vmem:[%s10814_s1 + $0x980] sm:$0xf]  ;;  %v7081_v58 = vld [vmem:[%s10814_s1 + $0xb8c] sm:$0xf0]  ;;  %v5590_v59 = vor.u32 %v6985_v51, %v5589_v50  ;;  %2570 = vmatpush.bf16.msra.mxu2 %v5862_v49 }
  0x55   :  { %v5845_v55 = vld [vmem:[%s10814_s1 + $0xa80] sm:$0xf]  ;;  %v5718_v60 = vor.u32 %v7017_v54, %v5717_v52  ;;  %v6981_v0 = vld [vmem:[%s10814_s1 + $0x86c] sm:$0xf0]  ;;  %2583 = vmatpush.bf16.msra.mxu3 %v5990_v53  ;;  %v6739_v53 = vld [vmem:[%s10814_s1 + $0xe4] sm:$0xf] }
  0x56   :  { %v5973_v57 = vld [vmem:[%s10814_s1 + $0xb80] sm:$0xf]  ;;  %v5846_v62 = vor.u32 %v7049_v56, %v5845_v55  ;;  %v7013_v6 = vld [vmem:[%s10814_s1 + $0x96c] sm:$0xf0]  ;;  %2545 = vmatpush.bf16.msra.mxu0 %v5590_v59  ;;  %v4615_v55 = vld [vmem:[%s10814_s1 + $0xf0] sm:$0xf0] }
  0x57   :  { %v5573_v63 = vld [vmem:[%s10814_s1 + $0x860] sm:$0xf]  ;;  %v5974_v5 = vor.u32 %v7081_v58, %v5973_v57  ;;  %v7045_v8 = vld [vmem:[%s10814_s1 + $0xa6c] sm:$0xf0]  ;;  %2558 = vmatpush.bf16.msra.mxu1 %v5718_v60  ;;  %v6771_v56 = vld [vmem:[%s10814_s1 + $0x1e4] sm:$0xf] }
  0x58   :  { %v5701_v4 = vld [vmem:[%s10814_s1 + $0x960] sm:$0xf]  ;;  %v7077_v10 = vld [vmem:[%s10814_s1 + $0xb6c] sm:$0xf0]  ;;  %v5574_v11 = vor.u32 %v6981_v0, %v5573_v63  ;;  %2571 = vmatpush.bf16.msra.mxu2 %v5846_v62  ;;  %v4743_v57 = vld [vmem:[%s10814_s1 + $0x1f0] sm:$0xf0] }
  0x59   :  { %v5829_v7 = vld [vmem:[%s10814_s1 + $0xa60] sm:$0xf]  ;;  %v5702_v12 = vor.u32 %v7013_v6, %v5701_v4  ;;  %v6977_v15 = vld [vmem:[%s10814_s1 + $0x84c] sm:$0xf0]  ;;  %2584 = vmatpush.bf16.msra.mxu3 %v5974_v5  ;;  %v6803_v60 = vld [vmem:[%s10814_s1 + $0x2e4] sm:$0xf]  ;;  %v4618_v5 = vor.u32 %v6739_v53, %v4615_v55  ;;  %v4746_v6 = vor.u32 %v6771_v56, %v4743_v57 }
  0x5a   :  { %v5957_v9 = vld [vmem:[%s10814_s1 + $0xb60] sm:$0xf]  ;;  %v5830_v13 = vor.u32 %v7045_v8, %v5829_v7  ;;  %v7009_v18 = vld [vmem:[%s10814_s1 + $0x94c] sm:$0xf0]  ;;  %2546 = vmatpush.bf16.msra.mxu0 %v5574_v11  ;;  %v4871_v62 = vld [vmem:[%s10814_s1 + $0x2f0] sm:$0xf0] }
  0x5b   :  { %v5557_v14 = vld [vmem:[%s10814_s1 + $0x840] sm:$0xf]  ;;  %v5958_v17 = vor.u32 %v7077_v10, %v5957_v9  ;;  %v7041_v20 = vld [vmem:[%s10814_s1 + $0xa4c] sm:$0xf0]  ;;  %2559 = vmatpush.bf16.msra.mxu1 %v5702_v12  ;;  %v6735_v9 = vld [vmem:[%s10814_s1 + $0xc4] sm:$0xf]  ;;  %v4874_v11 = vor.u32 %v6803_v60, %v4871_v62 }
  0x5c   :  { %v5685_v16 = vld [vmem:[%s10814_s1 + $0x940] sm:$0xf]  ;;  %v7073_v25 = vld [vmem:[%s10814_s1 + $0xb4c] sm:$0xf0]  ;;  %v5558_v26 = vor.u32 %v6977_v15, %v5557_v14  ;;  %2572 = vmatpush.bf16.msra.mxu2 %v5830_v13  ;;  %v4599_v10 = vld [vmem:[%s10814_s1 + $0xd0] sm:$0xf0] }
  0x5d   :  { %v5813_v19 = vld [vmem:[%s10814_s1 + $0xa40] sm:$0xf]  ;;  %v5686_v28 = vor.u32 %v7009_v18, %v5685_v16  ;;  %v6973_v31 = vld [vmem:[%s10814_s1 + $0x82c] sm:$0xf0]  ;;  %2585 = vmatpush.bf16.msra.mxu3 %v5958_v17  ;;  %v6767_v12 = vld [vmem:[%s10814_s1 + $0x1c4] sm:$0xf] }
  0x5e   :  { %v5941_v24 = vld [vmem:[%s10814_s1 + $0xb40] sm:$0xf]  ;;  %v5814_v29 = vor.u32 %v7041_v20, %v5813_v19  ;;  %v7005_v34 = vld [vmem:[%s10814_s1 + $0x92c] sm:$0xf0]  ;;  %2547 = vmatpush.bf16.msra.mxu0 %v5558_v26  ;;  %v4727_v13 = vld [vmem:[%s10814_s1 + $0x1d0] sm:$0xf0] }
  0x5f   :  { %v5541_v30 = vld [vmem:[%s10814_s1 + $0x820] sm:$0xf]  ;;  %v5942_v33 = vor.u32 %v7073_v25, %v5941_v24  ;;  %v7037_v36 = vld [vmem:[%s10814_s1 + $0xa2c] sm:$0xf0]  ;;  %2560 = vmatpush.bf16.msra.mxu1 %v5686_v28  ;;  %v6799_v14 = vld [vmem:[%s10814_s1 + $0x2c4] sm:$0xf]  ;;  %v4602_v25 = vor.u32 %v6735_v9, %v4599_v10  ;;  %v4730_v26 = vor.u32 %v6767_v12, %v4727_v13 }
  0x60   :  { %v5669_v32 = vld [vmem:[%s10814_s1 + $0x920] sm:$0xf]  ;;  %v7069_v38 = vld [vmem:[%s10814_s1 + $0xb2c] sm:$0xf0]  ;;  %v5542_v39 = vor.u32 %v6973_v31, %v5541_v30  ;;  %2573 = vmatpush.bf16.msra.mxu2 %v5814_v29  ;;  %v4855_v15 = vld [vmem:[%s10814_s1 + $0x2d0] sm:$0xf0] }
  0x61   :  { %v5797_v35 = vld [vmem:[%s10814_s1 + $0xa20] sm:$0xf]  ;;  %v6969_v41 = vld [vmem:[%s10814_s1 + $0x80c] sm:$0xf0]  ;;  %v5670_v42 = vor.u32 %v7005_v34, %v5669_v32  ;;  %2586 = vmatpush.bf16.msra.mxu3 %v5942_v33  ;;  %v6835_v16 = vld [vmem:[%s10814_s1 + $0x3e4] sm:$0xf]  ;;  %v4858_v30 = vor.u32 %v6799_v14, %v4855_v15 }
  0x62   :  { %v5925_v37 = vld [vmem:[%s10814_s1 + $0xb20] sm:$0xf]  ;;  %v5798_v43 = vor.u32 %v7037_v36, %v5797_v35  ;;  %v7001_v45 = vld [vmem:[%s10814_s1 + $0x90c] sm:$0xf0]  ;;  %2548 = vmatpush.bf16.msra.mxu0 %v5542_v39  ;;  %v4999_v17 = vld [vmem:[%s10814_s1 + $0x3f0] sm:$0xf0] }
  0x63   :  { %v5525_v40 = vld [vmem:[%s10814_s1 + $0x800] sm:$0xf]  ;;  %v5926_v47 = vor.u32 %v7069_v38, %v5925_v37  ;;  %v7033_v48 = vld [vmem:[%s10814_s1 + $0xa0c] sm:$0xf0]  ;;  %2561 = vmatpush.bf16.msra.mxu1 %v5670_v42  ;;  %v6731_v28 = vld [vmem:[%s10814_s1 + $0xa4] sm:$0xf]  ;;  %v5002_v31 = vor.u32 %v6835_v16, %v4999_v17 }
  0x64   :  { %v5653_v44 = vld [vmem:[%s10814_s1 + $0x900] sm:$0xf]  ;;  %v7065_v50 = vld [vmem:[%s10814_s1 + $0xb0c] sm:$0xf0]  ;;  %v5526_v54 = vor.u32 %v6969_v41, %v5525_v40  ;;  %2574 = vmatpush.bf16.msra.mxu2 %v5798_v43  ;;  %v4583_v29 = vld [vmem:[%s10814_s1 + $0xb0] sm:$0xf0] }
  0x65   :  { %v5781_v46 = vld [vmem:[%s10814_s1 + $0xa00] sm:$0xf]  ;;  %v7101_v52 = vld [vmem:[%s10814_s1 + $0xc2c] sm:$0xf0]  ;;  %v5654_v58 = vor.u32 %v7001_v45, %v5653_v44  ;;  %2587 = vmatpush.bf16.msra.mxu3 %v5926_v47  ;;  %v6763_v32 = vld [vmem:[%s10814_s1 + $0x1a4] sm:$0xf]  ;;  %v4586_v39 = vor.u32 %v6731_v28, %v4583_v29 }
  0x66   :  { %v5909_v49 = vld [vmem:[%s10814_s1 + $0xb00] sm:$0xf]  ;;  %v5782_v59 = vor.u32 %v7033_v48, %v5781_v46  ;;  %v7097_v8 = vld [vmem:[%s10814_s1 + $0xc0c] sm:$0xf0]  ;;  %2549 = vmatpush.bf16.msra.mxu0 %v5526_v54  ;;  %v4711_v33 = vld [vmem:[%s10814_s1 + $0x1b0] sm:$0xf0] }
  0x67   :  { %v6053_v51 = vld [vmem:[%s10814_s1 + $0xc20] sm:$0xf]  ;;  %v5910_v63 = vor.u32 %v7065_v50, %v5909_v49  ;;  %2562 = vmatpush.bf16.msra.mxu1 %v5654_v58  ;;  %v8022_v18 = vld [vmem:[#allocation1 + $0x12] sm:$0xff]  ;;  %v8024_v19 = vld [vmem:[#allocation1 + $0x9] sm:$0xff]  ;;  %v4714_v40 = vor.u32 %v6763_v32, %v4711_v33 }
  0x68   :  { %v6054_v0 = vor.u32 %v7101_v52, %v6053_v51  ;;  %v6037_v4 = vld [vmem:[%s10814_s1 + $0xc00] sm:$0xf]  ;;  %2575 = vmatpush.bf16.msra.mxu2 %v5782_v59  ;;  %v6795_v34 = vld [vmem:[%s10814_s1 + $0x2a4] sm:$0xf]  ;;  %v4839_v35 = vld [vmem:[%s10814_s1 + $0x2b0] sm:$0xf0] }
  0x69   :  { %v7993_v7 = vld [vmem:[#allocation1] sm:$0xff]  ;;  %2588 = vmatpush.bf16.msra.mxu3 %v5910_v63  ;;  %v6038_v20 = vor.u32 %v7097_v8, %v6037_v4  ;;  %v4983_v37 = vld [vmem:[%s10814_s1 + $0x3d0] sm:$0xf0]  ;;  %v4842_v44 = vor.u32 %v6795_v34, %v4839_v35 }
  0x6a   :  { %2600 = vmatpush.bf16.msrb.mxu0 %v6054_v0  ;;  %v8026_v24 = vld [vmem:[#allocation1 + $0x1b] sm:$0xff]  ;;  %2563 = vmatmul.bf16.vlgmr.msra.gmra.mxu1 %v8024_v19  ;;  %v6831_v36 = vld [vmem:[%s10814_s1 + $0x3c4] sm:$0xf]  ;;  %v4567_v41 = vld [vmem:[%s10814_s1 + $0x90] sm:$0xf0] }
  0x6b   :  { %2607 = vmatpush.bf16.msrb.mxu1 %v4618_v5  ;;  %2550 = vmatmul.bf16.vlgmr.msra.gmra.mxu0 %v7993_v7  ;;  %v6727_v38 = vld [vmem:[%s10814_s1 + $0x84] sm:$0xf]  ;;  %v4695_v43 = vld [vmem:[%s10814_s1 + $0x190] sm:$0xf0]  ;;  %v4986_v45 = vor.u32 %v6831_v36, %v4983_v37 }
  0x6c   :  { %2620 = vmatpush.bf16.msrb.mxu2 %v4746_v6  ;;  %2589 = vmatmul.bf16.vlgmr.msra.gmra.mxu3 %v8026_v24  ;;  %v6759_v42 = vld [vmem:[%s10814_s1 + $0x184] sm:$0xf]  ;;  %v4823_v47 = vld [vmem:[%s10814_s1 + $0x290] sm:$0xf0] }
  0x6d   :  { %2633 = vmatpush.bf16.msrb.mxu3 %v4874_v11  ;;  %2576 = vmatmul.bf16.vlgmr.msra.gmra.mxu2 %v8022_v18  ;;  %v6791_v46 = vld [vmem:[%s10814_s1 + $0x284] sm:$0xf]  ;;  %v4967_v49 = vld [vmem:[%s10814_s1 + $0x3b0] sm:$0xf0] }
  0x6e   :  { %2601 = vmatpush.bf16.msrb.mxu0 %v6038_v20  ;;  %v6827_v48 = vld [vmem:[%s10814_s1 + $0x3a4] sm:$0xf] }
  0x6f   :  { %2608 = vmatpush.bf16.msrb.mxu1 %v4602_v25 }
  0x70   :  { %2621 = vmatpush.bf16.msrb.mxu2 %v4730_v26 }
  0x71   :  { %2634 = vmatpush.bf16.msrb.mxu3 %v4858_v30 }
  0x72   :  { %2646 = vmatpush.bf16.msra.mxu0 %v5002_v31 }
  0x73   :  { %16 = vsyncpa [#allocation5], 0  ;;  %2609 = vmatpush.bf16.msrb.mxu1 %v4586_v39  ;;  %v4570_v50 = vor.u32 %v6727_v38, %v4567_v41  ;;  %v4698_v51 = vor.u32 %v6759_v42, %v4695_v43  ;;  %v6723_v52 = vld [vmem:[%s10814_s1 + $0x64] sm:$0xf]  ;;  %v4551_v53 = vld [vmem:[%s10814_s1 + $0x70] sm:$0xf0]  ;;  %v4826_v54 = vor.u32 %v6791_v46, %v4823_v47  ;;  %v4970_v55 = vor.u32 %v6827_v48, %v4967_v49 }
  0x74   :  { %2622 = vmatpush.bf16.msrb.mxu2 %v4714_v40  ;;  %v6755_v56 = vld [vmem:[%s10814_s1 + $0x164] sm:$0xf]  ;;  %v4679_v57 = vld [vmem:[%s10814_s1 + $0x170] sm:$0xf0]  ;;  %v4554_v63 = vor.u32 %v6723_v52, %v4551_v53  ;;  %vm2435_vm0 = vcmask 261120   ;;  %vm4445_vm1 = vcmask 41984  }
  0x75   :  { %2635 = vmatpush.bf16.msrb.mxu3 %v4842_v44  ;;  %v6787_v58 = vld [vmem:[%s10814_s1 + $0x264] sm:$0xf]  ;;  %v4807_v59 = vld [vmem:[%s10814_s1 + $0x270] sm:$0xf0]  ;;  %v4682_v0 = vor.u32 %v6755_v56, %v4679_v57  ;;  %vm40_vm2 = vcmask 0   ;;  %s7306_s29 = smov [#allocation4]  }
  0x76   :  { %2647 = vmatpush.bf16.msra.mxu0 %v4986_v45  ;;  %v6823_v60 = vld [vmem:[%s10814_s1 + $0x384] sm:$0xf]  ;;  %v4951_v62 = vld [vmem:[%s10814_s1 + $0x390] sm:$0xf0]  ;;  %v4810_v6 = vor.u32 %v6787_v58, %v4807_v59  ;;  %s4488_s30 = sshll.u32 %s7306_s29, 4  ;;  %s4490_s11 = sshll.u32 %s10822_s9, 4  ;;  %s4489_s30 = int_to_ptr.vmem [resolvable:$true] %s4488_s30  ;;  %s4491_s11 = int_to_ptr.hbm [resolvable:$true] %s4490_s11 }
  0x77   :  { %2610 = vmatpush.bf16.msrb.mxu1 %v4570_v50  ;;  %v6719_v4 = vld [vmem:[%s10814_s1 + $0x44] sm:$0xf]  ;;  %v4535_v5 = vld [vmem:[%s10814_s1 + $0x50] sm:$0xf0]  ;;  %v4954_v8 = vor.u32 %v6823_v60, %v4951_v62 }
  0x78   :  { %2623 = vmatpush.bf16.msrb.mxu2 %v4698_v51  ;;  %v6751_v9 = vld [vmem:[%s10814_s1 + $0x144] sm:$0xf]  ;;  %v4663_v10 = vld [vmem:[%s10814_s1 + $0x150] sm:$0xf0]  ;;  %v4538_v16 = vor.u32 %v6719_v4, %v4535_v5 }
  0x79   :  { %2636 = vmatpush.bf16.msrb.mxu3 %v4826_v54  ;;  %v6783_v11 = vld [vmem:[%s10814_s1 + $0x244] sm:$0xf]  ;;  %v4791_v12 = vld [vmem:[%s10814_s1 + $0x250] sm:$0xf0]  ;;  %v4666_v17 = vor.u32 %v6751_v9, %v4663_v10 }
  0x7a   :  { %2648 = vmatpush.bf16.msra.mxu0 %v4970_v55  ;;  %v6819_v13 = vld [vmem:[%s10814_s1 + $0x364] sm:$0xf]  ;;  %v4935_v14 = vld [vmem:[%s10814_s1 + $0x370] sm:$0xf0]  ;;  %v4794_v26 = vor.u32 %v6783_v11, %v4791_v12 }
  0x7b   :  { %v8128_v15 = vld [vmem:[#allocation1 + $0x24] sm:$0xff]  ;;  %2611 = vmatpush.bf16.msrb.mxu1 %v4554_v63  ;;  %v4519_v25 = vld [vmem:[%s10814_s1 + $0x30] sm:$0xf0]  ;;  %v4938_v28 = vor.u32 %v6819_v13, %v4935_v14 }
  0x7c   :  { %2624 = vmatpush.bf16.msrb.mxu2 %v4682_v0  ;;  %v6715_v20 = vld [vmem:[%s10814_s1 + $0x24] sm:$0xf]  ;;  %v4647_v30 = vld [vmem:[%s10814_s1 + $0x130] sm:$0xf0]  ;;  %6067 = vmatmul.msk.bf16.vlgmr.msrb.gmra.mxu0 %vm2435_vm0, %v8128_v15 }
  0x7d   :  { %2637 = vmatpush.bf16.msrb.mxu3 %v4810_v6  ;;  %v6747_v29 = vld [vmem:[%s10814_s1 + $0x124] sm:$0xf]  ;;  %v4775_v32 = vld [vmem:[%s10814_s1 + $0x230] sm:$0xf0]  ;;  %v4522_v35 = vor.u32 %v6715_v20, %v4519_v25 }
  0x7e   :  { %2649 = vmatpush.bf16.msra.mxu0 %v4954_v8  ;;  %v6779_v31 = vld [vmem:[%s10814_s1 + $0x224] sm:$0xf]  ;;  %v4919_v34 = vld [vmem:[%s10814_s1 + $0x350] sm:$0xf0]  ;;  %v4650_v36 = vor.u32 %v6747_v29, %v4647_v30 }
  0x7f   :  { %v6815_v33 = vld [vmem:[%s10814_s1 + $0x344] sm:$0xf]  ;;  %2612 = vmatpush.bf16.msrb.mxu1 %v4538_v16  ;;  %v4503_v38 = vld [vmem:[%s10814_s1 + $0x10] sm:$0xf0]  ;;  %v4778_v40 = vor.u32 %v6779_v31, %v4775_v32 }
  0x80   :  { %2625 = vmatpush.bf16.msrb.mxu2 %v4666_v17  ;;  %v6711_v37 = vld [vmem:[%s10814_s1 + $0x4] sm:$0xf]  ;;  %v4922_v41 = vor.u32 %v6815_v33, %v4919_v34  ;;  %v4631_v42 = vld [vmem:[%s10814_s1 + $0x110] sm:$0xf0] }
  0x81   :  { %v6743_v39 = vld [vmem:[%s10814_s1 + $0x104] sm:$0xf]  ;;  %2638 = vmatpush.bf16.msrb.mxu3 %v4794_v26  ;;  %v4759_v44 = vld [vmem:[%s10814_s1 + $0x210] sm:$0xf0]  ;;  %v4506_v51 = vor.u32 %v6711_v37, %v4503_v38 }
  0x82   :  { %2650 = vmatpush.bf16.msra.mxu0 %v4938_v28  ;;  %v6775_v43 = vld [vmem:[%s10814_s1 + $0x204] sm:$0xf]  ;;  %v4903_v46 = vld [vmem:[%s10814_s1 + $0x330] sm:$0xf0]  ;;  %v4634_v52 = vor.u32 %v6743_v39, %v4631_v42 }
  0x83   :  { %v6811_v45 = vld [vmem:[%s10814_s1 + $0x324] sm:$0xf]  ;;  %v5127_v48 = vld [vmem:[%s10814_s1 + $0x4f0] sm:$0xf0]  ;;  %2613 = vmatpush.bf16.msrb.mxu1 %v4522_v35  ;;  %v4762_v55 = vor.u32 %v6775_v43, %v4759_v44 }
  0x84   :  { %v6867_v47 = vld [vmem:[%s10814_s1 + $0x4e4] sm:$0xf]  ;;  %v5255_v50 = vld [vmem:[%s10814_s1 + $0x5f0] sm:$0xf0]  ;;  %2626 = vmatpush.bf16.msrb.mxu2 %v4650_v36  ;;  %v4906_v56 = vor.u32 %v6811_v45, %v4903_v46 }
  0x85   :  { %v6899_v49 = vld [vmem:[%s10814_s1 + $0x5e4] sm:$0xf]  ;;  %v5383_v54 = vld [vmem:[%s10814_s1 + $0x6f0] sm:$0xf0]  ;;  %2639 = vmatpush.bf16.msrb.mxu3 %v4778_v40  ;;  %v5130_v58 = vor.u32 %v6867_v47, %v5127_v48 }
  0x86   :  { %v6931_v53 = vld [vmem:[%s10814_s1 + $0x6e4] sm:$0xf]  ;;  %2651 = vmatpush.bf16.msra.mxu0 %v4922_v41  ;;  %v5258_v59 = vor.u32 %v6899_v49, %v5255_v50  ;;  %v4887_v60 = vld [vmem:[%s10814_s1 + $0x310] sm:$0xf0] }
  0x87   :  { %v6807_v57 = vld [vmem:[%s10814_s1 + $0x304] sm:$0xf]  ;;  %v5111_v63 = vld [vmem:[%s10814_s1 + $0x4d0] sm:$0xf0]  ;;  %v5386_v0 = vor.u32 %v6931_v53, %v5383_v54  ;;  %2614 = vmatpush.bf16.msrb.mxu1 %v4506_v51 }
  0x88   :  { %v6863_v62 = vld [vmem:[%s10814_s1 + $0x4c4] sm:$0xf]  ;;  %v5239_v5 = vld [vmem:[%s10814_s1 + $0x5d0] sm:$0xf0]  ;;  %2627 = vmatpush.bf16.msrb.mxu2 %v4634_v52  ;;  %v4890_v11 = vor.u32 %v6807_v57, %v4887_v60 }
  0x89   :  { %v6895_v4 = vld [vmem:[%s10814_s1 + $0x5c4] sm:$0xf]  ;;  %v5367_v8 = vld [vmem:[%s10814_s1 + $0x6d0] sm:$0xf0]  ;;  %2640 = vmatpush.bf16.msrb.mxu3 %v4762_v55  ;;  %v5114_v12 = vor.u32 %v6863_v62, %v5111_v63 }
  0x8a   :  { %v6927_v6 = vld [vmem:[%s10814_s1 + $0x6c4] sm:$0xf]  ;;  %v5511_v10 = vld [vmem:[%s10814_s1 + $0x7f0] sm:$0xf0]  ;;  %2652 = vmatpush.bf16.msra.mxu0 %v4906_v56  ;;  %v5242_v13 = vor.u32 %v6895_v4, %v5239_v5  ;;  %2615 = vmatmul.bf16.vlgmr.msrb.gmra.mxu1 %v7665_v22 }
  0x8b   :  { %v6963_v9 = vld [vmem:[%s10814_s1 + $0x7e4] sm:$0xf]  ;;  %2659 = vmatpush.bf16.msra.mxu1 %v5130_v58  ;;  %v5095_v16 = vld [vmem:[%s10814_s1 + $0x4b0] sm:$0xf0]  ;;  %v5370_v17 = vor.u32 %v6927_v6, %v5367_v8  ;;  %2628 = vmatmul.bf16.vlgmr.msrb.gmra.mxu2 %v7676_v27 }
  0x8c   :  { %2672 = vmatpush.bf16.msra.mxu2 %v5258_v59  ;;  %v6859_v14 = vld [vmem:[%s10814_s1 + $0x4a4] sm:$0xf]  ;;  %v5514_v20 = vor.u32 %v6963_v9, %v5511_v10  ;;  %v5223_v26 = vld [vmem:[%s10814_s1 + $0x5b0] sm:$0xf0]  ;;  %2641 = vmatmul.bf16.vlgmr.msrb.gmra.mxu3 %v7663_v21 }
  0x8d   :  { %2685 = vmatpush.bf16.msra.mxu3 %v5386_v0  ;;  %v6891_v25 = vld [vmem:[%s10814_s1 + $0x5a4] sm:$0xf]  ;;  %v5351_v29 = vld [vmem:[%s10814_s1 + $0x6b0] sm:$0xf0]  ;;  %v5098_v32 = vor.u32 %v6859_v14, %v5095_v16 }
  0x8e   :  { %v6923_v28 = vld [vmem:[%s10814_s1 + $0x6a4] sm:$0xf]  ;;  %v5495_v31 = vld [vmem:[%s10814_s1 + $0x7d0] sm:$0xf0]  ;;  %2653 = vmatpush.bf16.msra.mxu0 %v4890_v11  ;;  %v5226_v33 = vor.u32 %v6891_v25, %v5223_v26 }
  0x8f   :  { %v6959_v30 = vld [vmem:[%s10814_s1 + $0x7c4] sm:$0xf]  ;;  %2660 = vmatpush.bf16.msra.mxu1 %v5114_v12  ;;  %v5079_v35 = vld [vmem:[%s10814_s1 + $0x490] sm:$0xf0]  ;;  %v5354_v36 = vor.u32 %v6923_v28, %v5351_v29 }
  0x90   :  { %2673 = vmatpush.bf16.msra.mxu2 %v5242_v13  ;;  %v6855_v34 = vld [vmem:[%s10814_s1 + $0x484] sm:$0xf]  ;;  %v5498_v37 = vor.u32 %v6959_v30, %v5495_v31  ;;  %v5207_v39 = vld [vmem:[%s10814_s1 + $0x590] sm:$0xf0] }
  0x91   :  { %2686 = vmatpush.bf16.msra.mxu3 %v5370_v17  ;;  %v6887_v38 = vld [vmem:[%s10814_s1 + $0x584] sm:$0xf]  ;;  %v5335_v41 = vld [vmem:[%s10814_s1 + $0x690] sm:$0xf0]  ;;  %2654 = vmatmul.bf16.vlgmr.msra.gmra.mxu0 %v7667_v23  ;;  %v5082_v44 = vor.u32 %v6855_v34, %v5079_v35 }
  0x92   :  { %2698 = vmatpush.bf16.msrb.mxu0 %v5514_v20  ;;  %v6919_v40 = vld [vmem:[%s10814_s1 + $0x684] sm:$0xf]  ;;  %v5479_v43 = vld [vmem:[%s10814_s1 + $0x7b0] sm:$0xf0]  ;;  %v5210_v45 = vor.u32 %v6887_v38, %v5207_v39 }
  0x93   :  { %v6955_v42 = vld [vmem:[%s10814_s1 + $0x7a4] sm:$0xf]  ;;  %2661 = vmatpush.bf16.msra.mxu1 %v5098_v32  ;;  %v5063_v47 = vld [vmem:[%s10814_s1 + $0x470] sm:$0xf0]  ;;  %v5338_v48 = vor.u32 %v6919_v40, %v5335_v41 }
  0x94   :  { %2674 = vmatpush.bf16.msra.mxu2 %v5226_v33  ;;  %v6851_v46 = vld [vmem:[%s10814_s1 + $0x464] sm:$0xf]  ;;  %v5482_v49 = vor.u32 %v6955_v42, %v5479_v43  ;;  %v5191_v51 = vld [vmem:[%s10814_s1 + $0x570] sm:$0xf0] }
  0x95   :  { %2687 = vmatpush.bf16.msra.mxu3 %v5354_v36  ;;  %v6883_v50 = vld [vmem:[%s10814_s1 + $0x564] sm:$0xf]  ;;  %v5319_v53 = vld [vmem:[%s10814_s1 + $0x670] sm:$0xf0]  ;;  %v5066_v56 = vor.u32 %v6851_v46, %v5063_v47 }
  0x96   :  { %2699 = vmatpush.bf16.msrb.mxu0 %v5498_v37  ;;  %v6915_v52 = vld [vmem:[%s10814_s1 + $0x664] sm:$0xf]  ;;  %v5463_v55 = vld [vmem:[%s10814_s1 + $0x790] sm:$0xf0]  ;;  %v5194_v57 = vor.u32 %v6883_v50, %v5191_v51 }
  0x97   :  { %v6951_v54 = vld [vmem:[%s10814_s1 + $0x784] sm:$0xf]  ;;  %2662 = vmatpush.bf16.msra.mxu1 %v5082_v44  ;;  %v5047_v59 = vld [vmem:[%s10814_s1 + $0x450] sm:$0xf0]  ;;  %v5322_v60 = vor.u32 %v6915_v52, %v5319_v53 }
  0x98   :  { %2675 = vmatpush.bf16.msra.mxu2 %v5210_v45  ;;  %v6847_v58 = vld [vmem:[%s10814_s1 + $0x444] sm:$0xf]  ;;  %v5466_v62 = vor.u32 %v6951_v54, %v5463_v55  ;;  %v5175_v0 = vld [vmem:[%s10814_s1 + $0x550] sm:$0xf0] }
  0x99   :  { %2688 = vmatpush.bf16.msra.mxu3 %v5338_v48  ;;  %v6879_v63 = vld [vmem:[%s10814_s1 + $0x544] sm:$0xf]  ;;  %v5303_v5 = vld [vmem:[%s10814_s1 + $0x650] sm:$0xf0]  ;;  %v5050_v9 = vor.u32 %v6847_v58, %v5047_v59 }
  0x9a   :  { %2700 = vmatpush.bf16.msrb.mxu0 %v5482_v49  ;;  %v6911_v4 = vld [vmem:[%s10814_s1 + $0x644] sm:$0xf]  ;;  %v5447_v8 = vld [vmem:[%s10814_s1 + $0x770] sm:$0xf0]  ;;  %v5178_v10 = vor.u32 %v6879_v63, %v5175_v0 }
  0x9b   :  { %v6947_v6 = vld [vmem:[%s10814_s1 + $0x764] sm:$0xf]  ;;  %2663 = vmatpush.bf16.msra.mxu1 %v5066_v56  ;;  %v5031_v12 = vld [vmem:[%s10814_s1 + $0x430] sm:$0xf0]  ;;  %v5306_v13 = vor.u32 %v6911_v4, %v5303_v5 }
  0x9c   :  { %2676 = vmatpush.bf16.msra.mxu2 %v5194_v57  ;;  %v6843_v11 = vld [vmem:[%s10814_s1 + $0x424] sm:$0xf]  ;;  %v5450_v14 = vor.u32 %v6947_v6, %v5447_v8  ;;  %v5159_v17 = vld [vmem:[%s10814_s1 + $0x530] sm:$0xf0] }
  0x9d   :  { %2689 = vmatpush.bf16.msra.mxu3 %v5322_v60  ;;  %v6875_v16 = vld [vmem:[%s10814_s1 + $0x524] sm:$0xf]  ;;  %v5287_v25 = vld [vmem:[%s10814_s1 + $0x630] sm:$0xf0]  ;;  %v5034_v29 = vor.u32 %v6843_v11, %v5031_v12 }
  0x9e   :  { %2701 = vmatpush.bf16.msrb.mxu0 %v5466_v62  ;;  %v6907_v20 = vld [vmem:[%s10814_s1 + $0x624] sm:$0xf]  ;;  %v5431_v28 = vld [vmem:[%s10814_s1 + $0x750] sm:$0xf0]  ;;  %v5162_v30 = vor.u32 %v6875_v16, %v5159_v17 }
  0x9f   :  { %v6943_v26 = vld [vmem:[%s10814_s1 + $0x744] sm:$0xf]  ;;  %2664 = vmatpush.bf16.msra.mxu1 %v5050_v9  ;;  %v5015_v32 = vld [vmem:[%s10814_s1 + $0x410] sm:$0xf0]  ;;  %v5290_v34 = vor.u32 %v6907_v20, %v5287_v25 }
  0xa0   :  { %2677 = vmatpush.bf16.msra.mxu2 %v5178_v10  ;;  %v6839_v31 = vld [vmem:[%s10814_s1 + $0x404] sm:$0xf]  ;;  %v5434_v35 = vor.u32 %v6943_v26, %v5431_v28  ;;  %v5143_v36 = vld [vmem:[%s10814_s1 + $0x510] sm:$0xf0] }
  0xa1   :  { %v6871_v33 = vld [vmem:[%s10814_s1 + $0x504] sm:$0xf]  ;;  %2690 = vmatpush.bf16.msra.mxu3 %v5306_v13  ;;  %v5271_v38 = vld [vmem:[%s10814_s1 + $0x610] sm:$0xf0]  ;;  %v5018_v45 = vor.u32 %v6839_v31, %v5015_v32 }
  0xa2   :  { %2702 = vmatpush.bf16.msrb.mxu0 %v5450_v14  ;;  %v6903_v37 = vld [vmem:[%s10814_s1 + $0x604] sm:$0xf]  ;;  %v5415_v40 = vld [vmem:[%s10814_s1 + $0x730] sm:$0xf0]  ;;  %v5146_v46 = vor.u32 %v6871_v33, %v5143_v36 }
  0xa3   :  { %v6939_v39 = vld [vmem:[%s10814_s1 + $0x724] sm:$0xf]  ;;  %v5639_v42 = vld [vmem:[%s10814_s1 + $0x8f0] sm:$0xf0]  ;;  %2665 = vmatpush.bf16.msra.mxu1 %v5034_v29  ;;  %v5274_v49 = vor.u32 %v6903_v37, %v5271_v38 }
  0xa4   :  { %v6995_v41 = vld [vmem:[%s10814_s1 + $0x8e4] sm:$0xf]  ;;  %v5767_v44 = vld [vmem:[%s10814_s1 + $0x9f0] sm:$0xf0]  ;;  %2678 = vmatpush.bf16.msra.mxu2 %v5162_v30  ;;  %v5418_v50 = vor.u32 %v6939_v39, %v5415_v40 }
  0xa5   :  { %v7027_v43 = vld [vmem:[%s10814_s1 + $0x9e4] sm:$0xf]  ;;  %v5895_v48 = vld [vmem:[%s10814_s1 + $0xaf0] sm:$0xf0]  ;;  %2691 = vmatpush.bf16.msra.mxu3 %v5290_v34  ;;  %v5642_v52 = vor.u32 %v6995_v41, %v5639_v42 }
  0xa6   :  { %v7059_v47 = vld [vmem:[%s10814_s1 + $0xae4] sm:$0xf]  ;;  %2703 = vmatpush.bf16.msrb.mxu0 %v5434_v35  ;;  %v5770_v53 = vor.u32 %v7027_v43, %v5767_v44  ;;  %v5399_v54 = vld [vmem:[%s10814_s1 + $0x710] sm:$0xf0] }
  0xa7   :  { %v6935_v51 = vld [vmem:[%s10814_s1 + $0x704] sm:$0xf]  ;;  %v5623_v56 = vld [vmem:[%s10814_s1 + $0x8d0] sm:$0xf0]  ;;  %v5898_v57 = vor.u32 %v7059_v47, %v5895_v48  ;;  %2666 = vmatpush.bf16.msra.mxu1 %v5018_v45  ;;  %v8494_v47 = vld [vmem:[%s10815_s2] sm:$0xf] }
  0xa8   :  { %v6991_v55 = vld [vmem:[%s10814_s1 + $0x8c4] sm:$0xf]  ;;  %v5751_v59 = vld [vmem:[%s10814_s1 + $0x9d0] sm:$0xf0]  ;;  %2679 = vmatpush.bf16.msra.mxu2 %v5146_v46  ;;  %v5402_v4 = vor.u32 %v6935_v51, %v5399_v54 }
  0xa9   :  { %v7023_v58 = vld [vmem:[%s10814_s1 + $0x9c4] sm:$0xf]  ;;  %v5879_v62 = vld [vmem:[%s10814_s1 + $0xad0] sm:$0xf0]  ;;  %2692 = vmatpush.bf16.msra.mxu3 %v5274_v49  ;;  %v5626_v5 = vor.u32 %v6991_v55, %v5623_v56  ;;  %v438_v55 = vperm.slane %v8494_v47, 0 }
  0xaa   :  { %v7055_v60 = vld [vmem:[%s10814_s1 + $0xac4] sm:$0xf]  ;;  %v6023_v0 = vld [vmem:[%s10814_s1 + $0xbf0] sm:$0xf0]  ;;  %2704 = vmatpush.bf16.msrb.mxu0 %v5418_v50  ;;  %v5754_v6 = vor.u32 %v7023_v58, %v5751_v59  ;;  %2667 = vmatmul.bf16.vlgmr.msra.gmra.mxu1 %v7758_v1 }
  0xab   :  { %v7091_v63 = vld [vmem:[%s10814_s1 + $0xbe4] sm:$0xf]  ;;  %2711 = vmatpush.bf16.msrb.mxu1 %v5642_v52  ;;  %v5607_v9 = vld [vmem:[%s10814_s1 + $0x8b0] sm:$0xf0]  ;;  %v5882_v10 = vor.u32 %v7055_v60, %v5879_v62  ;;  %2680 = vmatmul.bf16.vlgmr.msra.gmra.mxu2 %v7762_v3 }
  0xac   :  { %2724 = vmatpush.bf16.msrb.mxu2 %v5770_v53  ;;  %v6987_v8 = vld [vmem:[%s10814_s1 + $0x8a4] sm:$0xf]  ;;  %v6026_v11 = vor.u32 %v7091_v63, %v6023_v0  ;;  %v5735_v13 = vld [vmem:[%s10814_s1 + $0x9b0] sm:$0xf0]  ;;  %2693 = vmatmul.bf16.vlgmr.msra.gmra.mxu3 %v7753_v61 }
  0xad   :  { %2737 = vmatpush.bf16.msrb.mxu3 %v5898_v57  ;;  %v7019_v12 = vld [vmem:[%s10814_s1 + $0x9a4] sm:$0xf]  ;;  %v5863_v16 = vld [vmem:[%s10814_s1 + $0xab0] sm:$0xf0]  ;;  %v5610_v25 = vor.u32 %v6987_v8, %v5607_v9 }
  0xae   :  { %v7051_v14 = vld [vmem:[%s10814_s1 + $0xaa4] sm:$0xf]  ;;  %v6007_v20 = vld [vmem:[%s10814_s1 + $0xbd0] sm:$0xf0]  ;;  %2705 = vmatpush.bf16.msrb.mxu0 %v5402_v4  ;;  %v5738_v26 = vor.u32 %v7019_v12, %v5735_v13 }
  0xaf   :  { %v7087_v17 = vld [vmem:[%s10814_s1 + $0xbc4] sm:$0xf]  ;;  %2712 = vmatpush.bf16.msrb.mxu1 %v5626_v5  ;;  %v5591_v29 = vld [vmem:[%s10814_s1 + $0x890] sm:$0xf0]  ;;  %v5866_v30 = vor.u32 %v7051_v14, %v5863_v16 }
  0xb0   :  { %2725 = vmatpush.bf16.msrb.mxu2 %v5754_v6  ;;  %v6983_v28 = vld [vmem:[%s10814_s1 + $0x884] sm:$0xf]  ;;  %v6010_v31 = vor.u32 %v7087_v17, %v6007_v20  ;;  %v5719_v33 = vld [vmem:[%s10814_s1 + $0x990] sm:$0xf0] }
  0xb1   :  { %2738 = vmatpush.bf16.msrb.mxu3 %v5882_v10  ;;  %v7015_v32 = vld [vmem:[%s10814_s1 + $0x984] sm:$0xf]  ;;  %v5847_v35 = vld [vmem:[%s10814_s1 + $0xa90] sm:$0xf0]  ;;  %2706 = vmatmul.bf16.vlgmr.msrb.gmra.mxu0 %v7760_v2  ;;  %v5594_v38 = vor.u32 %v6983_v28, %v5591_v29 }
  0xb2   :  { %2750 = vmatpush.bf16.msra.mxu0 %v6026_v11  ;;  %v7047_v34 = vld [vmem:[%s10814_s1 + $0xa84] sm:$0xf]  ;;  %v5991_v37 = vld [vmem:[%s10814_s1 + $0xbb0] sm:$0xf0]  ;;  %v5722_v39 = vor.u32 %v7015_v32, %v5719_v33 }
  0xb3   :  { %v7083_v36 = vld [vmem:[%s10814_s1 + $0xba4] sm:$0xf]  ;;  %2713 = vmatpush.bf16.msrb.mxu1 %v5610_v25  ;;  %v5575_v41 = vld [vmem:[%s10814_s1 + $0x870] sm:$0xf0]  ;;  %v5850_v43 = vor.u32 %v7047_v34, %v5847_v35  ;;  %v2460_v11 = vpop.f32.mrf.mxu1 }
  0xb4   :  { %2726 = vmatpush.bf16.msrb.mxu2 %v5738_v26  ;;  %v6979_v40 = vld [vmem:[%s10814_s1 + $0x864] sm:$0xf]  ;;  %v5994_v44 = vor.u32 %v7083_v36, %v5991_v37  ;;  %v5703_v45 = vld [vmem:[%s10814_s1 + $0x970] sm:$0xf0]  ;;  %v2447_v4 = vpop.f32.mrf.mxu0 }
  0xb5   :  { %v7011_v42 = vld [vmem:[%s10814_s1 + $0x964] sm:$0xf]  ;;  %2739 = vmatpush.bf16.msrb.mxu3 %v5866_v30  ;;  %v5831_v48 = vld [vmem:[%s10814_s1 + $0xa70] sm:$0xf0]  ;;  %v5578_v51 = vor.u32 %v6979_v40, %v5575_v41  ;;  %v2448_v10 = vadd.f32 %v2447_v4, %v438_v55 }
  0xb6   :  { %2751 = vmatpush.bf16.msra.mxu0 %v6010_v31  ;;  %v7043_v46 = vld [vmem:[%s10814_s1 + $0xa64] sm:$0xf]  ;;  %v5975_v50 = vld [vmem:[%s10814_s1 + $0xb90] sm:$0xf0]  ;;  %v5706_v52 = vor.u32 %v7011_v42, %v5703_v45 }
  0xb7   :  { %v7079_v49 = vld [vmem:[%s10814_s1 + $0xb84] sm:$0xf]  ;;  %2714 = vmatpush.bf16.msrb.mxu1 %v5594_v38  ;;  %v5559_v54 = vld [vmem:[%s10814_s1 + $0x850] sm:$0xf0]  ;;  %v5834_v56 = vor.u32 %v7043_v46, %v5831_v48  ;;  %v2461_v28 = vadd.f32 %v2460_v11, %v2448_v10  ;;  %v4621_v46 = vld [vmem:[%s10814_s1 + $0xe8] sm:$0xf] }
  0xb8   :  { %2727 = vmatpush.bf16.msrb.mxu2 %v5722_v39  ;;  %v6975_v53 = vld [vmem:[%s10814_s1 + $0x844] sm:$0xf]  ;;  %v5978_v57 = vor.u32 %v7079_v49, %v5975_v50  ;;  %v5687_v59 = vld [vmem:[%s10814_s1 + $0x950] sm:$0xf0]  ;;  %v6742_v48 = vld [vmem:[%s10814_s1 + $0xf4] sm:$0xf0] }
  0xb9   :  { %2740 = vmatpush.bf16.msrb.mxu3 %v5850_v43  ;;  %v7007_v58 = vld [vmem:[%s10814_s1 + $0x944] sm:$0xf]  ;;  %v5815_v62 = vld [vmem:[%s10814_s1 + $0xa50] sm:$0xf0]  ;;  %v5562_v5 = vor.u32 %v6975_v53, %v5559_v54  ;;  %v2473_v34 = vpop.f32.mrf.mxu2  ;;  %v4749_v53 = vld [vmem:[%s10814_s1 + $0x1e8] sm:$0xf] }
  0xba   :  { %2752 = vmatpush.bf16.msra.mxu0 %v5994_v44  ;;  %v7039_v60 = vld [vmem:[%s10814_s1 + $0xa44] sm:$0xf]  ;;  %v5959_v0 = vld [vmem:[%s10814_s1 + $0xb70] sm:$0xf0]  ;;  %v5690_v6 = vor.u32 %v7007_v58, %v5687_v59  ;;  %v2474_v40 = vadd.f32 %v2473_v34, %v2461_v28  ;;  %v6774_v54 = vld [vmem:[%s10814_s1 + $0x1f4] sm:$0xf0] }
  0xbb   :  { %v7075_v63 = vld [vmem:[%s10814_s1 + $0xb64] sm:$0xf]  ;;  %2715 = vmatpush.bf16.msrb.mxu1 %v5578_v51  ;;  %v5543_v9 = vld [vmem:[%s10814_s1 + $0x830] sm:$0xf0]  ;;  %v5818_v12 = vor.u32 %v7039_v60, %v5815_v62  ;;  %v2486_v41 = vpop.f32.mrf.mxu3  ;;  %v2462_v55 = vpop.f32.mrf.mxu1  ;;  %v4622_v60 = vor.u32 %v6742_v48, %v4621_v46  ;;  %v4750_v4 = vor.u32 %v6774_v54, %v4749_v53  ;;  %v4877_v10 = vld [vmem:[%s10814_s1 + $0x2e8] sm:$0xf] }
  0xbc   :  { %2728 = vmatpush.bf16.msrb.mxu2 %v5706_v52  ;;  %v6971_v8 = vld [vmem:[%s10814_s1 + $0x824] sm:$0xf]  ;;  %v5962_v13 = vor.u32 %v7075_v63, %v5959_v0  ;;  %v5671_v16 = vld [vmem:[%s10814_s1 + $0x930] sm:$0xf0]  ;;  %v8590_v49 = vadd.f32 %v2486_v41, %v2474_v40  ;;  %v2449_v50 = vpop.f32.mrf.mxu0  ;;  %v6806_v11 = vld [vmem:[%s10814_s1 + $0x2f4] sm:$0xf0] }
  0xbd   :  { %2741 = vmatpush.bf16.msrb.mxu3 %v5834_v56  ;;  %v7003_v14 = vld [vmem:[%s10814_s1 + $0x924] sm:$0xf]  ;;  %v5799_v20 = vld [vmem:[%s10814_s1 + $0xa30] sm:$0xf0]  ;;  %v5546_v29 = vor.u32 %v6971_v8, %v5543_v9  ;;  %v4733_v8 = vld [vmem:[%s10814_s1 + $0x1c8] sm:$0xf]  ;;  %v4878_v28 = vor.u32 %v6806_v11, %v4877_v10 }
  0xbe   :  { %2753 = vmatpush.bf16.msra.mxu0 %v5978_v57  ;;  %v7035_v17 = vld [vmem:[%s10814_s1 + $0xa24] sm:$0xf]  ;;  %v5943_v26 = vld [vmem:[%s10814_s1 + $0xb50] sm:$0xf0]  ;;  %v5674_v30 = vor.u32 %v7003_v14, %v5671_v16  ;;  %v6770_v9 = vld [vmem:[%s10814_s1 + $0x1d4] sm:$0xf0] }
  0xbf   :  { %v7071_v25 = vld [vmem:[%s10814_s1 + $0xb44] sm:$0xf]  ;;  %2716 = vmatpush.bf16.msrb.mxu1 %v5562_v5  ;;  %v5527_v32 = vld [vmem:[%s10814_s1 + $0x810] sm:$0xf0]  ;;  %v5802_v35 = vor.u32 %v7035_v17, %v5799_v20  ;;  %v4605_v5 = vld [vmem:[%s10814_s1 + $0xc8] sm:$0xf] }
  0xc0   :  { %2729 = vmatpush.bf16.msrb.mxu2 %v5690_v6  ;;  %v6967_v31 = vld [vmem:[%s10814_s1 + $0x804] sm:$0xf]  ;;  %v5946_v36 = vor.u32 %v7071_v25, %v5943_v26  ;;  %v5655_v37 = vld [vmem:[%s10814_s1 + $0x910] sm:$0xf0]  ;;  %v6738_v6 = vld [vmem:[%s10814_s1 + $0xd4] sm:$0xf0]  ;;  %v4734_v26 = vor.u32 %v6770_v9, %v4733_v8 }
  0xc1   :  { %v6999_v33 = vld [vmem:[%s10814_s1 + $0x904] sm:$0xf]  ;;  %2742 = vmatpush.bf16.msrb.mxu3 %v5818_v12  ;;  %v5783_v39 = vld [vmem:[%s10814_s1 + $0xa10] sm:$0xf0]  ;;  %v5530_v51 = vor.u32 %v6967_v31, %v5527_v32  ;;  %v2475_v12 = vpop.f32.mrf.mxu2  ;;  %v5005_v14 = vld [vmem:[%s10814_s1 + $0x3e8] sm:$0xf]  ;;  %v4606_v25 = vor.u32 %v6738_v6, %v4605_v5 }
  0xc2   :  { %2754 = vmatpush.bf16.msra.mxu0 %v5962_v13  ;;  %v7031_v38 = vld [vmem:[%s10814_s1 + $0xa04] sm:$0xf]  ;;  %v5927_v43 = vld [vmem:[%s10814_s1 + $0xb30] sm:$0xf0]  ;;  %v5658_v52 = vor.u32 %v6999_v33, %v5655_v37  ;;  %v6838_v16 = vld [vmem:[%s10814_s1 + $0x3f4] sm:$0xf0] }
  0xc3   :  { %v7067_v42 = vld [vmem:[%s10814_s1 + $0xb24] sm:$0xf]  ;;  %v6055_v45 = vld [vmem:[%s10814_s1 + $0xc30] sm:$0xf0]  ;;  %2717 = vmatpush.bf16.msrb.mxu1 %v5546_v29  ;;  %v5786_v56 = vor.u32 %v7031_v38, %v5783_v39  ;;  %v2488_v17 = vpop.f32.mrf.mxu3  ;;  %v4589_v29 = vld [vmem:[%s10814_s1 + $0xa8] sm:$0xf]  ;;  %v5006_v32 = vor.u32 %v6838_v16, %v5005_v14 }
  0xc4   :  { %v7099_v44 = vld [vmem:[%s10814_s1 + $0xc24] sm:$0xf]  ;;  %2730 = vmatpush.bf16.msrb.mxu2 %v5674_v30  ;;  %v5930_v57 = vor.u32 %v7067_v42, %v5927_v43  ;;  %v5911_v62 = vld [vmem:[%s10814_s1 + $0xb10] sm:$0xf0]  ;;  %v6734_v30 = vld [vmem:[%s10814_s1 + $0xb4] sm:$0xf0] }
  0xc5   :  { %2743 = vmatpush.bf16.msrb.mxu3 %v5802_v35  ;;  %v7063_v58 = vld [vmem:[%s10814_s1 + $0xb04] sm:$0xf]  ;;  %v6058_v59 = vor.u32 %v7099_v44, %v6055_v45  ;;  %v6039_v0 = vld [vmem:[%s10814_s1 + $0xc10] sm:$0xf0]  ;;  %v4717_v31 = vld [vmem:[%s10814_s1 + $0x1a8] sm:$0xf]  ;;  %v4590_v35 = vor.u32 %v6734_v30, %v4589_v29  ;;  %v2499_v46 = vpop.f32.mrf.mxu0 }
  0xc6   :  { %2755 = vmatpush.bf16.msra.mxu0 %v5946_v36  ;;  %v7095_v63 = vld [vmem:[%s10814_s1 + $0xc04] sm:$0xf]  ;;  %v5914_v13 = vor.u32 %v7063_v58, %v5911_v62  ;;  %v4861_v33 = vld [vmem:[%s10814_s1 + $0x2c8] sm:$0xf]  ;;  %v6802_v34 = vld [vmem:[%s10814_s1 + $0x2d4] sm:$0xf0]  ;;  %v2500_v50 = vadd.f32 %v2499_v46, %v8590_v49 }
  0xc7   :  { %2718 = vmatpush.bf16.msrb.mxu1 %v5530_v51  ;;  %v6042_v20 = vor.u32 %v7095_v63, %v6039_v0  ;;  %v4862_v37 = vor.u32 %v6802_v34, %v4861_v33  ;;  %v4573_v38 = vld [vmem:[%s10814_s1 + $0x88] sm:$0xf]  ;;  %v6730_v39 = vld [vmem:[%s10814_s1 + $0x94] sm:$0xf0]  ;;  %v2512_v51 = vpop.f32.mrf.mxu1 }
  0xc8   :  { %2731 = vmatpush.bf16.msrb.mxu2 %v5658_v52  ;;  %v4701_v40 = vld [vmem:[%s10814_s1 + $0x188] sm:$0xf]  ;;  %v6762_v42 = vld [vmem:[%s10814_s1 + $0x194] sm:$0xf0]  ;;  %v4574_v48 = vor.u32 %v6730_v39, %v4573_v38 }
  0xc9   :  { %2744 = vmatpush.bf16.msrb.mxu3 %v5786_v56  ;;  %v4845_v43 = vld [vmem:[%s10814_s1 + $0x2a8] sm:$0xf]  ;;  %v6798_v44 = vld [vmem:[%s10814_s1 + $0x2b4] sm:$0xf0]  ;;  %v4702_v52 = vor.u32 %v6762_v42, %v4701_v40 }
  0xca   :  { %2756 = vmatpush.bf16.msra.mxu0 %v5930_v57  ;;  %2719 = vmatmul.bf16.vlgmr.msrb.gmra.mxu1 %v7993_v7  ;;  %v6766_v7 = vld [vmem:[%s10814_s1 + $0x1b4] sm:$0xf0]  ;;  %v4973_v45 = vld [vmem:[%s10814_s1 + $0x3a8] sm:$0xf]  ;;  %v4846_v53 = vor.u32 %v6798_v44, %v4845_v43 }
  0xcb   :  { %2769 = vmatpush.bf16.msra.mxu1 %v6058_v59  ;;  %2732 = vmatmul.bf16.vlgmr.msrb.gmra.mxu2 %v8024_v19  ;;  %v4989_v19 = vld [vmem:[%s10814_s1 + $0x3c8] sm:$0xf]  ;;  %v4718_v36 = vor.u32 %v6766_v7, %v4717_v31  ;;  %v6726_v55 = vld [vmem:[%s10814_s1 + $0x74] sm:$0xf0] }
  0xcc   :  { %2776 = vmatpush.bf16.msra.mxu2 %v4622_v60  ;;  %2745 = vmatmul.bf16.vlgmr.msrb.gmra.mxu3 %v8022_v18  ;;  %v6834_v18 = vld [vmem:[%s10814_s1 + $0x3d4] sm:$0xf0]  ;;  %v4557_v54 = vld [vmem:[%s10814_s1 + $0x68] sm:$0xf]  ;;  %v2513_v60 = vadd.f32 %v2512_v51, %v2500_v50 }
  0xcd   :  { %2789 = vmatpush.bf16.msra.mxu3 %v4750_v4  ;;  %v4990_v41 = vor.u32 %v6834_v18, %v4989_v19  ;;  %v4685_v56 = vld [vmem:[%s10814_s1 + $0x168] sm:$0xf]  ;;  %v6758_v49 = vld [vmem:[%s10814_s1 + $0x174] sm:$0xf0]  ;;  %v4558_v0 = vor.u32 %v6726_v55, %v4557_v54  ;;  %v2525_v4 = vpop.f32.mrf.mxu2 }
  0xce   :  { %2757 = vmatpush.bf16.msra.mxu0 %v5914_v13  ;;  %v4829_v58 = vld [vmem:[%s10814_s1 + $0x288] sm:$0xf]  ;;  %v6794_v59 = vld [vmem:[%s10814_s1 + $0x294] sm:$0xf0]  ;;  %v4686_v5 = vor.u32 %v6758_v49, %v4685_v56  ;;  %v2526_v11 = vadd.f32 %v2525_v4, %v2513_v60 }
  0xcf   :  { %2770 = vmatpush.bf16.msra.mxu1 %v6042_v20  ;;  %v4957_v62 = vld [vmem:[%s10814_s1 + $0x388] sm:$0xf]  ;;  %v6826_v63 = vld [vmem:[%s10814_s1 + $0x394] sm:$0xf0]  ;;  %v4830_v6 = vor.u32 %v6794_v59, %v4829_v58  ;;  %v2538_v12 = vpop.f32.mrf.mxu3  ;;  %v2514_v30 = vpop.f32.mrf.mxu1 }
  0xd0   :  { %2777 = vmatpush.bf16.msra.mxu2 %v4606_v25  ;;  %v4541_v8 = vld [vmem:[%s10814_s1 + $0x48] sm:$0xf]  ;;  %v6722_v9 = vld [vmem:[%s10814_s1 + $0x54] sm:$0xf0]  ;;  %v4958_v13 = vor.u32 %v6826_v63, %v4957_v62 }
  0xd1   :  { %2790 = vmatpush.bf16.msra.mxu3 %v4734_v26  ;;  %2758 = vmatmul.bf16.vlgmr.msra.gmra.mxu0 %v8026_v24  ;;  %v6830_v24 = vld [vmem:[%s10814_s1 + $0x3b4] sm:$0xf0]  ;;  %v4669_v10 = vld [vmem:[%s10814_s1 + $0x148] sm:$0xf]  ;;  %v8735_v26 = vadd.f32 %v2538_v12, %v2526_v11  ;;  %v4542_v29 = vor.u32 %v6722_v9, %v4541_v8 }
  0xd2   :  { %2802 = vmatpush.bf16.msrb.mxu0 %v4878_v28  ;;  %v4974_v57 = vor.u32 %v6830_v24, %v4973_v45  ;;  %v6754_v14 = vld [vmem:[%s10814_s1 + $0x154] sm:$0xf0]  ;;  %v4813_v16 = vld [vmem:[%s10814_s1 + $0x268] sm:$0xf]  ;;  %v2501_v28 = vpop.f32.mrf.mxu0 }
  0xd3   :  { %2815 = vmatpush.bf16.msrb.mxu1 %v5006_v32  ;;  %v6790_v17 = vld [vmem:[%s10814_s1 + $0x274] sm:$0xf0]  ;;  %v4941_v20 = vld [vmem:[%s10814_s1 + $0x368] sm:$0xf]  ;;  %v4670_v31 = vor.u32 %v6754_v14, %v4669_v10 }
  0xd4   :  { %2778 = vmatpush.bf16.msra.mxu2 %v4590_v35  ;;  %v6822_v25 = vld [vmem:[%s10814_s1 + $0x374] sm:$0xf0]  ;;  %v4814_v32 = vor.u32 %v6790_v17, %v4813_v16  ;;  %v4525_v7 = vld [vmem:[%s10814_s1 + $0x28] sm:$0xf] }
  0xd5   :  { %2791 = vmatpush.bf16.msra.mxu3 %v4718_v36  ;;  %v6718_v33 = vld [vmem:[%s10814_s1 + $0x34] sm:$0xf0]  ;;  %v4653_v34 = vld [vmem:[%s10814_s1 + $0x128] sm:$0xf]  ;;  %v4942_v19 = vor.u32 %v6822_v25, %v4941_v20 }
  0xd6   :  { %2803 = vmatpush.bf16.msrb.mxu0 %v4862_v37  ;;  %v6750_v18 = vld [vmem:[%s10814_s1 + $0x134] sm:$0xf0]  ;;  %v4797_v35 = vld [vmem:[%s10814_s1 + $0x248] sm:$0xf]  ;;  %v4526_v39 = vor.u32 %v6718_v33, %v4525_v7 }
  0xd7   :  { %2816 = vmatpush.bf16.msrb.mxu1 %v4990_v41  ;;  %v6786_v36 = vld [vmem:[%s10814_s1 + $0x254] sm:$0xf0]  ;;  %v4925_v37 = vld [vmem:[%s10814_s1 + $0x348] sm:$0xf]  ;;  %v2527_v41 = vpop.f32.mrf.mxu2  ;;  %v4654_v42 = vor.u32 %v6750_v18, %v4653_v34  ;;  %v2540_v24 = vpop.f32.mrf.mxu3 }
  0xd8   :  { %2779 = vmatpush.bf16.msra.mxu2 %v4574_v48  ;;  %v6818_v38 = vld [vmem:[%s10814_s1 + $0x354] sm:$0xf0]  ;;  %v4509_v40 = vld [vmem:[%s10814_s1 + $0x8] sm:$0xf]  ;;  %v4798_v43 = vor.u32 %v6786_v36, %v4797_v35 }
  0xd9   :  { %2792 = vmatpush.bf16.msra.mxu3 %v4702_v52  ;;  %v4637_v44 = vld [vmem:[%s10814_s1 + $0x108] sm:$0xf]  ;;  %v6746_v45 = vld [vmem:[%s10814_s1 + $0x114] sm:$0xf0]  ;;  %v4926_v46 = vor.u32 %v6818_v38, %v4925_v37 }
  0xda   :  { %2804 = vmatpush.bf16.msrb.mxu0 %v4846_v53  ;;  %6068 = vmatmul.msk.bf16.vlgmr.msra.gmra.mxu1 %vm2435_vm0, %v8128_v15  ;;  %v6714_v15 = vld [vmem:[%s10814_s1 + $0x14] sm:$0xf0]  ;;  %v4781_v48 = vld [vmem:[%s10814_s1 + $0x228] sm:$0xf]  ;;  %v4638_v49 = vor.u32 %v6746_v45, %v4637_v44 }
  0xdb   :  { %2817 = vmatpush.bf16.msrb.mxu1 %v4974_v57  ;;  %v6782_v50 = vld [vmem:[%s10814_s1 + $0x234] sm:$0xf0]  ;;  %v4909_v51 = vld [vmem:[%s10814_s1 + $0x328] sm:$0xf]  ;;  %v4510_v55 = vor.u32 %v6714_v15, %v4509_v40 }
  0xdc   :  { %2780 = vmatpush.bf16.msra.mxu2 %v4558_v0  ;;  %v6814_v52 = vld [vmem:[%s10814_s1 + $0x334] sm:$0xf0]  ;;  %v5133_v53 = vld [vmem:[%s10814_s1 + $0x4e8] sm:$0xf]  ;;  %v4782_v58 = vor.u32 %v6782_v50, %v4781_v48 }
  0xdd   :  { %2793 = vmatpush.bf16.msra.mxu3 %v4686_v5  ;;  %v6870_v54 = vld [vmem:[%s10814_s1 + $0x4f4] sm:$0xf0]  ;;  %v5261_v56 = vld [vmem:[%s10814_s1 + $0x5e8] sm:$0xf]  ;;  %v4910_v60 = vor.u32 %v6814_v52, %v4909_v51 }
  0xde   :  { %2805 = vmatpush.bf16.msrb.mxu0 %v4830_v6  ;;  %v6902_v57 = vld [vmem:[%s10814_s1 + $0x5f4] sm:$0xf0]  ;;  %v4765_v59 = vld [vmem:[%s10814_s1 + $0x208] sm:$0xf]  ;;  %v5134_v62 = vor.u32 %v6870_v54, %v5133_v53 }
  0xdf   :  { %2818 = vmatpush.bf16.msrb.mxu1 %v4958_v13  ;;  %v6778_v63 = vld [vmem:[%s10814_s1 + $0x214] sm:$0xf0]  ;;  %v4893_v0 = vld [vmem:[%s10814_s1 + $0x308] sm:$0xf]  ;;  %v5262_v5 = vor.u32 %v6902_v57, %v5261_v56 }
  0xe0   :  { %2781 = vmatpush.bf16.msra.mxu2 %v4542_v29  ;;  %v6810_v4 = vld [vmem:[%s10814_s1 + $0x314] sm:$0xf0]  ;;  %v5117_v6 = vld [vmem:[%s10814_s1 + $0x4c8] sm:$0xf]  ;;  %v4766_v13 = vor.u32 %v6778_v63, %v4765_v59 }
  0xe1   :  { %2794 = vmatpush.bf16.msra.mxu3 %v4670_v31  ;;  %v6866_v8 = vld [vmem:[%s10814_s1 + $0x4d4] sm:$0xf0]  ;;  %v5245_v9 = vld [vmem:[%s10814_s1 + $0x5c8] sm:$0xf]  ;;  %v4894_v17 = vor.u32 %v6810_v4, %v4893_v0 }
  0xe2   :  { %2806 = vmatpush.bf16.msrb.mxu0 %v4814_v32  ;;  %v6898_v10 = vld [vmem:[%s10814_s1 + $0x5d4] sm:$0xf0]  ;;  %v5389_v11 = vld [vmem:[%s10814_s1 + $0x6e8] sm:$0xf]  ;;  %v5118_v20 = vor.u32 %v6866_v8, %v5117_v6 }
  0xe3   :  { %2819 = vmatpush.bf16.msrb.mxu1 %v4942_v19  ;;  %v6934_v12 = vld [vmem:[%s10814_s1 + $0x6f4] sm:$0xf0]  ;;  %v5517_v14 = vld [vmem:[%s10814_s1 + $0x7e8] sm:$0xf]  ;;  %v5246_v25 = vor.u32 %v6898_v10, %v5245_v9 }
  0xe4   :  { %2782 = vmatpush.bf16.msra.mxu2 %v4526_v39  ;;  %v6966_v16 = vld [vmem:[%s10814_s1 + $0x7f4] sm:$0xf0]  ;;  %v5390_v28 = vor.u32 %v6934_v12, %v5389_v11  ;;  %v5101_v29 = vld [vmem:[%s10814_s1 + $0x4a8] sm:$0xf] }
  0xe5   :  { %2795 = vmatpush.bf16.msra.mxu3 %v4654_v42  ;;  %v6862_v30 = vld [vmem:[%s10814_s1 + $0x4b4] sm:$0xf0]  ;;  %v5229_v31 = vld [vmem:[%s10814_s1 + $0x5a8] sm:$0xf]  ;;  %v5518_v32 = vor.u32 %v6966_v16, %v5517_v14 }
  0xe6   :  { %2807 = vmatpush.bf16.msrb.mxu0 %v4798_v43  ;;  %v6894_v7 = vld [vmem:[%s10814_s1 + $0x5b4] sm:$0xf0]  ;;  %v5373_v33 = vld [vmem:[%s10814_s1 + $0x6c8] sm:$0xf]  ;;  %v5102_v35 = vor.u32 %v6862_v30, %v5101_v29 }
  0xe7   :  { %2820 = vmatpush.bf16.msrb.mxu1 %v4926_v46  ;;  %v6930_v34 = vld [vmem:[%s10814_s1 + $0x6d4] sm:$0xf0]  ;;  %v5501_v19 = vld [vmem:[%s10814_s1 + $0x7c8] sm:$0xf]  ;;  %v5230_v36 = vor.u32 %v6894_v7, %v5229_v31  ;;  %v2564_v24 = vpop.f32.mrf.mxu1 }
  0xe8   :  { %2783 = vmatpush.bf16.msra.mxu2 %v4510_v55  ;;  %v6962_v18 = vld [vmem:[%s10814_s1 + $0x7d4] sm:$0xf0]  ;;  %v5374_v37 = vor.u32 %v6930_v34, %v5373_v33  ;;  %v5085_v38 = vld [vmem:[%s10814_s1 + $0x488] sm:$0xf]  ;;  %v2551_v42 = vpop.f32.mrf.mxu0 }
  0xe9   :  { %2796 = vmatpush.bf16.msra.mxu3 %v4638_v49  ;;  %v6858_v39 = vld [vmem:[%s10814_s1 + $0x494] sm:$0xf0]  ;;  %v5213_v40 = vld [vmem:[%s10814_s1 + $0x588] sm:$0xf]  ;;  %v5502_v41 = vor.u32 %v6962_v18, %v5501_v19  ;;  %v2552_v45 = vadd.f32 %v2551_v42, %v8735_v26 }
  0xea   :  { %2808 = vmatpush.bf16.msrb.mxu0 %v4782_v58  ;;  %v6890_v43 = vld [vmem:[%s10814_s1 + $0x594] sm:$0xf0]  ;;  %v5357_v15 = vld [vmem:[%s10814_s1 + $0x6a8] sm:$0xf]  ;;  %v5086_v50 = vor.u32 %v6858_v39, %v5085_v38 }
  0xeb   :  { %2821 = vmatpush.bf16.msrb.mxu1 %v4910_v60  ;;  %2784 = vmatmul.bf16.vlgmr.msra.gmra.mxu2 %v7665_v22  ;;  %v6926_v44 = vld [vmem:[%s10814_s1 + $0x6b4] sm:$0xf0]  ;;  %v5485_v46 = vld [vmem:[%s10814_s1 + $0x7a8] sm:$0xf]  ;;  %v5214_v51 = vor.u32 %v6890_v43, %v5213_v40  ;;  %v2565_v52 = vadd.f32 %v2564_v24, %v2552_v45 }
  0xec   :  { %2828 = vmatpush.bf16.msrb.mxu2 %v5134_v62  ;;  %2797 = vmatmul.bf16.vlgmr.msra.gmra.mxu3 %v7676_v27  ;;  %v6958_v48 = vld [vmem:[%s10814_s1 + $0x7b4] sm:$0xf0]  ;;  %v5358_v53 = vor.u32 %v6926_v44, %v5357_v15  ;;  %v5069_v26 = vld [vmem:[%s10814_s1 + $0x468] sm:$0xf] }
  0xed   :  { %2841 = vmatpush.bf16.msrb.mxu3 %v5262_v5  ;;  %v6854_v54 = vld [vmem:[%s10814_s1 + $0x474] sm:$0xf0]  ;;  %v5197_v55 = vld [vmem:[%s10814_s1 + $0x568] sm:$0xf]  ;;  %v5486_v56 = vor.u32 %v6958_v48, %v5485_v46 }
  0xee   :  { %2809 = vmatpush.bf16.msrb.mxu0 %v4766_v13  ;;  %v6886_v57 = vld [vmem:[%s10814_s1 + $0x574] sm:$0xf0]  ;;  %v5341_v49 = vld [vmem:[%s10814_s1 + $0x688] sm:$0xf]  ;;  %v5070_v62 = vor.u32 %v6854_v54, %v5069_v26 }
  0xef   :  { %2822 = vmatpush.bf16.msrb.mxu1 %v4894_v17  ;;  %v6922_v58 = vld [vmem:[%s10814_s1 + $0x694] sm:$0xf0]  ;;  %v5469_v59 = vld [vmem:[%s10814_s1 + $0x788] sm:$0xf]  ;;  %v5198_v63 = vor.u32 %v6886_v57, %v5197_v55  ;;  %v2590_v12 = vpop.f32.mrf.mxu3 }
  0xf0   :  { %2829 = vmatpush.bf16.msrb.mxu2 %v5118_v20  ;;  %v6954_v60 = vld [vmem:[%s10814_s1 + $0x794] sm:$0xf0]  ;;  %v2577_v0 = vpop.f32.mrf.mxu2  ;;  %v5342_v4 = vor.u32 %v6922_v58, %v5341_v49  ;;  %v5053_v5 = vld [vmem:[%s10814_s1 + $0x448] sm:$0xf]  ;;  %v2553_v11 = vpop.f32.mrf.mxu0 }
  0xf1   :  { %2842 = vmatpush.bf16.msrb.mxu3 %v5246_v25  ;;  %2810 = vmatmul.bf16.vlgmr.msrb.gmra.mxu0 %v7663_v21  ;;  %v6850_v6 = vld [vmem:[%s10814_s1 + $0x454] sm:$0xf0]  ;;  %v5181_v8 = vld [vmem:[%s10814_s1 + $0x548] sm:$0xf]  ;;  %v2578_v9 = vadd.f32 %v2577_v0, %v2565_v52  ;;  %v5470_v10 = vor.u32 %v6954_v60, %v5469_v59  ;;  %v2566_v25 = vpop.f32.mrf.mxu1 }
  0xf2   :  { %2854 = vmatpush.bf16.msra.mxu0 %v5390_v28  ;;  %2823 = vmatmul.bf16.vlgmr.msrb.gmra.mxu1 %v7667_v23  ;;  %v6882_v13 = vld [vmem:[%s10814_s1 + $0x554] sm:$0xf0]  ;;  %v5325_v14 = vld [vmem:[%s10814_s1 + $0x668] sm:$0xf]  ;;  %v5054_v29 = vor.u32 %v6850_v6, %v5053_v5 }
  0xf3   :  { %2867 = vmatpush.bf16.msra.mxu1 %v5518_v32  ;;  %v6918_v16 = vld [vmem:[%s10814_s1 + $0x674] sm:$0xf0]  ;;  %v5453_v17 = vld [vmem:[%s10814_s1 + $0x768] sm:$0xf]  ;;  %v2591_v28 = vadd.f32 %v2590_v12, %v2578_v9  ;;  %v5182_v30 = vor.u32 %v6882_v13, %v5181_v8 }
  0xf4   :  { %2830 = vmatpush.bf16.msrb.mxu2 %v5102_v35  ;;  %v6950_v20 = vld [vmem:[%s10814_s1 + $0x774] sm:$0xf0]  ;;  %v5326_v31 = vor.u32 %v6918_v16, %v5325_v14  ;;  %v5037_v32 = vld [vmem:[%s10814_s1 + $0x428] sm:$0xf] }
  0xf5   :  { %2843 = vmatpush.bf16.msrb.mxu3 %v5230_v36  ;;  %v6846_v7 = vld [vmem:[%s10814_s1 + $0x434] sm:$0xf0]  ;;  %v5165_v33 = vld [vmem:[%s10814_s1 + $0x528] sm:$0xf]  ;;  %v5454_v34 = vor.u32 %v6950_v20, %v5453_v17 }
  0xf6   :  { %2855 = vmatpush.bf16.msra.mxu0 %v5374_v37  ;;  %v6878_v19 = vld [vmem:[%s10814_s1 + $0x534] sm:$0xf0]  ;;  %v5309_v18 = vld [vmem:[%s10814_s1 + $0x648] sm:$0xf]  ;;  %v5038_v38 = vor.u32 %v6846_v7, %v5037_v32 }
  0xf7   :  { %2868 = vmatpush.bf16.msra.mxu1 %v5502_v41  ;;  %v6914_v35 = vld [vmem:[%s10814_s1 + $0x654] sm:$0xf0]  ;;  %v5437_v36 = vld [vmem:[%s10814_s1 + $0x748] sm:$0xf]  ;;  %v5166_v40 = vor.u32 %v6878_v19, %v5165_v33 }
  0xf8   :  { %2831 = vmatpush.bf16.msrb.mxu2 %v5086_v50  ;;  %v6946_v37 = vld [vmem:[%s10814_s1 + $0x754] sm:$0xf0]  ;;  %v5021_v39 = vld [vmem:[%s10814_s1 + $0x408] sm:$0xf]  ;;  %v5310_v41 = vor.u32 %v6914_v35, %v5309_v18  ;;  %v2579_v44 = vpop.f32.mrf.mxu2  ;;  %v2592_v50 = vpop.f32.mrf.mxu3 }
  0xf9   :  { %2844 = vmatpush.bf16.msrb.mxu3 %v5214_v51  ;;  %v6842_v42 = vld [vmem:[%s10814_s1 + $0x414] sm:$0xf0]  ;;  %v5149_v43 = vld [vmem:[%s10814_s1 + $0x508] sm:$0xf]  ;;  %v5438_v45 = vor.u32 %v6946_v37, %v5437_v36  ;;  %v2603_v51 = vpop.f32.mrf.mxu0 }
  0xfa   :  { %2856 = vmatpush.bf16.msra.mxu0 %v5358_v53  ;;  %v6874_v15 = vld [vmem:[%s10814_s1 + $0x514] sm:$0xf0]  ;;  %v5293_v24 = vld [vmem:[%s10814_s1 + $0x628] sm:$0xf]  ;;  %v8990_v54 = vadd.f32 %v2603_v51, %v2591_v28  ;;  %v5022_v55 = vor.u32 %v6842_v42, %v5021_v39  ;;  %v439_v42 = vperm.slane %v8494_v47, 1 }
  0xfb   :  { %2869 = vmatpush.bf16.msra.mxu1 %v5486_v56  ;;  %v6910_v46 = vld [vmem:[%s10814_s1 + $0x634] sm:$0xf0]  ;;  %v5421_v48 = vld [vmem:[%s10814_s1 + $0x728] sm:$0xf]  ;;  %v5150_v49 = vor.u32 %v6874_v15, %v5149_v43 }
  0xfc   :  { %2832 = vmatpush.bf16.msrb.mxu2 %v5070_v62  ;;  %v6942_v52 = vld [vmem:[%s10814_s1 + $0x734] sm:$0xf0]  ;;  %v5645_v53 = vld [vmem:[%s10814_s1 + $0x8e8] sm:$0xf]  ;;  %v5294_v58 = vor.u32 %v6910_v46, %v5293_v24 }
  0xfd   :  { %2845 = vmatpush.bf16.msrb.mxu3 %v5198_v63  ;;  %v6998_v26 = vld [vmem:[%s10814_s1 + $0x8f4] sm:$0xf0]  ;;  %v5773_v56 = vld [vmem:[%s10814_s1 + $0x9e8] sm:$0xf]  ;;  %v5422_v60 = vor.u32 %v6942_v52, %v5421_v48 }
  0xfe   :  { %2857 = vmatpush.bf16.msra.mxu0 %v5342_v4  ;;  %v7030_v57 = vld [vmem:[%s10814_s1 + $0x9f4] sm:$0xf0]  ;;  %v5277_v59 = vld [vmem:[%s10814_s1 + $0x608] sm:$0xf]  ;;  %v5646_v62 = vor.u32 %v6998_v26, %v5645_v53 }
  0xff   :  { %2870 = vmatpush.bf16.msra.mxu1 %v5470_v10  ;;  %v6906_v63 = vld [vmem:[%s10814_s1 + $0x614] sm:$0xf0]  ;;  %v5405_v0 = vld [vmem:[%s10814_s1 + $0x708] sm:$0xf]  ;;  %v5774_v5 = vor.u32 %v7030_v57, %v5773_v56 }
 0x100   :  { %2833 = vmatpush.bf16.msrb.mxu2 %v5054_v29  ;;  %v6938_v4 = vld [vmem:[%s10814_s1 + $0x714] sm:$0xf0]  ;;  %v5629_v6 = vld [vmem:[%s10814_s1 + $0x8c8] sm:$0xf]  ;;  %v5278_v13 = vor.u32 %v6906_v63, %v5277_v59 }
 0x101   :  { %2846 = vmatpush.bf16.msrb.mxu3 %v5182_v30  ;;  %v6994_v8 = vld [vmem:[%s10814_s1 + $0x8d4] sm:$0xf0]  ;;  %v5757_v9 = vld [vmem:[%s10814_s1 + $0x9c8] sm:$0xf]  ;;  %v5406_v17 = vor.u32 %v6938_v4, %v5405_v0  ;;  %v2605_v32 = vpop.f32.mrf.mxu0 }
 0x102   :  { %2858 = vmatpush.bf16.msra.mxu0 %v5326_v31  ;;  %v7026_v10 = vld [vmem:[%s10814_s1 + $0x9d4] sm:$0xf0]  ;;  %v5901_v11 = vld [vmem:[%s10814_s1 + $0xae8] sm:$0xf]  ;;  %v5630_v20 = vor.u32 %v6994_v8, %v5629_v6 }
 0x103   :  { %2871 = vmatpush.bf16.msra.mxu1 %v5454_v34  ;;  %v7062_v12 = vld [vmem:[%s10814_s1 + $0xaf4] sm:$0xf0]  ;;  %v6029_v14 = vld [vmem:[%s10814_s1 + $0xbe8] sm:$0xf]  ;;  %v5758_v25 = vor.u32 %v7026_v10, %v5757_v9 }
 0x104   :  { %2834 = vmatpush.bf16.msrb.mxu2 %v5038_v38  ;;  %v7094_v16 = vld [vmem:[%s10814_s1 + $0xbf4] sm:$0xf0]  ;;  %v5902_v28 = vor.u32 %v7062_v12, %v5901_v11  ;;  %v5613_v29 = vld [vmem:[%s10814_s1 + $0x8a8] sm:$0xf] }
 0x105   :  { %2847 = vmatpush.bf16.msrb.mxu3 %v5166_v40  ;;  %v6990_v30 = vld [vmem:[%s10814_s1 + $0x8b4] sm:$0xf0]  ;;  %v5741_v31 = vld [vmem:[%s10814_s1 + $0x9a8] sm:$0xf]  ;;  %v6030_v7 = vor.u32 %v7094_v16, %v6029_v14 }
 0x106   :  { %2859 = vmatpush.bf16.msra.mxu0 %v5310_v41  ;;  %v7022_v33 = vld [vmem:[%s10814_s1 + $0x9b4] sm:$0xf0]  ;;  %v5885_v34 = vld [vmem:[%s10814_s1 + $0xac8] sm:$0xf]  ;;  %v5614_v36 = vor.u32 %v6990_v30, %v5613_v29 }
 0x107   :  { %2872 = vmatpush.bf16.msra.mxu1 %v5438_v45  ;;  %v7058_v19 = vld [vmem:[%s10814_s1 + $0xad4] sm:$0xf0]  ;;  %v6013_v18 = vld [vmem:[%s10814_s1 + $0xbc8] sm:$0xf]  ;;  %v5742_v38 = vor.u32 %v7022_v33, %v5741_v31  ;;  %v2616_v46 = vpop.f32.mrf.mxu1 }
 0x108   :  { %2835 = vmatpush.bf16.msrb.mxu2 %v5022_v55  ;;  %v7090_v35 = vld [vmem:[%s10814_s1 + $0xbd4] sm:$0xf0]  ;;  %v5597_v37 = vld [vmem:[%s10814_s1 + $0x888] sm:$0xf]  ;;  %v5886_v39 = vor.u32 %v7058_v19, %v5885_v34  ;;  %v2617_v55 = vadd.f32 %v2616_v46, %v439_v42 }
 0x109   :  { %2848 = vmatpush.bf16.msrb.mxu3 %v5150_v49  ;;  %v6986_v40 = vld [vmem:[%s10814_s1 + $0x894] sm:$0xf0]  ;;  %v5725_v41 = vld [vmem:[%s10814_s1 + $0x988] sm:$0xf]  ;;  %v6014_v43 = vor.u32 %v7090_v35, %v6013_v18 }
 0x10a   :  { %2860 = vmatpush.bf16.msra.mxu0 %v5294_v58  ;;  %v7018_v15 = vld [vmem:[%s10814_s1 + $0x994] sm:$0xf0]  ;;  %v5869_v44 = vld [vmem:[%s10814_s1 + $0xaa8] sm:$0xf]  ;;  %v5598_v48 = vor.u32 %v6986_v40, %v5597_v37 }
 0x10b   :  { %2873 = vmatpush.bf16.msra.mxu1 %v5422_v60  ;;  %2836 = vmatmul.bf16.vlgmr.msrb.gmra.mxu2 %v7758_v1  ;;  %v7054_v45 = vld [vmem:[%s10814_s1 + $0xab4] sm:$0xf0]  ;;  %v5997_v47 = vld [vmem:[%s10814_s1 + $0xba8] sm:$0xf]  ;;  %v5726_v50 = vor.u32 %v7018_v15, %v5725_v41 }
 0x10c   :  { %2880 = vmatpush.bf16.msra.mxu2 %v5646_v62  ;;  %2849 = vmatmul.bf16.vlgmr.msrb.gmra.mxu3 %v7762_v3  ;;  %v7086_v24 = vld [vmem:[%s10814_s1 + $0xbb4] sm:$0xf0]  ;;  %v5870_v51 = vor.u32 %v7054_v45, %v5869_v44  ;;  %v5581_v52 = vld [vmem:[%s10814_s1 + $0x868] sm:$0xf] }
 0x10d   :  { %2893 = vmatpush.bf16.msra.mxu3 %v5774_v5  ;;  %v6982_v53 = vld [vmem:[%s10814_s1 + $0x874] sm:$0xf0]  ;;  %v5709_v26 = vld [vmem:[%s10814_s1 + $0x968] sm:$0xf]  ;;  %v5998_v56 = vor.u32 %v7086_v24, %v5997_v47 }
 0x10e   :  { %2861 = vmatpush.bf16.msra.mxu0 %v5278_v13  ;;  %v7014_v57 = vld [vmem:[%s10814_s1 + $0x974] sm:$0xf0]  ;;  %v5853_v49 = vld [vmem:[%s10814_s1 + $0xa88] sm:$0xf]  ;;  %v2655_v62 = vpop.f32.mrf.mxu0  ;;  %v5582_v63 = vor.u32 %v6982_v53, %v5581_v52  ;;  %v2629_v0 = vpop.f32.mrf.mxu2  ;;  %v6740_v53 = vld [vmem:[%s10814_s1 + $0xec] sm:$0xf] }
 0x10f   :  { %2874 = vmatpush.bf16.msra.mxu1 %v5406_v17  ;;  %v7050_v58 = vld [vmem:[%s10814_s1 + $0xa94] sm:$0xf0]  ;;  %v5981_v59 = vld [vmem:[%s10814_s1 + $0xb88] sm:$0xf]  ;;  %v5710_v4 = vor.u32 %v7014_v57, %v5709_v26  ;;  %v2630_v10 = vadd.f32 %v2629_v0, %v2617_v55  ;;  %v2642_v11 = vpop.f32.mrf.mxu3  ;;  %v4623_v26 = vld [vmem:[%s10814_s1 + $0xf8] sm:$0xf0] }
 0x110   :  { %2881 = vmatpush.bf16.msra.mxu2 %v5630_v20  ;;  %v7082_v60 = vld [vmem:[%s10814_s1 + $0xb94] sm:$0xf0]  ;;  %v5854_v5 = vor.u32 %v7050_v58, %v5853_v49  ;;  %v5565_v6 = vld [vmem:[%s10814_s1 + $0x848] sm:$0xf] }
 0x111   :  { %2894 = vmatpush.bf16.msra.mxu3 %v5758_v25  ;;  %2862 = vmatmul.bf16.vlgmr.msra.gmra.mxu0 %v7753_v61  ;;  %v6978_v8 = vld [vmem:[%s10814_s1 + $0x854] sm:$0xf0]  ;;  %v5693_v9 = vld [vmem:[%s10814_s1 + $0x948] sm:$0xf]  ;;  %v5982_v12 = vor.u32 %v7082_v60, %v5981_v59  ;;  %v2643_v25 = vadd.f32 %v2642_v11, %v2630_v10  ;;  %v6772_v11 = vld [vmem:[%s10814_s1 + $0x1ec] sm:$0xf] }
 0x112   :  { %2906 = vmatpush.bf16.msrb.mxu0 %v5902_v28  ;;  %2875 = vmatmul.bf16.vlgmr.msra.gmra.mxu1 %v7760_v2  ;;  %v7010_v13 = vld [vmem:[%s10814_s1 + $0x954] sm:$0xf0]  ;;  %v5837_v14 = vld [vmem:[%s10814_s1 + $0xa68] sm:$0xf]  ;;  %v2618_v28 = vpop.f32.mrf.mxu1  ;;  %v5566_v29 = vor.u32 %v6978_v8, %v5565_v6  ;;  %v4607_v8 = vld [vmem:[%s10814_s1 + $0xd8] sm:$0xf0] }
 0x113   :  { %2919 = vmatpush.bf16.msrb.mxu1 %v6030_v7  ;;  %v7046_v16 = vld [vmem:[%s10814_s1 + $0xa74] sm:$0xf0]  ;;  %v5965_v17 = vld [vmem:[%s10814_s1 + $0xb68] sm:$0xf]  ;;  %v5694_v30 = vor.u32 %v7010_v13, %v5693_v9  ;;  %v9144_v34 = vadd.f32 %v2655_v62, %v2643_v25  ;;  %v6804_v13 = vld [vmem:[%s10814_s1 + $0x2ec] sm:$0xf] }
 0x114   :  { %2882 = vmatpush.bf16.msra.mxu2 %v5614_v36  ;;  %v7078_v20 = vld [vmem:[%s10814_s1 + $0xb74] sm:$0xf0]  ;;  %v5838_v31 = vor.u32 %v7046_v16, %v5837_v14  ;;  %v5549_v32 = vld [vmem:[%s10814_s1 + $0x828] sm:$0xf]  ;;  %v4879_v16 = vld [vmem:[%s10814_s1 + $0x2f8] sm:$0xf0] }
 0x115   :  { %2895 = vmatpush.bf16.msra.mxu3 %v5742_v38  ;;  %v6974_v7 = vld [vmem:[%s10814_s1 + $0x834] sm:$0xf0]  ;;  %v5677_v33 = vld [vmem:[%s10814_s1 + $0x928] sm:$0xf]  ;;  %v5966_v19 = vor.u32 %v7078_v20, %v5965_v17  ;;  %v6836_v17 = vld [vmem:[%s10814_s1 + $0x3ec] sm:$0xf] }
 0x116   :  { %2907 = vmatpush.bf16.msrb.mxu0 %v5886_v39  ;;  %v7006_v18 = vld [vmem:[%s10814_s1 + $0x934] sm:$0xf0]  ;;  %v5821_v35 = vld [vmem:[%s10814_s1 + $0xa48] sm:$0xf]  ;;  %v2657_v39 = vpop.f32.mrf.mxu0  ;;  %v5550_v40 = vor.u32 %v6974_v7, %v5549_v32  ;;  %v2631_v42 = vpop.f32.mrf.mxu2  ;;  %v5007_v20 = vld [vmem:[%s10814_s1 + $0x3f8] sm:$0xf0] }
 0x117   :  { %2920 = vmatpush.bf16.msrb.mxu1 %v6014_v43  ;;  %v7042_v36 = vld [vmem:[%s10814_s1 + $0xa54] sm:$0xf0]  ;;  %v5949_v37 = vld [vmem:[%s10814_s1 + $0xb48] sm:$0xf]  ;;  %v5678_v43 = vor.u32 %v7006_v18, %v5677_v33  ;;  %v2644_v24 = vpop.f32.mrf.mxu3  ;;  %v4591_v32 = vld [vmem:[%s10814_s1 + $0xb8] sm:$0xf0]  ;;  %v5010_v18 = vor.u32 %v6836_v17, %v5007_v20 }
 0x118   :  { %2883 = vmatpush.bf16.msra.mxu2 %v5598_v48  ;;  %v7074_v38 = vld [vmem:[%s10814_s1 + $0xb54] sm:$0xf0]  ;;  %v5533_v41 = vld [vmem:[%s10814_s1 + $0x808] sm:$0xf]  ;;  %v5822_v15 = vor.u32 %v7042_v36, %v5821_v35  ;;  %v9245_v7 = vld [vmem:[#allocation1] sm:$0xff] }
 0x119   :  { %2896 = vmatpush.bf16.msra.mxu3 %v5726_v50  ;;  %v6970_v44 = vld [vmem:[%s10814_s1 + $0x814] sm:$0xf0]  ;;  %v5661_v45 = vld [vmem:[%s10814_s1 + $0x908] sm:$0xf]  ;;  %v5950_v46 = vor.u32 %v7074_v38, %v5949_v37  ;;  %v6768_v35 = vld [vmem:[%s10814_s1 + $0x1cc] sm:$0xf] }
 0x11a   :  { %2908 = vmatpush.bf16.msrb.mxu0 %v5870_v51  ;;  %v7002_v47 = vld [vmem:[%s10814_s1 + $0x914] sm:$0xf0]  ;;  %v5805_v48 = vld [vmem:[%s10814_s1 + $0xa28] sm:$0xf]  ;;  %v5534_v55 = vor.u32 %v6970_v44, %v5533_v41  ;;  %v4735_v36 = vld [vmem:[%s10814_s1 + $0x1d8] sm:$0xf0] }
 0x11b   :  { %2921 = vmatpush.bf16.msrb.mxu1 %v5998_v56  ;;  %v7038_v50 = vld [vmem:[%s10814_s1 + $0xa34] sm:$0xf0]  ;;  %v5933_v51 = vld [vmem:[%s10814_s1 + $0xb28] sm:$0xf]  ;;  %v5662_v49 = vor.u32 %v7002_v47, %v5661_v45  ;;  %v6800_v37 = vld [vmem:[%s10814_s1 + $0x2cc] sm:$0xf]  ;;  %v4738_v42 = vor.u32 %v6768_v35, %v4735_v36 }
 0x11c   :  { %2884 = vmatpush.bf16.msra.mxu2 %v5582_v63  ;;  %v7070_v52 = vld [vmem:[%s10814_s1 + $0xb34] sm:$0xf0]  ;;  %v6061_v56 = vld [vmem:[%s10814_s1 + $0xc28] sm:$0xf]  ;;  %v5806_v58 = vor.u32 %v7038_v50, %v5805_v48  ;;  %v4626_v63 = vor.u32 %v6740_v53, %v4623_v26  ;;  %v4863_v38 = vld [vmem:[%s10814_s1 + $0x2d8] sm:$0xf0] }
 0x11d   :  { %2897 = vmatpush.bf16.msra.mxu3 %v5710_v4  ;;  %v7102_v57 = vld [vmem:[%s10814_s1 + $0xc34] sm:$0xf0]  ;;  %v5789_v59 = vld [vmem:[%s10814_s1 + $0xa08] sm:$0xf]  ;;  %v5934_v62 = vor.u32 %v7070_v52, %v5933_v51  ;;  %v6832_v39 = vld [vmem:[%s10814_s1 + $0x3cc] sm:$0xf]  ;;  %v4866_v44 = vor.u32 %v6800_v37, %v4863_v38 }
 0x11e   :  { %2909 = vmatpush.bf16.msrb.mxu0 %v5854_v5  ;;  %v7034_v60 = vld [vmem:[%s10814_s1 + $0xa14] sm:$0xf0]  ;;  %v5917_v0 = vld [vmem:[%s10814_s1 + $0xb08] sm:$0xf]  ;;  %v6736_v5 = vld [vmem:[%s10814_s1 + $0xcc] sm:$0xf]  ;;  %v6062_v6 = vor.u32 %v7102_v57, %v6061_v56 }
 0x11f   :  { %2922 = vmatpush.bf16.msrb.mxu1 %v5982_v12  ;;  %v7066_v4 = vld [vmem:[%s10814_s1 + $0xb14] sm:$0xf0]  ;;  %v6045_v9 = vld [vmem:[%s10814_s1 + $0xc08] sm:$0xf]  ;;  %v4751_v12 = vld [vmem:[%s10814_s1 + $0x1f8] sm:$0xf0]  ;;  %v5790_v14 = vor.u32 %v7034_v60, %v5789_v59  ;;  %v4610_v28 = vor.u32 %v6736_v5, %v4607_v8 }
 0x120   :  { %2885 = vmatpush.bf16.msra.mxu2 %v5566_v29  ;;  %v7098_v10 = vld [vmem:[%s10814_s1 + $0xc14] sm:$0xf0]  ;;  %v5918_v25 = vor.u32 %v7066_v4, %v5917_v0  ;;  %v9248_v33 = vld [vmem:[#allocation1 + $0x9] sm:$0xff]  ;;  %v4719_v24 = vld [vmem:[%s10814_s1 + $0x1b8] sm:$0xf0] }
 0x121   :  { %2898 = vmatpush.bf16.msra.mxu3 %v5694_v30  ;;  %v6046_v29 = vor.u32 %v7098_v10, %v6045_v9  ;;  %v4754_v30 = vor.u32 %v6772_v11, %v4751_v12  ;;  %v6764_v47 = vld [vmem:[%s10814_s1 + $0x1ac] sm:$0xf]  ;;  %v9284_v48 = vld [vmem:[#allocation1 + $0x12] sm:$0xff]  ;;  %v4847_v50 = vld [vmem:[%s10814_s1 + $0x2b8] sm:$0xf0] }
 0x122   :  { %2910 = vmatpush.bf16.msrb.mxu0 %v5838_v31  ;;  %v6732_v31 = vld [vmem:[%s10814_s1 + $0xac] sm:$0xf]  ;;  %v9290_v51 = vld [vmem:[#allocation1 + $0x1b] sm:$0xff]  ;;  %v4722_v57 = vor.u32 %v6764_v47, %v4719_v24 }
 0x123   :  { %2923 = vmatpush.bf16.msrb.mxu1 %v5966_v19  ;;  %v4882_v19 = vor.u32 %v6804_v13, %v4879_v16  ;;  %v4594_v41 = vor.u32 %v6732_v31, %v4591_v32  ;;  %v6828_v52 = vld [vmem:[%s10814_s1 + $0x3ac] sm:$0xf]  ;;  %v4975_v53 = vld [vmem:[%s10814_s1 + $0x3b8] sm:$0xf0] }
 0x124   :  { %2886 = vmatpush.bf16.msra.mxu2 %v5550_v40  ;;  %v4991_v40 = vld [vmem:[%s10814_s1 + $0x3d8] sm:$0xf0]  ;;  %v4978_v60 = vor.u32 %v6828_v52, %v4975_v53  ;;  %v6720_v11 = vld [vmem:[%s10814_s1 + $0x4c] sm:$0xf] }
 0x125   :  { %2899 = vmatpush.bf16.msra.mxu3 %v5678_v43  ;;  %v6728_v43 = vld [vmem:[%s10814_s1 + $0x8c] sm:$0xf]  ;;  %v4994_v45 = vor.u32 %v6832_v39, %v4991_v40  ;;  %v4831_v0 = vld [vmem:[%s10814_s1 + $0x298] sm:$0xf0]  ;;  %v9356_v39 = vld [vmem:[#allocation1 + $0x24] sm:$0xff] }
 0x126   :  { %2911 = vmatpush.bf16.msrb.mxu0 %v5822_v15  ;;  %v4575_v15 = vld [vmem:[%s10814_s1 + $0x98] sm:$0xf0]  ;;  %v6756_v17 = vld [vmem:[%s10814_s1 + $0x16c] sm:$0xf] }
 0x127   :  { %2924 = vmatpush.bf16.msrb.mxu1 %v5950_v46  ;;  %v6796_v46 = vld [vmem:[%s10814_s1 + $0x2ac] sm:$0xf]  ;;  %v2668_v26 = vpop.f32.mrf.mxu1  ;;  %v4959_v8 = vld [vmem:[%s10814_s1 + $0x398] sm:$0xf0] }
 0x128   :  { %2887 = vmatpush.bf16.msra.mxu2 %v5534_v55  ;;  %v4578_v55 = vor.u32 %v6728_v43, %v4575_v15  ;;  %v2669_v56 = vadd.f32 %v2668_v26, %v9144_v34  ;;  %v4850_v59 = vor.u32 %v6796_v46, %v4847_v50  ;;  %v4703_v34 = vld [vmem:[%s10814_s1 + $0x198] sm:$0xf0]  ;;  %v6716_v36 = vld [vmem:[%s10814_s1 + $0x2c] sm:$0xf] }
 0x129   :  { %2900 = vmatpush.bf16.msra.mxu3 %v5662_v49  ;;  %v6724_v49 = vld [vmem:[%s10814_s1 + $0x6c] sm:$0xf]  ;;  %v4543_v12 = vld [vmem:[%s10814_s1 + $0x58] sm:$0xf0] }
 0x12a   :  { %2912 = vmatpush.bf16.msrb.mxu0 %v5806_v58  ;;  %v4559_v58 = vld [vmem:[%s10814_s1 + $0x78] sm:$0xf0]  ;;  %v4546_v32 = vor.u32 %v6720_v11, %v4543_v12  ;;  %v6784_v15 = vld [vmem:[%s10814_s1 + $0x24c] sm:$0xf] }
 0x12b   :  { %2925 = vmatpush.bf16.msrb.mxu1 %v5934_v62  ;;  %2888 = vmatmul.bf16.vlgmr.msra.gmra.mxu2 %v9245_v7  ;;  %v6760_v62 = vld [vmem:[%s10814_s1 + $0x18c] sm:$0xf]  ;;  %v4562_v5 = vor.u32 %v6724_v49, %v4559_v58  ;;  %v4687_v20 = vld [vmem:[%s10814_s1 + $0x178] sm:$0xf0] }
 0x12c   :  { %2938 = vmatpush.bf16.msrb.mxu2 %v6062_v6  ;;  %2901 = vmatmul.bf16.vlgmr.msra.gmra.mxu3 %v9248_v33  ;;  %v6824_v6 = vld [vmem:[%s10814_s1 + $0x38c] sm:$0xf]  ;;  %v4706_v10 = vor.u32 %v6760_v62, %v4703_v34  ;;  %v4690_v35 = vor.u32 %v6756_v17, %v4687_v20  ;;  %v4527_v37 = vld [vmem:[%s10814_s1 + $0x38] sm:$0xf0] }
 0x12d   :  { %2945 = vmatpush.bf16.msrb.mxu3 %v4626_v63  ;;  %v6792_v63 = vld [vmem:[%s10814_s1 + $0x28c] sm:$0xf]  ;;  %v4530_v47 = vor.u32 %v6716_v36, %v4527_v37  ;;  %v4927_v46 = vld [vmem:[%s10814_s1 + $0x358] sm:$0xf0] }
 0x12e   :  { %2913 = vmatpush.bf16.msrb.mxu0 %v5790_v14  ;;  %v2707_v4 = vpop.f32.mrf.mxu0  ;;  %v2681_v9 = vpop.f32.mrf.mxu2  ;;  %v4834_v16 = vor.u32 %v6792_v63, %v4831_v0  ;;  %v6816_v24 = vld [vmem:[%s10814_s1 + $0x34c] sm:$0xf]  ;;  %v4511_v26 = vld [vmem:[%s10814_s1 + $0x18] sm:$0xf0] }
 0x12f   :  { %2926 = vmatpush.bf16.msrb.mxu1 %v5918_v25  ;;  %v2682_v13 = vadd.f32 %v2681_v9, %v2669_v56  ;;  %v2694_v14 = vpop.f32.mrf.mxu3  ;;  %v4962_v25 = vor.u32 %v6824_v6, %v4959_v8  ;;  %v2670_v31 = vpop.f32.mrf.mxu1  ;;  %v6712_v53 = vld [vmem:[%s10814_s1 + $0xc] sm:$0xf]  ;;  %v4655_v49 = vld [vmem:[%s10814_s1 + $0x138] sm:$0xf0] }
 0x130   :  { %2939 = vmatpush.bf16.msrb.mxu2 %v6046_v29  ;;  %v4815_v29 = vld [vmem:[%s10814_s1 + $0x278] sm:$0xf0]  ;;  %v6868_v58 = vld [vmem:[%s10814_s1 + $0x4ec] sm:$0xf]  ;;  %v4514_v63 = vor.u32 %v6712_v53, %v4511_v26 }
 0x131   :  { %2946 = vmatpush.bf16.msrb.mxu3 %v4610_v28  ;;  %2914 = vmatmul.bf16.vlgmr.msrb.gmra.mxu0 %v9284_v48  ;;  %v6788_v28 = vld [vmem:[%s10814_s1 + $0x26c] sm:$0xf]  ;;  %v4783_v34 = vld [vmem:[%s10814_s1 + $0x238] sm:$0xf0] }
 0x132   :  { %2958 = vmatpush.bf16.msra.mxu0 %v4754_v30  ;;  %2927 = vmatmul.bf16.vlgmr.msrb.gmra.mxu1 %v9290_v51  ;;  %v2695_v30 = vadd.f32 %v2694_v14, %v2682_v13  ;;  %v4818_v40 = vor.u32 %v6788_v28, %v4815_v29  ;;  %v6780_v62 = vld [vmem:[%s10814_s1 + $0x22c] sm:$0xf]  ;;  %v4639_v9 = vld [vmem:[%s10814_s1 + $0x118] sm:$0xf0] }
 0x133   :  { %2971 = vmatpush.bf16.msra.mxu1 %v4882_v19  ;;  %v6820_v19 = vld [vmem:[%s10814_s1 + $0x36c] sm:$0xf]  ;;  %v4786_v11 = vor.u32 %v6780_v62, %v4783_v34  ;;  %v4767_v12 = vld [vmem:[%s10814_s1 + $0x218] sm:$0xf0] }
 0x134   :  { %2984 = vmatpush.bf16.msra.mxu2 %v5010_v18  ;;  %v4943_v18 = vld [vmem:[%s10814_s1 + $0x378] sm:$0xf0]  ;;  %v9354_v38 = vadd.f32 %v2707_v4, %v2695_v30  ;;  %v6812_v0 = vld [vmem:[%s10814_s1 + $0x32c] sm:$0xf] }
 0x135   :  { %2947 = vmatpush.bf16.msrb.mxu3 %v4594_v41  ;;  %v6752_v41 = vld [vmem:[%s10814_s1 + $0x14c] sm:$0xf]  ;;  %v4946_v43 = vor.u32 %v6820_v19, %v4943_v18  ;;  %v4911_v4 = vld [vmem:[%s10814_s1 + $0x338] sm:$0xf0] }
 0x136   :  { %2959 = vmatpush.bf16.msra.mxu0 %v4738_v42  ;;  %v4671_v42 = vld [vmem:[%s10814_s1 + $0x158] sm:$0xf0]  ;;  %v2683_v50 = vpop.f32.mrf.mxu2  ;;  %v6744_v8 = vld [vmem:[%s10814_s1 + $0x10c] sm:$0xf] }
 0x137   :  { %2972 = vmatpush.bf16.msra.mxu1 %v4866_v44  ;;  %v4799_v44 = vld [vmem:[%s10814_s1 + $0x258] sm:$0xf0]  ;;  %v4674_v52 = vor.u32 %v6752_v41, %v4671_v42  ;;  %v2696_v56 = vpop.f32.mrf.mxu3  ;;  %v6864_v13 = vld [vmem:[%s10814_s1 + $0x4cc] sm:$0xf]  ;;  %v4642_v31 = vor.u32 %v6744_v8, %v4639_v9 }
 0x138   :  { %2985 = vmatpush.bf16.msra.mxu2 %v4994_v45  ;;  %v2709_v45 = vpop.f32.mrf.mxu0  ;;  %v5119_v14 = vld [vmem:[%s10814_s1 + $0x4d8] sm:$0xf0]  ;;  %v6808_v17 = vld [vmem:[%s10814_s1 + $0x30c] sm:$0xf] }
 0x139   :  { %2948 = vmatpush.bf16.msrb.mxu3 %v4578_v55  ;;  %v6748_v55 = vld [vmem:[%s10814_s1 + $0x12c] sm:$0xf]  ;;  %v4895_v28 = vld [vmem:[%s10814_s1 + $0x318] sm:$0xf0] }
 0x13a   :  { %2960 = vmatpush.bf16.msra.mxu0 %v4722_v57  ;;  %v4802_v57 = vor.u32 %v6784_v15, %v4799_v44  ;;  %v6900_v20 = vld [vmem:[%s10814_s1 + $0x5ec] sm:$0xf]  ;;  %v5391_v30 = vld [vmem:[%s10814_s1 + $0x6f8] sm:$0xf0]  ;;  %v4898_v41 = vor.u32 %v6808_v17, %v4895_v28 }
 0x13b   :  { %2973 = vmatpush.bf16.msra.mxu1 %v4850_v59  ;;  %6069 = vmatmul.msk.bf16.vlgmr.msrb.gmra.mxu2 %vm2435_vm0, %v9356_v39  ;;  %v5135_v59 = vld [vmem:[%s10814_s1 + $0x4f8] sm:$0xf0]  ;;  %v6932_v29 = vld [vmem:[%s10814_s1 + $0x6ec] sm:$0xf] }
 0x13c   :  { %2986 = vmatpush.bf16.msra.mxu2 %v4978_v60  ;;  %v4930_v60 = vor.u32 %v6816_v24, %v4927_v46  ;;  %v5138_v6 = vor.u32 %v6868_v58, %v5135_v59  ;;  %v6964_v19 = vld [vmem:[%s10814_s1 + $0x7ec] sm:$0xf]  ;;  %v5519_v18 = vld [vmem:[%s10814_s1 + $0x7f8] sm:$0xf0]  ;;  %v5394_v42 = vor.u32 %v6932_v29, %v5391_v30 }
 0x13d   :  { %2949 = vmatpush.bf16.msrb.mxu3 %v4562_v5  ;;  %v4658_v5 = vor.u32 %v6748_v55, %v4655_v49  ;;  %v6860_v37 = vld [vmem:[%s10814_s1 + $0x4ac] sm:$0xf]  ;;  %v5247_v15 = vld [vmem:[%s10814_s1 + $0x5d8] sm:$0xf0]  ;;  %v5522_v44 = vor.u32 %v6964_v19, %v5519_v18 }
 0x13e   :  { %2961 = vmatpush.bf16.msra.mxu0 %v4706_v10  ;;  %v6776_v10 = vld [vmem:[%s10814_s1 + $0x20c] sm:$0xf]  ;;  %v5087_v53 = vld [vmem:[%s10814_s1 + $0x498] sm:$0xf0] }
 0x13f   :  { %2974 = vmatpush.bf16.msra.mxu1 %v4834_v16  ;;  %v4914_v16 = vor.u32 %v6812_v0, %v4911_v4  ;;  %v6928_v45 = vld [vmem:[%s10814_s1 + $0x6cc] sm:$0xf]  ;;  %v5231_v56 = vld [vmem:[%s10814_s1 + $0x5b8] sm:$0xf0] }
 0x140   :  { %2987 = vmatpush.bf16.msra.mxu2 %v4962_v25  ;;  %v5263_v25 = vld [vmem:[%s10814_s1 + $0x5f8] sm:$0xf0]  ;;  %v6960_v46 = vld [vmem:[%s10814_s1 + $0x7cc] sm:$0xf] }
 0x141   :  { %2950 = vmatpush.bf16.msrb.mxu3 %v4546_v32  ;;  %v5122_v32 = vor.u32 %v6864_v13, %v5119_v14  ;;  %v5266_v36 = vor.u32 %v6900_v20, %v5263_v25  ;;  %v6892_v55 = vld [vmem:[%s10814_s1 + $0x5ac] sm:$0xf]  ;;  %v5359_v59 = vld [vmem:[%s10814_s1 + $0x6b8] sm:$0xf0] }
 0x142   :  { %2962 = vmatpush.bf16.msra.mxu0 %v4690_v35  ;;  %v4770_v35 = vor.u32 %v6776_v10, %v4767_v12  ;;  %v6924_v58 = vld [vmem:[%s10814_s1 + $0x6ac] sm:$0xf]  ;;  %v5234_v0 = vor.u32 %v6892_v55, %v5231_v56  ;;  %v5199_v29 = vld [vmem:[%s10814_s1 + $0x578] sm:$0xf0] }
 0x143   :  { %2975 = vmatpush.bf16.msra.mxu1 %v4818_v40  ;;  %v5103_v40 = vld [vmem:[%s10814_s1 + $0x4b8] sm:$0xf0]  ;;  %v6956_v34 = vld [vmem:[%s10814_s1 + $0x7ac] sm:$0xf]  ;;  %v5362_v4 = vor.u32 %v6924_v58, %v5359_v59 }
 0x144   :  { %2988 = vmatpush.bf16.msra.mxu2 %v4946_v43  ;;  %v6896_v43 = vld [vmem:[%s10814_s1 + $0x5cc] sm:$0xf]  ;;  %v5106_v24 = vor.u32 %v6860_v37, %v5103_v40  ;;  %v5327_v18 = vld [vmem:[%s10814_s1 + $0x678] sm:$0xf0] }
 0x145   :  { %2951 = vmatpush.bf16.msrb.mxu3 %v4530_v47  ;;  %v5375_v47 = vld [vmem:[%s10814_s1 + $0x6d8] sm:$0xf0]  ;;  %v5250_v50 = vor.u32 %v6896_v43, %v5247_v15  ;;  %v6920_v8 = vld [vmem:[%s10814_s1 + $0x68c] sm:$0xf] }
 0x146   :  { %2963 = vmatpush.bf16.msra.mxu0 %v4674_v52  ;;  %v6856_v52 = vld [vmem:[%s10814_s1 + $0x48c] sm:$0xf]  ;;  %v5378_v26 = vor.u32 %v6928_v45, %v5375_v47  ;;  %v5455_v37 = vld [vmem:[%s10814_s1 + $0x778] sm:$0xf0] }
 0x147   :  { %2976 = vmatpush.bf16.msra.mxu1 %v4802_v57  ;;  %v2720_v49 = vpop.f32.mrf.mxu1  ;;  %v5090_v62 = vor.u32 %v6856_v52, %v5087_v53  ;;  %v6952_v10 = vld [vmem:[%s10814_s1 + $0x78c] sm:$0xf]  ;;  %v5039_v43 = vld [vmem:[%s10814_s1 + $0x438] sm:$0xf0] }
 0x148   :  { %2989 = vmatpush.bf16.msra.mxu2 %v4930_v60  ;;  %v2721_v60 = vadd.f32 %v2720_v49, %v9354_v38  ;;  %v5071_v38 = vld [vmem:[%s10814_s1 + $0x478] sm:$0xf0]  ;;  %v6848_v14 = vld [vmem:[%s10814_s1 + $0x44c] sm:$0xf] }
 0x149   :  { %2952 = vmatpush.bf16.msrb.mxu3 %v4514_v63  ;;  %v5487_v63 = vld [vmem:[%s10814_s1 + $0x7b8] sm:$0xf0]  ;;  %v6884_v28 = vld [vmem:[%s10814_s1 + $0x56c] sm:$0xf] }
 0x14a   :  { %2964 = vmatpush.bf16.msra.mxu0 %v4658_v5  ;;  %v6888_v5 = vld [vmem:[%s10814_s1 + $0x58c] sm:$0xf]  ;;  %v5183_v45 = vld [vmem:[%s10814_s1 + $0x558] sm:$0xf0] }
 0x14b   :  { %2977 = vmatpush.bf16.msra.mxu1 %v4786_v11  ;;  %v5471_v11 = vld [vmem:[%s10814_s1 + $0x798] sm:$0xf0]  ;;  %v6916_v19 = vld [vmem:[%s10814_s1 + $0x66c] sm:$0xf] }
 0x14c   :  { %2990 = vmatpush.bf16.msra.mxu2 %v4914_v16  ;;  %2953 = vmatmul.bf16.vlgmr.msrb.gmra.mxu3 %v7665_v22  ;;  %v5503_v22 = vld [vmem:[%s10814_s1 + $0x7d8] sm:$0xf0]  ;;  %v5330_v15 = vor.u32 %v6916_v19, %v5327_v18  ;;  %v6944_v52 = vld [vmem:[%s10814_s1 + $0x74c] sm:$0xf] }
 0x14d   :  { %2997 = vmatpush.bf16.msra.mxu3 %v5138_v6  ;;  %v5506_v57 = vor.u32 %v6960_v46, %v5503_v22  ;;  %v5490_v6 = vor.u32 %v6956_v34, %v5487_v63  ;;  %v5055_v16 = vld [vmem:[%s10814_s1 + $0x458] sm:$0xf0]  ;;  %v6912_v46 = vld [vmem:[%s10814_s1 + $0x64c] sm:$0xf] }
 0x14e   :  { %2965 = vmatpush.bf16.msra.mxu0 %v4642_v31  ;;  %v2759_v12 = vpop.f32.mrf.mxu0  ;;  %v2733_v17 = vpop.f32.mrf.mxu2  ;;  %v5474_v31 = vor.u32 %v6952_v10, %v5471_v11  ;;  %v5311_v22 = vld [vmem:[%s10814_s1 + $0x658] sm:$0xf0]  ;;  %v6840_v56 = vld [vmem:[%s10814_s1 + $0x40c] sm:$0xf] }
 0x14f   :  { %2978 = vmatpush.bf16.msra.mxu1 %v4770_v35  ;;  %v2746_v25 = vpop.f32.mrf.mxu3  ;;  %v2734_v30 = vadd.f32 %v2733_v17, %v2721_v60  ;;  %v5058_v35 = vor.u32 %v6848_v14, %v5055_v16  ;;  %v5439_v53 = vld [vmem:[%s10814_s1 + $0x758] sm:$0xf0]  ;;  %v6876_v49 = vld [vmem:[%s10814_s1 + $0x52c] sm:$0xf]  ;;  %v5314_v58 = vor.u32 %v6912_v46, %v5311_v22 }
 0x150   :  { %2991 = vmatpush.bf16.msra.mxu2 %v4898_v41  ;;  %v5202_v41 = vor.u32 %v6884_v28, %v5199_v29  ;;  %v5167_v59 = vld [vmem:[%s10814_s1 + $0x538] sm:$0xf0]  ;;  %v6996_v60 = vld [vmem:[%s10814_s1 + $0x8ec] sm:$0xf] }
 0x151   :  { %2998 = vmatpush.bf16.msra.mxu3 %v5122_v32  ;;  %2966 = vmatmul.bf16.vlgmr.msra.gmra.mxu0 %v7676_v27  ;;  %v6852_v27 = vld [vmem:[%s10814_s1 + $0x46c] sm:$0xf]  ;;  %v2722_v32 = vpop.f32.mrf.mxu1  ;;  %v2747_v40 = vadd.f32 %v2746_v25, %v2734_v30  ;;  %v5151_v10 = vld [vmem:[%s10814_s1 + $0x518] sm:$0xf0] }
 0x152   :  { %3010 = vmatpush.bf16.msrb.mxu0 %v5266_v36  ;;  %2979 = vmatmul.bf16.vlgmr.msra.gmra.mxu1 %v7663_v21  ;;  %v5215_v21 = vld [vmem:[%s10814_s1 + $0x598] sm:$0xf0]  ;;  %v5074_v9 = vor.u32 %v6852_v27, %v5071_v38  ;;  %v6948_v36 = vld [vmem:[%s10814_s1 + $0x76c] sm:$0xf] }
 0x153   :  { %3023 = vmatpush.bf16.msrb.mxu1 %v5394_v42  ;;  %2992 = vmatmul.bf16.vlgmr.msra.gmra.mxu2 %v7667_v23  ;;  %v5343_v23 = vld [vmem:[%s10814_s1 + $0x698] sm:$0xf0]  ;;  %v5218_v13 = vor.u32 %v6888_v5, %v5215_v21  ;;  %v6844_v42 = vld [vmem:[%s10814_s1 + $0x42c] sm:$0xf]  ;;  %v9563_v47 = vadd.f32 %v2759_v12, %v2747_v40 }
 0x154   :  { %3036 = vmatpush.bf16.msrb.mxu2 %v5522_v44  ;;  %v5346_v20 = vor.u32 %v6920_v8, %v5343_v23  ;;  %v6880_v44 = vld [vmem:[%s10814_s1 + $0x54c] sm:$0xf]  ;;  %v5295_v38 = vld [vmem:[%s10814_s1 + $0x638] sm:$0xf0]  ;;  %v5170_v8 = vor.u32 %v6876_v49, %v5167_v59 }
 0x155   :  { %2999 = vmatpush.bf16.msra.mxu3 %v5106_v24  ;;  %v5458_v24 = vor.u32 %v6948_v36, %v5455_v37  ;;  %v5186_v55 = vor.u32 %v6880_v44, %v5183_v45  ;;  %v6908_v27 = vld [vmem:[%s10814_s1 + $0x62c] sm:$0xf]  ;;  %v5423_v21 = vld [vmem:[%s10814_s1 + $0x738] sm:$0xf0] }
 0x156   :  { %3011 = vmatpush.bf16.msrb.mxu0 %v5250_v50  ;;  %v5042_v50 = vor.u32 %v6844_v42, %v5039_v43  ;;  %v2735_v63 = vpop.f32.mrf.mxu2  ;;  %v6940_v5 = vld [vmem:[%s10814_s1 + $0x72c] sm:$0xf]  ;;  %v5298_v12 = vor.u32 %v6908_v27, %v5295_v38  ;;  %v5631_v16 = vld [vmem:[%s10814_s1 + $0x8d8] sm:$0xf0] }
 0x157   :  { %3024 = vmatpush.bf16.msrb.mxu1 %v5378_v26  ;;  %v2761_v26 = vpop.f32.mrf.mxu0  ;;  %v2748_v34 = vpop.f32.mrf.mxu3  ;;  %v6904_v11 = vld [vmem:[%s10814_s1 + $0x60c] sm:$0xf]  ;;  %v5426_v17 = vor.u32 %v6940_v5, %v5423_v21  ;;  %v5775_v28 = vld [vmem:[%s10814_s1 + $0x9f8] sm:$0xf0] }
 0x158   :  { %3037 = vmatpush.bf16.msrb.mxu2 %v5506_v57  ;;  %v5023_v57 = vld [vmem:[%s10814_s1 + $0x418] sm:$0xf0]  ;;  %v6992_v14 = vld [vmem:[%s10814_s1 + $0x8cc] sm:$0xf] }
 0x159   :  { %3000 = vmatpush.bf16.msra.mxu3 %v5090_v62  ;;  %v5647_v62 = vld [vmem:[%s10814_s1 + $0x8f8] sm:$0xf0]  ;;  %v7028_v25 = vld [vmem:[%s10814_s1 + $0x9ec] sm:$0xf]  ;;  %v5634_v19 = vor.u32 %v6992_v14, %v5631_v16 }
 0x15a   :  { %3012 = vmatpush.bf16.msrb.mxu0 %v5234_v0  ;;  %v5442_v0 = vor.u32 %v6944_v52, %v5439_v53  ;;  %v5650_v23 = vor.u32 %v6996_v60, %v5647_v62  ;;  %v5407_v29 = vld [vmem:[%s10814_s1 + $0x718] sm:$0xf0]  ;;  %v7060_v30 = vld [vmem:[%s10814_s1 + $0xaec] sm:$0xf]  ;;  %v5778_v37 = vor.u32 %v7028_v25, %v5775_v28 }
 0x15b   :  { %3025 = vmatpush.bf16.msrb.mxu1 %v5362_v4  ;;  %v5026_v4 = vor.u32 %v6840_v56, %v5023_v57  ;;  %v7092_v18 = vld [vmem:[%s10814_s1 + $0xbec] sm:$0xf]  ;;  %v5759_v44 = vld [vmem:[%s10814_s1 + $0x9d8] sm:$0xf0] }
 0x15c   :  { %3038 = vmatpush.bf16.msrb.mxu2 %v5490_v6  ;;  %v9607_v6 = vpop.f32.mrf.mxu1  ;;  %v6988_v40 = vld [vmem:[%s10814_s1 + $0x8ac] sm:$0xf]  ;;  %v5887_v46 = vld [vmem:[%s10814_s1 + $0xad8] sm:$0xf0] }
 0x15d   :  { %3001 = vmatpush.bf16.msra.mxu3 %v5074_v9  ;;  %v6872_v9 = vld [vmem:[%s10814_s1 + $0x50c] sm:$0xf]  ;;  %v5743_v49 = vld [vmem:[%s10814_s1 + $0x9b8] sm:$0xf0] }
 0x15e   :  { %3013 = vmatpush.bf16.msrb.mxu0 %v5218_v13  ;;  %v5279_v13 = vld [vmem:[%s10814_s1 + $0x618] sm:$0xf0]  ;;  %v5154_v32 = vor.u32 %v6872_v9, %v5151_v10  ;;  %v7088_v22 = vld [vmem:[%s10814_s1 + $0xbcc] sm:$0xf] }
 0x15f   :  { %3026 = vmatpush.bf16.msrb.mxu1 %v5346_v20  ;;  %v6936_v20 = vld [vmem:[%s10814_s1 + $0x70c] sm:$0xf]  ;;  %v5282_v36 = vor.u32 %v6904_v11, %v5279_v13  ;;  %v5871_v60 = vld [vmem:[%s10814_s1 + $0xab8] sm:$0xf0] }
 0x160   :  { %3039 = vmatpush.bf16.msrb.mxu2 %v5474_v31  ;;  %v5903_v31 = vld [vmem:[%s10814_s1 + $0xaf8] sm:$0xf0]  ;;  %v5410_v42 = vor.u32 %v6936_v20, %v5407_v29  ;;  %v6984_v26 = vld [vmem:[%s10814_s1 + $0x88c] sm:$0xf] }
 0x161   :  { %3002 = vmatpush.bf16.msra.mxu3 %v5058_v35  ;;  %v6031_v35 = vld [vmem:[%s10814_s1 + $0xbf8] sm:$0xf0]  ;;  %v5906_v43 = vor.u32 %v7060_v30, %v5903_v31  ;;  %v7020_v57 = vld [vmem:[%s10814_s1 + $0x9ac] sm:$0xf] }
 0x162   :  { %3014 = vmatpush.bf16.msrb.mxu0 %v5202_v41  ;;  %v5615_v41 = vld [vmem:[%s10814_s1 + $0x8b8] sm:$0xf0]  ;;  %v6034_v45 = vor.u32 %v7092_v18, %v6031_v35  ;;  %v7052_v59 = vld [vmem:[%s10814_s1 + $0xaac] sm:$0xf] }
 0x163   :  { %3027 = vmatpush.bf16.msrb.mxu1 %v5330_v15  ;;  %v7024_v15 = vld [vmem:[%s10814_s1 + $0x9cc] sm:$0xf]  ;;  %v5999_v63 = vld [vmem:[%s10814_s1 + $0xbb8] sm:$0xf0]  ;;  %v5874_v38 = vor.u32 %v7052_v59, %v5871_v60 }
 0x164   :  { %3040 = vmatpush.bf16.msrb.mxu2 %v5458_v24  ;;  %v7056_v24 = vld [vmem:[%s10814_s1 + $0xacc] sm:$0xf]  ;;  %v2774_v52 = vpop.f32.mrf.mxu1  ;;  %v5762_v53 = vor.u32 %v7024_v15, %v5759_v44  ;;  %v5583_v27 = vld [vmem:[%s10814_s1 + $0x878] sm:$0xf0] }
 0x165   :  { %3003 = vmatpush.bf16.msra.mxu3 %v5042_v50  ;;  %v6015_v50 = vld [vmem:[%s10814_s1 + $0xbd8] sm:$0xf0]  ;;  %v5890_v56 = vor.u32 %v7056_v24, %v5887_v46  ;;  %v7084_v34 = vld [vmem:[%s10814_s1 + $0xbac] sm:$0xf] }
 0x166   :  { %3015 = vmatpush.bf16.msrb.mxu0 %v5186_v55  ;;  %v5599_v55 = vld [vmem:[%s10814_s1 + $0x898] sm:$0xf0]  ;;  %v7048_v5 = vld [vmem:[%s10814_s1 + $0xa8c] sm:$0xf] }
 0x167   :  { %3028 = vmatpush.bf16.msrb.mxu1 %v5314_v58  ;;  %v6018_v58 = vor.u32 %v7088_v22, %v6015_v50  ;;  %v5602_v62 = vor.u32 %v6984_v26, %v5599_v55  ;;  %v5855_v21 = vld [vmem:[%s10814_s1 + $0xa98] sm:$0xf0]  ;;  %v6976_v11 = vld [vmem:[%s10814_s1 + $0x84c] sm:$0xf] }
 0x168   :  { %3041 = vmatpush.bf16.msrb.mxu2 %v5442_v0  ;;  %v5746_v0 = vor.u32 %v7020_v57, %v5743_v49  ;;  %v5983_v9 = vld [vmem:[%s10814_s1 + $0xb98] sm:$0xf0]  ;;  %v5858_v14 = vor.u32 %v7048_v5, %v5855_v21  ;;  %v7012_v16 = vld [vmem:[%s10814_s1 + $0x96c] sm:$0xf] }
 0x169   :  { %3004 = vmatpush.bf16.msra.mxu3 %v5026_v4  ;;  %v7016_v4 = vld [vmem:[%s10814_s1 + $0x98c] sm:$0xf]  ;;  %v5839_v30 = vld [vmem:[%s10814_s1 + $0xa78] sm:$0xf0] }
 0x16a   :  { %3016 = vmatpush.bf16.msrb.mxu0 %v5170_v8  ;;  %v7044_v29 = vld [vmem:[%s10814_s1 + $0xa6c] sm:$0xf]  ;;  %v5967_v18 = vld [vmem:[%s10814_s1 + $0xb78] sm:$0xf0] }
 0x16b   :  { %3029 = vmatpush.bf16.msrb.mxu1 %v5298_v12  ;;  %v5567_v12 = vld [vmem:[%s10814_s1 + $0x858] sm:$0xf0]  ;;  %v7040_v15 = vld [vmem:[%s10814_s1 + $0xa4c] sm:$0xf] }
 0x16c   :  { %3042 = vmatpush.bf16.msrb.mxu2 %v5426_v17  ;;  %3005 = vmatmul.bf16.vlgmr.msra.gmra.mxu3 %v7758_v1  ;;  %v5618_v1 = vor.u32 %v6988_v40, %v5615_v41  ;;  %v5711_v17 = vld [vmem:[%s10814_s1 + $0x978] sm:$0xf0]  ;;  %v5842_v40 = vor.u32 %v7044_v29, %v5839_v30  ;;  %v7008_v41 = vld [vmem:[%s10814_s1 + $0x94c] sm:$0xf]  ;;  %v6441_v29 = vld [vmem:[%s10816_s3 + $0x2e0] sm:$0xf] }
 0x16d   :  { %3049 = vmatpush.bf16.msrb.mxu3 %v5650_v23  ;;  %v7080_v23 = vld [vmem:[%s10814_s1 + $0xb8c] sm:$0xf]  ;;  %v5714_v35 = vor.u32 %v7012_v16, %v5711_v17  ;;  %v5823_v44 = vld [vmem:[%s10814_s1 + $0xa58] sm:$0xf0]  ;;  %v6313_v16 = vld [vmem:[%s10816_s3 + $0x1e0] sm:$0xf] }
 0x16e   :  { %3017 = vmatpush.bf16.msrb.mxu0 %v5154_v32  ;;  %v9733_v13 = vpop.f32.mrf.mxu0  ;;  %v9741_v20 = vpop.f32.mrf.mxu2  ;;  %v5986_v28 = vor.u32 %v7080_v23, %v5983_v9  ;;  %v5570_v32 = vor.u32 %v6976_v11, %v5567_v12  ;;  %v7072_v24 = vld [vmem:[%s10814_s1 + $0xb4c] sm:$0xf]  ;;  %v5951_v46 = vld [vmem:[%s10814_s1 + $0xb58] sm:$0xf0]  ;;  %v5826_v26 = vor.u32 %v7040_v15, %v5823_v44  ;;  %v6185_v11 = vld [vmem:[%s10816_s3 + $0xe0] sm:$0xf] }
 0x16f   :  { %3030 = vmatpush.bf16.msrb.mxu1 %v5282_v36  ;;  %v9743_v25 = vpop.f32.mrf.mxu1  ;;  %v9751_v31 = vpop.f32.mrf.mxu3  ;;  %v6972_v36 = vld [vmem:[%s10814_s1 + $0x82c] sm:$0xf]  ;;  %v5535_v50 = vld [vmem:[%s10814_s1 + $0x818] sm:$0xf0]  ;;  %v5954_v59 = vor.u32 %v7072_v24, %v5951_v46  ;;  %v7133_v12 = vld [vmem:[%s10816_s3 + $0xec] sm:$0xf0] }
 0x170   :  { %3043 = vmatpush.bf16.msrb.mxu2 %v5410_v42  ;;  %v5695_v42 = vld [vmem:[%s10814_s1 + $0x958] sm:$0xf0]  ;;  %v6968_v22 = vld [vmem:[%s10814_s1 + $0x80c] sm:$0xf]  ;;  %v7165_v17 = vld [vmem:[%s10816_s3 + $0x1ec] sm:$0xf0] }
 0x171   :  { %3050 = vmatpush.bf16.msrb.mxu3 %v5634_v19  ;;  %3018 = vmatmul.bf16.vlgmr.msrb.gmra.mxu0 %v7762_v3  ;;  %v6980_v3 = vld [vmem:[%s10814_s1 + $0x86c] sm:$0xf]  ;;  %v5679_v55 = vld [vmem:[%s10814_s1 + $0x938] sm:$0xf0]  ;;  %v7197_v30 = vld [vmem:[%s10816_s3 + $0x2ec] sm:$0xf0] }
 0x172   :  { %3062 = vmatpush.bf16.msra.mxu0 %v5778_v37  ;;  %3031 = vmatmul.bf16.vlgmr.msrb.gmra.mxu1 %v7753_v61  ;;  %v5727_v61 = vld [vmem:[%s10814_s1 + $0x998] sm:$0xf0]  ;;  %v5586_v8 = vor.u32 %v6980_v3, %v5583_v27  ;;  %v7076_v19 = vld [vmem:[%s10814_s1 + $0xb6c] sm:$0xf]  ;;  %v7193_v15 = vld [vmem:[%s10816_s3 + $0x2cc] sm:$0xf0] }
 0x173   :  { %3075 = vmatpush.bf16.msra.mxu1 %v5906_v43  ;;  %3044 = vmatmul.bf16.vlgmr.msrb.gmra.mxu2 %v7760_v2  ;;  %v6002_v2 = vor.u32 %v7084_v34, %v5999_v63  ;;  %v5730_v10 = vor.u32 %v7016_v4, %v5727_v61  ;;  %v5551_v37 = vld [vmem:[%s10814_s1 + $0x838] sm:$0xf0]  ;;  %v5970_v43 = vor.u32 %v7076_v19, %v5967_v18  ;;  %v7004_v52 = vld [vmem:[%s10814_s1 + $0x92c] sm:$0xf]  ;;  %v6153_v24 = vld [vmem:[%s10816_s3 + $0xa0] sm:$0xf] }
 0x174   :  { %3088 = vmatpush.bf16.msra.mxu2 %v6034_v45  ;;  %v5554_v45 = vor.u32 %v6972_v36, %v5551_v37  ;;  %v6063_v57 = vld [vmem:[%s10814_s1 + $0xc38] sm:$0xf0]  ;;  %v7036_v60 = vld [vmem:[%s10814_s1 + $0xa2c] sm:$0xf]  ;;  %v5538_v63 = vor.u32 %v6968_v22, %v5535_v50  ;;  %v5682_v27 = vor.u32 %v7004_v52, %v5679_v55  ;;  %v6186_v18 = vor.u32 %v7133_v12, %v6185_v11  ;;  %v6169_v37 = vld [vmem:[%s10816_s3 + $0xc0] sm:$0xf] }
 0x175   :  { %3051 = vmatpush.bf16.msrb.mxu3 %v5618_v1  ;;  %v5698_v1 = vor.u32 %v7008_v41, %v5695_v42  ;;  %v5935_v3 = vld [vmem:[%s10814_s1 + $0xb38] sm:$0xf0]  ;;  %v7032_v61 = vld [vmem:[%s10814_s1 + $0xa0c] sm:$0xf]  ;;  %v6314_v36 = vor.u32 %v7165_v17, %v6313_v16  ;;  %v6297_v41 = vld [vmem:[%s10816_s3 + $0x1c0] sm:$0xf] }
 0x176   :  { %3063 = vmatpush.bf16.msra.mxu0 %v5762_v53  ;;  %v2813_v53 = vpop.f32.mrf.mxu0  ;;  %v2787_v49 = vpop.f32.mrf.mxu2  ;;  %v5663_v4 = vld [vmem:[%s10814_s1 + $0x918] sm:$0xf0]  ;;  %v7161_v42 = vld [vmem:[%s10816_s3 + $0x1cc] sm:$0xf0]  ;;  %v6409_v52 = vld [vmem:[%s10816_s3 + $0x2a0] sm:$0xf] }
 0x177   :  { %3076 = vmatpush.bf16.msra.mxu1 %v5890_v56  ;;  %v7100_v56 = vld [vmem:[%s10814_s1 + $0xc2c] sm:$0xf]  ;;  %v2800_v34 = vpop.f32.mrf.mxu3  ;;  %v5791_v21 = vld [vmem:[%s10814_s1 + $0xa18] sm:$0xf0]  ;;  %v7125_v46 = vld [vmem:[%s10816_s3 + $0xac] sm:$0xf0] }
 0x178   :  { %3089 = vmatpush.bf16.msra.mxu2 %v6018_v58  ;;  %v2826_v58 = vpop.f32.mrf.mxu1  ;;  %v6047_v23 = vld [vmem:[%s10814_s1 + $0xc18] sm:$0xf0]  ;;  %v5794_v19 = vor.u32 %v7032_v61, %v5791_v21  ;;  %v7157_v22 = vld [vmem:[%s10816_s3 + $0x1ac] sm:$0xf0]  ;;  %v6154_v53 = vor.u32 %v7125_v46, %v6153_v24  ;;  %v6137_v55 = vld [vmem:[%s10816_s3 + $0x80] sm:$0xf] }
 0x179   :  { %3052 = vmatpush.bf16.msrb.mxu3 %v5602_v62  ;;  %v5807_v62 = vld [vmem:[%s10814_s1 + $0xa38] sm:$0xf0]  ;;  %v6393_v49 = vld [vmem:[%s10816_s3 + $0x280] sm:$0xf]  ;;  %v7185_v58 = vld [vmem:[%s10816_s3 + $0x28c] sm:$0xf0] }
 0x17a   :  { %3064 = vmatpush.bf16.msra.mxu0 %v5746_v0  ;;  %v7068_v0 = vld [vmem:[%s10814_s1 + $0xb2c] sm:$0xf]  ;;  %v5810_v5 = vor.u32 %v7036_v60, %v5807_v62  ;;  %v6121_v62 = vld [vmem:[%s10816_s3 + $0x60] sm:$0xf]  ;;  %v7117_v34 = vld [vmem:[%s10816_s3 + $0x6c] sm:$0xf0]  ;;  %v6394_v61 = vor.u32 %v7185_v58, %v6393_v49 }
 0x17b   :  { %3077 = vmatpush.bf16.msra.mxu1 %v5874_v38  ;;  %v7000_v38 = vld [vmem:[%s10814_s1 + $0x90c] sm:$0xf]  ;;  %v5938_v9 = vor.u32 %v7068_v0, %v5935_v3  ;;  %v9924_v0 = vld [vmem:[%s10815_s2] sm:$0xf]  ;;  %v7113_v11 = vld [vmem:[%s10816_s3 + $0x4c] sm:$0xf0] }
 0x17c   :  { %3090 = vmatpush.bf16.msra.mxu2 %v6002_v2  ;;  %v6066_v2 = vor.u32 %v7100_v56, %v6063_v57  ;;  %v6265_v56 = vld [vmem:[%s10816_s3 + $0x180] sm:$0xf]  ;;  %v440_v3 = vperm.slane %v9924_v0, 2  ;;  %v7137_v46 = vld [vmem:[%s10816_s3 + $0x10c] sm:$0xf0] }
 0x17d   :  { %3053 = vmatpush.bf16.msrb.mxu3 %v5586_v8  ;;  %v7096_v8 = vld [vmem:[%s10814_s1 + $0xc0c] sm:$0xf]  ;;  %v6377_v21 = vld [vmem:[%s10816_s3 + $0x260] sm:$0xf] }
 0x17e   :  { %3065 = vmatpush.bf16.msra.mxu0 %v5730_v10  ;;  %v7064_v10 = vld [vmem:[%s10814_s1 + $0xb0c] sm:$0xf]  ;;  %v2786_v12 = vadd.f32 %v9741_v20, %v440_v3  ;;  %v6361_v17 = vld [vmem:[%s10816_s3 + $0x240] sm:$0xf]  ;;  %v6299_v3 = vld [vmem:[%s10816_s3 + $0x1d0] sm:$0xf0] }
 0x17f   :  { %3078 = vmatpush.bf16.msra.mxu1 %v5858_v14  ;;  %v5919_v14 = vld [vmem:[%s10814_s1 + $0xb18] sm:$0xf0]  ;;  %v6201_v24 = vld [vmem:[%s10816_s3 + $0x100] sm:$0xf] }
 0x180   :  { %3091 = vmatpush.bf16.msra.mxu2 %v5986_v28  ;;  %v5666_v28 = vor.u32 %v7000_v38, %v5663_v4  ;;  %v6249_v38 = vld [vmem:[%s10816_s3 + $0x160] sm:$0xf]  ;;  %v7149_v4 = vld [vmem:[%s10816_s3 + $0x16c] sm:$0xf0] }
 0x181   :  { %3054 = vmatpush.bf16.msrb.mxu3 %v5570_v32  ;;  %v6050_v32 = vor.u32 %v7096_v8, %v6047_v23  ;;  %v7181_v8 = vld [vmem:[%s10816_s3 + $0x26c] sm:$0xf0]  ;;  %v6122_v23 = vor.u32 %v7117_v34, %v6121_v62  ;;  %v6171_v62 = vld [vmem:[%s10816_s3 + $0xd0] sm:$0xf0] }
 0x182   :  { %3066 = vmatpush.bf16.msra.mxu0 %v5714_v35  ;;  %v5922_v35 = vor.u32 %v7064_v10, %v5919_v14  ;;  %v6105_v10 = vld [vmem:[%s10816_s3 + $0x40] sm:$0xf]  ;;  %v6378_v16 = vor.u32 %v7181_v8, %v6377_v21 }
 0x183   :  { %3079 = vmatpush.bf16.msra.mxu1 %v5842_v40  ;;  %v7129_v40 = vld [vmem:[%s10816_s3 + $0xcc] sm:$0xf0]  ;;  %v6233_v14 = vld [vmem:[%s10816_s3 + $0x140] sm:$0xf]  ;;  %v6106_v20 = vor.u32 %v7113_v11, %v6105_v10  ;;  %v7123_v10 = vld [vmem:[%s10816_s3 + $0xa4] sm:$0xf] }
 0x184   :  { %3092 = vmatpush.bf16.msra.mxu2 %v5970_v43  ;;  %v6442_v43 = vor.u32 %v7197_v30, %v6441_v29  ;;  %v6170_v44 = vor.u32 %v7129_v40, %v6169_v37  ;;  %v6089_v30 = vld [vmem:[%s10816_s3 + $0x20] sm:$0xf]  ;;  %v6155_v11 = vld [vmem:[%s10816_s3 + $0xb0] sm:$0xf0] }
 0x185   :  { %3055 = vmatpush.bf16.msrb.mxu3 %v5554_v45  ;;  %v6298_v45 = vor.u32 %v7161_v42, %v6297_v41  ;;  %v6345_v42 = vld [vmem:[%s10816_s3 + $0x220] sm:$0xf] }
 0x186   :  { %3067 = vmatpush.bf16.msra.mxu0 %v5698_v1  ;;  %v6281_v1 = vld [vmem:[%s10816_s3 + $0x1a0] sm:$0xf] }
 0x187   :  { %3080 = vmatpush.bf16.msra.mxu1 %v5826_v26  ;;  %v6282_v26 = vor.u32 %v7157_v22, %v6281_v1  ;;  %v2773_v1 = vadd.f32 %v9607_v6, %v9563_v47  ;;  %v6315_v47 = vld [vmem:[%s10816_s3 + $0x1f0] sm:$0xf0]  ;;  %v6329_v6 = vld [vmem:[%s10816_s3 + $0x200] sm:$0xf] }
 0x188   :  { %3093 = vmatpush.bf16.msra.mxu2 %v5954_v59 }
 0x189   :  { %3056 = vmatpush.bf16.msrb.mxu3 %v5538_v63  ;;  %v3115_v49 = vmax.f32 %v2773_v1, 0.0 }
 0x18a   :  { %3068 = vmatpush.bf16.msra.mxu0 %v5682_v27 }
 0x18b   :  { %3081 = vmatpush.bf16.msra.mxu1 %v5810_v5  ;;  %v10046_v8 = vpack.c.bf16 %v3115_v49, %v3115_v49  ;;  %v6219_v49 = vld [vmem:[%s10816_s3 + $0x130] sm:$0xf0] }
 0x18c   :  { %3094 = vmatpush.bf16.msra.mxu2 %v5938_v9  ;;  %3057 = vmatmul.bf16.vlgmr.msrb.gmra.mxu3 %v9245_v7  ;;  %v6425_v7 = vld [vmem:[%s10816_s3 + $0x2c0] sm:$0xf]  ;;  %v6250_v9 = vor.u32 %v7149_v4, %v6249_v38  ;;  %v7191_v38 = vld [vmem:[%s10816_s3 + $0x2c4] sm:$0xf]  ;;  %v6427_v4 = vld [vmem:[%s10816_s3 + $0x2d0] sm:$0xf0] }
 0x18d   :  { %3107 = vmatpush.bf16.msra.mxu3 %v6066_v2  ;;  %v6426_v50 = vor.u32 %v7193_v15, %v6425_v7  ;;  %v6073_v15 = vld [vmem:[%s10816_s3] sm:$0xf] }
 0x18e   :  { %3069 = vmatpush.bf16.msra.mxu0 %v5666_v28  ;;  %v9919_v63 = vpop.f32.mrf.mxu0  ;;  %v9927_v27 = vpop.f32.mrf.mxu2  ;;  %v7177_v28 = vld [vmem:[%s10816_s3 + $0x24c] sm:$0xf0] }
 0x18f   :  { %3082 = vmatpush.bf16.msra.mxu1 %v5794_v19  ;;  %v9935_v2 = vpop.f32.mrf.mxu1  ;;  %v9937_v5 = vpop.f32.mrf.mxu3  ;;  %v6362_v37 = vor.u32 %v7177_v28, %v6361_v17  ;;  %v6158_v17 = vor.u32 %v7123_v10, %v6155_v11  ;;  %v6203_v10 = vld [vmem:[%s10816_s3 + $0x110] sm:$0xf0]  ;;  %v6193_v11 = vld [vmem:[%s10816_s3 + $0xe8] sm:$0xf] }
 0x190   :  { %3095 = vmatpush.bf16.msra.mxu2 %v5922_v35  ;;  %v6217_v35 = vld [vmem:[%s10816_s3 + $0x120] sm:$0xf] }
 0x191   :  { %3108 = vmatpush.bf16.msra.mxu3 %v6050_v32  ;;  %3070 = vmatmul.bf16.vlgmr.msra.gmra.mxu0 %v9248_v33  ;;  %v7189_v33 = vld [vmem:[%s10816_s3 + $0x2ac] sm:$0xf0] }
 0x192   :  { %3900 = vmatpush.bf16.msrb.mxu0 %v6186_v18  ;;  %3083 = vmatmul.bf16.vlgmr.msra.gmra.mxu1 %v9284_v48  ;;  %v7121_v48 = vld [vmem:[%s10816_s3 + $0x8c] sm:$0xf0]  ;;  %v6410_v57 = vor.u32 %v7189_v33, %v6409_v52  ;;  %v2799_v18 = vadd.f32 %v9751_v31, %v2786_v12  ;;  %v6187_v52 = vld [vmem:[%s10816_s3 + $0xf0] sm:$0xf0]  ;;  %v7163_v33 = vld [vmem:[%s10816_s3 + $0x1e4] sm:$0xf] }
 0x193   :  { %3913 = vmatpush.bf16.msrb.mxu1 %v6314_v36  ;;  %3096 = vmatmul.bf16.vlgmr.msra.gmra.mxu2 %v9290_v51  ;;  %v7153_v51 = vld [vmem:[%s10816_s3 + $0x18c] sm:$0xf0]  ;;  %v6138_v59 = vor.u32 %v7121_v48, %v6137_v55  ;;  %v7195_v55 = vld [vmem:[%s10816_s3 + $0x2e4] sm:$0xf]  ;;  %v6443_v48 = vld [vmem:[%s10816_s3 + $0x2f0] sm:$0xf0] }
 0x194   :  { %3926 = vmatpush.bf16.msrb.mxu2 %v6442_v43  ;;  %v6266_v60 = vor.u32 %v7153_v51, %v6265_v56  ;;  %v7109_v32 = vld [vmem:[%s10816_s3 + $0x2c] sm:$0xf0]  ;;  %v2812_v22 = vadd.f32 %v9733_v13, %v2799_v18  ;;  %v3114_v56 = vmax.f32 %v8990_v54, 0.0  ;;  %v6202_v51 = vor.u32 %v7137_v46, %v6201_v24  ;;  %v7159_v54 = vld [vmem:[%s10816_s3 + $0x1c4] sm:$0xf] }
 0x195   :  { %v7141_v36 = vld [vmem:[%s10816_s3 + $0x12c] sm:$0xf0]  ;;  %v6090_v7 = vor.u32 %v7109_v32, %v6089_v30  ;;  %v7155_v12 = vld [vmem:[%s10816_s3 + $0x1a4] sm:$0xf]  ;;  %v6139_v30 = vld [vmem:[%s10816_s3 + $0x90] sm:$0xf0] }
 0x196   :  { %3901 = vmatpush.bf16.msrb.mxu0 %v6170_v44  ;;  %v2865_v19 = vpop.f32.mrf.mxu0  ;;  %v2839_v40 = vpop.f32.mrf.mxu2  ;;  %v7173_v31 = vld [vmem:[%s10816_s3 + $0x22c] sm:$0xf0]  ;;  %v6218_v44 = vor.u32 %v7141_v36, %v6217_v35  ;;  %v2825_v58 = vadd.f32 %v9743_v25, %v2812_v22  ;;  %v6446_v25 = vor.u32 %v7195_v55, %v6443_v48  ;;  %v7151_v32 = vld [vmem:[%s10816_s3 + $0x184] sm:$0xf]  ;;  %v6395_v35 = vld [vmem:[%s10816_s3 + $0x290] sm:$0xf0] }
 0x197   :  { %3914 = vmatpush.bf16.msrb.mxu1 %v6298_v45  ;;  %v2878_v41 = vpop.f32.mrf.mxu1  ;;  %v2852_v43 = vpop.f32.mrf.mxu3  ;;  %v7105_v45 = vld [vmem:[%s10816_s3 + $0xc] sm:$0xf0]  ;;  %v6267_v19 = vld [vmem:[%s10816_s3 + $0x190] sm:$0xf0]  ;;  %v7183_v18 = vld [vmem:[%s10816_s3 + $0x284] sm:$0xf] }
 0x198   :  { %3927 = vmatpush.bf16.msrb.mxu2 %v6426_v50  ;;  %v7131_v50 = vld [vmem:[%s10816_s3 + $0xe4] sm:$0xf]  ;;  %v7169_v13 = vld [vmem:[%s10816_s3 + $0x20c] sm:$0xf0]  ;;  %v6270_v40 = vor.u32 %v7151_v32, %v6267_v19  ;;  %v6251_v43 = vld [vmem:[%s10816_s3 + $0x170] sm:$0xf0] }
 0x199   :  { %v6330_v34 = vor.u32 %v7169_v13, %v6329_v6  ;;  %v7115_v41 = vld [vmem:[%s10816_s3 + $0x64] sm:$0xf]  ;;  %v6177_v19 = vld [vmem:[%s10816_s3 + $0xc8] sm:$0xf] }
 0x19a   :  { %3902 = vmatpush.bf16.msrb.mxu0 %v6154_v53  ;;  %v6346_v53 = vor.u32 %v7173_v31, %v6345_v42  ;;  %v6123_v42 = vld [vmem:[%s10816_s3 + $0x70] sm:$0xf0]  ;;  %v7147_v31 = vld [vmem:[%s10816_s3 + $0x164] sm:$0xf] }
 0x19b   :  { %3915 = vmatpush.bf16.msrb.mxu1 %v6282_v26  ;;  %v6074_v26 = vor.u32 %v7105_v45, %v6073_v15  ;;  %v6379_v45 = vld [vmem:[%s10816_s3 + $0x270] sm:$0xf0]  ;;  %v6126_v1 = vor.u32 %v7115_v41, %v6123_v42  ;;  %v7175_v13 = vld [vmem:[%s10816_s3 + $0x244] sm:$0xf] }
 0x19c   :  { %3928 = vmatpush.bf16.msrb.mxu2 %v6410_v57  ;;  %6070 = vmatmul.msk.bf16.vlgmr.msra.gmra.mxu3 %vm2435_vm0, %v9356_v39  ;;  %v7145_v39 = vld [vmem:[%s10816_s3 + $0x14c] sm:$0xf0]  ;;  %v6190_v57 = vor.u32 %v7131_v50, %v6187_v52  ;;  %v6254_v50 = vor.u32 %v7147_v31, %v6251_v43  ;;  %v7111_v52 = vld [vmem:[%s10816_s3 + $0x44] sm:$0xf]  ;;  %v6449_v31 = vld [vmem:[%s10816_s3 + $0x2e8] sm:$0xf] }
 0x19d   :  { %v6234_v29 = vor.u32 %v7145_v39, %v6233_v14  ;;  %v6430_v14 = vor.u32 %v7191_v38, %v6427_v4  ;;  %v7187_v39 = vld [vmem:[%s10816_s3 + $0x2a4] sm:$0xf]  ;;  %v7198_v43 = vld [vmem:[%s10816_s3 + $0x2f4] sm:$0xf0] }
 0x19e   :  { %3903 = vmatpush.bf16.msrb.mxu0 %v6138_v59  ;;  %v6318_v59 = vor.u32 %v7163_v33, %v6315_v47  ;;  %v6107_v33 = vld [vmem:[%s10816_s3 + $0x50] sm:$0xf0]  ;;  %v7103_v38 = vld [vmem:[%s10816_s3 + $0x4] sm:$0xf] }
 0x19f   :  { %3916 = vmatpush.bf16.msrb.mxu1 %v6266_v60  ;;  %v7127_v60 = vld [vmem:[%s10816_s3 + $0xc4] sm:$0xf]  ;;  %v6235_v47 = vld [vmem:[%s10816_s3 + $0x150] sm:$0xf0]  ;;  %v6110_v55 = vor.u32 %v7111_v52, %v6107_v33 }
 0x1a0   :  { %3929 = vmatpush.bf16.msrb.mxu2 %v6394_v61  ;;  %v10044_v61 = vpack.c.bf16 %v3114_v56, %v3114_v56  ;;  %v6174_v21 = vor.u32 %v7127_v60, %v6171_v62  ;;  %v7107_v56 = vld [vmem:[%s10816_s3 + $0x24] sm:$0xf]  ;;  %v6347_v62 = vld [vmem:[%s10816_s3 + $0x230] sm:$0xf0] }
 0x1a1   :  { %v7171_v60 = vld [vmem:[%s10816_s3 + $0x224] sm:$0xf] }
 0x1a2   :  { %3904 = vmatpush.bf16.msrb.mxu0 %v6122_v23  ;;  %v2838_v23 = vadd.f32 %v9927_v27, %v2825_v58  ;;  %v6283_v27 = vld [vmem:[%s10816_s3 + $0x1b0] sm:$0xf0] }
 0x1a3   :  { %3917 = vmatpush.bf16.msrb.mxu1 %v6250_v9  ;;  %v6302_v9 = vor.u32 %v7159_v54, %v6299_v3 }
 0x1a4   :  { %3930 = vmatpush.bf16.msrb.mxu2 %v6378_v16  ;;  %v6411_v16 = vld [vmem:[%s10816_s3 + $0x2b0] sm:$0xf0]  ;;  %v2851_v28 = vadd.f32 %v9937_v5, %v2838_v23 }
 0x1a5   :  { %v6414_v5 = vor.u32 %v7187_v39, %v6411_v16  ;;  %v6075_v23 = vld [vmem:[%s10816_s3 + $0x10] sm:$0xf0]  ;;  %v7166_v16 = vld [vmem:[%s10816_s3 + $0x1f4] sm:$0xf0] }
 0x1a6   :  { %3905 = vmatpush.bf16.msrb.mxu0 %v6106_v20  ;;  %v6286_v20 = vor.u32 %v7155_v12, %v6283_v27  ;;  %v7134_v12 = vld [vmem:[%s10816_s3 + $0xf4] sm:$0xf0]  ;;  %v6321_v27 = vld [vmem:[%s10816_s3 + $0x1e8] sm:$0xf] }
 0x1a7   :  { %3918 = vmatpush.bf16.msrb.mxu1 %v6234_v29  ;;  %v7119_v29 = vld [vmem:[%s10816_s3 + $0x84] sm:$0xf]  ;;  %v6322_v32 = vor.u32 %v7166_v16, %v6321_v27  ;;  %v6113_v27 = vld [vmem:[%s10816_s3 + $0x48] sm:$0xf] }
 0x1a8   :  { %3931 = vmatpush.bf16.msrb.mxu2 %v6362_v37  ;;  %v6142_v36 = vor.u32 %v7119_v29, %v6139_v30  ;;  %v2864_v37 = vadd.f32 %v9919_v63, %v2851_v28  ;;  %v6398_v63 = vor.u32 %v7183_v18, %v6395_v35  ;;  %v6331_v28 = vld [vmem:[%s10816_s3 + $0x210] sm:$0xf0]  ;;  %v6194_v30 = vor.u32 %v7134_v12, %v6193_v11  ;;  %v6401_v11 = vld [vmem:[%s10816_s3 + $0x288] sm:$0xf]  ;;  %v7186_v12 = vld [vmem:[%s10816_s3 + $0x294] sm:$0xf0] }
 0x1aa   :  { %3906 = vmatpush.bf16.msrb.mxu0 %v6090_v7  ;;  %v2877_v22 = vadd.f32 %v9935_v2, %v2864_v37  ;;  %v7162_v37 = vld [vmem:[%s10816_s3 + $0x1d4] sm:$0xf0] }
 0x1ab   :  { %3919 = vmatpush.bf16.msrb.mxu1 %v6218_v44  ;;  %v7179_v44 = vld [vmem:[%s10816_s3 + $0x264] sm:$0xf] }
 0x1ac   :  { %3932 = vmatpush.bf16.msrb.mxu2 %v6346_v53  ;;  %v7143_v53 = vld [vmem:[%s10816_s3 + $0x144] sm:$0xf]  ;;  %v6382_v2 = vor.u32 %v7179_v44, %v6379_v45  ;;  %v6569_v44 = vld [vmem:[%s10816_s3 + $0x3e0] sm:$0xf]  ;;  %v7229_v45 = vld [vmem:[%s10816_s3 + $0x3ec] sm:$0xf0] }
 0x1ad   :  { %v6238_v48 = vor.u32 %v7143_v53, %v6235_v47  ;;  %v6433_v53 = vld [vmem:[%s10816_s3 + $0x2c8] sm:$0xf]  ;;  %v7194_v47 = vld [vmem:[%s10816_s3 + $0x2d4] sm:$0xf0] }
 0x1ae   :  { %3907 = vmatpush.bf16.msrb.mxu0 %v6074_v26  ;;  %v2915_v7 = vpop.f32.mrf.mxu0  ;;  %v2889_v24 = vpop.f32.mrf.mxu2  ;;  %v6363_v26 = vld [vmem:[%s10816_s3 + $0x250] sm:$0xf0] }
 0x1af   :  { %3920 = vmatpush.bf16.msrb.mxu1 %v6202_v51  ;;  %v10101_v15 = vpop.f32.mrf.mxu1  ;;  %v2902_v46 = vpop.f32.mrf.mxu3  ;;  %v2890_v6 = vadd.f32 %v2889_v24, %v2877_v22  ;;  %v6091_v51 = vld [vmem:[%s10816_s3 + $0x30] sm:$0xf0]  ;;  %v6366_v58 = vor.u32 %v7175_v13, %v6363_v26  ;;  %v6570_v22 = vor.u32 %v7229_v45, %v6569_v44  ;;  %v7122_v13 = vld [vmem:[%s10816_s3 + $0x94] sm:$0xf0]  ;;  %v6553_v26 = vld [vmem:[%s10816_s3 + $0x3c0] sm:$0xf] }
 0x1b0   :  { %3933 = vmatpush.bf16.msrb.mxu2 %v6330_v34 }
 0x1b1   :  { %3908 = vmatmul.bf16.vlgmr.msrb.gmra.mxu0 %v10044_v61  ;;  %3939 = vmatpush.bf16.msrb.mxu3 %v6570_v22  ;;  %v7106_v22 = vld [vmem:[%s10816_s3 + $0x14] sm:$0xf0] }
 0x1b2   :  { %3952 = vmatpush.bf16.msra.mxu0 %v6190_v57  ;;  %3921 = vmatmul.bf16.vlgmr.msrb.gmra.mxu1 %v10046_v8  ;;  %v7139_v57 = vld [vmem:[%s10816_s3 + $0x124] sm:$0xf] }
 0x1b3   :  { %3965 = vmatpush.bf16.msra.mxu1 %v6318_v59  ;;  %v2903_v59 = vadd.f32 %v2902_v46, %v2890_v6  ;;  %v6289_v46 = vld [vmem:[%s10816_s3 + $0x1a8] sm:$0xf] }
 0x1b4   :  { %3978 = vmatpush.bf16.msra.mxu2 %v6446_v25  ;;  %v6094_v25 = vor.u32 %v7107_v56, %v6091_v51  ;;  %v7154_v56 = vld [vmem:[%s10816_s3 + $0x194] sm:$0xf0] }
 0x1b5   :  { %v2916_v39 = vadd.f32 %v2915_v7, %v2903_v59  ;;  %v6417_v59 = vld [vmem:[%s10816_s3 + $0x2a8] sm:$0xf] }
 0x1b6   :  { %3953 = vmatpush.bf16.msra.mxu0 %v6174_v21  ;;  %v2917_v34 = vpop.f32.mrf.mxu0  ;;  %v2891_v3 = vpop.f32.mrf.mxu2  ;;  %v6222_v21 = vor.u32 %v7139_v57, %v6219_v49  ;;  %v6434_v57 = vor.u32 %v7194_v47, %v6433_v53  ;;  %v6209_v47 = vld [vmem:[%s10816_s3 + $0x108] sm:$0xf] }
 0x1b7   :  { %3966 = vmatpush.bf16.msra.mxu1 %v6302_v9  ;;  %v2930_v54 = vpop.f32.mrf.mxu1  ;;  %v2904_v4 = vpop.f32.mrf.mxu3  ;;  %v7135_v9 = vld [vmem:[%s10816_s3 + $0x104] sm:$0xf]  ;;  %v2929_v35 = vadd.f32 %v10101_v15, %v2916_v39  ;;  %v7126_v15 = vld [vmem:[%s10816_s3 + $0xb4] sm:$0xf0]  ;;  %v6537_v3 = vld [vmem:[%s10816_s3 + $0x3a0] sm:$0xf] }
 0x1b8   :  { %3979 = vmatpush.bf16.msra.mxu2 %v6430_v14  ;;  %v6350_v14 = vor.u32 %v7171_v60, %v6347_v62  ;;  %v6206_v29 = vor.u32 %v7135_v9, %v6203_v10  ;;  %v7190_v60 = vld [vmem:[%s10816_s3 + $0x2b4] sm:$0xf0]  ;;  %v6129_v62 = vld [vmem:[%s10816_s3 + $0x68] sm:$0xf] }
 0x1b9   :  { %v7118_v54 = vld [vmem:[%s10816_s3 + $0x74] sm:$0xf0] }
 0x1ba   :  { %3954 = vmatpush.bf16.msra.mxu0 %v6158_v17  ;;  %v7167_v17 = vld [vmem:[%s10816_s3 + $0x204] sm:$0xf]  ;;  %v7150_v4 = vld [vmem:[%s10816_s3 + $0x174] sm:$0xf0]  ;;  %v6130_v10 = vor.u32 %v7118_v54, %v6129_v62  ;;  %v7205_v54 = vld [vmem:[%s10816_s3 + $0x32c] sm:$0xf0] }
 0x1bb   :  { %3967 = vmatpush.bf16.msra.mxu1 %v6286_v20  ;;  %v6078_v20 = vor.u32 %v7103_v38, %v6075_v23  ;;  %v6334_v18 = vor.u32 %v7167_v17, %v6331_v28  ;;  %v6257_v38 = vld [vmem:[%s10816_s3 + $0x168] sm:$0xf]  ;;  %v6418_v23 = vor.u32 %v7190_v60, %v6417_v59  ;;  %v7114_v17 = vld [vmem:[%s10816_s3 + $0x54] sm:$0xf0]  ;;  %v6521_v28 = vld [vmem:[%s10816_s3 + $0x380] sm:$0xf] }
 0x1bc   :  { %3980 = vmatpush.bf16.msra.mxu2 %v6414_v5  ;;  %v7130_v5 = vld [vmem:[%s10816_s3 + $0xd4] sm:$0xf0]  ;;  %v6258_v16 = vor.u32 %v7150_v4, %v6257_v38  ;;  %v6179_v38 = vld [vmem:[%s10816_s3 + $0xd8] sm:$0xf0] }
 0x1bd   :  { %v6178_v42 = vor.u32 %v7130_v5, %v6177_v19  ;;  %v6402_v19 = vor.u32 %v7186_v12, %v6401_v11  ;;  %v6114_v5 = vor.u32 %v7114_v17, %v6113_v27  ;;  %v7174_v59 = vld [vmem:[%s10816_s3 + $0x234] sm:$0xf0]  ;;  %v6337_v11 = vld [vmem:[%s10816_s3 + $0x208] sm:$0xf]  ;;  %v6451_v17 = vld [vmem:[%s10816_s3 + $0x2f8] sm:$0xf0] }
 0x1be   :  { %3955 = vmatpush.bf16.msra.mxu0 %v6142_v36  ;;  %v6305_v36 = vld [vmem:[%s10816_s3 + $0x1c8] sm:$0xf]  ;;  %v7170_v27 = vld [vmem:[%s10816_s3 + $0x214] sm:$0xf0] }
 0x1bf   :  { %3968 = vmatpush.bf16.msra.mxu1 %v6270_v40  ;;  %v2941_v40 = vpop.f32.mrf.mxu2  ;;  %v6306_v7 = vor.u32 %v7162_v37, %v6305_v36  ;;  %v6097_v36 = vld [vmem:[%s10816_s3 + $0x28] sm:$0xf] }
 0x1c0   :  { %3981 = vmatpush.bf16.msra.mxu2 %v6398_v63  ;;  %v2942_v41 = vadd.f32 %v2941_v40, %v2929_v35  ;;  %v6161_v63 = vld [vmem:[%s10816_s3 + $0xa8] sm:$0xf]  ;;  %v7182_v35 = vld [vmem:[%s10816_s3 + $0x274] sm:$0xf0] }
 0x1c1   :  { %v6162_v33 = vor.u32 %v7126_v15, %v6161_v63  ;;  %v7110_v40 = vld [vmem:[%s10816_s3 + $0x34] sm:$0xf0]  ;;  %v6369_v15 = vld [vmem:[%s10816_s3 + $0x248] sm:$0xf] }
 0x1c2   :  { %3956 = vmatpush.bf16.msra.mxu0 %v6126_v1  ;;  %v3116_v24 = vmax.f32 %v2942_v41, 0.0  ;;  %v7158_v1 = vld [vmem:[%s10816_s3 + $0x1b4] sm:$0xf0]  ;;  %v6505_v41 = vld [vmem:[%s10816_s3 + $0x360] sm:$0xf] }
 0x1c3   :  { %3969 = vmatpush.bf16.msra.mxu1 %v6254_v50  ;;  %v6450_v50 = vor.u32 %v7198_v43, %v6449_v31  ;;  %v6290_v6 = vor.u32 %v7158_v1, %v6289_v46  ;;  %v6225_v31 = vld [vmem:[%s10816_s3 + $0x128] sm:$0xf]  ;;  %v7142_v43 = vld [vmem:[%s10816_s3 + $0x134] sm:$0xf0] }
 0x1c4   :  { %3982 = vmatpush.bf16.msra.mxu2 %v6382_v2  ;;  %v10215_v52 = vpack.c.bf16 %v3116_v24, %v3116_v24  ;;  %v6145_v2 = vld [vmem:[%s10816_s3 + $0x88] sm:$0xf]  ;;  %v6098_v24 = vor.u32 %v7110_v40, %v6097_v36  ;;  %v7178_v46 = vld [vmem:[%s10816_s3 + $0x254] sm:$0xf0]  ;;  %v6226_v53 = vor.u32 %v7142_v43, %v6225_v31  ;;  %v6338_v36 = vor.u32 %v7170_v27, %v6337_v11  ;;  %v6291_v40 = vld [vmem:[%s10816_s3 + $0x1b8] sm:$0xf0] }
 0x1c5   :  { %v6081_v1 = vld [vmem:[%s10816_s3 + $0x8] sm:$0xf]  ;;  %v7192_v43 = vld [vmem:[%s10816_s3 + $0x2cc] sm:$0xf]  ;;  %v6243_v11 = vld [vmem:[%s10816_s3 + $0x158] sm:$0xf0] }
 0x1c6   :  { %3957 = vmatpush.bf16.msra.mxu0 %v6110_v55  ;;  %v7225_v55 = vld [vmem:[%s10816_s3 + $0x3cc] sm:$0xf0]  ;;  %3934 = vmatmul.bf16.vlgmr.msrb.gmra.mxu2 %v10215_v52 }
 0x1c7   :  { %3970 = vmatpush.bf16.msra.mxu1 %v6238_v48  ;;  %v6273_v48 = vld [vmem:[%s10816_s3 + $0x188] sm:$0xf]  ;;  %v6554_v51 = vor.u32 %v7225_v55, %v6553_v26  ;;  %v2943_v49 = vpop.f32.mrf.mxu2  ;;  %v7132_v26 = vld [vmem:[%s10816_s3 + $0xec] sm:$0xf]  ;;  %v6195_v55 = vld [vmem:[%s10816_s3 + $0xf8] sm:$0xf0] }
 0x1c8   :  { %3983 = vmatpush.bf16.msra.mxu2 %v6366_v58  ;;  %v6146_v58 = vor.u32 %v7122_v13, %v6145_v2  ;;  %v6274_v34 = vor.u32 %v7154_v56, %v6273_v48  ;;  %v6489_v2 = vld [vmem:[%s10816_s3 + $0x340] sm:$0xf]  ;;  %v7138_v13 = vld [vmem:[%s10816_s3 + $0x114] sm:$0xf0]  ;;  %v6370_v56 = vor.u32 %v7178_v46, %v6369_v15  ;;  %v6082_v49 = vor.u32 %v7106_v22, %v6081_v1  ;;  %v6555_v46 = vld [vmem:[%s10816_s3 + $0x3d0] sm:$0xf0] }
 0x1c9   :  { %3940 = vmatpush.bf16.msrb.mxu3 %v6554_v51  ;;  %v7164_v51 = vld [vmem:[%s10816_s3 + $0x1ec] sm:$0xf]  ;;  %v6210_v60 = vor.u32 %v7138_v13, %v6209_v47  ;;  %v6198_v62 = vor.u32 %v7132_v26, %v6195_v55  ;;  %v6275_v22 = vld [vmem:[%s10816_s3 + $0x198] sm:$0xf0]  ;;  %v7219_v55 = vld [vmem:[%s10816_s3 + $0x3a4] sm:$0xf] }
 0x1ca   :  { %3958 = vmatpush.bf16.msra.mxu0 %v6094_v25  ;;  %v7221_v25 = vld [vmem:[%s10816_s3 + $0x3ac] sm:$0xf0]  ;;  %v7152_v1 = vld [vmem:[%s10816_s3 + $0x18c] sm:$0xf]  ;;  %v6131_v26 = vld [vmem:[%s10816_s3 + $0x78] sm:$0xf0] }
 0x1cb   :  { %3971 = vmatpush.bf16.msra.mxu1 %v6222_v21  ;;  %v6538_v21 = vor.u32 %v7221_v25, %v6537_v3  ;;  %v7128_v25 = vld [vmem:[%s10816_s3 + $0xcc] sm:$0xf]  ;;  %v6278_v13 = vor.u32 %v7152_v1, %v6275_v22  ;;  %v6211_v22 = vld [vmem:[%s10816_s3 + $0x118] sm:$0xf0] }
 0x1cc   :  { %3984 = vmatpush.bf16.msra.mxu2 %v6350_v14  ;;  %v7188_v47 = vld [vmem:[%s10816_s3 + $0x2ac] sm:$0xf] }
 0x1cd   :  { %3941 = vmatpush.bf16.msrb.mxu3 %v6538_v21  ;;  %v7136_v1 = vld [vmem:[%s10816_s3 + $0x10c] sm:$0xf] }
 0x1ce   :  { %3959 = vmatpush.bf16.msra.mxu0 %v6078_v20  ;;  %v10266_v9 = vpop.f32.mrf.mxu0  ;;  %v7217_v20 = vld [vmem:[%s10816_s3 + $0x38c] sm:$0xf0] }
 0x1cf   :  { %3972 = vmatpush.bf16.msra.mxu1 %v6206_v29  ;;  %v10277_v14 = vpop.f32.mrf.mxu3  ;;  %v10279_v39 = vpop.f32.mrf.mxu1  ;;  %v6241_v29 = vld [vmem:[%s10816_s3 + $0x148] sm:$0xf] }
 0x1d0   :  { %3985 = vmatpush.bf16.msra.mxu2 %v6334_v18  ;;  %v6385_v18 = vld [vmem:[%s10816_s3 + $0x268] sm:$0xf] }
 0x1d1   :  { %3960 = vmatmul.bf16.vlgmr.msra.gmra.mxu0 %v10044_v61 }
 0x1d2   :  { %4004 = vmatpush.bf16.msrb.mxu0 %v6194_v30  ;;  %3973 = vmatmul.bf16.vlgmr.msra.gmra.mxu1 %v10046_v8  ;;  %v7146_v30 = vld [vmem:[%s10816_s3 + $0x154] sm:$0xf0] }
 0x1d3   :  { %4017 = vmatpush.bf16.msrb.mxu1 %v6322_v32  ;;  %v6522_v32 = vor.u32 %v7217_v20, %v6521_v28  ;;  %v6242_v37 = vor.u32 %v7146_v30, %v6241_v29  ;;  %v6182_v28 = vor.u32 %v7128_v25, %v6179_v38  ;;  %v7124_v20 = vld [vmem:[%s10816_s3 + $0xac] sm:$0xf]  ;;  %v6457_v29 = vld [vmem:[%s10816_s3 + $0x300] sm:$0xf]  ;;  %v7201_v30 = vld [vmem:[%s10816_s3 + $0x30c] sm:$0xf0] }
 0x1d4   :  { %4030 = vmatpush.bf16.msrb.mxu2 %v6450_v50  ;;  %v6115_v38 = vld [vmem:[%s10816_s3 + $0x58] sm:$0xf0] }
 0x1d5   :  { %3942 = vmatpush.bf16.msrb.mxu3 %v6522_v32 }
 0x1d6   :  { %4005 = vmatpush.bf16.msrb.mxu0 %v6178_v42  ;;  %v7213_v42 = vld [vmem:[%s10816_s3 + $0x36c] sm:$0xf0]  ;;  %v10323_v44 = vpop.f32.mrf.mxu2  ;;  %v2969_v45 = vpop.f32.mrf.mxu0  ;;  %3986 = vmatmul.bf16.vlgmr.msra.gmra.mxu2 %v10215_v52 }
 0x1d7   :  { %4018 = vmatpush.bf16.msrb.mxu1 %v6306_v7  ;;  %v6506_v63 = vor.u32 %v7213_v42, %v6505_v41  ;;  %v6386_v7 = vor.u32 %v7182_v35, %v6385_v18  ;;  %v2956_v50 = vpop.f32.mrf.mxu3  ;;  %v7227_v18 = vld [vmem:[%s10816_s3 + $0x3e4] sm:$0xf]  ;;  %v6571_v35 = vld [vmem:[%s10816_s3 + $0x3f0] sm:$0xf0]  ;;  %v6147_v45 = vld [vmem:[%s10816_s3 + $0x98] sm:$0xf0] }
 0x1d8   :  { %4031 = vmatpush.bf16.msrb.mxu2 %v6434_v57  ;;  %v6323_v57 = vld [vmem:[%s10816_s3 + $0x1f8] sm:$0xf0]  ;;  %v6574_v41 = vor.u32 %v7227_v18, %v6571_v35 }
 0x1d9   :  { %3943 = vmatpush.bf16.msrb.mxu3 %v6506_v63  ;;  %v6326_v3 = vor.u32 %v7164_v51, %v6323_v57  ;;  %v6435_v63 = vld [vmem:[%s10816_s3 + $0x2d8] sm:$0xf0]  ;;  %v7148_v51 = vld [vmem:[%s10816_s3 + $0x16c] sm:$0xf] }
 0x1da   :  { %4006 = vmatpush.bf16.msrb.mxu0 %v6162_v33  ;;  %v2982_v33 = vpop.f32.mrf.mxu1  ;;  %v6259_v57 = vld [vmem:[%s10816_s3 + $0x178] sm:$0xf0] }
 0x1db   :  { %4019 = vmatpush.bf16.msrb.mxu1 %v6290_v6  ;;  %v7209_v6 = vld [vmem:[%s10816_s3 + $0x34c] sm:$0xf0]  ;;  %v6438_v33 = vor.u32 %v7192_v43, %v6435_v63  ;;  %v6262_v25 = vor.u32 %v7148_v51, %v6259_v57  ;;  %v6227_v18 = vld [vmem:[%s10816_s3 + $0x138] sm:$0xf0]  ;;  %v7104_v43 = vld [vmem:[%s10816_s3 + $0xc] sm:$0xf] }
 0x1dc   :  { %4032 = vmatpush.bf16.msrb.mxu2 %v6418_v23  ;;  %v6490_v48 = vor.u32 %v7209_v6, %v6489_v2  ;;  %v7160_v23 = vld [vmem:[%s10816_s3 + $0x1cc] sm:$0xf]  ;;  %v6419_v2 = vld [vmem:[%s10816_s3 + $0x2b8] sm:$0xf0] }
 0x1dd   :  { %v7116_v6 = vld [vmem:[%s10816_s3 + $0x6c] sm:$0xf]  ;;  %v6339_v57 = vld [vmem:[%s10816_s3 + $0x218] sm:$0xf0] }
 0x1de   :  { %4007 = vmatpush.bf16.msrb.mxu0 %v6146_v58  ;;  %v6353_v58 = vld [vmem:[%s10816_s3 + $0x228] sm:$0xf]  ;;  %3944 = vmatpush.bf16.msrb.mxu3 %v6490_v48  ;;  %v2995_v12 = vpop.f32.mrf.mxu2  ;;  %v6539_v48 = vld [vmem:[%s10816_s3 + $0x3b0] sm:$0xf0]  ;;  %v7168_v51 = vld [vmem:[%s10816_s3 + $0x20c] sm:$0xf] }
 0x1df   :  { %4020 = vmatpush.bf16.msrb.mxu1 %v6274_v34  ;;  %v6473_v34 = vld [vmem:[%s10816_s3 + $0x320] sm:$0xf]  ;;  %v6354_v21 = vor.u32 %v7174_v59, %v6353_v58  ;;  %v6422_v58 = vor.u32 %v7188_v47, %v6419_v2  ;;  %v7172_v47 = vld [vmem:[%s10816_s3 + $0x22c] sm:$0xf]  ;;  %v6214_v2 = vor.u32 %v7136_v1, %v6211_v22  ;;  %v6497_v1 = vld [vmem:[%s10816_s3 + $0x348] sm:$0xf] }
 0x1e0   :  { %4033 = vmatpush.bf16.msrb.mxu2 %v6402_v19  ;;  %v6474_v4 = vor.u32 %v7205_v54, %v6473_v34  ;;  %v6163_v19 = vld [vmem:[%s10816_s3 + $0xb8] sm:$0xf0]  ;;  %v7112_v54 = vld [vmem:[%s10816_s3 + $0x4c] sm:$0xf]  ;;  %v7210_v22 = vld [vmem:[%s10816_s3 + $0x354] sm:$0xf0] }
 0x1e1   :  { %v6166_v31 = vor.u32 %v7124_v20, %v6163_v19  ;;  %v6403_v34 = vld [vmem:[%s10816_s3 + $0x298] sm:$0xf0] }
 0x1e2   :  { %4008 = vmatpush.bf16.msrb.mxu0 %v6130_v10  ;;  %v6307_v10 = vld [vmem:[%s10816_s3 + $0x1d8] sm:$0xf0]  ;;  %3945 = vmatpush.bf16.msrb.mxu3 %v6474_v4  ;;  %v7215_v4 = vld [vmem:[%s10816_s3 + $0x384] sm:$0xf] }
 0x1e3   :  { %4021 = vmatpush.bf16.msrb.mxu1 %v6258_v16  ;;  %v7196_v16 = vld [vmem:[%s10816_s3 + $0x2ec] sm:$0xf]  ;;  %v6310_v32 = vor.u32 %v7160_v23, %v6307_v10 }
 0x1e4   :  { %4034 = vmatpush.bf16.msrb.mxu2 %v6386_v7  ;;  %v6454_v42 = vor.u32 %v7196_v16, %v6451_v17  ;;  %v7120_v7 = vld [vmem:[%s10816_s3 + $0x8c] sm:$0xf]  ;;  %v6118_v16 = vor.u32 %v7112_v54, %v6115_v38 }
 0x1e5   :  { %v7144_v10 = vld [vmem:[%s10816_s3 + $0x14c] sm:$0xf] }
 0x1e6   :  { %4009 = vmatpush.bf16.msrb.mxu0 %v6114_v5  ;;  %v6458_v5 = vor.u32 %v7201_v30, %v6457_v29  ;;  %v7180_v17 = vld [vmem:[%s10816_s3 + $0x26c] sm:$0xf]  ;;  %v6246_v20 = vor.u32 %v7144_v10, %v6243_v11  ;;  %v6099_v29 = vld [vmem:[%s10816_s3 + $0x38] sm:$0xf0]  ;;  %v7211_v30 = vld [vmem:[%s10816_s3 + $0x364] sm:$0xf] }
 0x1e7   :  { %4022 = vmatpush.bf16.msrb.mxu1 %v6242_v37  ;;  %v7156_v37 = vld [vmem:[%s10816_s3 + $0x1ac] sm:$0xf] }
 0x1e8   :  { %4035 = vmatpush.bf16.msrb.mxu2 %v6370_v56  ;;  %3946 = vmatpush.bf16.msrb.mxu3 %v6458_v5  ;;  %v6294_v15 = vor.u32 %v7156_v37, %v6291_v40  ;;  %v441_v56 = vperm.slane %v9924_v0, 3  ;;  %v7184_v0 = vld [vmem:[%s10816_s3 + $0x28c] sm:$0xf] }
 0x1e9   :  { %v6406_v27 = vor.u32 %v7184_v0, %v6403_v34  ;;  %v7140_v5 = vld [vmem:[%s10816_s3 + $0x12c] sm:$0xf]  ;;  %v6342_v0 = vor.u32 %v7168_v51, %v6339_v57 }
 0x1ea   :  { %4010 = vmatpush.bf16.msrb.mxu0 %v6098_v24  ;;  %v7223_v24 = vld [vmem:[%s10816_s3 + $0x3c4] sm:$0xf]  ;;  %v2955_v23 = vadd.f32 %v10277_v14, %v441_v56  ;;  %v6387_v14 = vld [vmem:[%s10816_s3 + $0x278] sm:$0xf0] }
 0x1eb   :  { %4023 = vmatpush.bf16.msrb.mxu1 %v6226_v53  ;;  %v6558_v50 = vor.u32 %v7223_v24, %v6555_v46  ;;  %v6150_v53 = vor.u32 %v7120_v7, %v6147_v45  ;;  %v6230_v7 = vor.u32 %v7140_v5, %v6227_v18  ;;  %v7207_v45 = vld [vmem:[%s10816_s3 + $0x344] sm:$0xf]  ;;  %v6491_v24 = vld [vmem:[%s10816_s3 + $0x350] sm:$0xf0] }
 0x1ec   :  { %4036 = vmatpush.bf16.msrb.mxu2 %v6354_v21  ;;  %3991 = vmatpush.bf16.msra.mxu3 %v6574_v41  ;;  %v6523_v21 = vld [vmem:[%s10816_s3 + $0x390] sm:$0xf0]  ;;  %v2968_v19 = vadd.f32 %v10266_v9, %v2955_v23  ;;  %v7176_v9 = vld [vmem:[%s10816_s3 + $0x24c] sm:$0xf] }
 0x1ed   :  { %v6526_v12 = vor.u32 %v7215_v4, %v6523_v21 }
 0x1ee   :  { %4011 = vmatpush.bf16.msrb.mxu0 %v6082_v49  ;;  %v6542_v49 = vor.u32 %v7219_v55, %v6539_v48  ;;  %v10471_v59 = vpop.f32.mrf.mxu0  ;;  %v2981_v46 = vadd.f32 %v10279_v39, %v2968_v19  ;;  %v6355_v39 = vld [vmem:[%s10816_s3 + $0x238] sm:$0xf0] }
 0x1ef   :  { %4024 = vmatpush.bf16.msrb.mxu1 %v6210_v60  ;;  %v6134_v60 = vor.u32 %v7116_v6, %v6131_v26  ;;  %v7203_v6 = vld [vmem:[%s10816_s3 + $0x324] sm:$0xf]  ;;  %v6358_v48 = vor.u32 %v7172_v47, %v6355_v39  ;;  %v6465_v39 = vld [vmem:[%s10816_s3 + $0x308] sm:$0xf] }
 0x1f0   :  { %4037 = vmatpush.bf16.msrb.mxu2 %v6338_v36  ;;  %3992 = vmatpush.bf16.msra.mxu3 %v6558_v50  ;;  %v6390_v36 = vor.u32 %v7180_v17, %v6387_v14  ;;  %v6494_v50 = vor.u32 %v7207_v45, %v6491_v24  ;;  %v2994_v26 = vadd.f32 %v10323_v44, %v2981_v46  ;;  %v6459_v44 = vld [vmem:[%s10816_s3 + $0x310] sm:$0xf0] }
 0x1f1   :  { %4012 = vmatmul.bf16.vlgmr.msrb.gmra.mxu0 %v10044_v61 }
 0x1f2   :  { %4056 = vmatpush.bf16.msra.mxu0 %v6198_v62  ;;  %4025 = vmatmul.bf16.vlgmr.msrb.gmra.mxu1 %v10046_v8  ;;  %v10473_v62 = vpop.f32.mrf.mxu3 }
 0x1f3   :  { %4069 = vmatpush.bf16.msra.mxu1 %v6326_v3  ;;  %4038 = vmatmul.bf16.vlgmr.msrb.gmra.mxu2 %v10215_v52  ;;  %v10484_v3 = vpop.f32.mrf.mxu1 }
 0x1f4   :  { %4082 = vmatpush.bf16.msra.mxu2 %v6454_v42  ;;  %3993 = vmatpush.bf16.msra.mxu3 %v6542_v49  ;;  %v7199_v49 = vld [vmem:[%s10816_s3 + $0x304] sm:$0xf] }
 0x1f6   :  { %4057 = vmatpush.bf16.msra.mxu0 %v6182_v28  ;;  %v7108_v28 = vld [vmem:[%s10816_s3 + $0x2c] sm:$0xf]  ;;  %v3045_v37 = vpop.f32.mrf.mxu2  ;;  %v3021_v40 = vpop.f32.mrf.mxu0 }
 0x1f7   :  { %4070 = vmatpush.bf16.msra.mxu1 %v6310_v32  ;;  %v6507_v32 = vld [vmem:[%s10816_s3 + $0x370] sm:$0xf0]  ;;  %v6102_v41 = vor.u32 %v7108_v28, %v6099_v29  ;;  %v6561_v29 = vld [vmem:[%s10816_s3 + $0x3c8] sm:$0xf] }
 0x1f8   :  { %4083 = vmatpush.bf16.msra.mxu2 %v6438_v33  ;;  %3994 = vmatpush.bf16.msra.mxu3 %v6526_v12  ;;  %v6510_v35 = vor.u32 %v7211_v30, %v6507_v32  ;;  %v7226_v30 = vld [vmem:[%s10816_s3 + $0x3d4] sm:$0xf0]  ;;  %v10600_v32 = vld [vmem:[%s10817_s4] sm:$0xf] }
 0x1f9   :  { %v6562_v5 = vor.u32 %v7226_v30, %v6561_v29  ;;  %v3252_v18 = vperm.slane %v10600_v32, 0  ;;  %v3253_v57 = vperm.slane %v10600_v32, 1 }
 0x1fa   :  { %4058 = vmatpush.bf16.msra.mxu0 %v6166_v31  ;;  %v3008_v42 = vpop.f32.mrf.mxu3  ;;  %v6371_v31 = vld [vmem:[%s10816_s3 + $0x258] sm:$0xf0] }
 0x1fb   :  { %4071 = vmatpush.bf16.msra.mxu1 %v6294_v15  ;;  %v3034_v63 = vpop.f32.mrf.mxu1  ;;  %v6083_v15 = vld [vmem:[%s10816_s3 + $0x18] sm:$0xf0]  ;;  %v6374_v33 = vor.u32 %v7176_v9, %v6371_v31  ;;  %v6529_v9 = vld [vmem:[%s10816_s3 + $0x388] sm:$0xf]  ;;  %v7218_v31 = vld [vmem:[%s10816_s3 + $0x394] sm:$0xf0] }
 0x1fc   :  { %4084 = vmatpush.bf16.msra.mxu2 %v6422_v58  ;;  %3995 = vmatpush.bf16.msra.mxu3 %v6510_v35  ;;  %v3007_v58 = vadd.f32 %v10473_v62, %v2994_v26  ;;  %v6545_v35 = vld [vmem:[%s10816_s3 + $0x3a8] sm:$0xf]  ;;  %v6530_v63 = vor.u32 %v7218_v31, %v6529_v9 }
 0x1fe   :  { %4059 = vmatpush.bf16.msra.mxu0 %v6150_v53  ;;  %v6086_v53 = vor.u32 %v7104_v43, %v6083_v15  ;;  %v3047_v56 = vpop.f32.mrf.mxu2  ;;  %v3020_v34 = vadd.f32 %v10471_v59, %v3007_v58  ;;  %v7214_v15 = vld [vmem:[%s10816_s3 + $0x374] sm:$0xf0] }
 0x1ff   :  { %4072 = vmatpush.bf16.msra.mxu1 %v6278_v13  ;;  %v6475_v13 = vld [vmem:[%s10816_s3 + $0x330] sm:$0xf0]  ;;  %v6563_v56 = vld [vmem:[%s10816_s3 + $0x3d8] sm:$0xf0] }
 0x200   :  { %4085 = vmatpush.bf16.msra.mxu2 %v6406_v27  ;;  %3996 = vmatpush.bf16.msra.mxu3 %v6494_v50  ;;  %v6478_v55 = vor.u32 %v7203_v6, %v6475_v13  ;;  %v3033_v54 = vadd.f32 %v10484_v3, %v3020_v34  ;;  %v6577_v3 = vld [vmem:[%s10816_s3 + $0x3e8] sm:$0xf]  ;;  %v6498_v50 = vor.u32 %v7210_v22, %v6497_v1  ;;  %v7228_v6 = vld [vmem:[%s10816_s3 + $0x3ec] sm:$0xf]  ;;  %v6579_v13 = vld [vmem:[%s10816_s3 + $0x3f8] sm:$0xf0] }
 0x201   :  { %v7237_v1 = vld [vmem:[%s10820_s7 + $0x30] sm:$0xff] }
 0x202   :  { %4060 = vmatpush.bf16.msra.mxu0 %v6134_v60  ;;  %v6462_v60 = vor.u32 %v7199_v49, %v6459_v44  ;;  %v3046_v21 = vadd.f32 %v3045_v37, %v3033_v54  ;;  %v7220_v49 = vld [vmem:[%s10816_s3 + $0x3ac] sm:$0xf]  ;;  %v6547_v44 = vld [vmem:[%s10816_s3 + $0x3b8] sm:$0xf0]  ;;  %v7245_v22 = vld [vmem:[%s10820_s7 + $0x70] sm:$0xff] }
 0x203   :  { %4073 = vmatpush.bf16.msra.mxu1 %v6262_v25  ;;  %v7216_v54 = vld [vmem:[%s10816_s3 + $0x38c] sm:$0xf] }
 0x204   :  { %4086 = vmatpush.bf16.msra.mxu2 %v6390_v36  ;;  %3997 = vmatpush.bf16.msra.mxu3 %v6478_v55  ;;  %v7222_v36 = vld [vmem:[%s10816_s3 + $0x3b4] sm:$0xf0]  ;;  %v6582_v55 = vor.u32 %v7228_v6, %v6579_v13  ;;  %v7243_v6 = vld [vmem:[%s10820_s7 + $0x60] sm:$0xff] }
 0x205   :  { %v6546_v40 = vor.u32 %v7222_v36, %v6545_v35  ;;  %v7234_v13 = vld [vmem:[%s10820_s7 + $0x18] sm:$0xff] }
 0x206   :  { %4061 = vmatpush.bf16.msra.mxu0 %v6118_v16 }
 0x207   :  { %4074 = vmatpush.bf16.msra.mxu1 %v6246_v20 }
 0x208   :  { %4087 = vmatpush.bf16.msra.mxu2 %v6374_v33  ;;  %3998 = vmatpush.bf16.msra.mxu3 %v6462_v60  ;;  %v6481_v33 = vld [vmem:[%s10816_s3 + $0x328] sm:$0xf]  ;;  %v6550_v60 = vor.u32 %v7220_v49, %v6547_v44  ;;  %v7231_v49 = vld [vmem:[%s10820_s7] sm:$0xff] }
 0x209   :  { %v7239_v44 = vld [vmem:[%s10820_s7 + $0x40] sm:$0xff] }
 0x20a   :  { %4062 = vmatpush.bf16.msra.mxu0 %v6102_v41 }
 0x20b   :  { %4075 = vmatpush.bf16.msra.mxu1 %v6230_v7  ;;  %v6513_v7 = vld [vmem:[%s10816_s3 + $0x368] sm:$0xf] }
 0x20c   :  { %4088 = vmatpush.bf16.msra.mxu2 %v6358_v48  ;;  %v6514_v24 = vor.u32 %v7214_v15, %v6513_v7  ;;  %v7224_v48 = vld [vmem:[%s10816_s3 + $0x3cc] sm:$0xf]  ;;  %v3255_v7 = vperm.slane %v10600_v32, 3 }
 0x20d   :  { %v6566_v51 = vor.u32 %v7224_v48, %v6563_v56  ;;  %v7233_v48 = vld [vmem:[%s10820_s7 + $0x10] sm:$0xff] }
 0x20e   :  { %4063 = vmatpush.bf16.msra.mxu0 %v6086_v53  ;;  %v3071_v25 = vpop.f32.mrf.mxu0  ;;  %v7206_v53 = vld [vmem:[%s10816_s3 + $0x334] sm:$0xf0]  ;;  %v7241_v56 = vld [vmem:[%s10820_s7 + $0x50] sm:$0xff] }
 0x20f   :  { %4076 = vmatpush.bf16.msra.mxu1 %v6214_v2  ;;  %v3058_v38 = vpop.f32.mrf.mxu3  ;;  %v3084_v4 = vpop.f32.mrf.mxu1  ;;  %v6482_v47 = vor.u32 %v7206_v53, %v6481_v33  ;;  %v7202_v2 = vld [vmem:[%s10816_s3 + $0x314] sm:$0xf0]  ;;  %v7244_v53 = vld [vmem:[%s10820_s7 + $0x68] sm:$0xff] }
 0x210   :  { %4089 = vmatpush.bf16.msra.mxu2 %v6342_v0  ;;  %v3059_v62 = vadd.f32 %v3058_v38, %v3046_v21  ;;  %v6466_v26 = vor.u32 %v7202_v2, %v6465_v39  ;;  %v7212_v21 = vld [vmem:[%s10816_s3 + $0x36c] sm:$0xf]  ;;  %v7235_v2 = vld [vmem:[%s10820_s7 + $0x20] sm:$0xff] }
 0x211   :  { %4064 = vmatmul.bf16.vlgmr.msra.gmra.mxu0 %v10044_v61 }
 0x212   :  { %4077 = vmatmul.bf16.vlgmr.msra.gmra.mxu1 %v10046_v8  ;;  %v3072_v23 = vadd.f32 %v3071_v25, %v3059_v62  ;;  %v6531_v25 = vld [vmem:[%s10816_s3 + $0x398] sm:$0xf0] }
 0x213   :  { %4090 = vmatmul.bf16.vlgmr.msra.gmra.mxu2 %v10215_v52  ;;  %v7230_v52 = vld [vmem:[%s10816_s3 + $0x3f4] sm:$0xf0]  ;;  %v6515_v62 = vld [vmem:[%s10816_s3 + $0x378] sm:$0xf0] }
 0x214   :  { %v3085_v27 = vadd.f32 %v3084_v4, %v3072_v23  ;;  %v6578_v28 = vor.u32 %v7230_v52, %v6577_v3  ;;  %v6534_v4 = vor.u32 %v7216_v54, %v6531_v25  ;;  %v7200_v52 = vld [vmem:[%s10816_s3 + $0x30c] sm:$0xf]  ;;  %v7253_v54 = vld [vmem:[%s10818_s5 + $0x30] sm:$0xff] }
 0x215   :  { %v7261_v25 = vld [vmem:[%s10818_s5 + $0x70] sm:$0xff] }
 0x216   :  { %v3097_v10 = vpop.f32.mrf.mxu2  ;;  %v3073_v11 = vpop.f32.mrf.mxu0 }
 0x217   :  { %v3060_v61 = vpop.f32.mrf.mxu3  ;;  %v3086_v12 = vpop.f32.mrf.mxu1  ;;  %v3098_v8 = vadd.f32 %v3097_v10, %v3085_v27  ;;  %v6518_v10 = vor.u32 %v7212_v21, %v6515_v62 }
 0x218   :  { %v7208_v61 = vld [vmem:[%s10816_s3 + $0x34c] sm:$0xf]  ;;  %v6499_v12 = vld [vmem:[%s10816_s3 + $0x358] sm:$0xf0] }
 0x21e   :  { %v3099_v16 = vpop.f32.mrf.mxu2 }
 0x21f   :  { %v3110_v17 = vpop.f32.mrf.mxu3  ;;  %v6502_v16 = vor.u32 %v7208_v61, %v6499_v12 }
 0x220   :  { %v3111_v59 = vadd.f32 %v3110_v17, %v3098_v8  ;;  %v7204_v17 = vld [vmem:[%s10816_s3 + $0x32c] sm:$0xf] }
 0x222   :  { %v3117_v14 = vmax.f32 %v3111_v59, 0.0  ;;  %v6483_v59 = vld [vmem:[%s10816_s3 + $0x338] sm:$0xf0] }
 0x223   :  { %v6486_v3 = vor.u32 %v7204_v17, %v6483_v59 }
 0x224   :  { %v10589_v20 = vpack.c.bf16 %v3117_v14, %v3117_v14  ;;  %v6467_v14 = vld [vmem:[%s10816_s3 + $0x318] sm:$0xf0] }
 0x225   :  { %v6470_v29 = vor.u32 %v7200_v52, %v6467_v14 }
 0x226   :  { %3947 = vmatmul.bf16.vlgmr.msrb.gmra.mxu3 %v10589_v20 }
 0x227   :  { %4043 = vmatpush.bf16.msrb.mxu3 %v6578_v28  ;;  %v3112_v19 = vpop.f32.mrf.mxu3 }
 0x228   :  { %v3254_v19 = vperm.slane %v10600_v32, 2  ;;  %v7236_v32 = vld [vmem:[%s10820_s7 + $0x28] sm:$0xff] }
 0x22b   :  { %4044 = vmatpush.bf16.msrb.mxu3 %v6562_v5 }
 0x22e   :  { %v3909_v37 = vpop.f32.mrf.mxu0 }
 0x22f   :  { %v3910_v41 = vadd.f32 %v3909_v37, %v3252_v18  ;;  %v3922_v42 = vpop.f32.mrf.mxu1  ;;  %4045 = vmatpush.bf16.msrb.mxu3 %v6546_v40 }
 0x231   :  { %v3923_v43 = vadd.f32 %v3922_v42, %v3910_v41 }
 0x233   :  { %4046 = vmatpush.bf16.msrb.mxu3 %v6530_v63  ;;  %v7246_v63 = vld [vmem:[%s10820_s7 + $0x78] sm:$0xff] }
 0x234   :  { %4266 = vmatpush.bf16.msrb.mxu1 %v7246_v63 }
 0x236   :  { %v3911_v45 = vpop.f32.mrf.mxu0  ;;  %3999 = vmatmul.bf16.vlgmr.msra.gmra.mxu3 %v10589_v20 }
 0x237   :  { %v3924_v46 = vpop.f32.mrf.mxu1  ;;  %4047 = vmatpush.bf16.msrb.mxu3 %v6514_v24 }
 0x238   :  { %4267 = vmatpush.bf16.msrb.mxu1 %v7245_v22 }
 0x23b   :  { %4048 = vmatpush.bf16.msrb.mxu3 %v6498_v50 }
 0x23c   :  { %4268 = vmatpush.bf16.msrb.mxu1 %v7244_v53  ;;  %v7271_v53 = vld [vmem:[%s10819_s6] ss:$0 sm:$0xff] }
 0x23f   :  { %4049 = vmatpush.bf16.msrb.mxu3 %v6482_v47 }
 0x240   :  { %4269 = vmatpush.bf16.msrb.mxu1 %v7243_v6 }
 0x243   :  { %4050 = vmatpush.bf16.msrb.mxu3 %v6466_v26  ;;  %v7242_v26 = vld [vmem:[%s10820_s7 + $0x58] sm:$0xff] }
 0x244   :  { %4270 = vmatpush.bf16.msrb.mxu1 %v7242_v26 }
 0x246   :  { %4051 = vmatmul.bf16.vlgmr.msrb.gmra.mxu3 %v10589_v20 }
 0x247   :  { %4095 = vmatpush.bf16.msra.mxu3 %v6582_v55 }
 0x248   :  { %4271 = vmatpush.bf16.msrb.mxu1 %v7241_v56 }
 0x249   :  { %v3935_v27 = vpop.f32.mrf.mxu2 }
 0x24a   :  { %v10679_v8 = vadd.f32 %v3935_v27, %v3923_v43  ;;  %v7238_v43 = vld [vmem:[%s10820_s7 + $0x38] sm:$0xff] }
 0x24b   :  { %4096 = vmatpush.bf16.msra.mxu3 %v6566_v51  ;;  %4253 = vmatpush.bf16.msrb.mxu0 %v7238_v43  ;;  %v7232_v51 = vld [vmem:[%s10820_s7 + $0x8] sm:$0xff] }
 0x24e   :  { %v3961_v58 = vpop.f32.mrf.mxu0 }
 0x24f   :  { %v3962_v0 = vadd.f32 %v3961_v58, %v3253_v57  ;;  %v3974_v34 = vpop.f32.mrf.mxu1  ;;  %4097 = vmatpush.bf16.msra.mxu3 %v6550_v60  ;;  %4254 = vmatpush.bf16.msrb.mxu0 %v7237_v1  ;;  %v7240_v57 = vld [vmem:[%s10820_s7 + $0x48] sm:$0xff]  ;;  %v7254_v60 = vld [vmem:[%s10818_s5 + $0x38] sm:$0xff] }
 0x250   :  { %4272 = vmatpush.bf16.msrb.mxu1 %v7240_v57  ;;  %4418 = vmatpush.bf16.msrb.mxu2 %v7254_v60 }
 0x251   :  { %v3975_v38 = vadd.f32 %v3974_v34, %v3962_v0  ;;  %v3937_v28 = vpop.f32.mrf.mxu2  ;;  %v7262_v0 = vld [vmem:[%s10818_s5 + $0x78] sm:$0xff] }
 0x252   :  { %v7249_v28 = vld [vmem:[%s10818_s5 + $0x10] sm:$0xff] }
 0x253   :  { %4098 = vmatpush.bf16.msra.mxu3 %v6534_v4  ;;  %4255 = vmatpush.bf16.msrb.mxu0 %v7236_v32  ;;  %v7260_v4 = vld [vmem:[%s10818_s5 + $0x68] sm:$0xff]  ;;  %v7304_v32 = vmov 0  }
 0x254   :  { %4273 = vmatpush.bf16.msrb.mxu1 %v7239_v44  ;;  %4419 = vmatpush.bf16.msrb.mxu2 %v7253_v54 }
 0x255   :  { %7268 = vset.pattern.permute.xlu0 %v7304_v32  ;;  %7269 = vset.pattern.permute.xlu1 %v7304_v32 }
 0x256   :  { %v3963_v23 = vpop.f32.mrf.mxu0 }
 0x257   :  { %v3976_v11 = vpop.f32.mrf.mxu1  ;;  %4099 = vmatpush.bf16.msra.mxu3 %v6518_v10  ;;  %4256 = vmatpush.bf16.msrb.mxu0 %v7235_v2  ;;  %v7251_v10 = vld [vmem:[%s10818_s5 + $0x20] sm:$0xff] }
 0x258   :  { %v7259_v11 = vld [vmem:[%s10818_s5 + $0x60] sm:$0xff] }
 0x259   :  { %v3987_v30 = vpop.f32.mrf.mxu2 }
 0x25a   :  { %v10694_v5 = vadd.f32 %v3987_v30, %v3975_v38  ;;  %v7252_v38 = vld [vmem:[%s10818_s5 + $0x28] sm:$0xff] }
 0x25b   :  { %4100 = vmatpush.bf16.msra.mxu3 %v6502_v16  ;;  %4257 = vmatpush.bf16.msrb.mxu0 %v7234_v13  ;;  %v7258_v16 = vld [vmem:[%s10818_s5 + $0x58] sm:$0xff]  ;;  %v7248_v30 = vld [vmem:[%s10818_s5 + $0x8] sm:$0xff] }
 0x25c   :  { %4420 = vmatpush.bf16.msrb.mxu2 %v7252_v38 }
 0x25f   :  { %4101 = vmatpush.bf16.msra.mxu3 %v6486_v3  ;;  %4258 = vmatpush.bf16.msrb.mxu0 %v7233_v48  ;;  %v7305_v48 = vmov 0.0  }
 0x260   :  { %4421 = vmatpush.bf16.msrb.mxu2 %v7251_v10  ;;  %41 = vst.msk [vmem:[#allocation2] sm:$0x1] %vm40_vm2, %v7305_v48 }
 0x261   :  { %v3989_v40 = vpop.f32.mrf.mxu2 }
 0x263   :  { %4102 = vmatpush.bf16.msra.mxu3 %v6470_v29  ;;  %4259 = vmatpush.bf16.msrb.mxu0 %v7232_v51  ;;  %v7257_v29 = vld [vmem:[%s10818_s5 + $0x50] sm:$0xff] }
 0x266   :  { %4103 = vmatmul.bf16.vlgmr.msra.gmra.mxu3 %v10589_v20 }
 0x267   :  { %4260 = vmatpush.bf16.msrb.mxu0 %v7231_v49  ;;  %4431 = vmatpush.bf16.msrb.mxu3 %v7262_v0  ;;  %v4444_v54 = vld [vmem:[#allocation2] sm:$0x1] }
 0x26b   :  { %4432 = vmatpush.bf16.msrb.mxu3 %v7261_v25 }
 0x26e   :  { %v4013_v18 = vpop.f32.mrf.mxu0 }
 0x26f   :  { %v4014_v35 = vadd.f32 %v4013_v18, %v3254_v19  ;;  %v4026_v36 = vpop.f32.mrf.mxu1  ;;  %4433 = vmatpush.bf16.msrb.mxu3 %v7260_v4  ;;  %v7256_v19 = vld [vmem:[%s10818_s5 + $0x48] sm:$0xff]  ;;  %v7247_v18 = vld [vmem:[%s10818_s5] sm:$0xff] }
 0x271   :  { %v4027_v37 = vadd.f32 %v4026_v36, %v4014_v35  ;;  %v7255_v35 = vld [vmem:[%s10818_s5 + $0x40] sm:$0xff] }
 0x273   :  { %4434 = vmatpush.bf16.msrb.mxu3 %v7259_v11 }
 0x276   :  { %v4015_v41 = vpop.f32.mrf.mxu0  ;;  %v4039_v9 = vpop.f32.mrf.mxu2 }
 0x277   :  { %v4028_v42 = vpop.f32.mrf.mxu1  ;;  %v10697_v31 = vadd.f32 %v4039_v9, %v4027_v37  ;;  %4435 = vmatpush.bf16.msrb.mxu3 %v7258_v16 }
 0x27b   :  { %4436 = vmatpush.bf16.msrb.mxu3 %v7257_v29 }
 0x27e   :  { %v4041_v20 = vpop.f32.mrf.mxu2 }
 0x27f   :  { %4437 = vmatpush.bf16.msrb.mxu3 %v7256_v19 }
 0x283   :  { %4438 = vmatpush.bf16.msrb.mxu3 %v7255_v35 }
 0x28e   :  { %v4065_v15 = vpop.f32.mrf.mxu0 }
 0x28f   :  { %v4066_v45 = vadd.f32 %v4065_v15, %v3255_v7  ;;  %v4078_v24 = vpop.f32.mrf.mxu1 }
 0x291   :  { %v4079_v46 = vadd.f32 %v4078_v24, %v4066_v45  ;;  %v7270_v24 = vld [vmem:[#allocation3] ss:$0 sm:$0xff] }
 0x296   :  { %v4067_v50 = vpop.f32.mrf.mxu0  ;;  %v4091_v47 = vpop.f32.mrf.mxu2 }
 0x297   :  { %v4080_v33 = vpop.f32.mrf.mxu1  ;;  %v10718_v39 = vadd.f32 %v4091_v47, %v4079_v46 }
 0x29e   :  { %v4093_v55 = vpop.f32.mrf.mxu2 }
 0x2a9   :  { %v3948_v58 = vpop.f32.mrf.mxu3 }
 0x2aa   :  { %v3949_v21 = vadd.f32 %v3948_v58, %v10679_v8  ;;  %v7250_v8 = vld [vmem:[%s10818_s5 + $0x18] sm:$0xff] }
 0x2ab   :  { %4422 = vmatpush.bf16.msrb.mxu2 %v7250_v8 }
 0x2ac   :  { %v4108_v61 = vmax.f32 %v3949_v21, 0.0 }
 0x2af   :  { %4423 = vmatpush.bf16.msrb.mxu2 %v7249_v28 }
 0x2b1   :  { %v3950_v34 = vpop.f32.mrf.mxu3 }
 0x2b3   :  { %4424 = vmatpush.bf16.msrb.mxu2 %v7248_v30 }
 0x2b7   :  { %4425 = vmatpush.bf16.msrb.mxu2 %v7247_v18 }
 0x2b9   :  { %v4000_v62 = vpop.f32.mrf.mxu3 }
 0x2ba   :  { %v4001_v23 = vadd.f32 %v4000_v62, %v10694_v5 }
 0x2bc   :  { %v4109_v12 = vmax.f32 %v4001_v23, 0.0 }
 0x2be   :  { %v4112_v27 = vpack.c.bf16 %v4109_v12, %v4108_v61 }
 0x2c0   :  { %v4151_v17 = vunpack.c.l.b16 %v4112_v27  ;;  %v4152_v59 = vunpack.c.h.b16 %v4112_v27 }
 0x2c1   :  { %v4002_v3 = vpop.f32.mrf.mxu3 }
 0x2c2   :  { %v4153_v52 = vpack.c.b16 %v4151_v17, %v4151_v17  ;;  %v4154_v14 = vpack.c.b16 %v4152_v59, %v4152_v59 }
 0x2c4   :  { %4261 = vmatmul.bf16.vlgmr.msrb.gmra.mxu0 %v4153_v52  ;;  %4274 = vmatmul.bf16.vlgmr.msrb.gmra.mxu1 %v4154_v14 }
 0x2c9   :  { %v4052_v5 = vpop.f32.mrf.mxu3 }
 0x2ca   :  { %v4053_v37 = vadd.f32 %v4052_v5, %v10697_v31 }
 0x2cc   :  { %v4110_v42 = vmax.f32 %v4053_v37, 0.0 }
 0x2d1   :  { %v4054_v36 = vpop.f32.mrf.mxu3 }
 0x2e9   :  { %v4104_v40 = vpop.f32.mrf.mxu3 }
 0x2ea   :  { %v4105_v41 = vadd.f32 %v4104_v40, %v10718_v39 }
 0x2ec   :  { %v4111_v9 = vmax.f32 %v4105_v41, 0.0 }
 0x2ee   :  { %v4113_v43 = vpack.c.bf16 %v4111_v9, %v4110_v42 }
 0x2f0   :  { %v4316_v63 = vunpack.c.l.b16 %v4113_v43  ;;  %v4317_v20 = vunpack.c.h.b16 %v4113_v43 }
 0x2f1   :  { %v4106_v7 = vpop.f32.mrf.mxu3 }
 0x2f2   :  { %v4318_v15 = vpack.c.b16 %v4316_v63, %v4316_v63  ;;  %v4319_v45 = vpack.c.b16 %v4317_v20, %v4317_v20 }
 0x2f4   :  { %4426 = vmatmul.bf16.vlgmr.msrb.gmra.mxu2 %v4318_v15  ;;  %4439 = vmatmul.bf16.vlgmr.msrb.gmra.mxu3 %v4319_v45 }
 0x341   :  { %v4262_v46 = vpop.f32.mrf.mxu0  ;;  %v4275_v1 = vpop.f32.mrf.mxu1 }
 0x342   :  { %v4263_v22 = vadd.f32 %v7270_v24, %v4262_v46 }
 0x344   :  { %v4276_v50 = vadd.f32 %v4275_v1, %v4263_v22 }
 0x349   :  { %v4264_v33 = vpop.f32.mrf.mxu0  ;;  %v4277_v31 = vpop.f32.mrf.mxu1 }
 0x377   :  { %v4427_v47 = vpop.f32.mrf.mxu2  ;;  %v4440_v39 = vpop.f32.mrf.mxu3 }
 0x378   :  { %v4428_v2 = vadd.f32 %v7271_v53, %v4427_v47 }
 0x37a   :  { %v4441_v6 = vadd.f32 %v4440_v39, %v4428_v2 }
 0x37c   :  { %v4446_v13 = vsel %vm4445_vm1, %v4441_v6, 0.0 }
 0x37d   :  { %4447 = vadd.xlane.f32.xlu0 %v4446_v13 }
 0x37f   :  { %v4429_v26 = vpop.f32.mrf.mxu2  ;;  %v4442_v55 = vpop.f32.mrf.mxu3 }
 0x391   :  { %4462 = vperm.xlu0 %7268, %v4276_v50  }
 0x3f0   :  { %v4448_v56 = vpop.xlane.xlu0 %4447 }
 0x3f1   :  { %v4449_v51 = vrot.slane %v4448_v56, 4 }
 0x3f3   :  { %v4450_v57 = vadd.f32 %v4449_v51, %v4448_v56 }
 0x3f5   :  { %v4451_v49 = vrot.slane %v4450_v57, 2 }
 0x3f7   :  { %v4452_v44 = vadd.f32 %v4451_v49, %v4450_v57 }
 0x3f9   :  { %v4453_v58 = vrot.slane %v4452_v44, 1 }
 0x3fb   :  { %v4454_v60 = vadd.f32 %v4453_v58, %v4452_v44 }
 0x3fd   :  { %7263 = vpush %v4454_v60 }
 0x403   :  { %v4463_v0 = vpop.permute.xlu0 %4462 }
 0x404   :  { %v4465_v34 = vadd.f32 %v4463_v0, %v4441_v6 }
 0x406   :  { %4468 = vst.msk [vmem:[#allocation4] sm:$0x3] %vm4445_vm1, %v4465_v34 }
 0x40d   :  { %v4474_v23 = vld [vmem:[#allocation4] sm:$0x3] }
 0x42e   :  { %s7264_s6 = spop %7263 }
 0x42f   :  { %v4456_v25 = vstv %s7264_s6 }
 0x430   :  { %v4457_v38 = vadd.f32 %v4456_v25, %v4444_v54 }
 0x432   :  { %4459 = vst.msk [vmem:[#allocation2] sm:$0x1] %vm40_vm2, %v4457_v38 }
 0x439   :  { %v4472_v4 = vld [vmem:[#allocation2] sm:$0x1] }
 0x43a   :  { %v4473_v21 = vmul.f32 0.083333336, %v4472_v4 }
 0x43c   :  { %v4476_v62 = vperm.slane %v4473_v21, 0 }
 0x43e   :  { %4478 = vperm.xlu1 %7269, %v4476_v62  }
 0x4b0   :  { %v4479_v10 = vpop.permute.xlu1 %4478 }
 0x4b1   :  { %v4481_v11 = vsub.f32 %v4474_v23, %v4479_v10 }
 0x4b3   :  { %4482 = vst.msk [vmem:[#allocation4] sm:$0x3] %vm4445_vm1, %v4481_v11 }
 0x4b4   :  { %4493 = dma.vmem_to_hbm [thread:$0]  %s4489_s30, 32, %s4491_s11, [#allocation5]  }
 0x4b5   :  { %7302 = dma.done.wait [#allocation5], 32  }
 0x4b6   :  { %7303 = vsyncadd [#allocation5], 4294967264 }
 0x4b7   :  { %4498 = vsyncpa [#allocation5], 1 }

</bundles_post_ra>
